<compile_context>
chip_gen: v6e
topology: v6e:2x2x1
jax: 0.10.0
libtpu: 0.0.40
codegen_flags: <defaults>
</compile_context>

<pallas_src>
import math

import jax
import jax.numpy as jnp
from jax.experimental import pallas as pl
from jax.experimental.pallas import tpu as pltpu


LANE = 128            # TPU lane width; every matmul K / N dim is padded to 128
NCELL = 208           # pooled 14x14 = 196 cells, padded (>= NC2 + max shift 60, 8-mult)
NC2 = 144             # conv2 output rows computed (covers all valid cells <= 135)
ROWS1 = 4 * NCELL     # conv1 patch rows per sample (4 pool-quadrant blocks)
C1, C2 = 6, 16        # real conv1 / conv2 output channel counts


# ------------------------------ fused kernel --------------------------------

def _net_kernel(pat_ref, w1_ref, w2_ref, wf1_ref, wf2_ref, wf3_ref, b_ref, out_ref):
    pat = pat_ref[0]                                   # (ROWS1, 128) bf16
    b1 = b_ref[0:1, :]
    b2 = b_ref[1:2, :]
    bf1 = b_ref[2:3, :]
    bf2 = b_ref[3:4, :]
    bf3 = b_ref[4:5, :]

    # ---- conv1 (5x5 valid) + ReLU: one MXU matmul over all 4 pool quadrants ----
    h1 = jnp.dot(pat, w1_ref[...], preferred_element_type=jnp.float32)
    h1 = jnp.maximum(h1 + b1, 0.0)                     # (ROWS1, 128) f32, 6 lanes valid

    # ---- 2x2 max-pool, stride 2: quadrant blocks are contiguous & 8-aligned ----
    hp = jnp.maximum(
        jnp.maximum(h1[0 * NCELL:1 * NCELL], h1[1 * NCELL:2 * NCELL]),
        jnp.maximum(h1[2 * NCELL:3 * NCELL], h1[3 * NCELL:4 * NCELL]))
    # hp: (NCELL, 128) f32, rows = pool cell ph*14+pw (first 196 real)

    # ---- conv2 (5x5 valid) + ReLU: 25 shifted matmuls accumulated in f32 ----
    # Tap (i,j) is a row shift of i*14+j in the (14,14)-flattened pooled layout;
    # valid output cells (oh2<10, ow2<10) never read wrapped/pad rows.
    acc = jnp.zeros((NC2, LANE), jnp.float32)
    for i in range(5):
        for j in range(5):
            ofs = i * 14 + j
            lhs = hp[ofs:ofs + NC2, :].astype(jnp.bfloat16)
            acc = acc + jnp.dot(lhs, w2_ref[i * 5 + j],
                                preferred_element_type=jnp.float32)
    h2 = jnp.maximum(acc + b2, 0.0)                    # (NC2, 128) f32, 16 lanes valid

    # ---- flatten + fc1: one XLU transpose, then 16 channel-wise MXU dots ----
    # (PyTorch's NCHW flatten order is folded into the wf1 packing at prep time.)
    h2t = jnp.transpose(h2).astype(jnp.bfloat16)       # (128, NC2)
    a1 = jnp.zeros((1, LANE), jnp.float32)
    for ch in range(C2):
        a1 = a1 + jnp.dot(h2t[ch:ch + 1, :], wf1_ref[ch],
                          preferred_element_type=jnp.float32)
    a1 = jnp.maximum(a1 + bf1, 0.0)                    # (1, 128), 120 valid

    # ---- fc2 / fc3 + sigmoid ----
    a2 = jnp.dot(a1.astype(jnp.bfloat16), wf2_ref[...],
                 preferred_element_type=jnp.float32)
    a2 = jnp.maximum(a2 + bf2, 0.0)                    # (1, 128), 84 valid
    z = jnp.dot(a2.astype(jnp.bfloat16), wf3_ref[...],
                preferred_element_type=jnp.float32) + bf3
    sig = 1.0 / (1.0 + jnp.exp(-z))                    # lanes >= 10 hold sigmoid(0)=0.5
    out_ref[0] = jnp.broadcast_to(sig, (8, LANE)).astype(out_ref.dtype)


# ------------------------------ wrapper --------------------------------------

def _im2col_pool_ordered(x_nchw):
    """(N,3,32,32) f32 -> (N, ROWS1, 128) bf16 conv1 patch matrix.

    Per sample: 4 contiguous blocks, one per 2x2 pool-window position q=(di,dj);
    each block has NCELL rows indexed by pool cell ph*14+pw (196 real + pad);
    columns are the (kh,kw,cin)-ordered 75-wide patch, zero-padded to 128 lanes.
    """
    N = x_nchw.shape[0]
    x = jnp.transpose(x_nchw, (0, 2, 3, 1))                        # NHWC
    cols = [x[:, kh:kh + 28, kw:kw + 28, :] for kh in range(5) for kw in range(5)]
    pat = jnp.concatenate(cols, axis=-1)                           # (N,28,28,75)
    pat = pat.reshape(N, 14, 2, 14, 2, 75)                         # (n,ph,di,pw,dj,k)
    pat = jnp.transpose(pat, (0, 2, 4, 1, 3, 5)).reshape(N, 4, 196, 75)
    pat = jnp.pad(pat, ((0, 0), (0, 0), (0, NCELL - 196), (0, LANE - 75)))
    return pat.reshape(N, ROWS1, LANE).astype(jnp.bfloat16)


def net_forward(kparams, x_nchw):
    """x_nchw: (N, 3, 32, 32) float32 -> (N, 10) sigmoid outputs."""
    N = x_nchw.shape[0]
    patches = _im2col_pool_ordered(x_nchw)

    flops = 2 * N * (ROWS1 * LANE * LANE + 25 * NC2 * LANE * LANE
                     + C2 * NC2 * LANE + 2 * LANE * LANE)
    wbytes = sum(int(v.size) * v.dtype.itemsize
                 for v in jax.tree_util.tree_leaves(kparams))
    bytes_accessed = int(patches.size) * 2 + wbytes + N * 8 * LANE * 4

    const2 = lambda n: (0, 0)
    const3 = lambda n: (0, 0, 0)

    out = pl.pallas_call(
        _net_kernel,
        out_shape=jax.ShapeDtypeStruct((N, 8, LANE), jnp.float32),
        grid=(N,),
        in_specs=[
            pl.BlockSpec((1, ROWS1, LANE), lambda n: (n, 0, 0)),   # conv1 patches
            pl.BlockSpec((LANE, LANE), const2),                    # w1
            pl.BlockSpec((25, LANE, LANE), const3),                # w2 (per tap)
            pl.BlockSpec((C2, NC2, LANE), const3),                 # fc1 (per channel)
            pl.BlockSpec((LANE, LANE), const2),                    # fc2
            pl.BlockSpec((LANE, LANE), const2),                    # fc3
            pl.BlockSpec((8, LANE), const2),                       # packed biases
        ],
        out_specs=pl.BlockSpec((1, 8, LANE), lambda n: (n, 0, 0)),
        compiler_params=pltpu.CompilerParams(dimension_semantics=("parallel",)),
        cost_estimate=pl.CostEstimate(flops=flops, transcendentals=N * LANE,
                                      bytes_accessed=bytes_accessed),
    )(patches, kparams["w1"], kparams["w2"], kparams["wf1"],
      kparams["wf2"], kparams["wf3"], kparams["bias"])
    return out[:, 0, :10]


# ------------------------------ parameters -----------------------------------

def init_params(key):
    """PyTorch-layout parameters, default U(-1/sqrt(fan_in), +) init."""
    def uniform(k, shape, bound):
        return jax.random.uniform(k, shape, jnp.float32, -bound, bound)

    keys = jax.random.split(key, 10)
    p = {}
    bnd = 1.0 / math.sqrt(3 * 5 * 5)
    p["conv1_w"] = uniform(keys[0], (6, 3, 5, 5), bnd)
    p["conv1_b"] = uniform(keys[1], (6,), bnd)
    bnd = 1.0 / math.sqrt(6 * 5 * 5)
    p["conv2_w"] = uniform(keys[2], (16, 6, 5, 5), bnd)
    p["conv2_b"] = uniform(keys[3], (16,), bnd)
    bnd = 1.0 / math.sqrt(16 * 10 * 10)
    p["fc1_w"] = uniform(keys[4], (16 * 10 * 10, 120), bnd)   # (in, out)
    p["fc1_b"] = uniform(keys[5], (120,), bnd)
    bnd = 1.0 / math.sqrt(120)
    p["fc2_w"] = uniform(keys[6], (120, 84), bnd)
    p["fc2_b"] = uniform(keys[7], (84,), bnd)
    bnd = 1.0 / math.sqrt(84)
    p["fc3_w"] = uniform(keys[8], (84, 10), bnd)
    p["fc3_b"] = uniform(keys[9], (10,), bnd)
    return p


def prepare_params(p):
    """One-time repack of PyTorch-layout params into the kernel layout (bf16 weights)."""
    f32, bf16 = jnp.float32, jnp.bfloat16
    kp = {}

    # conv1 -> (128,128): rows = (kh,kw,cin) im2col index, cols = cout.
    w1 = jnp.transpose(p["conv1_w"], (2, 3, 1, 0)).reshape(75, 6)
    kp["w1"] = jnp.zeros((LANE, LANE), f32).at[:75, :6].set(w1).astype(bf16)

    # conv2 -> (25,128,128): one (cin,cout) matrix per tap (i,j), zero-padded.
    w2 = jnp.transpose(p["conv2_w"], (2, 3, 1, 0)).reshape(25, 6, 16)   # (tap,cin,cout)
    kp["w2"] = jnp.zeros((25, LANE, LANE), f32).at[:, :6, :16].set(w2).astype(bf16)

    # fc1 -> (16, NC2, 128): per input channel, rows = pool cell (oh2*14+ow2),
    # cols = fc1 output.  PyTorch NCHW flatten index k = ch*100 + oh2*10 + ow2.
    wf1 = p["fc1_w"].reshape(16, 10, 10, 120)                           # (ch,oh2,ow2,out)
    g = jnp.zeros((16, 14, 14, 120), f32).at[:, :10, :10, :].set(wf1)
    g = g.reshape(16, 196, 120)[:, :NC2, :]
    kp["wf1"] = jnp.zeros((C2, NC2, LANE), f32).at[:, :, :120].set(g).astype(bf16)

    # fc2 / fc3, zero-padded to 128x128.
    kp["wf2"] = jnp.zeros((LANE, LANE), f32).at[:120, :84].set(p["fc2_w"]).astype(bf16)
    kp["wf3"] = jnp.zeros((LANE, LANE), f32).at[:84, :10].set(p["fc3_w"]).astype(bf16)

    # All five biases packed into one (8,128) f32 array (rows 0..4).
    b = jnp.zeros((8, LANE), f32)
    b = b.at[0, :6].set(p["conv1_b"])
    b = b.at[1, :16].set(p["conv2_b"])
    b = b.at[2, :120].set(p["fc1_b"])
    b = b.at[3, :84].set(p["fc2_b"])
    b = b.at[4, :10].set(p["fc3_b"])
    kp["bias"] = b
    return kp


# --------------------------- pure-JAX reference ------------------------------

def reference_forward(p, x):
    hi = jax.lax.Precision.HIGHEST
    dn = ("NCHW", "OIHW", "NCHW")
    out = jax.lax.conv_general_dilated(x, p["conv1_w"], (1, 1), "VALID",
                                       dimension_numbers=dn, precision=hi)
    out = jax.nn.relu(out + p["conv1_b"][None, :, None, None])
    out = jax.lax.reduce_window(out, -jnp.inf, jax.lax.max,
                                (1, 1, 2, 2), (1, 1, 2, 2), "VALID")
    out = jax.lax.conv_general_dilated(out, p["conv2_w"], (1, 1), "VALID",
                                       dimension_numbers=dn, precision=hi)
    out = jax.nn.relu(out + p["conv2_b"][None, :, None, None])
    out = out.reshape(out.shape[0], -1)
    out = jax.nn.relu(jnp.dot(out, p["fc1_w"], precision=hi) + p["fc1_b"])
    out = jax.nn.relu(jnp.dot(out, p["fc2_w"], precision=hi) + p["fc2_b"])
    return jax.nn.sigmoid(jnp.dot(out, p["fc3_w"], precision=hi) + p["fc3_b"])


if __name__ == "__main__":
    key = jax.random.PRNGKey(0)
    pkey, xkey = jax.random.split(key)
    params = init_params(pkey)
    kparams = prepare_params(params)
    # Input must be 32x32 spatial for the 16*10*10 Linear to be consistent.
    x = jax.random.normal(xkey, (2, 3, 32, 32), jnp.float32)

    out = jax.jit(net_forward)(kparams, x)
    out = jax.block_until_ready(out)

    assert out.shape == (2, 10), out.shape
    assert bool(jnp.all(jnp.isfinite(out)))
    assert bool(jnp.all((out >= 0.0) & (out <= 1.0)))  # sigmoid output range

    ref = reference_forward(params, x)
    max_err = float(jnp.max(jnp.abs(out - ref)))
    # bf16 matmul operands (f32 accumulation) vs. an all-f32 reference.
    assert max_err < 2e-2, f"kernel/reference mismatch: max abs err = {max_err}"

    print("KERNEL_OK")
</pallas_src>

<mosaic_0001>
module attributes {stable_mosaic.version = 11 : i64} {
  func.func @_net_kernel(%arg0: i32, %arg1: memref<1x832x128xbf16, #tpu.memory_space<vmem>>, %arg2: memref<128x128xbf16, #tpu.memory_space<vmem>>, %arg3: memref<25x128x128xbf16, #tpu.memory_space<vmem>>, %arg4: memref<16x144x128xbf16, #tpu.memory_space<vmem>>, %arg5: memref<128x128xbf16, #tpu.memory_space<vmem>>, %arg6: memref<128x128xbf16, #tpu.memory_space<vmem>>, %arg7: memref<8x128xf32, #tpu.memory_space<vmem>>, %arg8: memref<1x8x128xf32, #tpu.memory_space<vmem>>) attributes {dimension_semantics = [#tpu.dimension_semantics<parallel>], iteration_bounds = array<i64: 2>, scalar_prefetch = 0 : i64, scratch_operands = 0 : i64, tpu.core_type = #tpu.core_type<tc>, window_params = [{transform_indices = @transform_0, window_bounds = array<i64: 1, 832, 128>}, {pipeline_mode = #tpu.pipeline_mode<synchronous>, transform_indices = @transform_1, window_bounds = array<i64: 128, 128>}, {pipeline_mode = #tpu.pipeline_mode<synchronous>, transform_indices = @transform_2, window_bounds = array<i64: 25, 128, 128>}, {pipeline_mode = #tpu.pipeline_mode<synchronous>, transform_indices = @transform_3, window_bounds = array<i64: 16, 144, 128>}, {pipeline_mode = #tpu.pipeline_mode<synchronous>, transform_indices = @transform_4, window_bounds = array<i64: 128, 128>}, {pipeline_mode = #tpu.pipeline_mode<synchronous>, transform_indices = @transform_5, window_bounds = array<i64: 128, 128>}, {pipeline_mode = #tpu.pipeline_mode<synchronous>, transform_indices = @transform_6, window_bounds = array<i64: 8, 128>}, {transform_indices = @transform_7, window_bounds = array<i64: 1, 8, 128>}]} {
    %c0 = arith.constant 0 : index
    %c0_0 = arith.constant 0 : index
    %c0_1 = arith.constant 0 : index
    %0 = vector.load %arg1[%c0, %c0_0, %c0_1] : memref<1x832x128xbf16, #tpu.memory_space<vmem>>, vector<1x832x128xbf16>
    %1 = vector.shape_cast %0 : vector<1x832x128xbf16> to vector<832x128xbf16>
    %c0_2 = arith.constant 0 : index
    %c0_3 = arith.constant 0 : index
    %2 = vector.load %arg7[%c0_2, %c0_3] : memref<8x128xf32, #tpu.memory_space<vmem>>, vector<1x128xf32>
    %c1 = arith.constant 1 : index
    %c0_4 = arith.constant 0 : index
    %3 = vector.load %arg7[%c1, %c0_4] : memref<8x128xf32, #tpu.memory_space<vmem>>, vector<1x128xf32>
    %c2 = arith.constant 2 : index
    %c0_5 = arith.constant 0 : index
    %4 = vector.load %arg7[%c2, %c0_5] : memref<8x128xf32, #tpu.memory_space<vmem>>, vector<1x128xf32>
    %c3 = arith.constant 3 : index
    %c0_6 = arith.constant 0 : index
    %5 = vector.load %arg7[%c3, %c0_6] : memref<8x128xf32, #tpu.memory_space<vmem>>, vector<1x128xf32>
    %c4 = arith.constant 4 : index
    %c0_7 = arith.constant 0 : index
    %6 = vector.load %arg7[%c4, %c0_7] : memref<8x128xf32, #tpu.memory_space<vmem>>, vector<1x128xf32>
    %c0_8 = arith.constant 0 : index
    %c0_9 = arith.constant 0 : index
    %7 = vector.load %arg2[%c0_8, %c0_9] : memref<128x128xbf16, #tpu.memory_space<vmem>>, vector<128x128xbf16>
    %cst = arith.constant dense<0.000000e+00> : vector<832x128xf32>
    %8 = tpu.matmul %1, %7, %cst {dimension_numbers = #tpu.dot_dimension_numbers<[1], [0], [0], [1], [0, 0, 1, 1], [], []>} : vector<832x128xbf16>, vector<128x128xbf16>, vector<832x128xf32> -> vector<832x128xf32>
    %9 = vector.broadcast %2 : vector<1x128xf32> to vector<832x128xf32>
    %10 = arith.addf %8, %9 : vector<832x128xf32>
    %cst_10 = arith.constant 0.000000e+00 : f32
    %11 = vector.broadcast %cst_10 : f32 to vector<832x128xf32>
    %12 = arith.maximumf %10, %11 : vector<832x128xf32>
    %13 = vector.extract_strided_slice %12 {offsets = [0, 0], sizes = [208, 128], strides = [1, 1]} : vector<832x128xf32> to vector<208x128xf32>
    %14 = vector.extract_strided_slice %12 {offsets = [208, 0], sizes = [208, 128], strides = [1, 1]} : vector<832x128xf32> to vector<208x128xf32>
    %15 = arith.maximumf %13, %14 : vector<208x128xf32>
    %16 = vector.extract_strided_slice %12 {offsets = [416, 0], sizes = [208, 128], strides = [1, 1]} : vector<832x128xf32> to vector<208x128xf32>
    %17 = vector.extract_strided_slice %12 {offsets = [624, 0], sizes = [208, 128], strides = [1, 1]} : vector<832x128xf32> to vector<208x128xf32>
    %18 = arith.maximumf %16, %17 : vector<208x128xf32>
    %19 = arith.maximumf %15, %18 : vector<208x128xf32>
    %cst_11 = arith.constant 0.000000e+00 : f32
    %20 = vector.broadcast %cst_11 : f32 to vector<144x128xf32>
    %21 = vector.extract_strided_slice %19 {offsets = [0, 0], sizes = [144, 128], strides = [1, 1]} : vector<208x128xf32> to vector<144x128xf32>
    %22 = arith.truncf %21 : vector<144x128xf32> to vector<144x128xbf16>
    %c0_12 = arith.constant 0 : index
    %c0_13 = arith.constant 0 : index
    %c0_14 = arith.constant 0 : index
    %23 = vector.load %arg3[%c0_12, %c0_13, %c0_14] : memref<25x128x128xbf16, #tpu.memory_space<vmem>>, vector<1x128x128xbf16>
    %24 = vector.shape_cast %23 : vector<1x128x128xbf16> to vector<128x128xbf16>
    %cst_15 = arith.constant dense<0.000000e+00> : vector<144x128xf32>
    %25 = tpu.matmul %22, %24, %cst_15 {dimension_numbers = #tpu.dot_dimension_numbers<[1], [0], [0], [1], [0, 0, 1, 1], [], []>} : vector<144x128xbf16>, vector<128x128xbf16>, vector<144x128xf32> -> vector<144x128xf32>
    %26 = arith.addf %20, %25 : vector<144x128xf32>
    %27 = vector.extract_strided_slice %19 {offsets = [1, 0], sizes = [144, 128], strides = [1, 1]} : vector<208x128xf32> to vector<144x128xf32>
    %28 = arith.truncf %27 : vector<144x128xf32> to vector<144x128xbf16>
    %c1_16 = arith.constant 1 : index
    %c0_17 = arith.constant 0 : index
    %c0_18 = arith.constant 0 : index
    %29 = vector.load %arg3[%c1_16, %c0_17, %c0_18] : memref<25x128x128xbf16, #tpu.memory_space<vmem>>, vector<1x128x128xbf16>
    %30 = vector.shape_cast %29 : vector<1x128x128xbf16> to vector<128x128xbf16>
    %cst_19 = arith.constant dense<0.000000e+00> : vector<144x128xf32>
    %31 = tpu.matmul %28, %30, %cst_19 {dimension_numbers = #tpu.dot_dimension_numbers<[1], [0], [0], [1], [0, 0, 1, 1], [], []>} : vector<144x128xbf16>, vector<128x128xbf16>, vector<144x128xf32> -> vector<144x128xf32>
    %32 = arith.addf %26, %31 : vector<144x128xf32>
    %33 = vector.extract_strided_slice %19 {offsets = [2, 0], sizes = [144, 128], strides = [1, 1]} : vector<208x128xf32> to vector<144x128xf32>
    %34 = arith.truncf %33 : vector<144x128xf32> to vector<144x128xbf16>
    %c2_20 = arith.constant 2 : index
    %c0_21 = arith.constant 0 : index
    %c0_22 = arith.constant 0 : index
    %35 = vector.load %arg3[%c2_20, %c0_21, %c0_22] : memref<25x128x128xbf16, #tpu.memory_space<vmem>>, vector<1x128x128xbf16>
    %36 = vector.shape_cast %35 : vector<1x128x128xbf16> to vector<128x128xbf16>
    %cst_23 = arith.constant dense<0.000000e+00> : vector<144x128xf32>
    %37 = tpu.matmul %34, %36, %cst_23 {dimension_numbers = #tpu.dot_dimension_numbers<[1], [0], [0], [1], [0, 0, 1, 1], [], []>} : vector<144x128xbf16>, vector<128x128xbf16>, vector<144x128xf32> -> vector<144x128xf32>
    %38 = arith.addf %32, %37 : vector<144x128xf32>
    %39 = vector.extract_strided_slice %19 {offsets = [3, 0], sizes = [144, 128], strides = [1, 1]} : vector<208x128xf32> to vector<144x128xf32>
    %40 = arith.truncf %39 : vector<144x128xf32> to vector<144x128xbf16>
    %c3_24 = arith.constant 3 : index
    %c0_25 = arith.constant 0 : index
    %c0_26 = arith.constant 0 : index
    %41 = vector.load %arg3[%c3_24, %c0_25, %c0_26] : memref<25x128x128xbf16, #tpu.memory_space<vmem>>, vector<1x128x128xbf16>
    %42 = vector.shape_cast %41 : vector<1x128x128xbf16> to vector<128x128xbf16>
    %cst_27 = arith.constant dense<0.000000e+00> : vector<144x128xf32>
    %43 = tpu.matmul %40, %42, %cst_27 {dimension_numbers = #tpu.dot_dimension_numbers<[1], [0], [0], [1], [0, 0, 1, 1], [], []>} : vector<144x128xbf16>, vector<128x128xbf16>, vector<144x128xf32> -> vector<144x128xf32>
    %44 = arith.addf %38, %43 : vector<144x128xf32>
    %45 = vector.extract_strided_slice %19 {offsets = [4, 0], sizes = [144, 128], strides = [1, 1]} : vector<208x128xf32> to vector<144x128xf32>
    %46 = arith.truncf %45 : vector<144x128xf32> to vector<144x128xbf16>
    %c4_28 = arith.constant 4 : index
    %c0_29 = arith.constant 0 : index
    %c0_30 = arith.constant 0 : index
    %47 = vector.load %arg3[%c4_28, %c0_29, %c0_30] : memref<25x128x128xbf16, #tpu.memory_space<vmem>>, vector<1x128x128xbf16>
    %48 = vector.shape_cast %47 : vector<1x128x128xbf16> to vector<128x128xbf16>
    %cst_31 = arith.constant dense<0.000000e+00> : vector<144x128xf32>
    %49 = tpu.matmul %46, %48, %cst_31 {dimension_numbers = #tpu.dot_dimension_numbers<[1], [0], [0], [1], [0, 0, 1, 1], [], []>} : vector<144x128xbf16>, vector<128x128xbf16>, vector<144x128xf32> -> vector<144x128xf32>
    %50 = arith.addf %44, %49 : vector<144x128xf32>
    %51 = vector.extract_strided_slice %19 {offsets = [14, 0], sizes = [144, 128], strides = [1, 1]} : vector<208x128xf32> to vector<144x128xf32>
    %52 = arith.truncf %51 : vector<144x128xf32> to vector<144x128xbf16>
    %c5 = arith.constant 5 : index
    %c0_32 = arith.constant 0 : index
    %c0_33 = arith.constant 0 : index
    %53 = vector.load %arg3[%c5, %c0_32, %c0_33] : memref<25x128x128xbf16, #tpu.memory_space<vmem>>, vector<1x128x128xbf16>
    %54 = vector.shape_cast %53 : vector<1x128x128xbf16> to vector<128x128xbf16>
    %cst_34 = arith.constant dense<0.000000e+00> : vector<144x128xf32>
    %55 = tpu.matmul %52, %54, %cst_34 {dimension_numbers = #tpu.dot_dimension_numbers<[1], [0], [0], [1], [0, 0, 1, 1], [], []>} : vector<144x128xbf16>, vector<128x128xbf16>, vector<144x128xf32> -> vector<144x128xf32>
    %56 = arith.addf %50, %55 : vector<144x128xf32>
    %57 = vector.extract_strided_slice %19 {offsets = [15, 0], sizes = [144, 128], strides = [1, 1]} : vector<208x128xf32> to vector<144x128xf32>
    %58 = arith.truncf %57 : vector<144x128xf32> to vector<144x128xbf16>
    %c6 = arith.constant 6 : index
    %c0_35 = arith.constant 0 : index
    %c0_36 = arith.constant 0 : index
    %59 = vector.load %arg3[%c6, %c0_35, %c0_36] : memref<25x128x128xbf16, #tpu.memory_space<vmem>>, vector<1x128x128xbf16>
    %60 = vector.shape_cast %59 : vector<1x128x128xbf16> to vector<128x128xbf16>
    %cst_37 = arith.constant dense<0.000000e+00> : vector<144x128xf32>
    %61 = tpu.matmul %58, %60, %cst_37 {dimension_numbers = #tpu.dot_dimension_numbers<[1], [0], [0], [1], [0, 0, 1, 1], [], []>} : vector<144x128xbf16>, vector<128x128xbf16>, vector<144x128xf32> -> vector<144x128xf32>
    %62 = arith.addf %56, %61 : vector<144x128xf32>
    %63 = vector.extract_strided_slice %19 {offsets = [16, 0], sizes = [144, 128], strides = [1, 1]} : vector<208x128xf32> to vector<144x128xf32>
    %64 = arith.truncf %63 : vector<144x128xf32> to vector<144x128xbf16>
    %c7 = arith.constant 7 : index
    %c0_38 = arith.constant 0 : index
    %c0_39 = arith.constant 0 : index
    %65 = vector.load %arg3[%c7, %c0_38, %c0_39] : memref<25x128x128xbf16, #tpu.memory_space<vmem>>, vector<1x128x128xbf16>
    %66 = vector.shape_cast %65 : vector<1x128x128xbf16> to vector<128x128xbf16>
    %cst_40 = arith.constant dense<0.000000e+00> : vector<144x128xf32>
    %67 = tpu.matmul %64, %66, %cst_40 {dimension_numbers = #tpu.dot_dimension_numbers<[1], [0], [0], [1], [0, 0, 1, 1], [], []>} : vector<144x128xbf16>, vector<128x128xbf16>, vector<144x128xf32> -> vector<144x128xf32>
    %68 = arith.addf %62, %67 : vector<144x128xf32>
    %69 = vector.extract_strided_slice %19 {offsets = [17, 0], sizes = [144, 128], strides = [1, 1]} : vector<208x128xf32> to vector<144x128xf32>
    %70 = arith.truncf %69 : vector<144x128xf32> to vector<144x128xbf16>
    %c8 = arith.constant 8 : index
    %c0_41 = arith.constant 0 : index
    %c0_42 = arith.constant 0 : index
    %71 = vector.load %arg3[%c8, %c0_41, %c0_42] : memref<25x128x128xbf16, #tpu.memory_space<vmem>>, vector<1x128x128xbf16>
    %72 = vector.shape_cast %71 : vector<1x128x128xbf16> to vector<128x128xbf16>
    %cst_43 = arith.constant dense<0.000000e+00> : vector<144x128xf32>
    %73 = tpu.matmul %70, %72, %cst_43 {dimension_numbers = #tpu.dot_dimension_numbers<[1], [0], [0], [1], [0, 0, 1, 1], [], []>} : vector<144x128xbf16>, vector<128x128xbf16>, vector<144x128xf32> -> vector<144x128xf32>
    %74 = arith.addf %68, %73 : vector<144x128xf32>
    %75 = vector.extract_strided_slice %19 {offsets = [18, 0], sizes = [144, 128], strides = [1, 1]} : vector<208x128xf32> to vector<144x128xf32>
    %76 = arith.truncf %75 : vector<144x128xf32> to vector<144x128xbf16>
    %c9 = arith.constant 9 : index
    %c0_44 = arith.constant 0 : index
    %c0_45 = arith.constant 0 : index
    %77 = vector.load %arg3[%c9, %c0_44, %c0_45] : memref<25x128x128xbf16, #tpu.memory_space<vmem>>, vector<1x128x128xbf16>
    %78 = vector.shape_cast %77 : vector<1x128x128xbf16> to vector<128x128xbf16>
    %cst_46 = arith.constant dense<0.000000e+00> : vector<144x128xf32>
    %79 = tpu.matmul %76, %78, %cst_46 {dimension_numbers = #tpu.dot_dimension_numbers<[1], [0], [0], [1], [0, 0, 1, 1], [], []>} : vector<144x128xbf16>, vector<128x128xbf16>, vector<144x128xf32> -> vector<144x128xf32>
    %80 = arith.addf %74, %79 : vector<144x128xf32>
    %81 = vector.extract_strided_slice %19 {offsets = [28, 0], sizes = [144, 128], strides = [1, 1]} : vector<208x128xf32> to vector<144x128xf32>
    %82 = arith.truncf %81 : vector<144x128xf32> to vector<144x128xbf16>
    %c10 = arith.constant 10 : index
    %c0_47 = arith.constant 0 : index
    %c0_48 = arith.constant 0 : index
    %83 = vector.load %arg3[%c10, %c0_47, %c0_48] : memref<25x128x128xbf16, #tpu.memory_space<vmem>>, vector<1x128x128xbf16>
    %84 = vector.shape_cast %83 : vector<1x128x128xbf16> to vector<128x128xbf16>
    %cst_49 = arith.constant dense<0.000000e+00> : vector<144x128xf32>
    %85 = tpu.matmul %82, %84, %cst_49 {dimension_numbers = #tpu.dot_dimension_numbers<[1], [0], [0], [1], [0, 0, 1, 1], [], []>} : vector<144x128xbf16>, vector<128x128xbf16>, vector<144x128xf32> -> vector<144x128xf32>
    %86 = arith.addf %80, %85 : vector<144x128xf32>
    %87 = vector.extract_strided_slice %19 {offsets = [29, 0], sizes = [144, 128], strides = [1, 1]} : vector<208x128xf32> to vector<144x128xf32>
    %88 = arith.truncf %87 : vector<144x128xf32> to vector<144x128xbf16>
    %c11 = arith.constant 11 : index
    %c0_50 = arith.constant 0 : index
    %c0_51 = arith.constant 0 : index
    %89 = vector.load %arg3[%c11, %c0_50, %c0_51] : memref<25x128x128xbf16, #tpu.memory_space<vmem>>, vector<1x128x128xbf16>
    %90 = vector.shape_cast %89 : vector<1x128x128xbf16> to vector<128x128xbf16>
    %cst_52 = arith.constant dense<0.000000e+00> : vector<144x128xf32>
    %91 = tpu.matmul %88, %90, %cst_52 {dimension_numbers = #tpu.dot_dimension_numbers<[1], [0], [0], [1], [0, 0, 1, 1], [], []>} : vector<144x128xbf16>, vector<128x128xbf16>, vector<144x128xf32> -> vector<144x128xf32>
    %92 = arith.addf %86, %91 : vector<144x128xf32>
    %93 = vector.extract_strided_slice %19 {offsets = [30, 0], sizes = [144, 128], strides = [1, 1]} : vector<208x128xf32> to vector<144x128xf32>
    %94 = arith.truncf %93 : vector<144x128xf32> to vector<144x128xbf16>
    %c12 = arith.constant 12 : index
    %c0_53 = arith.constant 0 : index
    %c0_54 = arith.constant 0 : index
    %95 = vector.load %arg3[%c12, %c0_53, %c0_54] : memref<25x128x128xbf16, #tpu.memory_space<vmem>>, vector<1x128x128xbf16>
    %96 = vector.shape_cast %95 : vector<1x128x128xbf16> to vector<128x128xbf16>
    %cst_55 = arith.constant dense<0.000000e+00> : vector<144x128xf32>
    %97 = tpu.matmul %94, %96, %cst_55 {dimension_numbers = #tpu.dot_dimension_numbers<[1], [0], [0], [1], [0, 0, 1, 1], [], []>} : vector<144x128xbf16>, vector<128x128xbf16>, vector<144x128xf32> -> vector<144x128xf32>
    %98 = arith.addf %92, %97 : vector<144x128xf32>
    %99 = vector.extract_strided_slice %19 {offsets = [31, 0], sizes = [144, 128], strides = [1, 1]} : vector<208x128xf32> to vector<144x128xf32>
    %100 = arith.truncf %99 : vector<144x128xf32> to vector<144x128xbf16>
    %c13 = arith.constant 13 : index
    %c0_56 = arith.constant 0 : index
    %c0_57 = arith.constant 0 : index
    %101 = vector.load %arg3[%c13, %c0_56, %c0_57] : memref<25x128x128xbf16, #tpu.memory_space<vmem>>, vector<1x128x128xbf16>
    %102 = vector.shape_cast %101 : vector<1x128x128xbf16> to vector<128x128xbf16>
    %cst_58 = arith.constant dense<0.000000e+00> : vector<144x128xf32>
    %103 = tpu.matmul %100, %102, %cst_58 {dimension_numbers = #tpu.dot_dimension_numbers<[1], [0], [0], [1], [0, 0, 1, 1], [], []>} : vector<144x128xbf16>, vector<128x128xbf16>, vector<144x128xf32> -> vector<144x128xf32>
    %104 = arith.addf %98, %103 : vector<144x128xf32>
    %105 = vector.extract_strided_slice %19 {offsets = [32, 0], sizes = [144, 128], strides = [1, 1]} : vector<208x128xf32> to vector<144x128xf32>
    %106 = arith.truncf %105 : vector<144x128xf32> to vector<144x128xbf16>
    %c14 = arith.constant 14 : index
    %c0_59 = arith.constant 0 : index
    %c0_60 = arith.constant 0 : index
    %107 = vector.load %arg3[%c14, %c0_59, %c0_60] : memref<25x128x128xbf16, #tpu.memory_space<vmem>>, vector<1x128x128xbf16>
    %108 = vector.shape_cast %107 : vector<1x128x128xbf16> to vector<128x128xbf16>
    %cst_61 = arith.constant dense<0.000000e+00> : vector<144x128xf32>
    %109 = tpu.matmul %106, %108, %cst_61 {dimension_numbers = #tpu.dot_dimension_numbers<[1], [0], [0], [1], [0, 0, 1, 1], [], []>} : vector<144x128xbf16>, vector<128x128xbf16>, vector<144x128xf32> -> vector<144x128xf32>
    %110 = arith.addf %104, %109 : vector<144x128xf32>
    %111 = vector.extract_strided_slice %19 {offsets = [42, 0], sizes = [144, 128], strides = [1, 1]} : vector<208x128xf32> to vector<144x128xf32>
    %112 = arith.truncf %111 : vector<144x128xf32> to vector<144x128xbf16>
    %c15 = arith.constant 15 : index
    %c0_62 = arith.constant 0 : index
    %c0_63 = arith.constant 0 : index
    %113 = vector.load %arg3[%c15, %c0_62, %c0_63] : memref<25x128x128xbf16, #tpu.memory_space<vmem>>, vector<1x128x128xbf16>
    %114 = vector.shape_cast %113 : vector<1x128x128xbf16> to vector<128x128xbf16>
    %cst_64 = arith.constant dense<0.000000e+00> : vector<144x128xf32>
    %115 = tpu.matmul %112, %114, %cst_64 {dimension_numbers = #tpu.dot_dimension_numbers<[1], [0], [0], [1], [0, 0, 1, 1], [], []>} : vector<144x128xbf16>, vector<128x128xbf16>, vector<144x128xf32> -> vector<144x128xf32>
    %116 = arith.addf %110, %115 : vector<144x128xf32>
    %117 = vector.extract_strided_slice %19 {offsets = [43, 0], sizes = [144, 128], strides = [1, 1]} : vector<208x128xf32> to vector<144x128xf32>
    %118 = arith.truncf %117 : vector<144x128xf32> to vector<144x128xbf16>
    %c16 = arith.constant 16 : index
    %c0_65 = arith.constant 0 : index
    %c0_66 = arith.constant 0 : index
    %119 = vector.load %arg3[%c16, %c0_65, %c0_66] : memref<25x128x128xbf16, #tpu.memory_space<vmem>>, vector<1x128x128xbf16>
    %120 = vector.shape_cast %119 : vector<1x128x128xbf16> to vector<128x128xbf16>
    %cst_67 = arith.constant dense<0.000000e+00> : vector<144x128xf32>
    %121 = tpu.matmul %118, %120, %cst_67 {dimension_numbers = #tpu.dot_dimension_numbers<[1], [0], [0], [1], [0, 0, 1, 1], [], []>} : vector<144x128xbf16>, vector<128x128xbf16>, vector<144x128xf32> -> vector<144x128xf32>
    %122 = arith.addf %116, %121 : vector<144x128xf32>
    %123 = vector.extract_strided_slice %19 {offsets = [44, 0], sizes = [144, 128], strides = [1, 1]} : vector<208x128xf32> to vector<144x128xf32>
    %124 = arith.truncf %123 : vector<144x128xf32> to vector<144x128xbf16>
    %c17 = arith.constant 17 : index
    %c0_68 = arith.constant 0 : index
    %c0_69 = arith.constant 0 : index
    %125 = vector.load %arg3[%c17, %c0_68, %c0_69] : memref<25x128x128xbf16, #tpu.memory_space<vmem>>, vector<1x128x128xbf16>
    %126 = vector.shape_cast %125 : vector<1x128x128xbf16> to vector<128x128xbf16>
    %cst_70 = arith.constant dense<0.000000e+00> : vector<144x128xf32>
    %127 = tpu.matmul %124, %126, %cst_70 {dimension_numbers = #tpu.dot_dimension_numbers<[1], [0], [0], [1], [0, 0, 1, 1], [], []>} : vector<144x128xbf16>, vector<128x128xbf16>, vector<144x128xf32> -> vector<144x128xf32>
    %128 = arith.addf %122, %127 : vector<144x128xf32>
    %129 = vector.extract_strided_slice %19 {offsets = [45, 0], sizes = [144, 128], strides = [1, 1]} : vector<208x128xf32> to vector<144x128xf32>
    %130 = arith.truncf %129 : vector<144x128xf32> to vector<144x128xbf16>
    %c18 = arith.constant 18 : index
    %c0_71 = arith.constant 0 : index
    %c0_72 = arith.constant 0 : index
    %131 = vector.load %arg3[%c18, %c0_71, %c0_72] : memref<25x128x128xbf16, #tpu.memory_space<vmem>>, vector<1x128x128xbf16>
    %132 = vector.shape_cast %131 : vector<1x128x128xbf16> to vector<128x128xbf16>
    %cst_73 = arith.constant dense<0.000000e+00> : vector<144x128xf32>
    %133 = tpu.matmul %130, %132, %cst_73 {dimension_numbers = #tpu.dot_dimension_numbers<[1], [0], [0], [1], [0, 0, 1, 1], [], []>} : vector<144x128xbf16>, vector<128x128xbf16>, vector<144x128xf32> -> vector<144x128xf32>
    %134 = arith.addf %128, %133 : vector<144x128xf32>
    %135 = vector.extract_strided_slice %19 {offsets = [46, 0], sizes = [144, 128], strides = [1, 1]} : vector<208x128xf32> to vector<144x128xf32>
    %136 = arith.truncf %135 : vector<144x128xf32> to vector<144x128xbf16>
    %c19 = arith.constant 19 : index
    %c0_74 = arith.constant 0 : index
    %c0_75 = arith.constant 0 : index
    %137 = vector.load %arg3[%c19, %c0_74, %c0_75] : memref<25x128x128xbf16, #tpu.memory_space<vmem>>, vector<1x128x128xbf16>
    %138 = vector.shape_cast %137 : vector<1x128x128xbf16> to vector<128x128xbf16>
    %cst_76 = arith.constant dense<0.000000e+00> : vector<144x128xf32>
    %139 = tpu.matmul %136, %138, %cst_76 {dimension_numbers = #tpu.dot_dimension_numbers<[1], [0], [0], [1], [0, 0, 1, 1], [], []>} : vector<144x128xbf16>, vector<128x128xbf16>, vector<144x128xf32> -> vector<144x128xf32>
    %140 = arith.addf %134, %139 : vector<144x128xf32>
    %141 = vector.extract_strided_slice %19 {offsets = [56, 0], sizes = [144, 128], strides = [1, 1]} : vector<208x128xf32> to vector<144x128xf32>
    %142 = arith.truncf %141 : vector<144x128xf32> to vector<144x128xbf16>
    %c20 = arith.constant 20 : index
    %c0_77 = arith.constant 0 : index
    %c0_78 = arith.constant 0 : index
    %143 = vector.load %arg3[%c20, %c0_77, %c0_78] : memref<25x128x128xbf16, #tpu.memory_space<vmem>>, vector<1x128x128xbf16>
    %144 = vector.shape_cast %143 : vector<1x128x128xbf16> to vector<128x128xbf16>
    %cst_79 = arith.constant dense<0.000000e+00> : vector<144x128xf32>
    %145 = tpu.matmul %142, %144, %cst_79 {dimension_numbers = #tpu.dot_dimension_numbers<[1], [0], [0], [1], [0, 0, 1, 1], [], []>} : vector<144x128xbf16>, vector<128x128xbf16>, vector<144x128xf32> -> vector<144x128xf32>
    %146 = arith.addf %140, %145 : vector<144x128xf32>
    %147 = vector.extract_strided_slice %19 {offsets = [57, 0], sizes = [144, 128], strides = [1, 1]} : vector<208x128xf32> to vector<144x128xf32>
    %148 = arith.truncf %147 : vector<144x128xf32> to vector<144x128xbf16>
    %c21 = arith.constant 21 : index
    %c0_80 = arith.constant 0 : index
    %c0_81 = arith.constant 0 : index
    %149 = vector.load %arg3[%c21, %c0_80, %c0_81] : memref<25x128x128xbf16, #tpu.memory_space<vmem>>, vector<1x128x128xbf16>
    %150 = vector.shape_cast %149 : vector<1x128x128xbf16> to vector<128x128xbf16>
    %cst_82 = arith.constant dense<0.000000e+00> : vector<144x128xf32>
    %151 = tpu.matmul %148, %150, %cst_82 {dimension_numbers = #tpu.dot_dimension_numbers<[1], [0], [0], [1], [0, 0, 1, 1], [], []>} : vector<144x128xbf16>, vector<128x128xbf16>, vector<144x128xf32> -> vector<144x128xf32>
    %152 = arith.addf %146, %151 : vector<144x128xf32>
    %153 = vector.extract_strided_slice %19 {offsets = [58, 0], sizes = [144, 128], strides = [1, 1]} : vector<208x128xf32> to vector<144x128xf32>
    %154 = arith.truncf %153 : vector<144x128xf32> to vector<144x128xbf16>
    %c22 = arith.constant 22 : index
    %c0_83 = arith.constant 0 : index
    %c0_84 = arith.constant 0 : index
    %155 = vector.load %arg3[%c22, %c0_83, %c0_84] : memref<25x128x128xbf16, #tpu.memory_space<vmem>>, vector<1x128x128xbf16>
    %156 = vector.shape_cast %155 : vector<1x128x128xbf16> to vector<128x128xbf16>
    %cst_85 = arith.constant dense<0.000000e+00> : vector<144x128xf32>
    %157 = tpu.matmul %154, %156, %cst_85 {dimension_numbers = #tpu.dot_dimension_numbers<[1], [0], [0], [1], [0, 0, 1, 1], [], []>} : vector<144x128xbf16>, vector<128x128xbf16>, vector<144x128xf32> -> vector<144x128xf32>
    %158 = arith.addf %152, %157 : vector<144x128xf32>
    %159 = vector.extract_strided_slice %19 {offsets = [59, 0], sizes = [144, 128], strides = [1, 1]} : vector<208x128xf32> to vector<144x128xf32>
    %160 = arith.truncf %159 : vector<144x128xf32> to vector<144x128xbf16>
    %c23 = arith.constant 23 : index
    %c0_86 = arith.constant 0 : index
    %c0_87 = arith.constant 0 : index
    %161 = vector.load %arg3[%c23, %c0_86, %c0_87] : memref<25x128x128xbf16, #tpu.memory_space<vmem>>, vector<1x128x128xbf16>
    %162 = vector.shape_cast %161 : vector<1x128x128xbf16> to vector<128x128xbf16>
    %cst_88 = arith.constant dense<0.000000e+00> : vector<144x128xf32>
    %163 = tpu.matmul %160, %162, %cst_88 {dimension_numbers = #tpu.dot_dimension_numbers<[1], [0], [0], [1], [0, 0, 1, 1], [], []>} : vector<144x128xbf16>, vector<128x128xbf16>, vector<144x128xf32> -> vector<144x128xf32>
    %164 = arith.addf %158, %163 : vector<144x128xf32>
    %165 = vector.extract_strided_slice %19 {offsets = [60, 0], sizes = [144, 128], strides = [1, 1]} : vector<208x128xf32> to vector<144x128xf32>
    %166 = arith.truncf %165 : vector<144x128xf32> to vector<144x128xbf16>
    %c24 = arith.constant 24 : index
    %c0_89 = arith.constant 0 : index
    %c0_90 = arith.constant 0 : index
    %167 = vector.load %arg3[%c24, %c0_89, %c0_90] : memref<25x128x128xbf16, #tpu.memory_space<vmem>>, vector<1x128x128xbf16>
    %168 = vector.shape_cast %167 : vector<1x128x128xbf16> to vector<128x128xbf16>
    %cst_91 = arith.constant dense<0.000000e+00> : vector<144x128xf32>
    %169 = tpu.matmul %166, %168, %cst_91 {dimension_numbers = #tpu.dot_dimension_numbers<[1], [0], [0], [1], [0, 0, 1, 1], [], []>} : vector<144x128xbf16>, vector<128x128xbf16>, vector<144x128xf32> -> vector<144x128xf32>
    %170 = arith.addf %164, %169 : vector<144x128xf32>
    %171 = vector.broadcast %3 : vector<1x128xf32> to vector<144x128xf32>
    %172 = arith.addf %170, %171 : vector<144x128xf32>
    %cst_92 = arith.constant 0.000000e+00 : f32
    %173 = vector.broadcast %cst_92 : f32 to vector<144x128xf32>
    %174 = arith.maximumf %172, %173 : vector<144x128xf32>
    %175 = tpu.transpose %174, [1, 0] : vector<144x128xf32> -> vector<128x144xf32>
    %176 = arith.truncf %175 : vector<128x144xf32> to vector<128x144xbf16>
    %cst_93 = arith.constant 0.000000e+00 : f32
    %177 = vector.broadcast %cst_93 : f32 to vector<1x128xf32>
    %178 = vector.extract_strided_slice %176 {offsets = [0, 0], sizes = [1, 144], strides = [1, 1]} : vector<128x144xbf16> to vector<1x144xbf16>
    %c0_94 = arith.constant 0 : index
    %c0_95 = arith.constant 0 : index
    %c0_96 = arith.constant 0 : index
    %179 = vector.load %arg4[%c0_94, %c0_95, %c0_96] : memref<16x144x128xbf16, #tpu.memory_space<vmem>>, vector<1x144x128xbf16>
    %180 = vector.shape_cast %179 : vector<1x144x128xbf16> to vector<144x128xbf16>
    %cst_97 = arith.constant dense<0.000000e+00> : vector<1x128xf32>
    %181 = tpu.matmul %178, %180, %cst_97 {dimension_numbers = #tpu.dot_dimension_numbers<[1], [0], [0], [1], [0, 0, 1, 1], [], []>} : vector<1x144xbf16>, vector<144x128xbf16>, vector<1x128xf32> -> vector<1x128xf32>
    %182 = arith.addf %177, %181 : vector<1x128xf32>
    %183 = vector.extract_strided_slice %176 {offsets = [1, 0], sizes = [1, 144], strides = [1, 1]} : vector<128x144xbf16> to vector<1x144xbf16>
    %c1_98 = arith.constant 1 : index
    %c0_99 = arith.constant 0 : index
    %c0_100 = arith.constant 0 : index
    %184 = vector.load %arg4[%c1_98, %c0_99, %c0_100] : memref<16x144x128xbf16, #tpu.memory_space<vmem>>, vector<1x144x128xbf16>
    %185 = vector.shape_cast %184 : vector<1x144x128xbf16> to vector<144x128xbf16>
    %cst_101 = arith.constant dense<0.000000e+00> : vector<1x128xf32>
    %186 = tpu.matmul %183, %185, %cst_101 {dimension_numbers = #tpu.dot_dimension_numbers<[1], [0], [0], [1], [0, 0, 1, 1], [], []>} : vector<1x144xbf16>, vector<144x128xbf16>, vector<1x128xf32> -> vector<1x128xf32>
    %187 = arith.addf %182, %186 : vector<1x128xf32>
    %188 = vector.extract_strided_slice %176 {offsets = [2, 0], sizes = [1, 144], strides = [1, 1]} : vector<128x144xbf16> to vector<1x144xbf16>
    %c2_102 = arith.constant 2 : index
    %c0_103 = arith.constant 0 : index
    %c0_104 = arith.constant 0 : index
    %189 = vector.load %arg4[%c2_102, %c0_103, %c0_104] : memref<16x144x128xbf16, #tpu.memory_space<vmem>>, vector<1x144x128xbf16>
    %190 = vector.shape_cast %189 : vector<1x144x128xbf16> to vector<144x128xbf16>
    %cst_105 = arith.constant dense<0.000000e+00> : vector<1x128xf32>
    %191 = tpu.matmul %188, %190, %cst_105 {dimension_numbers = #tpu.dot_dimension_numbers<[1], [0], [0], [1], [0, 0, 1, 1], [], []>} : vector<1x144xbf16>, vector<144x128xbf16>, vector<1x128xf32> -> vector<1x128xf32>
    %192 = arith.addf %187, %191 : vector<1x128xf32>
    %193 = vector.extract_strided_slice %176 {offsets = [3, 0], sizes = [1, 144], strides = [1, 1]} : vector<128x144xbf16> to vector<1x144xbf16>
    %c3_106 = arith.constant 3 : index
    %c0_107 = arith.constant 0 : index
    %c0_108 = arith.constant 0 : index
    %194 = vector.load %arg4[%c3_106, %c0_107, %c0_108] : memref<16x144x128xbf16, #tpu.memory_space<vmem>>, vector<1x144x128xbf16>
    %195 = vector.shape_cast %194 : vector<1x144x128xbf16> to vector<144x128xbf16>
    %cst_109 = arith.constant dense<0.000000e+00> : vector<1x128xf32>
    %196 = tpu.matmul %193, %195, %cst_109 {dimension_numbers = #tpu.dot_dimension_numbers<[1], [0], [0], [1], [0, 0, 1, 1], [], []>} : vector<1x144xbf16>, vector<144x128xbf16>, vector<1x128xf32> -> vector<1x128xf32>
    %197 = arith.addf %192, %196 : vector<1x128xf32>
    %198 = vector.extract_strided_slice %176 {offsets = [4, 0], sizes = [1, 144], strides = [1, 1]} : vector<128x144xbf16> to vector<1x144xbf16>
    %c4_110 = arith.constant 4 : index
    %c0_111 = arith.constant 0 : index
    %c0_112 = arith.constant 0 : index
    %199 = vector.load %arg4[%c4_110, %c0_111, %c0_112] : memref<16x144x128xbf16, #tpu.memory_space<vmem>>, vector<1x144x128xbf16>
    %200 = vector.shape_cast %199 : vector<1x144x128xbf16> to vector<144x128xbf16>
    %cst_113 = arith.constant dense<0.000000e+00> : vector<1x128xf32>
    %201 = tpu.matmul %198, %200, %cst_113 {dimension_numbers = #tpu.dot_dimension_numbers<[1], [0], [0], [1], [0, 0, 1, 1], [], []>} : vector<1x144xbf16>, vector<144x128xbf16>, vector<1x128xf32> -> vector<1x128xf32>
    %202 = arith.addf %197, %201 : vector<1x128xf32>
    %203 = vector.extract_strided_slice %176 {offsets = [5, 0], sizes = [1, 144], strides = [1, 1]} : vector<128x144xbf16> to vector<1x144xbf16>
    %c5_114 = arith.constant 5 : index
    %c0_115 = arith.constant 0 : index
    %c0_116 = arith.constant 0 : index
    %204 = vector.load %arg4[%c5_114, %c0_115, %c0_116] : memref<16x144x128xbf16, #tpu.memory_space<vmem>>, vector<1x144x128xbf16>
    %205 = vector.shape_cast %204 : vector<1x144x128xbf16> to vector<144x128xbf16>
    %cst_117 = arith.constant dense<0.000000e+00> : vector<1x128xf32>
    %206 = tpu.matmul %203, %205, %cst_117 {dimension_numbers = #tpu.dot_dimension_numbers<[1], [0], [0], [1], [0, 0, 1, 1], [], []>} : vector<1x144xbf16>, vector<144x128xbf16>, vector<1x128xf32> -> vector<1x128xf32>
    %207 = arith.addf %202, %206 : vector<1x128xf32>
    %208 = vector.extract_strided_slice %176 {offsets = [6, 0], sizes = [1, 144], strides = [1, 1]} : vector<128x144xbf16> to vector<1x144xbf16>
    %c6_118 = arith.constant 6 : index
    %c0_119 = arith.constant 0 : index
    %c0_120 = arith.constant 0 : index
    %209 = vector.load %arg4[%c6_118, %c0_119, %c0_120] : memref<16x144x128xbf16, #tpu.memory_space<vmem>>, vector<1x144x128xbf16>
    %210 = vector.shape_cast %209 : vector<1x144x128xbf16> to vector<144x128xbf16>
    %cst_121 = arith.constant dense<0.000000e+00> : vector<1x128xf32>
    %211 = tpu.matmul %208, %210, %cst_121 {dimension_numbers = #tpu.dot_dimension_numbers<[1], [0], [0], [1], [0, 0, 1, 1], [], []>} : vector<1x144xbf16>, vector<144x128xbf16>, vector<1x128xf32> -> vector<1x128xf32>
    %212 = arith.addf %207, %211 : vector<1x128xf32>
    %213 = vector.extract_strided_slice %176 {offsets = [7, 0], sizes = [1, 144], strides = [1, 1]} : vector<128x144xbf16> to vector<1x144xbf16>
    %c7_122 = arith.constant 7 : index
    %c0_123 = arith.constant 0 : index
    %c0_124 = arith.constant 0 : index
    %214 = vector.load %arg4[%c7_122, %c0_123, %c0_124] : memref<16x144x128xbf16, #tpu.memory_space<vmem>>, vector<1x144x128xbf16>
    %215 = vector.shape_cast %214 : vector<1x144x128xbf16> to vector<144x128xbf16>
    %cst_125 = arith.constant dense<0.000000e+00> : vector<1x128xf32>
    %216 = tpu.matmul %213, %215, %cst_125 {dimension_numbers = #tpu.dot_dimension_numbers<[1], [0], [0], [1], [0, 0, 1, 1], [], []>} : vector<1x144xbf16>, vector<144x128xbf16>, vector<1x128xf32> -> vector<1x128xf32>
    %217 = arith.addf %212, %216 : vector<1x128xf32>
    %218 = vector.extract_strided_slice %176 {offsets = [8, 0], sizes = [1, 144], strides = [1, 1]} : vector<128x144xbf16> to vector<1x144xbf16>
    %c8_126 = arith.constant 8 : index
    %c0_127 = arith.constant 0 : index
    %c0_128 = arith.constant 0 : index
    %219 = vector.load %arg4[%c8_126, %c0_127, %c0_128] : memref<16x144x128xbf16, #tpu.memory_space<vmem>>, vector<1x144x128xbf16>
    %220 = vector.shape_cast %219 : vector<1x144x128xbf16> to vector<144x128xbf16>
    %cst_129 = arith.constant dense<0.000000e+00> : vector<1x128xf32>
    %221 = tpu.matmul %218, %220, %cst_129 {dimension_numbers = #tpu.dot_dimension_numbers<[1], [0], [0], [1], [0, 0, 1, 1], [], []>} : vector<1x144xbf16>, vector<144x128xbf16>, vector<1x128xf32> -> vector<1x128xf32>
    %222 = arith.addf %217, %221 : vector<1x128xf32>
    %223 = vector.extract_strided_slice %176 {offsets = [9, 0], sizes = [1, 144], strides = [1, 1]} : vector<128x144xbf16> to vector<1x144xbf16>
    %c9_130 = arith.constant 9 : index
    %c0_131 = arith.constant 0 : index
    %c0_132 = arith.constant 0 : index
    %224 = vector.load %arg4[%c9_130, %c0_131, %c0_132] : memref<16x144x128xbf16, #tpu.memory_space<vmem>>, vector<1x144x128xbf16>
    %225 = vector.shape_cast %224 : vector<1x144x128xbf16> to vector<144x128xbf16>
    %cst_133 = arith.constant dense<0.000000e+00> : vector<1x128xf32>
    %226 = tpu.matmul %223, %225, %cst_133 {dimension_numbers = #tpu.dot_dimension_numbers<[1], [0], [0], [1], [0, 0, 1, 1], [], []>} : vector<1x144xbf16>, vector<144x128xbf16>, vector<1x128xf32> -> vector<1x128xf32>
    %227 = arith.addf %222, %226 : vector<1x128xf32>
    %228 = vector.extract_strided_slice %176 {offsets = [10, 0], sizes = [1, 144], strides = [1, 1]} : vector<128x144xbf16> to vector<1x144xbf16>
    %c10_134 = arith.constant 10 : index
    %c0_135 = arith.constant 0 : index
    %c0_136 = arith.constant 0 : index
    %229 = vector.load %arg4[%c10_134, %c0_135, %c0_136] : memref<16x144x128xbf16, #tpu.memory_space<vmem>>, vector<1x144x128xbf16>
    %230 = vector.shape_cast %229 : vector<1x144x128xbf16> to vector<144x128xbf16>
    %cst_137 = arith.constant dense<0.000000e+00> : vector<1x128xf32>
    %231 = tpu.matmul %228, %230, %cst_137 {dimension_numbers = #tpu.dot_dimension_numbers<[1], [0], [0], [1], [0, 0, 1, 1], [], []>} : vector<1x144xbf16>, vector<144x128xbf16>, vector<1x128xf32> -> vector<1x128xf32>
    %232 = arith.addf %227, %231 : vector<1x128xf32>
    %233 = vector.extract_strided_slice %176 {offsets = [11, 0], sizes = [1, 144], strides = [1, 1]} : vector<128x144xbf16> to vector<1x144xbf16>
    %c11_138 = arith.constant 11 : index
    %c0_139 = arith.constant 0 : index
    %c0_140 = arith.constant 0 : index
    %234 = vector.load %arg4[%c11_138, %c0_139, %c0_140] : memref<16x144x128xbf16, #tpu.memory_space<vmem>>, vector<1x144x128xbf16>
    %235 = vector.shape_cast %234 : vector<1x144x128xbf16> to vector<144x128xbf16>
    %cst_141 = arith.constant dense<0.000000e+00> : vector<1x128xf32>
    %236 = tpu.matmul %233, %235, %cst_141 {dimension_numbers = #tpu.dot_dimension_numbers<[1], [0], [0], [1], [0, 0, 1, 1], [], []>} : vector<1x144xbf16>, vector<144x128xbf16>, vector<1x128xf32> -> vector<1x128xf32>
    %237 = arith.addf %232, %236 : vector<1x128xf32>
    %238 = vector.extract_strided_slice %176 {offsets = [12, 0], sizes = [1, 144], strides = [1, 1]} : vector<128x144xbf16> to vector<1x144xbf16>
    %c12_142 = arith.constant 12 : index
    %c0_143 = arith.constant 0 : index
    %c0_144 = arith.constant 0 : index
    %239 = vector.load %arg4[%c12_142, %c0_143, %c0_144] : memref<16x144x128xbf16, #tpu.memory_space<vmem>>, vector<1x144x128xbf16>
    %240 = vector.shape_cast %239 : vector<1x144x128xbf16> to vector<144x128xbf16>
    %cst_145 = arith.constant dense<0.000000e+00> : vector<1x128xf32>
    %241 = tpu.matmul %238, %240, %cst_145 {dimension_numbers = #tpu.dot_dimension_numbers<[1], [0], [0], [1], [0, 0, 1, 1], [], []>} : vector<1x144xbf16>, vector<144x128xbf16>, vector<1x128xf32> -> vector<1x128xf32>
    %242 = arith.addf %237, %241 : vector<1x128xf32>
    %243 = vector.extract_strided_slice %176 {offsets = [13, 0], sizes = [1, 144], strides = [1, 1]} : vector<128x144xbf16> to vector<1x144xbf16>
    %c13_146 = arith.constant 13 : index
    %c0_147 = arith.constant 0 : index
    %c0_148 = arith.constant 0 : index
    %244 = vector.load %arg4[%c13_146, %c0_147, %c0_148] : memref<16x144x128xbf16, #tpu.memory_space<vmem>>, vector<1x144x128xbf16>
    %245 = vector.shape_cast %244 : vector<1x144x128xbf16> to vector<144x128xbf16>
    %cst_149 = arith.constant dense<0.000000e+00> : vector<1x128xf32>
    %246 = tpu.matmul %243, %245, %cst_149 {dimension_numbers = #tpu.dot_dimension_numbers<[1], [0], [0], [1], [0, 0, 1, 1], [], []>} : vector<1x144xbf16>, vector<144x128xbf16>, vector<1x128xf32> -> vector<1x128xf32>
    %247 = arith.addf %242, %246 : vector<1x128xf32>
    %248 = vector.extract_strided_slice %176 {offsets = [14, 0], sizes = [1, 144], strides = [1, 1]} : vector<128x144xbf16> to vector<1x144xbf16>
    %c14_150 = arith.constant 14 : index
    %c0_151 = arith.constant 0 : index
    %c0_152 = arith.constant 0 : index
    %249 = vector.load %arg4[%c14_150, %c0_151, %c0_152] : memref<16x144x128xbf16, #tpu.memory_space<vmem>>, vector<1x144x128xbf16>
    %250 = vector.shape_cast %249 : vector<1x144x128xbf16> to vector<144x128xbf16>
    %cst_153 = arith.constant dense<0.000000e+00> : vector<1x128xf32>
    %251 = tpu.matmul %248, %250, %cst_153 {dimension_numbers = #tpu.dot_dimension_numbers<[1], [0], [0], [1], [0, 0, 1, 1], [], []>} : vector<1x144xbf16>, vector<144x128xbf16>, vector<1x128xf32> -> vector<1x128xf32>
    %252 = arith.addf %247, %251 : vector<1x128xf32>
    %253 = vector.extract_strided_slice %176 {offsets = [15, 0], sizes = [1, 144], strides = [1, 1]} : vector<128x144xbf16> to vector<1x144xbf16>
    %c15_154 = arith.constant 15 : index
    %c0_155 = arith.constant 0 : index
    %c0_156 = arith.constant 0 : index
    %254 = vector.load %arg4[%c15_154, %c0_155, %c0_156] : memref<16x144x128xbf16, #tpu.memory_space<vmem>>, vector<1x144x128xbf16>
    %255 = vector.shape_cast %254 : vector<1x144x128xbf16> to vector<144x128xbf16>
    %cst_157 = arith.constant dense<0.000000e+00> : vector<1x128xf32>
    %256 = tpu.matmul %253, %255, %cst_157 {dimension_numbers = #tpu.dot_dimension_numbers<[1], [0], [0], [1], [0, 0, 1, 1], [], []>} : vector<1x144xbf16>, vector<144x128xbf16>, vector<1x128xf32> -> vector<1x128xf32>
    %257 = arith.addf %252, %256 : vector<1x128xf32>
    %258 = arith.addf %257, %4 : vector<1x128xf32>
    %cst_158 = arith.constant 0.000000e+00 : f32
    %259 = vector.broadcast %cst_158 : f32 to vector<1x128xf32>
    %260 = arith.maximumf %258, %259 : vector<1x128xf32>
    %261 = arith.truncf %260 : vector<1x128xf32> to vector<1x128xbf16>
    %c0_159 = arith.constant 0 : index
    %c0_160 = arith.constant 0 : index
    %262 = vector.load %arg5[%c0_159, %c0_160] : memref<128x128xbf16, #tpu.memory_space<vmem>>, vector<128x128xbf16>
    %cst_161 = arith.constant dense<0.000000e+00> : vector<1x128xf32>
    %263 = tpu.matmul %261, %262, %cst_161 {dimension_numbers = #tpu.dot_dimension_numbers<[1], [0], [0], [1], [0, 0, 1, 1], [], []>} : vector<1x128xbf16>, vector<128x128xbf16>, vector<1x128xf32> -> vector<1x128xf32>
    %264 = arith.addf %263, %5 : vector<1x128xf32>
    %cst_162 = arith.constant 0.000000e+00 : f32
    %265 = vector.broadcast %cst_162 : f32 to vector<1x128xf32>
    %266 = arith.maximumf %264, %265 : vector<1x128xf32>
    %267 = arith.truncf %266 : vector<1x128xf32> to vector<1x128xbf16>
    %c0_163 = arith.constant 0 : index
    %c0_164 = arith.constant 0 : index
    %268 = vector.load %arg6[%c0_163, %c0_164] : memref<128x128xbf16, #tpu.memory_space<vmem>>, vector<128x128xbf16>
    %cst_165 = arith.constant dense<0.000000e+00> : vector<1x128xf32>
    %269 = tpu.matmul %267, %268, %cst_165 {dimension_numbers = #tpu.dot_dimension_numbers<[1], [0], [0], [1], [0, 0, 1, 1], [], []>} : vector<1x128xbf16>, vector<128x128xbf16>, vector<1x128xf32> -> vector<1x128xf32>
    %270 = arith.addf %269, %6 : vector<1x128xf32>
    %cst_166 = arith.constant 0.000000e+00 : f32
    %271 = vector.broadcast %cst_166 : f32 to vector<1x128xf32>
    %272 = arith.subf %271, %270 : vector<1x128xf32>
    %273 = math.exp %272 : vector<1x128xf32>
    %cst_167 = arith.constant 1.000000e+00 : f32
    %274 = vector.broadcast %cst_167 : f32 to vector<1x128xf32>
    %275 = arith.addf %274, %273 : vector<1x128xf32>
    %cst_168 = arith.constant 1.000000e+00 : f32
    %276 = vector.broadcast %cst_168 : f32 to vector<1x128xf32>
    %277 = arith.divf %276, %275 : vector<1x128xf32>
    %278 = vector.shape_cast %277 : vector<1x128xf32> to vector<1x128xf32>
    %279 = vector.broadcast %278 : vector<1x128xf32> to vector<8x128xf32>
    %c0_169 = arith.constant 0 : index
    %c0_170 = arith.constant 0 : index
    %c0_171 = arith.constant 0 : index
    %280 = vector.load %arg8[%c0_169, %c0_170, %c0_171] : memref<1x8x128xf32, #tpu.memory_space<vmem>>, vector<1x8x128xf32>
    %281 = vector.shape_cast %280 : vector<1x8x128xf32> to vector<8x128xf32>
    %282 = vector.shape_cast %279 : vector<8x128xf32> to vector<1x8x128xf32>
    tpu.vector_store %arg8[%c0_169, %c0_170, %c0_171], %282 {strides = array<i32>} : memref<1x8x128xf32, #tpu.memory_space<vmem>>, vector<1x8x128xf32>,
    return
  }
  func.func @transform_0(%arg0: i32) -> (i32, i32, i32) {
    %c0_i32 = arith.constant 0 : i32
    %c0_i32_0 = arith.constant 0 : i32
    %c0_i32_1 = arith.constant 0 : i32
    return %arg0, %c0_i32, %c0_i32_0 : i32, i32, i32
  }
  func.func @transform_1(%arg0: i32) -> (i32, i32) {
    %c0_i32 = arith.constant 0 : i32
    %c0_i32_0 = arith.constant 0 : i32
    %c0_i32_1 = arith.constant 0 : i32
    return %c0_i32, %c0_i32_0 : i32, i32
  }
  func.func @transform_2(%arg0: i32) -> (i32, i32, i32) {
    %c0_i32 = arith.constant 0 : i32
    %c0_i32_0 = arith.constant 0 : i32
    %c0_i32_1 = arith.constant 0 : i32
    %c0_i32_2 = arith.constant 0 : i32
    return %c0_i32, %c0_i32_0, %c0_i32_1 : i32, i32, i32
  }
  func.func @transform_3(%arg0: i32) -> (i32, i32, i32) {
    %c0_i32 = arith.constant 0 : i32
    %c0_i32_0 = arith.constant 0 : i32
    %c0_i32_1 = arith.constant 0 : i32
    %c0_i32_2 = arith.constant 0 : i32
    return %c0_i32, %c0_i32_0, %c0_i32_1 : i32, i32, i32
  }
  func.func @transform_4(%arg0: i32) -> (i32, i32) {
    %c0_i32 = arith.constant 0 : i32
    %c0_i32_0 = arith.constant 0 : i32
    %c0_i32_1 = arith.constant 0 : i32
    return %c0_i32, %c0_i32_0 : i32, i32
  }
  func.func @transform_5(%arg0: i32) -> (i32, i32) {
    %c0_i32 = arith.constant 0 : i32
    %c0_i32_0 = arith.constant 0 : i32
    %c0_i32_1 = arith.constant 0 : i32
    return %c0_i32, %c0_i32_0 : i32, i32
  }
  func.func @transform_6(%arg0: i32) -> (i32, i32) {
    %c0_i32 = arith.constant 0 : i32
    %c0_i32_0 = arith.constant 0 : i32
    %c0_i32_1 = arith.constant 0 : i32
    return %c0_i32, %c0_i32_0 : i32, i32
  }
  func.func @transform_7(%arg0: i32) -> (i32, i32, i32) {
    %c0_i32 = arith.constant 0 : i32
    %c0_i32_0 = arith.constant 0 : i32
    %c0_i32_1 = arith.constant 0 : i32
    return %arg0, %c0_i32, %c0_i32_0 : i32, i32, i32
  }
}

</mosaic_0001>

<bundles_post_ra>
// kernel: net_forward.1
= control target key start
LH: loop header
LB: loop body
LE: loop exit
PB: predicated region body
PF: predicated region fallthrough
CT: control target
= control target key end

     0   :  { %s12597_s24 = smov 0   ;;  %s17343_s0 = inlined_call_operand.vmem [shape: bf16[2,832,128], index: 0, kind: input, shape index: {}]   ;;  %s17344_s1 = inlined_call_operand.vmem [shape: bf16[128,128], index: 1, kind: input, shape index: {}]   ;;  %s17345_s2 = inlined_call_operand.vmem [shape: bf16[25,128,128], index: 2, kind: input, shape index: {}]   ;;  %s17346_s3 = inlined_call_operand.vmem [shape: bf16[16,144,128], index: 3, kind: input, shape index: {}]   ;;  %s17347_s4 = inlined_call_operand.vmem [shape: bf16[128,128], index: 4, kind: input, shape index: {}]   ;;  %s17348_s5 = inlined_call_operand.vmem [shape: bf16[128,128], index: 5, kind: input, shape index: {}]   ;;  %s17349_s6 = inlined_call_operand.vmem [shape: f32[8,128], index: 6, kind: input, shape index: {}]   ;;  %s17350_s7 = inlined_call_operand.vmem [shape: f32[2,8,128], index: 7, kind: output, shape index: {}]  }
   0x1 LB: > { %s9045_s25 = sadd.s32 4294967295, %s12552_s24   ;;  %p9049_p0 = scmp.ge.s32.totalorder %s12552_s24, 1  ;;  %s12552_s24 = sphi %s12597_s24, %s17_s24  }
   0x2   : > { %p237_p1 = scmp.lt.s32.totalorder %s12552_s24, 3 }
   0x4   : > { %p238_p2 = pnand %p9049_p0, %p237_p1 }
   0x6   : > { %241 = sbr.rel (%p238_p2) target bundleno = 2640 (0xa50), region = 48 }
   0xb   : > { %v12121_v0 = vld [vmem:[%s17344_s1 + $0x38] sm:$0xff]   ;;  %p268_p3 = scmp.lt.s32.totalorder %s9045_s25, 1  ;;  %v12122_v1 = vld [vmem:[%s17344_s1 + $0x30] sm:$0xff]   ;;  %v12123_v2 = vld [vmem:[%s17344_s1 + $0x28] sm:$0xff]   ;;  %vm12555_vm0 = vmmov 0   ;;  %vm2553_vm3 = vcmask 1044480  }
   0xc   : > { %10649 = vmatprep.subr.bf16.mxu0 %v12121_v0  ;;  %v12124_v3 = vld [vmem:[%s17344_s1 + $0x20] sm:$0xff]   ;;  %v12125_v5 = vld [vmem:[%s17344_s1 + $0x18] sm:$0xff]   ;;  %v12126_v6 = vld [vmem:[%s17344_s1 + $0x10] sm:$0xff]   ;;  %vm1441_vm1 = vsmask.f32 7424  ;;  %vm1860_vm6 = vcmask 1046528  }
   0xd   : > { %s17916_s25 = smov (!%p268_p3, %s9045_s25), 1  ;;  %10650 = vmatpush3.bf16.msra.mxu0 %v12121_v0  ;;  %v12127_v7 = vld [vmem:[%s17344_s1 + $0x8] sm:$0xff]   ;;  %v12128_v8 = vld [vmem:[%s17344_s1] sm:$0xff]   ;;  %vm2077_vm2 = vsmask.f32 6400  ;;  %vm2316_vm7 = vcmask 1045504  }
   0xe   : > { %10651 = vmatprep.subr.bf16.mxu0 %v12122_v1  ;;  %s12109_s9 = smul.u32 416, %s17916_s25  ;;  %vm2770_vm4 = vsmask.f32 4352  ;;  %vm3866_vm5 = vsmask.f32 5376  ;;  %vm6946_vm8 = vcmask 130048  }
   0xf   : > { %s9051_s20 = sshll.u32 %s17916_s25, 3 }
  0x10   : > { %s12620_s12 = scalar_lea.vmem %s17343_s0, %s12109_s9  ;;  %s276_s23 = scalar_lea.vmem %s17350_s7, %s9051_s20 }
  0x11   : > { %10652 = vmatpush3.bf16.msra.mxu0 %v12122_v1  ;;  %v12129_v4 = vld [vmem:[%s12620_s12] sm:$0xff]   ;;  %v12130_v9 = vld [vmem:[%s12620_s12 + $0x8] sm:$0xff]   ;;  %v12131_v10 = vld [vmem:[%s12620_s12 + $0x10] sm:$0xff]  }
  0x12   : > { %10653 = vmatprep.subr.bf16.mxu0 %v12123_v2  ;;  %10665 = vmatprep.mubr.bf16.mxu0 %v12129_v4  ;;  %v12132_v11 = vld [vmem:[%s12620_s12 + $0x18] sm:$0xff]   ;;  %v12133_v12 = vld [vmem:[%s12620_s12 + $0x20] sm:$0xff]   ;;  %v12134_v13 = vld [vmem:[%s12620_s12 + $0x28] sm:$0xff]  }
  0x13   : > { %v12135_v14 = vld [vmem:[%s12620_s12 + $0x30] sm:$0xff]   ;;  %v12136_v15 = vld [vmem:[%s12620_s12 + $0x38] sm:$0xff]   ;;  %v12137_v16 = vld [vmem:[%s12620_s12 + $0x40] sm:$0xff]  }
  0x14   : > { %v12138_v17 = vld [vmem:[%s12620_s12 + $0x48] sm:$0xff]   ;;  %v12139_v18 = vld [vmem:[%s12620_s12 + $0x50] sm:$0xff]   ;;  %v12140_v19 = vld [vmem:[%s12620_s12 + $0x58] sm:$0xff]  }
  0x15   : > { %10654 = vmatpush3.bf16.msra.mxu0 %v12123_v2  ;;  %v12141_v20 = vld [vmem:[%s12620_s12 + $0x60] sm:$0xff]   ;;  %v12142_v21 = vld [vmem:[%s12620_s12 + $0x68] sm:$0xff]   ;;  %v12143_v22 = vld [vmem:[%s12620_s12 + $0x70] sm:$0xff]  }
  0x16   : > { %10655 = vmatprep.subr.bf16.mxu0 %v12124_v3  ;;  %v12144_v23 = vld [vmem:[%s12620_s12 + $0x78] sm:$0xff]   ;;  %v12145_v24 = vld [vmem:[%s12620_s12 + $0x80] sm:$0xff]   ;;  %v12146_v25 = vld [vmem:[%s12620_s12 + $0x88] sm:$0xff]  }
  0x17   : > { %v12147_v26 = vld [vmem:[%s12620_s12 + $0x90] sm:$0xff]   ;;  %v12148_v27 = vld [vmem:[%s12620_s12 + $0x98] sm:$0xff]   ;;  %v12149_v28 = vld [vmem:[%s12620_s12 + $0xa0] sm:$0xff]  }
  0x18   : > { %v12150_v29 = vld [vmem:[%s12620_s12 + $0xa8] sm:$0xff]   ;;  %v12151_v30 = vld [vmem:[%s12620_s12 + $0xb0] sm:$0xff]   ;;  %v12152_v31 = vld [vmem:[%s12620_s12 + $0xb8] sm:$0xff]  }
  0x19   : > { %10656 = vmatpush3.bf16.msra.mxu0 %v12124_v3  ;;  %v12153_v32 = vld [vmem:[%s12620_s12 + $0xc0] sm:$0xff]   ;;  %v12154_v33 = vld [vmem:[%s12620_s12 + $0xc8] sm:$0xff]   ;;  %v12155_v34 = vld [vmem:[%s12620_s12 + $0xd0] sm:$0xff]  }
  0x1a   : > { %10657 = vmatprep.subr.bf16.mxu0 %v12125_v5  ;;  %v12156_v35 = vld [vmem:[%s12620_s12 + $0xd8] sm:$0xff]   ;;  %v12157_v36 = vld [vmem:[%s12620_s12 + $0xe0] sm:$0xff]   ;;  %v12158_v37 = vld [vmem:[%s12620_s12 + $0xe8] sm:$0xff]  }
  0x1b   : > { %v12159_v38 = vld [vmem:[%s12620_s12 + $0xf0] sm:$0xff]   ;;  %v12160_v39 = vld [vmem:[%s12620_s12 + $0xf8] sm:$0xff]   ;;  %v12161_v40 = vld [vmem:[%s12620_s12 + $0x100] sm:$0xff]  }
  0x1c   : > { %v12162_v41 = vld [vmem:[%s12620_s12 + $0x108] sm:$0xff]   ;;  %v12163_v42 = vld [vmem:[%s12620_s12 + $0x110] sm:$0xff]   ;;  %v12164_v43 = vld [vmem:[%s12620_s12 + $0x118] sm:$0xff]  }
  0x1d   : > { %10658 = vmatpush3.bf16.msra.mxu0 %v12125_v5  ;;  %v12165_v44 = vld [vmem:[%s12620_s12 + $0x120] sm:$0xff]   ;;  %v12166_v45 = vld [vmem:[%s12620_s12 + $0x128] sm:$0xff]   ;;  %v12167_v46 = vld [vmem:[%s12620_s12 + $0x130] sm:$0xff]  }
  0x1e   : > { %10659 = vmatprep.subr.bf16.mxu0 %v12126_v6  ;;  %v12168_v47 = vld [vmem:[%s12620_s12 + $0x138] sm:$0xff]   ;;  %v12169_v48 = vld [vmem:[%s12620_s12 + $0x140] sm:$0xff]   ;;  %v12170_v49 = vld [vmem:[%s12620_s12 + $0x148] sm:$0xff]  }
  0x1f   : > { %v12171_v50 = vld [vmem:[%s12620_s12 + $0x150] sm:$0xff]   ;;  %v12172_v51 = vld [vmem:[%s12620_s12 + $0x158] sm:$0xff]   ;;  %v12173_v52 = vld [vmem:[%s12620_s12 + $0x160] sm:$0xff]  }
  0x20   : > { %v12174_v53 = vld [vmem:[%s12620_s12 + $0x168] sm:$0xff]   ;;  %v12175_v54 = vld [vmem:[%s12620_s12 + $0x170] sm:$0xff]   ;;  %v12176_v55 = vld [vmem:[%s12620_s12 + $0x178] sm:$0xff]  }
  0x21   : > { %10660 = vmatpush3.bf16.msra.mxu0 %v12126_v6  ;;  %v12177_v56 = vld [vmem:[%s12620_s12 + $0x180] sm:$0xff]   ;;  %v12178_v57 = vld [vmem:[%s12620_s12 + $0x188] sm:$0xff]   ;;  %v12179_v58 = vld [vmem:[%s12620_s12 + $0x190] sm:$0xff]  }
  0x22   : > { %10661 = vmatprep.subr.bf16.mxu0 %v12127_v7  ;;  %v12180_v61 = vld [vmem:[%s12620_s12 + $0x198] sm:$0xff]  }
  0x25   : > { %10662 = vmatpush3.bf16.msra.mxu0 %v12127_v7  ;;  %v12181_v7 = vld [vmem:[%s17345_s2 + $0x78] sm:$0xff]  }
  0x26   : > { %10663 = vmatprep.subr.bf16.mxu0 %v12128_v8 }
  0x29   : > { %10664 = vmatpush3.bf16.msra.mxu0 %v12128_v8 }
  0x2c   : > { %10666 = vmatmul.mubr.bf16.vlgmr.msra.gmra.mxu0 %v12130_v9  ;;  %v17351_v9 = vmov 0.0  }
  0x2d   : > { %10669 = vmatprep.mubr.bf16.mxu0 %v12131_v10  ;;  %10769 = vmatprep.subr.bf16.mxu1 %v17351_v9  ;;  %v12182_v10 = vld [vmem:[%s17345_s2 + $0xf8] sm:$0xff]  }
  0x2e   : > { %10925 = vmatprep.subr.bf16.mxu0 %v17351_v9  ;;  %10770 = vmatpush3.bf16.msra.mxu1 %v12181_v7 }
  0x2f   : > { %10771 = vmatprep.subr.bf16.mxu1 %v17351_v9  ;;  %10926 = vmatpush3.bf16.msra.mxu0 %v12182_v10 }
  0x30   : > { %10927 = vmatprep.subr.bf16.mxu0 %v17351_v9  ;;  %10785 = vmatprep.mubr.msk.bf16.mxu1 %vm12555_vm0, %v17351_v9 }
  0x34   : > { %10670 = vmatmul.mubr.bf16.gmra.mxu0 %v12132_v11 }
  0x35   : > { %10673 = vmatprep.mubr.bf16.mxu0 %v12133_v12  ;;  %v12183_v12 = vld [vmem:[%s17345_s2 + $0x70] sm:$0xff]  }
  0x36   : > { %10772 = vmatpush3.bf16.msra.mxu1 %v12183_v12 }
  0x37   : > { %10773 = vmatprep.subr.bf16.mxu1 %v17351_v9 }
  0x3c   : > { %10674 = vmatmul.mubr.bf16.gmra.mxu0 %v12134_v13 }
  0x3d   : > { %10677 = vmatprep.mubr.bf16.mxu0 %v12135_v14  ;;  %v12184_v14 = vld [vmem:[%s17345_s2 + $0xf0] sm:$0xff]  }
  0x3e   : > { %10928 = vmatpush3.bf16.msra.mxu0 %v12184_v14 }
  0x3f   : > { %10929 = vmatprep.subr.bf16.mxu0 %v17351_v9 }
  0x44   : > { %10678 = vmatmul.mubr.bf16.gmra.mxu0 %v12136_v15 }
  0x45   : > { %10681 = vmatprep.mubr.bf16.mxu0 %v12137_v16  ;;  %v12185_v16 = vld [vmem:[%s17345_s2 + $0x68] sm:$0xff]  }
  0x46   : > { %10774 = vmatpush3.bf16.msra.mxu1 %v12185_v16 }
  0x47   : > { %10775 = vmatprep.subr.bf16.mxu1 %v17351_v9 }
  0x4c   : > { %10682 = vmatmul.mubr.bf16.gmra.mxu0 %v12138_v17 }
  0x4d   : > { %10685 = vmatprep.mubr.bf16.mxu0 %v12139_v18  ;;  %v12186_v18 = vld [vmem:[%s17345_s2 + $0xe8] sm:$0xff]  }
  0x4e   : > { %10930 = vmatpush3.bf16.msra.mxu0 %v12186_v18 }
  0x4f   : > { %10931 = vmatprep.subr.bf16.mxu0 %v17351_v9 }
  0x54   : > { %10686 = vmatmul.mubr.bf16.gmra.mxu0 %v12140_v19 }
  0x55   : > { %10689 = vmatprep.mubr.bf16.mxu0 %v12141_v20  ;;  %v12187_v20 = vld [vmem:[%s17345_s2 + $0x60] sm:$0xff]  }
  0x56   : > { %10776 = vmatpush3.bf16.msra.mxu1 %v12187_v20 }
  0x57   : > { %10777 = vmatprep.subr.bf16.mxu1 %v17351_v9 }
  0x5c   : > { %10690 = vmatmul.mubr.bf16.gmra.mxu0 %v12142_v21 }
  0x5d   : > { %10693 = vmatprep.mubr.bf16.mxu0 %v12143_v22  ;;  %v12188_v22 = vld [vmem:[%s17345_s2 + $0xe0] sm:$0xff]  }
  0x5e   : > { %10932 = vmatpush3.bf16.msra.mxu0 %v12188_v22 }
  0x5f   : > { %10933 = vmatprep.subr.bf16.mxu0 %v17351_v9 }
  0x64   : > { %10694 = vmatmul.mubr.bf16.gmra.mxu0 %v12144_v23 }
  0x65   : > { %10697 = vmatprep.mubr.bf16.mxu0 %v12145_v24 }
  0x6c   : > { %10698 = vmatmul.mubr.bf16.gmra.mxu0 %v12146_v25  ;;  %v12189_v25 = vld [vmem:[%s17345_s2 + $0x58] sm:$0xff]  }
  0x6d   : > { %10701 = vmatprep.mubr.bf16.mxu0 %v12147_v26  ;;  %10778 = vmatpush3.bf16.msra.mxu1 %v12189_v25 }
  0x6e   : > { %10779 = vmatprep.subr.bf16.mxu1 %v17351_v9 }
  0x74   : > { %10702 = vmatmul.mubr.bf16.gmra.mxu0 %v12148_v27  ;;  %v12190_v27 = vld [vmem:[%s17345_s2 + $0xd8] sm:$0xff]  }
  0x75   : > { %10705 = vmatprep.mubr.bf16.mxu0 %v12149_v28  ;;  %10934 = vmatpush3.bf16.msra.mxu0 %v12190_v27 }
  0x76   : > { %10935 = vmatprep.subr.bf16.mxu0 %v17351_v9 }
  0x7c   : > { %10706 = vmatmul.mubr.bf16.gmra.mxu0 %v12150_v29  ;;  %v12191_v29 = vld [vmem:[%s17345_s2 + $0x50] sm:$0xff]  }
  0x7d   : > { %10709 = vmatprep.mubr.bf16.mxu0 %v12151_v30  ;;  %v12778_v30 = vld [vmem:[%s17349_s6] ss:$0 sm:$0xff]  ;;  %10780 = vmatpush3.bf16.msra.mxu1 %v12191_v29 }
  0x7e   : > { %10781 = vmatprep.subr.bf16.mxu1 %v17351_v9 }
  0x84   : > { %10710 = vmatmul.mubr.bf16.gmra.mxu0 %v12152_v31 }
  0x85   : > { %10713 = vmatprep.mubr.bf16.mxu0 %v12153_v32 }
  0x8c   : > { %10714 = vmatmul.mubr.bf16.gmra.mxu0 %v12154_v33  ;;  %v12192_v33 = vld [vmem:[%s17345_s2 + $0xd0] sm:$0xff]  }
  0x8d   : > { %10717 = vmatprep.mubr.bf16.mxu0 %v12155_v34  ;;  %10936 = vmatpush3.bf16.msra.mxu0 %v12192_v33 }
  0x8e   : > { %10937 = vmatprep.subr.bf16.mxu0 %v17351_v9 }
  0x94   : > { %10718 = vmatmul.mubr.bf16.gmra.mxu0 %v12156_v35  ;;  %v12193_v35 = vld [vmem:[%s17345_s2 + $0x48] sm:$0xff]  }
  0x95   : > { %10721 = vmatprep.mubr.bf16.mxu0 %v12157_v36  ;;  %10782 = vmatpush3.bf16.msra.mxu1 %v12193_v35 }
  0x96   : > { %10783 = vmatprep.subr.bf16.mxu1 %v17351_v9 }
  0x9c   : > { %10722 = vmatmul.mubr.bf16.gmra.mxu0 %v12158_v37 }
  0x9d   : > { %10725 = vmatprep.mubr.bf16.mxu0 %v12159_v38 }
  0xa4   : > { %10726 = vmatmul.mubr.bf16.gmra.mxu0 %v12160_v39  ;;  %v12194_v39 = vld [vmem:[%s17345_s2 + $0xc8] sm:$0xff]  }
  0xa5   : > { %10729 = vmatprep.mubr.bf16.mxu0 %v12161_v40  ;;  %10938 = vmatpush3.bf16.msra.mxu0 %v12194_v39 }
  0xa6   : > { %10939 = vmatprep.subr.bf16.mxu0 %v17351_v9 }
  0xac   : > { %10730 = vmatmul.mubr.bf16.gmra.mxu0 %v12162_v41 }
  0xad   : > { %10733 = vmatprep.mubr.bf16.mxu0 %v12163_v42  ;;  %v12195_v42 = vld [vmem:[%s17345_s2 + $0x40] sm:$0xff]  }
  0xae   : > { %10784 = vmatpush3.bf16.msra.mxu1 %v12195_v42 }
  0xaf   : > { %10821 = vmatprep.subr.bf16.mxu1 %v17351_v9 }
  0xb4   : > { %10734 = vmatmul.mubr.bf16.gmra.mxu0 %v12164_v43 }
  0xb5   : > { %10737 = vmatprep.mubr.bf16.mxu0 %v12165_v44 }
  0xbc   : > { %10738 = vmatmul.mubr.bf16.gmra.mxu0 %v12166_v45  ;;  %v12196_v45 = vld [vmem:[%s17345_s2 + $0xc0] sm:$0xff]  }
  0xbd   : > { %10741 = vmatprep.mubr.bf16.mxu0 %v12167_v46  ;;  %10940 = vmatpush3.bf16.msra.mxu0 %v12196_v45 }
  0xbe   : > { %11029 = vmatprep.subr.bf16.mxu0 %v17351_v9 }
  0xc4   : > { %10742 = vmatmul.mubr.bf16.gmra.mxu0 %v12168_v47 }
  0xc5   : > { %10745 = vmatprep.mubr.bf16.mxu0 %v12169_v48 }
  0xcc   : > { %10746 = vmatmul.mubr.bf16.gmra.mxu0 %v12170_v49 }
  0xcd   : > { %10749 = vmatprep.mubr.bf16.mxu0 %v12171_v50 }
  0xd4   : > { %10750 = vmatmul.mubr.bf16.gmra.mxu0 %v12172_v51 }
  0xd5   : > { %10753 = vmatprep.mubr.bf16.mxu0 %v12173_v52 }
  0xdc   : > { %10754 = vmatmul.mubr.bf16.gmra.mxu0 %v12174_v53 }
  0xdd   : > { %10757 = vmatprep.mubr.bf16.mxu0 %v12175_v54 }
  0xe4   : > { %10758 = vmatmul.mubr.bf16.gmra.mxu0 %v12176_v55 }
  0xe5   : > { %10761 = vmatprep.mubr.bf16.mxu0 %v12177_v56 }
  0xec   : > { %v12688_v59 = vpop.f32.mrf.mxu0  ;;  %10762 = vmatmul.mubr.bf16.gmra.mxu0 %v12178_v57 }
  0xed   : > { %10765 = vmatprep.mubr.bf16.mxu0 %v12179_v58  ;;  %v810_v49 = vadd.f32 %v12688_v59, %v12778_v30 }
  0xee   : > { %v801_v60 = vpop.f32.mrf.mxu0 }
  0xef   : > { %v802_v32 = vadd.f32 %v12778_v30, %v801_v60  ;;  %v1218_v56 = vmax.f32 %v810_v49, 0.0 }
  0xf0   : > { %v12691_v62 = vpop.f32.mrf.mxu0 }
  0xf1   : > { %v1216_v37 = vmax.f32 %v802_v32, 0.0 }
  0xf2   : > { %v12693_v63 = vpop.f32.mrf.mxu0 }
  0xf4   : > { %v12695_v0 = vpop.f32.mrf.mxu0  ;;  %10766 = vmatmul.mubr.bf16.gmra.mxu0 %v12180_v61 }
  0xf5   : > { %10941 = vmatprep.mubr.msk.bf16.mxu0 %vm12555_vm0, %v17351_v9  ;;  %v826_v7 = vadd.f32 %v12695_v0, %v12778_v30 }
  0xf6   : > { %v12697_v1 = vpop.f32.mrf.mxu0 }
  0xf7   : > { %v818_v47 = vadd.f32 %v12778_v30, %v12697_v1  ;;  %v1222_v22 = vmax.f32 %v826_v7, 0.0 }
  0xf8   : > { %v12699_v2 = vpop.f32.mrf.mxu0 }
  0xf9   : > { %v1220_v52 = vmax.f32 %v818_v47, 0.0 }
  0xfa   : > { %v12701_v3 = vpop.f32.mrf.mxu0 }
  0xfc   : > { %v12703_v4 = vpop.f32.mrf.mxu0 }
  0xfd   : > { %v842_v33 = vadd.f32 %v12703_v4, %v12778_v30 }
  0xfe   : > { %v12705_v5 = vpop.f32.mrf.mxu0 }
  0xff   : > { %v834_v61 = vadd.f32 %v12778_v30, %v12705_v5  ;;  %v1226_v42 = vmax.f32 %v842_v33, 0.0 }
 0x100   : > { %v12707_v6 = vpop.f32.mrf.mxu0 }
 0x101   : > { %v1224_v14 = vmax.f32 %v834_v61, 0.0 }
 0x102   : > { %v12712_v8 = vpop.f32.mrf.mxu0 }
 0x103   : > { %v837_v9 = vadd.f32 %v12778_v30, %v12712_v8 }
 0x104   : > { %v12719_v11 = vpop.f32.mrf.mxu0 }
 0x106   : > { %v12725_v13 = vpop.f32.mrf.mxu0 }
 0x107   : > { %v850_v29 = vadd.f32 %v12778_v30, %v12725_v13 }
 0x108   : > { %v12731_v15 = vpop.f32.mrf.mxu0 }
 0x10a   : > { %v12737_v17 = vpop.f32.mrf.mxu0 }
 0x10c   : > { %v12743_v19 = vpop.f32.mrf.mxu0 }
 0x10e   : > { %v12749_v21 = vpop.f32.mrf.mxu0 }
 0x110   : > { %v12755_v23 = vpop.f32.mrf.mxu0 }
 0x112   : > { %v12758_v24 = vpop.f32.mrf.mxu0 }
 0x114   : > { %v12764_v26 = vpop.f32.mrf.mxu0 }
 0x116   : > { %v12770_v28 = vpop.f32.mrf.mxu0 }
 0x118   : > { %v12781_v31 = vpop.f32.mrf.mxu0 }
 0x11a   : > { %v12788_v34 = vpop.f32.mrf.mxu0 }
 0x11c   : > { %v10691_v36 = vpop.f32.mrf.mxu0 }
 0x11d   : > { %v906_v38 = vadd.f32 %v10691_v36, %v12778_v30 }
 0x11e   : > { %v12798_v40 = vpop.f32.mrf.mxu0 }
 0x11f   : > { %v1242_v41 = vmax.f32 %v906_v38, 0.0 }
 0x120   : > { %v12804_v43 = vpop.f32.mrf.mxu0 }
 0x121   : > { %v12807_v44 = vmax.f32 %v1216_v37, %v1242_v41  ;;  %v1228_v37 = vmax.f32 %v850_v29, 0.0 }
 0x122   : > { %v12812_v46 = vpop.f32.mrf.mxu0 }
 0x124   : > { %v10695_v48 = vpop.f32.mrf.mxu0 }
 0x125   : > { %v922_v50 = vadd.f32 %v10695_v48, %v12778_v30  ;;  %v866_v48 = vadd.f32 %v12778_v30, %v12749_v21 }
 0x126   : > { %v913_v51 = vpop.f32.mrf.mxu0 }
 0x127   : > { %v1246_v53 = vmax.f32 %v922_v50, 0.0  ;;  %v914_v54 = vadd.f32 %v12778_v30, %v913_v51  ;;  %v858_v50 = vadd.f32 %v12719_v11, %v12778_v30 }
 0x128   : > { %v12826_v55 = vpop.f32.mrf.mxu0 }
 0x129   : > { %v12828_v57 = vmax.f32 %v1220_v52, %v1246_v53  ;;  %v1244_v58 = vmax.f32 %v914_v54, 0.0  ;;  %v1232_v53 = vmax.f32 %v866_v48, 0.0  ;;  %v1230_v61 = vmax.f32 %v858_v50, 0.0 }
 0x12a   : > { %v12830_v60 = vpop.f32.mrf.mxu0  ;;  %v925_v8 = vadd.f32 %v12826_v55, %v12778_v30  ;;  %v869_v55 = vadd.f32 %v12778_v30, %v12758_v24 }
 0x12b   : > { %17457 = vst [vmem:[#allocation2_spill] sm:$0xff] %v12828_v57  ;;  %v12834_v1 = vmax.f32 %v1218_v56, %v1244_v58 }
 0x12c   : > { %v10699_v59 = vpop.f32.mrf.mxu0 }
 0x12d   : > { %v938_v10 = vadd.f32 %v10699_v59, %v12778_v30 }
 0x12e   : > { %v929_v12 = vpop.f32.mrf.mxu0 }
 0x12f   : > { %v1250_v16 = vmax.f32 %v938_v10, 0.0  ;;  %v930_v18 = vadd.f32 %v12778_v30, %v929_v12  ;;  %v882_v10 = vadd.f32 %v12778_v30, %v12770_v28 }
 0x130   : > { %v12840_v20 = vpop.f32.mrf.mxu0 }
 0x131   : > { %v12842_v25 = vmax.f32 %v1224_v14, %v1250_v16  ;;  %v1248_v27 = vmax.f32 %v930_v18, 0.0  ;;  %v874_v14 = vadd.f32 %v12743_v19, %v12778_v30 }
 0x132   : > { %v12844_v5 = vpop.f32.mrf.mxu0 }
 0x133   : > { %17458 = vst [vmem:[#allocation3_spill] sm:$0xff] %v12842_v25  ;;  %v12848_v32 = vmax.f32 %v1222_v22, %v1248_v27  ;;  %v1236_v22 = vmax.f32 %v882_v10, 0.0  ;;  %v1234_v33 = vmax.f32 %v874_v14, 0.0 }
 0x134   : > { %v10703_v0 = vpop.f32.mrf.mxu0 }
 0x135   : > { %17459 = vst [vmem:[#allocation4_spill] sm:$0xff] %v12848_v32  ;;  %v954_v35 = vadd.f32 %v10703_v0, %v12778_v30 }
 0x136   : > { %v945_v36 = vpop.f32.mrf.mxu0 }
 0x137   : > { %v1254_v38 = vmax.f32 %v954_v35, 0.0  ;;  %v946_v39 = vadd.f32 %v12778_v30, %v945_v36 }
 0x138   : > { %v12854_v41 = vpop.f32.mrf.mxu0 }
 0x139   : > { %v12856_v45 = vmax.f32 %v1228_v37, %v1254_v38  ;;  %v1252_v47 = vmax.f32 %v946_v39, 0.0  ;;  %v898_v37 = vadd.f32 %v12778_v30, %v12798_v40  ;;  %v890_v39 = vadd.f32 %v12764_v26, %v12778_v30 }
 0x13a   : > { %v12858_v13 = vpop.f32.mrf.mxu0 }
 0x13b   : > { %17460 = vst [vmem:[#allocation5_spill] sm:$0xff] %v12856_v45  ;;  %v12862_v49 = vmax.f32 %v1226_v42, %v1252_v47  ;;  %v1240_v48 = vmax.f32 %v898_v37, 0.0  ;;  %v949_v24 = vadd.f32 %v12778_v30, %v12858_v13 }
 0x13c   : > { %v10707_v4 = vpop.f32.mrf.mxu0 }
 0x13d   : > { %17461 = vst [vmem:[#allocation6_spill] sm:$0xff] %v12862_v49  ;;  %v970_v51 = vadd.f32 %v10707_v4, %v12778_v30 }
 0x13e   : > { %v961_v52 = vpop.f32.mrf.mxu0 }
 0x13f   : > { %v1258_v54 = vmax.f32 %v970_v51, 0.0  ;;  %v962_v56 = vadd.f32 %v12778_v30, %v961_v52  ;;  %v1238_v52 = vmax.f32 %v890_v39, 0.0 }
 0x140   : > { %v12868_v58 = vpop.f32.mrf.mxu0 }
 0x141   : > { %v12870_v59 = vmax.f32 %v1232_v53, %v1258_v54  ;;  %v1256_v7 = vmax.f32 %v962_v56, 0.0 }
 0x142   : > { %v12872_v21 = vpop.f32.mrf.mxu0 }
 0x143   : > { %17462 = vst [vmem:[#allocation7_spill] sm:$0xff] %v12870_v59  ;;  %v12876_v12 = vmax.f32 %v1230_v61, %v1256_v7 }
 0x144   : > { %v10711_v11 = vpop.f32.mrf.mxu0 }
 0x145   : > { %17463 = vst [vmem:[#allocation8_spill] sm:$0xff] %v12876_v12  ;;  %v986_v16 = vadd.f32 %v10711_v11, %v12778_v30 }
 0x146   : > { %v977_v18 = vpop.f32.mrf.mxu0 }
 0x147   : > { %v1262_v27 = vmax.f32 %v986_v16, 0.0  ;;  %v978_v29 = vadd.f32 %v12778_v30, %v977_v18 }
 0x148   : > { %v12882_v0 = vpop.f32.mrf.mxu0 }
 0x149   : > { %v12884_v35 = vmax.f32 %v1236_v22, %v1262_v27  ;;  %v1260_v36 = vmax.f32 %v978_v29, 0.0 }
 0x14a   : > { %v12886_v28 = vpop.f32.mrf.mxu0 }
 0x14b   : > { %17464 = vst [vmem:[#allocation9_spill] sm:$0xff] %v12884_v35  ;;  %v12890_v38 = vmax.f32 %v1234_v33, %v1260_v36  ;;  %v941_v35 = vadd.f32 %v12840_v20, %v12778_v30  ;;  %v885_v20 = vadd.f32 %v12778_v30, %v12788_v34  ;;  %v965_v34 = vadd.f32 %v12778_v30, %v12872_v21 }
 0x14c   : > { %v10715_v19 = vpop.f32.mrf.mxu0 }
 0x14d   : > { %17465 = vst [vmem:[#allocation10_spill] sm:$0xff] %v12890_v38  ;;  %v1002_v42 = vadd.f32 %v10715_v19, %v12778_v30  ;;  %v1251_v49 = vmax.f32 %v941_v35, 0.0  ;;  %v13006_v35 = vadd.f32 %v12781_v31, %v12778_v30  ;;  %v1237_v45 = vmax.f32 %v885_v20, 0.0 }
 0x14e   : > { %v993_v47 = vpop.f32.mrf.mxu0 }
 0x14f   : > { %v1266_v4 = vmax.f32 %v1002_v42, 0.0  ;;  %v994_v50 = vadd.f32 %v12778_v30, %v993_v47  ;;  %v813_v47 = vadd.f32 %v12691_v62, %v12778_v30  ;;  %v12956_v62 = vadd.f32 %v12731_v15, %v12778_v30  ;;  %17470 = vst [vmem:[#allocation15_spill] sm:$0xff] %v13006_v35 }
 0x150   : > { %v12896_v51 = vpop.f32.mrf.mxu0  ;;  %v917_v15 = vadd.f32 %v12778_v30, %v12830_v60  ;;  %v933_v60 = vadd.f32 %v12778_v30, %v12844_v5  ;;  %v973_v5 = vadd.f32 %v12868_v58, %v12778_v30 }
 0x151   : > { %v12898_v53 = vmax.f32 %v1240_v48, %v1266_v4  ;;  %v1264_v54 = vmax.f32 %v994_v50, 0.0  ;;  %v805_v48 = vadd.f32 %v12778_v30, %v12693_v63  ;;  %v829_v50 = vadd.f32 %v12699_v2, %v12778_v30 }
 0x152   : > { %v12900_v40 = vpop.f32.mrf.mxu0  ;;  %v1219_v2 = vmax.f32 %v813_v47, 0.0  ;;  %v1225_v47 = vmax.f32 %v837_v9, 0.0  ;;  %v12986_v9 = vadd.f32 %v12778_v30, %v12812_v46  ;;  %v989_v46 = vadd.f32 %v12882_v0, %v12778_v30 }
 0x153   : > { %17466 = vst [vmem:[#allocation11_spill] sm:$0xff] %v12898_v53  ;;  %v12902_v56 = vmax.f32 %v1238_v52, %v1264_v54  ;;  %v821_v52 = vadd.f32 %v12778_v30, %v12701_v3  ;;  %v12950_v54 = vadd.f32 %v12707_v6, %v12778_v30  ;;  %v1217_v53 = vmax.f32 %v805_v48, 0.0 }
 0x154   : > { %v12904_v61 = vpop.f32.mrf.mxu0  ;;  %v909_v3 = vadd.f32 %v12804_v43, %v12778_v30  ;;  %v1223_v6 = vmax.f32 %v829_v50, 0.0  ;;  %v1231_v48 = vmax.f32 %v12956_v62, 0.0  ;;  %v877_v50 = vadd.f32 %v12755_v23, %v12778_v30 }
 0x155   : > { %17467 = vst [vmem:[#allocation12_spill] sm:$0xff] %v12902_v56  ;;  %v853_v56 = vadd.f32 %v12778_v30, %v12737_v17  ;;  %v1221_v12 = vmax.f32 %v821_v52, 0.0  ;;  %v1227_v17 = vmax.f32 %v12950_v54, 0.0  ;;  %v1247_v23 = vmax.f32 %v925_v8, 0.0 }
 0x156   : > { %v12906_v26 = vpop.f32.mrf.mxu0  ;;  %v1243_v52 = vmax.f32 %v909_v3, 0.0  ;;  %v1245_v62 = vmax.f32 %v917_v15, 0.0  ;;  %v1235_v8 = vmax.f32 %v877_v50, 0.0  ;;  %v1233_v15 = vmax.f32 %v869_v55, 0.0 }
 0x157   : > { %v1229_v43 = vmax.f32 %v853_v56, 0.0  ;;  %v957_v56 = vadd.f32 %v12854_v41, %v12778_v30  ;;  %v981_v41 = vadd.f32 %v12778_v30, %v12886_v28  ;;  %v1249_v13 = vmax.f32 %v933_v60, 0.0 }
 0x158   : > { %v12908_v7 = vpop.f32.mrf.mxu0  ;;  %v1321_v58 = vmax.f32 %v1217_v53, %v1243_v52  ;;  %v13011_v0 = vmax.f32 %v1221_v12, %v1247_v23  ;;  %v13013_v25 = vmax.f32 %v1219_v2, %v1245_v62  ;;  %v13015_v28 = vmax.f32 %v1225_v47, %v1251_v49 }
 0x159   : > { %v1255_v21 = vmax.f32 %v957_v56, 0.0  ;;  %v1253_v50 = vmax.f32 %v949_v24, 0.0  ;;  %v1259_v55 = vmax.f32 %v973_v5, 0.0  ;;  %v1263_v57 = vmax.f32 %v989_v46, 0.0 }
 0x15a   : > { %v12910_v10 = vpop.f32.mrf.mxu0  ;;  %v1261_v31 = vmax.f32 %v981_v41, 0.0  ;;  %v13017_v60 = vmax.f32 %v1223_v6, %v1249_v13  ;;  %v13021_v53 = vadd.f32 %v12896_v51, %v12778_v30  ;;  %v1010_v12 = vadd.f32 %v12778_v30, %v12906_v26 }
 0x15b   : > { %v13026_v20 = vmax.f32 %v1229_v43, %v1255_v21  ;;  %v13030_v49 = vadd.f32 %v12778_v30, %v12900_v40  ;;  %v1018_v47 = vadd.f32 %v12904_v61, %v12778_v30  ;;  %v13036_v6 = vadd.f32 %v12908_v7, %v12778_v30 }
 0x15c   : > { %v12912_v11 = vpop.f32.mrf.mxu0  ;;  %v13040_v52 = vmax.f32 %v1227_v17, %v1253_v50  ;;  %v1013_v26 = vadd.f32 %v12778_v30, %v12910_v10  ;;  %v13048_v56 = vmax.f32 %v1233_v15, %v1259_v55  ;;  %v13052_v61 = vmax.f32 %v1237_v45, %v1263_v57 }
 0x15d   : > { %v13046_v43 = vadd.f32 %v12912_v11, %v12778_v30  ;;  %v13054_v7 = vmax.f32 %v1235_v8, %v1261_v31  ;;  %v1268_v24 = vmax.f32 %v1010_v12, 0.0  ;;  %v1271_v46 = vmax.f32 %v13036_v6, 0.0 }
 0x15e   : > { %v12914_v14 = vpop.f32.mrf.mxu0 }
 0x15f   : > { %v1026_v10 = vadd.f32 %v12778_v30, %v12914_v14  ;;  %v1274_v41 = vmax.f32 %v13046_v43, 0.0 }
 0x160   : > { %v12916_v16 = vpop.f32.mrf.mxu0 }
 0x161   : > { %v13064_v57 = vadd.f32 %v12916_v16, %v12778_v30  ;;  %v1272_v21 = vmax.f32 %v1026_v10, 0.0 }
 0x162   : > { %v12918_v18 = vpop.f32.mrf.mxu0 }
 0x163   : > { %v1029_v14 = vadd.f32 %v12778_v30, %v12918_v18 }
 0x164   : > { %v12920_v22 = vpop.f32.mrf.mxu0 }
 0x165   : > { %v13073_v15 = vadd.f32 %v12920_v22, %v12778_v30  ;;  %v1275_v22 = vmax.f32 %v13064_v57, 0.0 }
 0x166   : > { %v12922_v27 = vpop.f32.mrf.mxu0 }
 0x168   : > { %v12924_v29 = vpop.f32.mrf.mxu0 }
 0x169   : > { %v13081_v16 = vadd.f32 %v12924_v29, %v12778_v30 }
 0x16a   : > { %v12926_v33 = vpop.f32.mrf.mxu0 }
 0x16b   : > { %v13085_v50 = vadd.f32 %v12778_v30, %v12926_v33 }
 0x16c   : > { %v12928_v36 = vpop.f32.mrf.mxu0 }
 0x16d   : > { %v13091_v31 = vadd.f32 %v12928_v36, %v12778_v30 }
 0x16e   : > { %v12930_v37 = vpop.f32.mrf.mxu0 }
 0x170   : > { %v12932_v19 = vpop.f32.mrf.mxu0 }
 0x171   : > { %v13099_v29 = vadd.f32 %v12932_v19, %v12778_v30 }
 0x172   : > { %v12934_v39 = vpop.f32.mrf.mxu0 }
 0x174   : > { %v12936_v42 = vpop.f32.mrf.mxu0 }
 0x176   : > { %v12942_v4 = vpop.f32.mrf.mxu0 }
 0x178   : > { %v12958_v63 = vpop.f32.mrf.mxu0 }
 0x17a   : > { %v12964_v38 = vpop.f32.mrf.mxu0 }
 0x17c   : > { %v12974_v59 = vpop.f32.mrf.mxu0 }
 0x17e   : > { %v12990_v54 = vpop.f32.mrf.mxu0 }
 0x17f   : > { %17468 = vst [vmem:[#allocation13_spill] sm:$0xff] %v12990_v54 }
 0x180   : > { %v13002_v3 = vpop.f32.mrf.mxu0 }
 0x181   : > { %17469 = vst [vmem:[#allocation14_spill] sm:$0xff] %v13002_v3  ;;  %v1257_v3 = vmax.f32 %v965_v34, 0.0  ;;  %v1270_v34 = vmax.f32 %v1018_v47, 0.0 }
 0x182   : > { %v13009_v54 = vpop.f32.mrf.mxu0 }
 0x183   : > { %v13050_v23 = vmax.f32 %v1231_v48, %v1257_v3  ;;  %v1269_v48 = vmax.f32 %v1013_v26, 0.0  ;;  %v1273_v26 = vmax.f32 %v1029_v14, 0.0  ;;  %v13115_v14 = vadd.f32 %v12778_v30, %v12934_v39 }
 0x184   : > { %v10743_v35 = vpop.f32.mrf.mxu0 }
 0x185   : > { %v1114_v2 = vadd.f32 %v10743_v35, %v12778_v30  ;;  %v13077_v35 = vadd.f32 %v12778_v30, %v12922_v27  ;;  %v13095_v27 = vadd.f32 %v12778_v30, %v12930_v37 }
 0x186   : > { %v13038_v51 = vpop.f32.mrf.mxu0 }
 0x187   : > { %v1294_v40 = vmax.f32 %v1114_v2, 0.0  ;;  %v1276_v36 = vmax.f32 %v13077_v35, 0.0 }
 0x188   : > { %v10744_v62 = vpop.f32.mrf.mxu0 }
 0x189   : > { %v1117_v5 = vadd.f32 %v10744_v62, %v12778_v30  ;;  %v1346_v3 = vmax.f32 %v1268_v24, %v1294_v40  ;;  %v1278_v40 = vmax.f32 %v13073_v15, 0.0  ;;  %v1277_v24 = vmax.f32 %v13085_v50, 0.0 }
 0x18a   : > { %v13066_v45 = vpop.f32.mrf.mxu0 }
 0x18b   : > { %v1295_v8 = vmax.f32 %v1117_v5, 0.0  ;;  %v1372_v33 = vmax.f32 %v12807_v44, %v1346_v3 }
 0x18c   : > { %v10747_v13 = vpop.f32.mrf.mxu0 }
 0x18d   : > { %v1347_v55 = vmax.f32 %v1269_v48, %v1295_v8  ;;  %v1130_v18 = vadd.f32 %v10747_v13, %v12778_v30 }
 0x18e   : > { %v1121_v12 = vpop.f32.mrf.mxu0 }
 0x18f   : > { %v1373_v2 = vmax.f32 %v1321_v58, %v1347_v55  ;;  %v1298_v47 = vmax.f32 %v1130_v18, 0.0  ;;  %v1122_v6 = vadd.f32 %v12778_v30, %v1121_v12  ;;  %v1280_v58 = vmax.f32 %v13095_v27, 0.0 }
 0x190   : > { %v10748_v37 = vpop.f32.mrf.mxu0  ;;  %v13120_v18 = vadd.f32 %v12936_v42, %v12778_v30  ;;  %v13124_v12 = vadd.f32 %v12778_v30, %v12942_v4  ;;  %v13136_v42 = vadd.f32 %v12778_v30, %v12964_v38  ;;  %v13140_v4 = vadd.f32 %v12974_v59, %v12778_v30  ;;  %v17474_v38 = vld [vmem:[#allocation3_spill] sm:$0xff] }
 0x191   : > { %v13107_v10 = vpack.c.bf16 %v1373_v2, %v1372_v33  ;;  %v1296_v19 = vmax.f32 %v1122_v6, 0.0  ;;  %v1133_v5 = vadd.f32 %v10748_v37, %v12778_v30  ;;  %v1350_v3 = vmax.f32 %v1272_v21, %v1298_v47 }
 0x192   : > { %v1124_v8 = vpop.f32.mrf.mxu0 }
 0x193   : > { %v1348_v35 = vmax.f32 %v1270_v34, %v1296_v19  ;;  %v1299_v13 = vmax.f32 %v1133_v5, 0.0  ;;  %v1125_v55 = vadd.f32 %v12778_v30, %v1124_v8  ;;  %v1443_v21 = vshrl.u32 %v13107_v10, 16  ;;  %v17471_v5 = vld [vmem:[#allocation2_spill] sm:$0xff] }
 0x194   : > { %v10751_v33 = vpop.f32.mrf.mxu0  ;;  %v1445_v47 = vshll.u32 %v13107_v10, 16  ;;  %v13132_v19 = vadd.f32 %v12958_v63, %v12778_v30  ;;  %v1376_v8 = vmax.f32 %v17471_v5, %v1350_v3  ;;  %v1281_v63 = vmax.f32 %v13115_v14, 0.0 }
 0x195   : > { %v1374_v39 = vmax.f32 %v12834_v1, %v1348_v35  ;;  %v1351_v6 = vmax.f32 %v1273_v26, %v1299_v13  ;;  %v1297_v34 = vmax.f32 %v1125_v55, 0.0  ;;  %v1146_v37 = vadd.f32 %v10751_v33, %v12778_v30 }
 0x196   : > { %v1137_v11 = vpop.f32.mrf.mxu0  ;;  %v1447_v3 = vrot.slane %v1445_v47, 1  ;;  %v13152_v5 = vrot.slane %v1443_v21, 1 }
 0x197   : > { %v13143_v1 = vpack.c.bf16 %v1374_v39, %v1373_v2  ;;  %v1377_v26 = vmax.f32 %v13011_v0, %v1351_v6  ;;  %v1349_v35 = vmax.f32 %v1271_v46, %v1297_v34  ;;  %v1302_v13 = vmax.f32 %v1146_v37, 0.0 }
 0x198   : > { %v1138_v33 = vadd.f32 %v12778_v30, %v1137_v11  ;;  %v10752_v59 = vpop.f32.mrf.mxu0  ;;  %v13154_v2 = vrot.slane %v1445_v47, 2  ;;  %v1448_v62 = vor.u32 %v1447_v3, %v1443_v21  ;;  %v12197_v21 = vld [vmem:[%s17345_s2 + $0x38] sm:$0xff]  }
 0x199   : > { %v13150_v32 = vpack.c.bf16 %v1377_v26, %v1376_v8  ;;  %v1375_v0 = vmax.f32 %v13013_v25, %v1349_v35  ;;  %v1354_v46 = vmax.f32 %v1276_v36, %v1302_v13  ;;  %v1149_v34 = vadd.f32 %v10752_v59, %v12778_v30  ;;  %v17475_v13 = vld [vmem:[#allocation13_spill] sm:$0xff] }
 0x19a   : > { %v1300_v6 = vmax.f32 %v1138_v33, 0.0  ;;  %v1140_v37 = vpop.f32.mrf.mxu0  ;;  %v13171_v33 = vadd.f32 %v12778_v30, %v17475_v13 }
 0x19b   : > { %17472 = vst [vmem:[#allocation2_spill] sm:$0xff] %v13150_v32  ;;  %v1141_v48 = vadd.f32 %v12778_v30, %v1140_v37  ;;  %v13162_v44 = vpack.c.bf16 %v1375_v0, %v1374_v39  ;;  %v13164_v47 = vpack.c.bf16 %v1376_v8, %v1375_v0  ;;  %v1380_v25 = vmax.f32 %v17474_v38, %v1354_v46  ;;  %v17476_v37 = vld [vmem:[#allocation4_spill] sm:$0xff] }
 0x19c   : > { %v1352_v36 = vmax.f32 %v1274_v41, %v1300_v6  ;;  %v10755_v35 = vpop.f32.mrf.mxu0  ;;  %v1303_v59 = vmax.f32 %v1149_v34, 0.0  ;;  %v2080_v38 = vor.u32 %v13154_v2, %v13152_v5  ;;  %v1462_v15 = vshrl.u32 %v13150_v32, 16 }
 0x19d   : > { %17473 = vst [vmem:[#allocation16_spill] sm:$0xff] %v13164_v47  ;;  %v1301_v17 = vmax.f32 %v1141_v48, 0.0  ;;  %v1162_v11 = vadd.f32 %v10755_v35, %v12778_v30  ;;  %v1450_v8 = vshll.u32 %v13162_v44, 16  ;;  %v1454_v3 = vshrl.u32 %v13162_v44, 16 }
 0x19e   : > { %v1378_v55 = vmax.f32 %v17476_v37, %v1352_v36  ;;  %v1153_v39 = vpop.f32.mrf.mxu0  ;;  %v1355_v43 = vmax.f32 %v1277_v24, %v1303_v59  ;;  %v2085_v14 = vrot.slane %v1462_v15, 1 }
 0x19f   : > { %v1353_v41 = vmax.f32 %v1275_v22, %v1301_v17  ;;  %v1306_v0 = vmax.f32 %v1162_v11, 0.0  ;;  %v1154_v48 = vadd.f32 %v12778_v30, %v1153_v39  ;;  %v1452_v34 = vrot.slane %v1450_v8, 1 }
 0x1a0   : > { %v13183_v46 = vpack.c.bf16 %v1378_v55, %v1377_v26  ;;  %v10756_v6 = vpop.f32.mrf.mxu0  ;;  %v2082_v36 = vrot.slane %v1450_v8, 2  ;;  %v1381_v50 = vmax.f32 %v13015_v28, %v1355_v43  ;;  %v2081_v2 = vrot.slane %v1454_v3, 1  ;;  %v17481_v28 = vld [vmem:[#allocation5_spill] sm:$0xff] }
 0x1a1   : > { %v1379_v24 = vmax.f32 %v13017_v60, %v1353_v41  ;;  %v1358_v17 = vmax.f32 %v1280_v58, %v1306_v0  ;;  %v1304_v57 = vmax.f32 %v1154_v48, 0.0  ;;  %v1165_v22 = vadd.f32 %v10756_v6, %v12778_v30  ;;  %v17483_v0 = vld [vmem:[#allocation6_spill] sm:$0xff] }
 0x1a2   : > { %17477 = vst [vmem:[#allocation3_spill] sm:$0xff] %v13183_v46  ;;  %v1156_v26 = vpop.f32.mrf.mxu0  ;;  %v1453_v5 = vsel %vm1441_vm1, %v1448_v62, %v1452_v34  ;;  %v1458_v11 = vshll.u32 %v13150_v32, 16  ;;  %v13196_v35 = vpack.c.bf16 %v1381_v50, %v1380_v25  ;;  %v2083_v39 = vor.u32 %v2082_v36, %v2081_v2 }
 0x1a3   : > { %v13198_v13 = vpack.c.bf16 %v1379_v24, %v1378_v55  ;;  %v13200_v59 = vpack.c.bf16 %v1380_v25, %v1379_v24  ;;  %v1384_v60 = vmax.f32 %v17481_v28, %v1358_v17  ;;  %10786 = vmatmul.mubr.bf16.vlgmr.msra.gmra.mxu1 %v1453_v5  ;;  %v1356_v27 = vmax.f32 %v1278_v40, %v1304_v57  ;;  %v12198_v55 = vld [vmem:[%s17345_s2 + $0x30] sm:$0xff]   ;;  %v12202_v40 = vld [vmem:[%s17345_s2 + $0x178] sm:$0xff]  }
 0x1a4   : > { %17478 = vst [vmem:[#allocation13_spill] sm:$0xff] %v13196_v35  ;;  %v1307_v58 = vmax.f32 %v1165_v22, 0.0  ;;  %v1157_v37 = vadd.f32 %v12778_v30, %v1156_v26  ;;  %10822 = vmatpush3.bf16.msra.mxu1 %v12197_v21  ;;  %v10759_v62 = vpop.f32.mrf.mxu0  ;;  %v17482_v8 = vmov 0.0   ;;  %v1288_v25 = vmax.f32 %v13171_v33, 0.0 }
 0x1a5   : > { %17479 = vst [vmem:[#allocation4_spill] sm:$0xff] %v13198_v13  ;;  %17480 = vst [vmem:[#allocation17_spill] sm:$0xff] %v13200_v59  ;;  %10789 = vmatprep.mubr.msk.bf16.mxu1 %vm12555_vm0, %v17482_v8  ;;  %v1178_v43 = vadd.f32 %v10759_v62, %v12778_v30  ;;  %v1456_v41 = vor.u32 %v1454_v3, %v1452_v34  ;;  %10823 = vmatprep.subr.bf16.mxu1 %v17482_v8  ;;  %v1460_v3 = vrot.slane %v1458_v11, 1 }
 0x1a6   : > { %v1382_v48 = vmax.f32 %v17483_v0, %v1356_v27  ;;  %v1359_v6 = vmax.f32 %v1281_v63, %v1307_v58  ;;  %v1305_v36 = vmax.f32 %v1157_v37, 0.0  ;;  %v2084_v21 = vsel %vm2077_vm2, %v2080_v38, %v2083_v39  ;;  %v1169_v24 = vpop.f32.mrf.mxu0 }
 0x1a7   : > { %v1310_v17 = vmax.f32 %v1178_v43, 0.0  ;;  %10942 = vmatmul.mubr.bf16.vlgmr.msra.gmra.mxu0 %v2084_v21  ;;  %v1170_v34 = vadd.f32 %v12778_v30, %v1169_v24  ;;  %v2086_v57 = vrot.slane %v1458_v11, 2  ;;  %v17485_v5 = vmax.f32 %v13081_v16, 0.0  ;;  %v12204_v16 = vld [vmem:[%s17345_s2 + $0x170] sm:$0xff]   ;;  %v17488_v43 = vld [vmem:[#allocation7_spill] sm:$0xff] }
 0x1a8   : > { %v13223_v22 = vpack.c.bf16 %v1382_v48, %v1381_v50  ;;  %v1385_v26 = vmax.f32 %v13026_v20, %v1359_v6  ;;  %v10760_v28 = vpop.f32.mrf.mxu0  ;;  %10824 = vmatpush3.bf16.msra.mxu1 %v12198_v55  ;;  %10945 = vmatprep.mubr.msk.bf16.mxu0 %vm12555_vm0, %v17482_v8  ;;  %v17486_v63 = vmax.f32 %v13124_v12, 0.0  ;;  %v13236_v11 = vsel %vm1441_vm1, %v1456_v41, %v1460_v3  ;;  %v12199_v20 = vld [vmem:[%s17345_s2 + $0x28] sm:$0xff]  }
 0x1a9   : > { %v1357_v2 = vmax.f32 %v17485_v5, %v1305_v36  ;;  %v1308_v27 = vmax.f32 %v1170_v34, 0.0  ;;  %v1181_v50 = vadd.f32 %v10760_v28, %v12778_v30  ;;  %10825 = vmatprep.subr.bf16.mxu1 %v17482_v8  ;;  %11030 = vmatpush3.bf16.msra.mxu0 %v12202_v40  ;;  %v1466_v62 = vshll.u32 %v13198_v13, 16 }
 0x1aa   : > { %17484 = vst [vmem:[#allocation5_spill] sm:$0xff] %v13223_v22  ;;  %v1362_v38 = vmax.f32 %v17486_v63, %v1310_v17  ;;  %v13245_v58 = vpack.c.bf16 %v1385_v26, %v1384_v60  ;;  %v1172_v37 = vpop.f32.mrf.mxu0  ;;  %v1470_v55 = vshrl.u32 %v13198_v13, 16  ;;  %11031 = vmatprep.subr.bf16.mxu0 %v17482_v8  ;;  %v17489_v0 = vmax.f32 %v13091_v31, 0.0  ;;  %v17492_v31 = vld [vmem:[#allocation8_spill] sm:$0xff] }
 0x1ab   : > { %v1383_v12 = vmax.f32 %v13040_v52, %v1357_v2  ;;  %v1311_v6 = vmax.f32 %v1181_v50, 0.0  ;;  %v1173_v36 = vadd.f32 %v12778_v30, %v1172_v37  ;;  %10790 = vmatmul.mubr.bf16.gmra.mxu1 %v13236_v11  ;;  %v1093_v52 = vadd.f32 %v12778_v30, %v13009_v54  ;;  %v13272_v30 = vld [vmem:[%s17349_s6] ss:$0 sm:$0xff] }
 0x1ac   : > { %17487 = vst [vmem:[#allocation6_spill] sm:$0xff] %v13245_v58  ;;  %v1388_v41 = vmax.f32 %v17488_v43, %v1362_v38  ;;  %v1360_v40 = vmax.f32 %v17489_v0, %v1308_v27  ;;  %v10763_v17 = vpop.f32.mrf.mxu0  ;;  %v13262_v34 = vor.u32 %v2086_v57, %v2085_v14  ;;  %10793 = vmatprep.mubr.msk.bf16.mxu1 %vm12555_vm0, %v17482_v8  ;;  %v17493_v2 = vmax.f32 %v13136_v42, 0.0  ;;  %v12205_v27 = vld [vmem:[%s17345_s2 + $0x168] sm:$0xff]  }
 0x1ad   : > { %v13258_v21 = vpack.c.bf16 %v1383_v12, %v1382_v48  ;;  %v13260_v24 = vpack.c.bf16 %v1384_v60, %v1383_v12  ;;  %v1309_v63 = vmax.f32 %v1173_v36, 0.0  ;;  %v1194_v54 = vadd.f32 %v13272_v30, %v10763_v17  ;;  %10826 = vmatpush3.bf16.msra.mxu1 %v12199_v20  ;;  %v12200_v60 = vld [vmem:[%s17345_s2 + $0x20] sm:$0xff]   ;;  %11032 = vmatpush3.bf16.msra.mxu0 %v12204_v16 }
 0x1ae   : > { %v1386_v5 = vmax.f32 %v17492_v31, %v1360_v40  ;;  %v1363_v28 = vmax.f32 %v17493_v2, %v1311_v6  ;;  %v2088_v48 = vsel %vm2077_vm2, %v2083_v39, %v13262_v34  ;;  %v1185_v57 = vpop.f32.mrf.mxu0  ;;  %v1468_v42 = vrot.slane %v1466_v62, 1  ;;  %10827 = vmatprep.subr.bf16.mxu1 %v17482_v8  ;;  %11033 = vmatprep.subr.bf16.mxu0 %v17482_v8  ;;  %v17500_v31 = vld [vmem:[#allocation9_spill] sm:$0xff] }
 0x1af   : > { %17490 = vst [vmem:[#allocation7_spill] sm:$0xff] %v13258_v21  ;;  %17491 = vst [vmem:[#allocation18_spill] sm:$0xff] %v13260_v24  ;;  %v2089_v14 = vrot.slane %v1470_v55, 1  ;;  %v2090_v38 = vrot.slane %v1466_v62, 2  ;;  %v17495_v39 = vmax.f32 %v13099_v29, 0.0  ;;  %v1314_v12 = vmax.f32 %v1194_v54, 0.0  ;;  %10946 = vmatmul.mubr.bf16.gmra.mxu0 %v2088_v48 }
 0x1b0   : > { %v13287_v50 = vpack.c.bf16 %v1386_v5, %v1385_v26  ;;  %v1389_v20 = vmax.f32 %v13048_v56, %v1363_v28  ;;  %v1289_v37 = vmax.f32 %v1093_v52, 0.0  ;;  %v1106_v62 = vadd.f32 %v13272_v30, %v13038_v51  ;;  %v10764_v0 = vpop.f32.mrf.mxu0  ;;  %10949 = vmatprep.mubr.msk.bf16.mxu0 %vm12555_vm0, %v17482_v8  ;;  %v12201_v51 = vld [vmem:[%s17345_s2 + $0x18] sm:$0xff]  }
 0x1b1   : > { %v1361_v16 = vmax.f32 %v17495_v39, %v1309_v63  ;;  %v1186_v43 = vadd.f32 %v13272_v30, %v1185_v57  ;;  %v1464_v40 = vor.u32 %v1462_v15, %v1460_v3  ;;  %v1366_v29 = vmax.f32 %v1288_v25, %v1314_v12  ;;  %10828 = vmatpush3.bf16.msra.mxu1 %v12200_v60  ;;  %v17502_v63 = vld [vmem:[#allocation14_spill] sm:$0xff] }
 0x1b2   : > { %17494 = vst [vmem:[#allocation8_spill] sm:$0xff] %v13287_v50  ;;  %v13299_v26 = vpack.c.bf16 %v1389_v20, %v1388_v41  ;;  %v1197_v6 = vadd.f32 %v13272_v30, %v10764_v0  ;;  %v1188_v52 = vpop.f32.mrf.mxu0  ;;  %v13311_v3 = vor.u32 %v2090_v38, %v2089_v14  ;;  %v1474_v17 = vshll.u32 %v13196_v35, 16  ;;  %10829 = vmatprep.subr.bf16.mxu1 %v17482_v8 }
 0x1b3   : > { %v1387_v56 = vmax.f32 %v13050_v23, %v1361_v16  ;;  %v1312_v36 = vmax.f32 %v1186_v43, 0.0  ;;  %v13309_v15 = vsel %vm1441_vm1, %v1464_v40, %v1468_v42  ;;  %11034 = vmatpush3.bf16.msra.mxu0 %v12205_v27  ;;  %v12207_v23 = vld [vmem:[%s17345_s2 + $0x160] sm:$0xff]   ;;  %v13323_v2 = vmax.f32 %v17500_v31, %v1366_v29 }
 0x1b4   : > { %17496 = vst [vmem:[#allocation19_spill] sm:$0xff] %v13299_v26  ;;  %17497 = vst [vmem:[#allocation20_spill] sm:$0xff] %v13309_v15  ;;  %v1315_v28 = vmax.f32 %v1197_v6, 0.0  ;;  %10794 = vmatmul.mubr.bf16.gmra.mxu1 %v13309_v15  ;;  %11035 = vmatprep.subr.bf16.mxu0 %v17482_v8  ;;  %v13329_v54 = vadd.f32 %v13272_v30, %v17502_v63  ;;  %v17503_v60 = vmax.f32 %v13120_v18, 0.0  ;;  %v10767_v57 = vpop.f32.mrf.mxu0  ;;  %v1292_v14 = vmax.f32 %v1106_v62, 0.0  ;;  %v12203_v18 = vld [vmem:[%s17345_s2 + $0x10] sm:$0xff]  }
 0x1b5   : > { %v13318_v33 = vpack.c.bf16 %v1387_v56, %v1386_v5  ;;  %v13320_v25 = vpack.c.bf16 %v1388_v41, %v1387_v56  ;;  %17501 = vst [vmem:[#allocation9_spill] sm:$0xff] %v13323_v2  ;;  %v1189_v5 = vadd.f32 %v13272_v30, %v1188_v52  ;;  %10797 = vmatprep.mubr.msk.bf16.mxu1 %vm12555_vm0, %v17482_v8  ;;  %v1478_v41 = vshrl.u32 %v13196_v35, 16  ;;  %v17504_v16 = vld [vmem:[#allocation10_spill] sm:$0xff] }
 0x1b6   : > { %v1364_v48 = vmax.f32 %v17503_v60, %v1312_v36  ;;  %v1109_v38 = vadd.f32 %v13272_v30, %v13066_v45  ;;  %v1367_v27 = vmax.f32 %v1289_v37, %v1315_v28  ;;  %v1210_v39 = vadd.f32 %v13272_v30, %v10767_v57  ;;  %10830 = vmatpush3.bf16.msra.mxu1 %v12201_v51  ;;  %v1201_v62 = vpop.f32.mrf.mxu0  ;;  %v12208_v37 = vld [vmem:[%s17345_s2 + $0x158] sm:$0xff]   ;;  %v17509_v57 = vld [vmem:[#allocation11_spill] sm:$0xff] }
 0x1b7   : > { %17498 = vst [vmem:[#allocation21_spill] sm:$0xff] %v13318_v33  ;;  %17499 = vst [vmem:[#allocation22_spill] sm:$0xff] %v13320_v25  ;;  %v1313_v43 = vmax.f32 %v1189_v5, 0.0  ;;  %v2092_v0 = vsel %vm2077_vm2, %v13262_v34, %v13311_v3  ;;  %v1472_v45 = vor.u32 %v1470_v55, %v1468_v42  ;;  %10831 = vmatprep.subr.bf16.mxu1 %v17482_v8  ;;  %11036 = vmatpush3.bf16.msra.mxu0 %v12207_v23  ;;  %v12210_v5 = vld [vmem:[%s17345_s2 + $0x150] sm:$0xff]  }
 0x1b8   : > { %v13344_v12 = vmax.f32 %v17504_v16, %v1364_v48  ;;  %v13356_v40 = vmax.f32 %v13052_v61, %v1367_v27  ;;  %v1318_v56 = vmax.f32 %v1210_v39, 0.0  ;;  %10950 = vmatmul.mubr.bf16.gmra.mxu0 %v2092_v0  ;;  %v1202_v29 = vadd.f32 %v13272_v30, %v1201_v62  ;;  %11037 = vmatprep.subr.bf16.mxu0 %v17482_v8  ;;  %v10768_v51 = vpop.f32.mrf.mxu0 }
 0x1b9   : > { %v1476_v6 = vrot.slane %v1474_v17, 1  ;;  %v17507_v55 = vmax.f32 %v13132_v19, 0.0  ;;  %10953 = vmatprep.mubr.msk.bf16.mxu0 %vm12555_vm0, %v17482_v8  ;;  %v2093_v61 = vrot.slane %v1478_v41, 1  ;;  %v2094_v36 = vrot.slane %v1474_v17, 2 }
 0x1ba   : > { %17505 = vst [vmem:[#allocation14_spill] sm:$0xff] %v13356_v40  ;;  %v13361_v34 = vpack.c.bf16 %v13344_v12, %v1389_v20  ;;  %v1293_v52 = vmax.f32 %v1109_v38, 0.0  ;;  %v1370_v23 = vmax.f32 %v1292_v14, %v1318_v56  ;;  %v1316_v31 = vmax.f32 %v1202_v29, 0.0  ;;  %10832 = vmatpush3.bf16.msra.mxu1 %v12203_v18  ;;  %v12206_v20 = vld [vmem:[%s17345_s2 + $0x8] sm:$0xff]   ;;  %v1204_v63 = vpop.f32.mrf.mxu0 }
 0x1bb   : > { %v1365_v42 = vmax.f32 %v17507_v55, %v1313_v43  ;;  %v1213_v28 = vadd.f32 %v13272_v30, %v10768_v51  ;;  %v13377_v60 = vsel %vm1441_vm1, %v1472_v45, %v1476_v6  ;;  %v1482_v48 = vshll.u32 %v13258_v21, 16  ;;  %10833 = vmatprep.subr.bf16.mxu1 %v17482_v8  ;;  %11038 = vmatpush3.bf16.msra.mxu0 %v12208_v37  ;;  %v17511_v18 = vld [vmem:[#allocation15_spill] sm:$0xff]  ;;  %v17515_v37 = vld [vmem:[#allocation12_spill] sm:$0xff] }
 0x1bc   : > { %17506 = vst [vmem:[#allocation10_spill] sm:$0xff] %v13361_v34  ;;  %17508 = vst [vmem:[#allocation23_spill] sm:$0xff] %v13377_v60  ;;  %v1486_v17 = vshrl.u32 %v13258_v21, 16  ;;  %v1396_v14 = vmax.f32 %v17509_v57, %v1370_v23  ;;  %v1205_v39 = vadd.f32 %v13272_v30, %v1204_v63  ;;  %10798 = vmatmul.mubr.bf16.gmra.mxu1 %v13377_v60  ;;  %11039 = vmatprep.subr.bf16.mxu0 %v17482_v8  ;;  %v12212_v63 = vld [vmem:[%s17345_s2 + $0x140] sm:$0xff]  }
 0x1bd   : > { %v13374_v19 = vmax.f32 %v13054_v7, %v1365_v42  ;;  %v17510_v7 = vmax.f32 %v13140_v4, 0.0  ;;  %v1319_v27 = vmax.f32 %v1213_v28, 0.0  ;;  %v1239_v16 = vmax.f32 %v17511_v18, 0.0  ;;  %10801 = vmatprep.mubr.msk.bf16.mxu1 %vm12555_vm0, %v17482_v8 }
 0x1be   : > { %v17512_v43 = vmax.f32 %v13021_v53, 0.0  ;;  %v17513_v0 = vmax.f32 %v12986_v9, 0.0  ;;  %v2095_v4 = vor.u32 %v2094_v36, %v2093_v61  ;;  %v1291_v30 = vmax.f32 %v13329_v54, 0.0  ;;  %10834 = vmatpush3.bf16.msra.mxu1 %v12206_v20  ;;  %v12209_v9 = vld [vmem:[%s17345_s2] sm:$0xff]   ;;  %v12211_v54 = vld [vmem:[%s17345_s2 + $0x148] sm:$0xff]  }
 0x1bf   : > { %v13388_v38 = vmax.f32 %v17510_v7, %v1316_v31  ;;  %v13400_v45 = vpack.c.bf16 %v13374_v19, %v13344_v12  ;;  %v1371_v29 = vmax.f32 %v1293_v52, %v1319_v27  ;;  %v1317_v55 = vmax.f32 %v1205_v39, 0.0  ;;  %10835 = vmatprep.subr.bf16.mxu1 %v17482_v8  ;;  %11040 = vmatpush3.bf16.msra.mxu0 %v12210_v5 }
 0x1c0   : > { %v1345_v62 = vmax.f32 %v17513_v0, %v17512_v43  ;;  %v2096_v53 = vsel %vm2077_vm2, %v13311_v3, %v2095_v4  ;;  %v1484_v42 = vrot.slane %v1482_v48, 1  ;;  %v2097_v51 = vrot.slane %v1486_v17, 1  ;;  %11041 = vmatprep.subr.bf16.mxu0 %v17482_v8 }
 0x1c1   : > { %17514 = vst [vmem:[#allocation11_spill] sm:$0xff] %v13400_v45  ;;  %v1394_v56 = vmax.f32 %v17515_v37, %v13388_v38  ;;  %v2098_v61 = vrot.slane %v1482_v48, 2  ;;  %v17516_v36 = vmax.f32 %v13030_v49, 0.0  ;;  %v1369_v31 = vmax.f32 %v1291_v30, %v1317_v55  ;;  %10954 = vmatmul.mubr.bf16.gmra.mxu0 %v2096_v53 }
 0x1c2   : > { %v13418_v23 = vmax.f32 %v1345_v62, %v1371_v29  ;;  %v1480_v3 = vor.u32 %v1478_v41, %v1476_v6  ;;  %10957 = vmatprep.mubr.msk.bf16.mxu0 %vm12555_vm0, %v17482_v8  ;;  %10836 = vmatpush3.bf16.msra.mxu1 %v12209_v9  ;;  %v1490_v41 = vshll.u32 %v13245_v58, 16  ;;  %v1494_v6 = vshrl.u32 %v13245_v58, 16 }
 0x1c3   : > { %v1343_v52 = vmax.f32 %v1239_v16, %v17516_v36  ;;  %v2099_v49 = vor.u32 %v2098_v61, %v2097_v51  ;;  %11042 = vmatpush3.bf16.msra.mxu0 %v12211_v54  ;;  %10873 = vmatprep.subr.bf16.mxu1 %v17482_v8  ;;  %v1488_v57 = vor.u32 %v1486_v17, %v1484_v42  ;;  %v1498_v18 = vshll.u32 %v13318_v33, 16 }
 0x1c4   : > { %v13428_v20 = vsel %vm1441_vm1, %v1480_v3, %v1484_v42  ;;  %11043 = vmatprep.subr.bf16.mxu0 %v17482_v8  ;;  %v1492_v7 = vrot.slane %v1490_v41, 1  ;;  %v2101_v27 = vrot.slane %v1494_v6, 1  ;;  %v2102_v39 = vrot.slane %v1490_v41, 2 }
 0x1c5   : > { %v13425_v28 = vmax.f32 %v1343_v52, %v1369_v31  ;;  %17517 = vst [vmem:[#allocation15_spill] sm:$0xff] %v13428_v20  ;;  %10802 = vmatmul.mubr.bf16.gmra.mxu1 %v13428_v20  ;;  %v2100_v5 = vsel %vm2077_vm2, %v2095_v4, %v2099_v49  ;;  %v1502_v17 = vshrl.u32 %v13318_v33, 16  ;;  %v13460_v0 = vrot.slane %v13361_v34, 3 }
 0x1c6   : > { %10805 = vmatprep.mubr.msk.bf16.mxu1 %vm12555_vm0, %v17482_v8  ;;  %v13453_v16 = vsel %vm1441_vm1, %v1488_v57, %v1492_v7  ;;  %v2103_v43 = vor.u32 %v2102_v39, %v2101_v27  ;;  %v1500_v4 = vrot.slane %v1498_v18, 1  ;;  %v2106_v55 = vrot.slane %v1498_v18, 2 }
 0x1c7   : > { %v13434_v48 = vpack.c.bf16 %v1396_v14, %v13425_v28  ;;  %11044 = vmatpush3.bf16.msra.mxu0 %v12212_v63  ;;  %v13447_v14 = vpack.c.bf16 %v13374_v19, %v13374_v19  ;;  %17519 = vst [vmem:[#allocation24_spill] sm:$0xff] %v13453_v16  ;;  %v2105_v29 = vrot.slane %v1502_v17, 1  ;;  %v1496_v53 = vor.u32 %v1494_v6, %v1492_v7 }
 0x1c8   : > { %11133 = vmatprep.subr.bf16.mxu0 %v17482_v8  ;;  %v2104_v30 = vsel %vm2077_vm2, %v2099_v49, %v2103_v43  ;;  %v1506_v61 = vshll.u32 %v13299_v26, 16  ;;  %v1510_v54 = vshrl.u32 %v13299_v26, 16  ;;  %v13480_v36 = vpack.c.bf16 %v13344_v12, %v13344_v12 }
 0x1c9   : > { %17518 = vst [vmem:[#allocation12_spill] sm:$0xff] %v13434_v48  ;;  %10958 = vmatmul.mubr.bf16.gmra.mxu0 %v2100_v5  ;;  %v2571_v62 = vrot.slane %v13447_v14, 3  ;;  %v13471_v42 = vsel %vm1441_vm1, %v1496_v53, %v1500_v4  ;;  %v2107_v51 = vor.u32 %v2106_v55, %v2105_v29  ;;  %v1504_v31 = vor.u32 %v1502_v17, %v1500_v4  ;;  %v12213_v53 = vld [vmem:[%s17345_s2 + $0xb8] sm:$0xff]  }
 0x1ca   : > { %10961 = vmatprep.mubr.msk.bf16.mxu0 %vm12555_vm0, %v17482_v8  ;;  %17520 = vst [vmem:[#allocation25_spill] sm:$0xff] %v13471_v42  ;;  %v1508_v3 = vrot.slane %v1506_v61, 1  ;;  %v2109_v49 = vrot.slane %v1510_v54, 1  ;;  %v2110_v63 = vrot.slane %v1506_v61, 2  ;;  %v1514_v6 = vshll.u32 %v13480_v36, 16 }
 0x1cb   : > { %v13466_v9 = vsel %vm2553_vm3, %v13460_v0, %v2571_v62  ;;  %v2108_v52 = vsel %vm2077_vm2, %v2103_v43, %v2107_v51  ;;  %v2113_v5 = vshrl.u32 %v13480_v36, 16  ;;  %v13503_v62 = vshrl.u32 %v13361_v34, 16 }
 0x1cc   : > { %v13486_v41 = vsel %vm1441_vm1, %v1504_v31, %v1508_v3  ;;  %v2111_v12 = vor.u32 %v2110_v63, %v2109_v49  ;;  %v1516_v7 = vrot.slane %v1514_v6, 1  ;;  %v2116_v39 = vrot.slane %v1514_v6, 2  ;;  %v12214_v63 = vld [vmem:[%s17345_s2 + $0xb0] sm:$0xff]  }
 0x1cd   : > { %10806 = vmatmul.mubr.bf16.gmra.mxu1 %v13453_v16  ;;  %17521 = vst [vmem:[#allocation26_spill] sm:$0xff] %v13486_v41  ;;  %v2115_v27 = vrot.slane %v2113_v5, 1  ;;  %v13494_v18 = vor.u32 %v1510_v54, %v1508_v3  ;;  %v13507_v4 = vpack.c.bf16 %v13323_v2, %v13374_v19  ;;  %v13511_v29 = vshll.u32 %v13361_v34, 16 }
 0x1ce   : > { %10809 = vmatprep.mubr.msk.bf16.mxu1 %vm12555_vm0, %v17482_v8  ;;  %v2112_v57 = vsel %vm2077_vm2, %v2107_v51, %v2111_v12  ;;  %v13515_v55 = vpack.c.bf16 %v13356_v40, %v13356_v40  ;;  %v2555_v19 = vrot.slane %v13164_v47, 3  ;;  %v2845_v51 = vrot.slane %v13503_v62, 3 }
 0x1cf   : > { %17522 = vst [vmem:[#allocation27_spill] sm:$0xff] %v13494_v18  ;;  %v1517_v17 = vsel %vm1441_vm1, %v13494_v18, %v1516_v7  ;;  %v2117_v43 = vor.u32 %v2116_v39, %v2115_v27  ;;  %17523 = vst [vmem:[#allocation28_spill] sm:$0xff] %v13507_v4  ;;  %v2848_v61 = vrot.slane %v13511_v29, 4  ;;  %v13526_v54 = vshrl.u32 %v13507_v4, 16 }
 0x1d0   : > { %v2855_v31 = vshll.u32 %v13447_v14, 16  ;;  %v13532_v3 = vshll.u32 %v13507_v4, 16  ;;  %v2554_v49 = vrot.slane %v13143_v1, 3  ;;  %v13660_v37 = vshrl.u32 %v13287_v50, 16 }
 0x1d1   : > { %10962 = vmatmul.mubr.bf16.gmra.mxu0 %v2104_v30  ;;  %v2118_v30 = vsel %vm2077_vm2, %v2111_v12, %v2117_v43  ;;  %v17355_v12 = vshrl.u32 %v13515_v55, 16  ;;  %v13547_v27 = vor.u32 %v2848_v61, %v2845_v51  ;;  %v12220_v61 = vld [vmem:[%s17345_s2 + $0x1f0] sm:$0xff]  }
 0x1d2   : > { %10965 = vmatprep.mubr.msk.bf16.mxu0 %vm12555_vm0, %v17482_v8  ;;  %v2857_v5 = vrot.slane %v2855_v31, 4  ;;  %v2556_v7 = vsel %vm2553_vm3, %v2554_v49, %v2555_v19  ;;  %v4308_v43 = vrot.slane %v13532_v3, 4  ;;  %v2557_v49 = vrot.slane %v13183_v46, 3 }
 0x1d3   : > { %v4311_v51 = vrot.slane %v17355_v12, 3  ;;  %v13654_v12 = vshrl.u32 %v13260_v24, 16 }
 0x1d5   : > { %10810 = vmatmul.mubr.bf16.gmra.mxu1 %v13471_v42 }
 0x1d6   : > { %10813 = vmatprep.mubr.msk.bf16.mxu1 %vm12555_vm0, %v17482_v8 }
 0x1d9   : > { %10966 = vmatmul.mubr.bf16.gmra.mxu0 %v2108_v52  ;;  %v2852_v52 = vshrl.u32 %v13447_v14, 16  ;;  %v12218_v14 = vld [vmem:[%s17345_s2 + $0x1f8] sm:$0xff]  }
 0x1da   : > { %10969 = vmatprep.mubr.msk.bf16.mxu0 %vm12555_vm0, %v17482_v8 }
 0x1db   : > { %v2854_v6 = vrot.slane %v2852_v52, 3 }
 0x1dd   : > { %10814 = vmatmul.mubr.bf16.gmra.mxu1 %v13486_v41  ;;  %v2858_v39 = vor.u32 %v2857_v5, %v2854_v6  ;;  %v12216_v5 = vld [vmem:[%s17345_s2 + $0xa0] sm:$0xff]  }
 0x1de   : > { %10817 = vmatprep.mubr.msk.bf16.mxu1 %vm12555_vm0, %v17482_v8 }
 0x1e1   : > { %10970 = vmatmul.mubr.bf16.gmra.mxu0 %v2112_v57  ;;  %v17354_v57 = vshll.u32 %v13515_v55, 16 }
 0x1e2   : > { %10973 = vmatprep.mubr.msk.bf16.mxu0 %vm12555_vm0, %v17482_v8 }
 0x1e3   : > { %v4312_v31 = vrot.slane %v17354_v57, 4  ;;  %v4115_v57 = vrot.slane %v13515_v55, 3 }
 0x1e5   : > { %10818 = vmatmul.mubr.bf16.gmra.mxu1 %v1517_v17  ;;  %v4307_v17 = vrot.slane %v13526_v54, 3  ;;  %v4313_v6 = vor.u32 %v4312_v31, %v4311_v51  ;;  %v12223_v51 = vld [vmem:[%s17345_s2 + $0x1e0] sm:$0xff]   ;;  %v13631_v31 = vshrl.u32 %v13200_v59, 16 }
 0x1e6   : > { %10837 = vmatprep.mubr.msk.bf16.mxu1 %vm12555_vm0, %v17482_v8 }
 0x1e7   : > { %v4309_v52 = vor.u32 %v4308_v43, %v4307_v17  ;;  %v2559_v17 = vrot.slane %v13200_v59, 3  ;;  %v17356_v43 = vrot.slane %v13223_v22, 3 }
 0x1e9   : > { %10974 = vmatmul.mubr.bf16.gmra.mxu0 %v2118_v30  ;;  %v12215_v30 = vld [vmem:[%s17345_s2 + $0xa8] sm:$0xff]   ;;  %v13619_v38 = vsel %vm2553_vm3, %v2559_v17, %v17356_v43  ;;  %v13657_v43 = vshll.u32 %v13260_v24, 16 }
 0x1ea   : > { %11045 = vmatprep.mubr.msk.bf16.mxu0 %vm12555_vm0, %v17482_v8  ;;  %17530 = vst [vmem:[#allocation35_spill] sm:$0xff] %v13619_v38 }
 0x1ed   : > { %10838 = vmatmul.mubr.bf16.vlgmr.msra.gmra.mxu1 %v13107_v10 }
 0x1ee   : > { %10874 = vmatpush3.bf16.msra.mxu1 %v12213_v53  ;;  %10841 = vmatprep.mubr.msk.bf16.mxu1 %vm12555_vm0, %v17482_v8  ;;  %v13558_v53 = vsel %vm2770_vm4, %v13547_v27, %v2858_v39  ;;  %v13588_v39 = vsel %vm2553_vm3, %v2555_v19, %v2557_v49  ;;  %v13603_v19 = vpack.c.bf16 %v1394_v56, %v13356_v40  ;;  %v13625_v56 = vshrl.u32 %v13183_v46, 16 }
 0x1ef   : > { %10875 = vmatprep.subr.bf16.mxu1 %v17482_v8  ;;  %17526 = vst [vmem:[#allocation31_spill] sm:$0xff] %v13588_v39 }
 0x1f0   : > { %17527 = vst [vmem:[#allocation32_spill] sm:$0xff] %v13603_v19  ;;  %v5552_v40 = vrot.slane %v13603_v19, 3 }
 0x1f1   : > { %11046 = vmatmul.mubr.bf16.vlgmr.msra.gmra.mxu0 %v2556_v7  ;;  %v13585_v7 = vsel %vm2770_vm4, %v4309_v52, %v4313_v6  ;;  %v12219_v6 = vld [vmem:[%s17345_s2 + $0x90] sm:$0xff]  }
 0x1f2   : > { %10876 = vmatpush3.bf16.msra.mxu1 %v12214_v63  ;;  %11049 = vmatprep.mubr.msk.bf16.mxu0 %vm12555_vm0, %v17482_v8  ;;  %v13573_v63 = vsel %vm2770_vm4, %v13547_v27, %v4309_v52  ;;  %17525 = vst [vmem:[#allocation30_spill] sm:$0xff] %v13585_v7  ;;  %v13614_v52 = vsel %vm2553_vm3, %v2557_v49, %v2559_v17  ;;  %v13634_v49 = vshll.u32 %v13200_v59, 16  ;;  %v4113_v17 = vrot.slane %v13507_v4, 3 }
 0x1f3   : > { %10877 = vmatprep.subr.bf16.mxu1 %v17482_v8  ;;  %11134 = vmatpush3.bf16.msra.mxu0 %v12218_v14  ;;  %17524 = vst [vmem:[#allocation29_spill] sm:$0xff] %v13573_v63  ;;  %v12221_v14 = vld [vmem:[%s17345_s2 + $0x1e8] sm:$0xff]   ;;  %17529 = vst [vmem:[#allocation34_spill] sm:$0xff] %v13614_v52  ;;  %v13679_v59 = vshll.u32 %v13320_v25, 16  ;;  %v4914_v63 = vrot.slane %v13625_v56, 1 }
 0x1f4   : > { %11135 = vmatprep.subr.bf16.mxu0 %v17482_v8  ;;  %v13672_v4 = vsel %vm2553_vm3, %v13460_v0, %v4113_v17  ;;  %v13675_v34 = vsel %vm2553_vm3, %v4113_v17, %v4115_v57  ;;  %v13682_v7 = vsel %vm2553_vm3, %v4113_v17, %v5552_v40  ;;  %v12222_v57 = vld [vmem:[%s17345_s2 + $0x88] sm:$0xff]   ;;  %v5936_v17 = vrot.slane %v13634_v49, 1 }
 0x1f5   : > { %10842 = vmatmul.mubr.bf16.gmra.mxu1 %v13162_v44  ;;  %17531 = vst [vmem:[#allocation36_spill] sm:$0xff] %v13672_v4  ;;  %17532 = vst [vmem:[#allocation37_spill] sm:$0xff] %v13675_v34  ;;  %v4917_v4 = vrot.slane %v13631_v31, 1 }
 0x1f6   : > { %10845 = vmatprep.mubr.msk.bf16.mxu1 %vm12555_vm0, %v17482_v8  ;;  %10878 = vmatpush3.bf16.msra.mxu1 %v12215_v30  ;;  %v12217_v30 = vld [vmem:[%s17345_s2 + $0x98] sm:$0xff]   ;;  %17533 = vst [vmem:[#allocation38_spill] sm:$0xff] %v13682_v7  ;;  %v12226_v7 = vld [vmem:[%s17345_s2 + $0x1d0] sm:$0xff]   ;;  %v5937_v60 = vor.u32 %v5936_v17, %v13631_v31 }
 0x1f7   : > { %10879 = vmatprep.subr.bf16.mxu1 %v17482_v8  ;;  %11136 = vmatpush3.bf16.msra.mxu0 %v12220_v61  ;;  %v13611_v61 = vpack.c.bf16 %v13425_v28, %v13425_v28  ;;  %v13628_v28 = vshll.u32 %v13183_v46, 16 }
 0x1f8   : > { %11137 = vmatprep.subr.bf16.mxu0 %v17482_v8 }
 0x1f9   : > { %11050 = vmatmul.mubr.bf16.gmra.mxu0 %v13588_v39  ;;  %17528 = vst [vmem:[#allocation33_spill] sm:$0xff] %v13611_v61  ;;  %v13665_v39 = vshll.u32 %v13287_v50, 16  ;;  %v5554_v46 = vrot.slane %v13611_v61, 3  ;;  %v4915_v34 = vrot.slane %v13628_v28, 2 }
 0x1fa   : > { %11053 = vmatprep.mubr.msk.bf16.mxu0 %vm12555_vm0, %v17482_v8  ;;  %10880 = vmatpush3.bf16.msra.mxu1 %v12216_v5  ;;  %v13642_v5 = vshrl.u32 %v13223_v22, 16 }
 0x1fb   : > { %10881 = vmatprep.subr.bf16.mxu1 %v17482_v8  ;;  %11138 = vmatpush3.bf16.msra.mxu0 %v12221_v14  ;;  %v13645_v14 = vshll.u32 %v13223_v22, 16  ;;  %v4916_v16 = vor.u32 %v4915_v34, %v4914_v63  ;;  %v12225_v34 = vld [vmem:[%s17345_s2 + $0x80] sm:$0xff]  }
 0x1fc   : > { %11139 = vmatprep.subr.bf16.mxu0 %v17482_v8  ;;  %v4921_v41 = vrot.slane %v13642_v5, 1 }
 0x1fd   : > { %10846 = vmatmul.mubr.bf16.gmra.mxu1 %v13150_v32  ;;  %v5938_v18 = vrot.slane %v13645_v14, 1  ;;  %v4922_v42 = vrot.slane %v13645_v14, 2 }
 0x1fe   : > { %10849 = vmatprep.mubr.msk.bf16.mxu1 %vm12555_vm0, %v17482_v8  ;;  %10882 = vmatpush3.bf16.msra.mxu1 %v12217_v30  ;;  %v12224_v30 = vld [vmem:[%s17345_s2 + $0x1d8] sm:$0xff]  }
 0x1ff   : > { %10883 = vmatprep.subr.bf16.mxu1 %v17482_v8  ;;  %11140 = vmatpush3.bf16.msra.mxu0 %v12223_v51  ;;  %v13668_v51 = vshrl.u32 %v13320_v25, 16  ;;  %v4923_v15 = vor.u32 %v4922_v42, %v4921_v41  ;;  %v13721_v63 = vsel %vm1441_vm1, %v5937_v60, %v5938_v18  ;;  %v5944_v41 = vrot.slane %v13665_v39, 1 }
 0x200   : > { %11141 = vmatprep.subr.bf16.mxu0 %v17482_v8  ;;  %17536 = vst [vmem:[#allocation41_spill] sm:$0xff] %v13721_v63  ;;  %v4929_v60 = vrot.slane %v13660_v37, 1 }
 0x201   : > { %11054 = vmatmul.mubr.bf16.gmra.mxu0 %v13614_v52  ;;  %v4918_v52 = vrot.slane %v13634_v49, 2  ;;  %v5946_v63 = vor.u32 %v5944_v41, %v13660_v37 }
 0x202   : > { %11057 = vmatprep.mubr.msk.bf16.mxu0 %vm12555_vm0, %v17482_v8  ;;  %10884 = vmatpush3.bf16.msra.mxu1 %v12219_v6  ;;  %v13700_v6 = vsel %vm2553_vm3, %v5552_v40, %v5554_v46  ;;  %v5940_v46 = vor.u32 %v5938_v18, %v13642_v5  ;;  %v4925_v40 = vrot.slane %v13654_v12, 1 }
 0x203   : > { %10885 = vmatprep.subr.bf16.mxu1 %v17482_v8  ;;  %11142 = vmatpush3.bf16.msra.mxu0 %v12224_v30  ;;  %17534 = vst [vmem:[#allocation39_spill] sm:$0xff] %v13700_v6  ;;  %v4919_v20 = vor.u32 %v4918_v52, %v4917_v4  ;;  %v5941_v30 = vrot.slane %v13657_v43, 1  ;;  %v4926_v6 = vrot.slane %v13657_v43, 2  ;;  %v12227_v52 = vld [vmem:[%s17345_s2 + $0x1c8] sm:$0xff]  }
 0x204   : > { %11143 = vmatprep.subr.bf16.mxu0 %v17482_v8 }
 0x205   : > { %10850 = vmatmul.mubr.bf16.gmra.mxu1 %v13198_v13  ;;  %v13718_v4 = vsel %vm2077_vm2, %v4916_v16, %v4919_v20  ;;  %v5943_v42 = vor.u32 %v5941_v30, %v13654_v12  ;;  %v13733_v16 = vsel %vm1441_vm1, %v5940_v46, %v5941_v30  ;;  %v4927_v17 = vor.u32 %v4926_v6, %v4925_v40 }
 0x206   : > { %10853 = vmatprep.mubr.msk.bf16.mxu1 %vm12555_vm0, %v17482_v8  ;;  %10886 = vmatpush3.bf16.msra.mxu1 %v12222_v57  ;;  %17535 = vst [vmem:[#allocation40_spill] sm:$0xff] %v13718_v4  ;;  %v13730_v57 = vsel %vm2077_vm2, %v4919_v20, %v4923_v15  ;;  %17538 = vst [vmem:[#allocation43_spill] sm:$0xff] %v13733_v16  ;;  %v5947_v4 = vrot.slane %v13679_v59, 1  ;;  %v4933_v6 = vrot.slane %v13668_v51, 1  ;;  %v4934_v30 = vrot.slane %v13679_v59, 2 }
 0x207   : > { %10887 = vmatprep.subr.bf16.mxu1 %v17482_v8  ;;  %11144 = vmatpush3.bf16.msra.mxu0 %v12226_v7  ;;  %17537 = vst [vmem:[#allocation42_spill] sm:$0xff] %v13730_v57  ;;  %v13738_v18 = vsel %vm1441_vm1, %v5943_v42, %v5944_v41  ;;  %v4930_v7 = vrot.slane %v13665_v39, 2  ;;  %v13745_v20 = vsel %vm2077_vm2, %v4923_v15, %v4927_v17  ;;  %v5950_v46 = vrot.slane %v13511_v29, 1  ;;  %v12228_v15 = vld [vmem:[%s17345_s2 + $0x1c0] sm:$0xff]  }
 0x208   : > { %11145 = vmatprep.subr.bf16.mxu0 %v17482_v8  ;;  %17539 = vst [vmem:[#allocation44_spill] sm:$0xff] %v13738_v18  ;;  %17540 = vst [vmem:[#allocation45_spill] sm:$0xff] %v13745_v20  ;;  %v13753_v42 = vsel %vm1441_vm1, %v5946_v63, %v5947_v4  ;;  %v5949_v41 = vor.u32 %v5947_v4, %v13668_v51  ;;  %v4937_v18 = vrot.slane %v13503_v62, 1  ;;  %v4938_v16 = vrot.slane %v13511_v29, 2 }
 0x209   : > { %11058 = vmatmul.mubr.bf16.gmra.mxu0 %v13619_v38  ;;  %v4931_v40 = vor.u32 %v4930_v7, %v4929_v60  ;;  %17541 = vst [vmem:[#allocation46_spill] sm:$0xff] %v13753_v42  ;;  %v4935_v20 = vor.u32 %v4934_v30, %v4933_v6  ;;  %v5953_v60 = vrot.slane %v13532_v3, 1  ;;  %v4942_v7 = vrot.slane %v13532_v3, 2 }
 0x20a   : > { %11061 = vmatprep.mubr.msk.bf16.mxu0 %vm12555_vm0, %v17482_v8  ;;  %10888 = vmatpush3.bf16.msra.mxu1 %v12225_v34  ;;  %v5952_v34 = vor.u32 %v5950_v46, %v13503_v62  ;;  %v13769_v63 = vsel %vm1441_vm1, %v5949_v41, %v5950_v46  ;;  %v13775_v6 = vpack.c.bf16 %v13418_v23, %v13418_v23  ;;  %v13789_v41 = vshll.u32 %v13603_v19, 16 }
 0x20b   : > { %11146 = vmatpush3.bf16.msra.mxu0 %v12227_v52  ;;  %10977 = vmatprep.subr.bf16.mxu1 %v17482_v8  ;;  %v13766_v4 = vsel %vm2077_vm2, %v4927_v17, %v4931_v40  ;;  %17543 = vst [vmem:[#allocation48_spill] sm:$0xff] %v13769_v63  ;;  %v4941_v52 = vrot.slane %v13526_v54, 1  ;;  %v13779_v30 = vsel %vm2077_vm2, %v4931_v40, %v4935_v20  ;;  %v13795_v63 = vshrl.u32 %v13603_v19, 16 }
 0x20c   : > { %11147 = vmatprep.subr.bf16.mxu0 %v17482_v8  ;;  %17542 = vst [vmem:[#allocation47_spill] sm:$0xff] %v13766_v4  ;;  %17544 = vst [vmem:[#allocation49_spill] sm:$0xff] %v13775_v6  ;;  %v4939_v42 = vor.u32 %v4938_v16, %v4937_v18  ;;  %v13782_v17 = vsel %vm1441_vm1, %v5952_v34, %v5953_v60  ;;  %v13792_v23 = vor.u32 %v5953_v60, %v13526_v54 }
 0x20d   : > { %10854 = vmatmul.mubr.bf16.gmra.mxu1 %v13196_v35  ;;  %17545 = vst [vmem:[#allocation50_spill] sm:$0xff] %v13779_v30  ;;  %17546 = vst [vmem:[#allocation51_spill] sm:$0xff] %v13782_v17  ;;  %v13786_v46 = vor.u32 %v4942_v7, %v4941_v52  ;;  %v17551_v40 = vrot.slane %v13260_v24, 3  ;;  %v17552_v16 = vrot.slane %v13223_v22, 3  ;;  %v3901_v52 = vrot.slane %v13526_v54, 2 }
 0x20e   : > { %10857 = vmatprep.mubr.msk.bf16.mxu1 %vm12555_vm0, %v17482_v8  ;;  %17548 = vst [vmem:[#allocation53_spill] sm:$0xff] %v13789_v41  ;;  %17549 = vst [vmem:[#allocation54_spill] sm:$0xff] %v13792_v23  ;;  %v13805_v34 = vsel %vm2077_vm2, %v4935_v20, %v4939_v42  ;;  %v3904_v60 = vrot.slane %v13532_v3, 3  ;;  %v17385_v20 = vshrl.u32 %v13434_v48, 16  ;;  %v4948_v54 = vrot.slane %v13795_v63, 1 }
 0x20f   : > { %17547 = vst [vmem:[#allocation52_spill] sm:$0xff] %v13786_v46  ;;  %17550 = vst [vmem:[#allocation55_spill] sm:$0xff] %v13795_v63  ;;  %v13802_v18 = vsel %vm2553_vm3, %v17552_v16, %v17551_v40  ;;  %11148 = vmatpush3.bf16.msra.mxu0 %v12228_v15  ;;  %v13812_v7 = vsel %vm2077_vm2, %v4939_v42, %v13786_v46  ;;  %v4951_v3 = vrot.slane %v13789_v41, 2  ;;  %v5354_v16 = vrot.slane %v13795_v63, 2 }
 0x210   : > { %17553 = vst [vmem:[#allocation56_spill] sm:$0xff] %v13802_v18  ;;  %17554 = vst [vmem:[#allocation57_spill] sm:$0xff] %v13805_v34  ;;  %11237 = vmatprep.subr.bf16.mxu0 %v17482_v8  ;;  %v5355_v23 = vrot.slane %v13789_v41, 3  ;;  %v6365_v40 = vrot.slane %v17385_v20, 1  ;;  %v2565_v15 = vrot.slane %v13287_v50, 3  ;;  %v13829_v46 = vor.u32 %v3904_v60, %v3901_v52 }
 0x211   : > { %17555 = vst [vmem:[#allocation58_spill] sm:$0xff] %v13812_v7  ;;  %11062 = vmatmul.mubr.bf16.gmra.mxu0 %v13802_v18  ;;  %v17556_v7 = vshll.u32 %v13434_v48, 16  ;;  %v17557_v30 = vshrl.u32 %v13611_v61, 16  ;;  %v17558_v63 = vshll.u32 %v13611_v61, 16  ;;  %v6369_v41 = vshrl.u32 %v13775_v6, 16 }
 0x212   : > { %11065 = vmatprep.mubr.msk.bf16.mxu0 %vm12555_vm0, %v17482_v8  ;;  %v5356_v34 = vor.u32 %v5355_v23, %v5354_v16  ;;  %v13841_v52 = vor.u32 %v4951_v3, %v4948_v54  ;;  %v2318_v38 = vrot.slane %v13162_v44, 2  ;;  %v2322_v22 = vrot.slane %v13198_v13, 2 }
 0x213   : > { %v6366_v17 = vrot.slane %v17556_v7, 2  ;;  %v5358_v42 = vrot.slane %v17557_v30, 2  ;;  %v5359_v4 = vrot.slane %v17558_v63, 3  ;;  %v17560_v7 = vshll.u32 %v13775_v6, 16 }
 0x214   : > { %17559 = vst [vmem:[#allocation59_spill] sm:$0xff] %v13841_v52  ;;  %v13847_v23 = vsel %vm3866_vm5, %v13829_v46, %v5356_v34  ;;  %v6371_v16 = vrot.slane %v6369_v41, 1  ;;  %v17562_v63 = vrot.slane %v13260_v24, 3  ;;  %v2567_v41 = vrot.slane %v13320_v25, 3 }
 0x215   : > { %10858 = vmatmul.mubr.bf16.gmra.mxu1 %v13258_v21  ;;  %v6367_v60 = vor.u32 %v6366_v17, %v6365_v40  ;;  %v6372_v20 = vrot.slane %v17560_v7, 2  ;;  %17561 = vst [vmem:[#allocation60_spill] sm:$0xff] %v13847_v23  ;;  %v5360_v30 = vor.u32 %v5359_v4, %v5358_v42  ;;  %v12234_v42 = vld [vmem:[%s17345_s2 + $0x278] sm:$0xff]   ;;  %v12231_v7 = vld [vmem:[%s17345_s2 + $0x128] sm:$0xff]  }
 0x216   : > { %10861 = vmatprep.mubr.msk.bf16.mxu1 %vm12555_vm0, %v17482_v8  ;;  %v13852_v48 = vsel %vm2553_vm3, %v17562_v63, %v2565_v15  ;;  %v13872_v54 = vsel %vm2553_vm3, %v2565_v15, %v2567_v41  ;;  %v1862_v15 = vrot.slane %v13162_v44, 1  ;;  %v12232_v63 = vld [vmem:[%s17345_s2 + $0x120] sm:$0xff]  }
 0x217   : > { %17563 = vst [vmem:[#allocation61_spill] sm:$0xff] %v13852_v48  ;;  %v13856_v57 = vsel %vm2077_vm2, %v13841_v52, %v6367_v60  ;;  %v13860_v17 = vsel %vm3866_vm5, %v5356_v34, %v5360_v30  ;;  %v6373_v40 = vor.u32 %v6372_v20, %v6371_v16  ;;  %17567 = vst [vmem:[#allocation65_spill] sm:$0xff] %v13872_v54  ;;  %v1861_v20 = vrot.slane %v13107_v10, 1  ;;  %v12236_v30 = vld [vmem:[%s17345_s2 + $0x270] sm:$0xff]  }
 0x218   : > { %17564 = vst [vmem:[#allocation62_spill] sm:$0xff] %v13856_v57  ;;  %17565 = vst [vmem:[#allocation63_spill] sm:$0xff] %v13860_v17  ;;  %v13882_v34 = vsel %vm2553_vm3, %v2567_v41, %v13460_v0  ;;  %v12229_v0 = vld [vmem:[%s17345_s2 + $0x138] sm:$0xff]   ;;  %v1866_v41 = vrot.slane %v13198_v13, 1  ;;  %v1878_v52 = vrot.slane %v13480_v36, 1 }
 0x219   : > { %11066 = vmatmul.mubr.bf16.gmra.mxu0 %v13852_v48  ;;  %v13865_v4 = vsel %vm2077_vm2, %v6367_v60, %v6373_v40  ;;  %17568 = vst [vmem:[#allocation66_spill] sm:$0xff] %v13882_v34  ;;  %v1863_v3 = vsel %vm1860_vm6, %v1861_v20, %v1862_v15  ;;  %v1864_v60 = vrot.slane %v13150_v32, 1  ;;  %v12237_v40 = vld [vmem:[%s17345_s2 + $0x268] sm:$0xff]   ;;  %v12239_v20 = vld [vmem:[%s17345_s2 + $0x260] sm:$0xff]  }
 0x21a   : > { %11069 = vmatprep.mubr.msk.bf16.mxu0 %vm12555_vm0, %v17482_v8  ;;  %17566 = vst [vmem:[#allocation64_spill] sm:$0xff] %v13865_v4 }
 0x21b   : > { %v13920_v16 = vsel %vm1860_vm6, %v1862_v15, %v1864_v60  ;;  %v12233_v15 = vld [vmem:[%s17345_s2 + $0x118] sm:$0xff]  }
 0x21d   : > { %10862 = vmatmul.mubr.bf16.gmra.mxu1 %v13245_v58 }
 0x21e   : > { %10865 = vmatprep.mubr.msk.bf16.mxu1 %vm12555_vm0, %v17482_v8 }
 0x221   : > { %11070 = vmatmul.mubr.bf16.gmra.mxu0 %v13872_v54 }
 0x222   : > { %11073 = vmatprep.mubr.msk.bf16.mxu0 %vm12555_vm0, %v17482_v8 }
 0x225   : > { %10866 = vmatmul.mubr.bf16.gmra.mxu1 %v13318_v33 }
 0x226   : > { %10869 = vmatprep.mubr.msk.bf16.mxu1 %vm12555_vm0, %v17482_v8 }
 0x229   : > { %11074 = vmatmul.mubr.bf16.gmra.mxu0 %v13882_v34 }
 0x22a   : > { %11077 = vmatprep.mubr.msk.bf16.mxu0 %vm12555_vm0, %v17482_v8 }
 0x22d   : > { %10870 = vmatmul.mubr.bf16.gmra.mxu1 %v13299_v26 }
 0x22e   : > { %10889 = vmatprep.mubr.msk.bf16.mxu1 %vm12555_vm0, %v17482_v8 }
 0x231   : > { %11078 = vmatmul.mubr.bf16.gmra.mxu0 %v13466_v9  ;;  %v12230_v9 = vld [vmem:[%s17345_s2 + $0x130] sm:$0xff]  }
 0x232   : > { %11149 = vmatprep.mubr.msk.bf16.mxu0 %vm12555_vm0, %v17482_v8 }
 0x235   : > { %10890 = vmatmul.mubr.bf16.vlgmr.msra.gmra.mxu1 %v1863_v3  ;;  %v12235_v3 = vld [vmem:[%s17345_s2 + $0x110] sm:$0xff]  }
 0x236   : > { %10978 = vmatpush3.bf16.msra.mxu1 %v12229_v0  ;;  %10893 = vmatprep.mubr.msk.bf16.mxu1 %vm12555_vm0, %v17482_v8  ;;  %v13946_v0 = vsel %vm1860_vm6, %v1864_v60, %v1866_v41  ;;  %v12238_v60 = vld [vmem:[%s17345_s2 + $0x108] sm:$0xff]  }
 0x237   : > { %10979 = vmatprep.subr.bf16.mxu1 %v17482_v8 }
 0x239   : > { %11150 = vmatmul.mubr.bf16.vlgmr.msra.gmra.mxu0 %v13162_v44 }
 0x23a   : > { %10980 = vmatpush3.bf16.msra.mxu1 %v12230_v9  ;;  %11153 = vmatprep.mubr.msk.bf16.mxu0 %vm12555_vm0, %v17482_v8  ;;  %v12240_v9 = vld [vmem:[%s17345_s2 + $0x258] sm:$0xff]  }
 0x23b   : > { %10981 = vmatprep.subr.bf16.mxu1 %v17482_v8  ;;  %11238 = vmatpush3.bf16.msra.mxu0 %v12234_v42  ;;  %v1868_v42 = vrot.slane %v13196_v35, 1 }
 0x23c   : > { %11239 = vmatprep.subr.bf16.mxu0 %v17482_v8 }
 0x23d   : > { %10894 = vmatmul.mubr.bf16.gmra.mxu1 %v13920_v16 }
 0x23e   : > { %10897 = vmatprep.mubr.msk.bf16.mxu1 %vm12555_vm0, %v17482_v8  ;;  %10982 = vmatpush3.bf16.msra.mxu1 %v12231_v7  ;;  %v12242_v7 = vld [vmem:[%s17345_s2 + $0x250] sm:$0xff]  }
 0x23f   : > { %10983 = vmatprep.subr.bf16.mxu1 %v17482_v8  ;;  %11240 = vmatpush3.bf16.msra.mxu0 %v12236_v30  ;;  %v13972_v30 = vsel %vm1860_vm6, %v1866_v41, %v1868_v42  ;;  %v1870_v41 = vrot.slane %v13258_v21, 1 }
 0x240   : > { %11241 = vmatprep.subr.bf16.mxu0 %v17482_v8 }
 0x241   : > { %11154 = vmatmul.mubr.bf16.gmra.mxu0 %v13150_v32 }
 0x242   : > { %11157 = vmatprep.mubr.msk.bf16.mxu0 %vm12555_vm0, %v17482_v8  ;;  %10984 = vmatpush3.bf16.msra.mxu1 %v12232_v63  ;;  %v12241_v63 = vld [vmem:[%s17345_s2 + $0x100] sm:$0xff]  }
 0x243   : > { %10985 = vmatprep.subr.bf16.mxu1 %v17482_v8  ;;  %11242 = vmatpush3.bf16.msra.mxu0 %v12237_v40  ;;  %v12243_v40 = vld [vmem:[%s17345_s2 + $0x248] sm:$0xff]  }
 0x244   : > { %11243 = vmatprep.subr.bf16.mxu0 %v17482_v8 }
 0x245   : > { %10898 = vmatmul.mubr.bf16.gmra.mxu1 %v13946_v0 }
 0x246   : > { %10901 = vmatprep.mubr.msk.bf16.mxu1 %vm12555_vm0, %v17482_v8  ;;  %10986 = vmatpush3.bf16.msra.mxu1 %v12233_v15  ;;  %v12244_v15 = vld [vmem:[%s17345_s2 + $0x240] sm:$0xff]  }
 0x247   : > { %10987 = vmatprep.subr.bf16.mxu1 %v17482_v8  ;;  %11244 = vmatpush3.bf16.msra.mxu0 %v12239_v20  ;;  %v13995_v20 = vsel %vm1860_vm6, %v1868_v42, %v1870_v41  ;;  %v1874_v42 = vrot.slane %v13318_v33, 1 }
 0x248   : > { %11245 = vmatprep.subr.bf16.mxu0 %v17482_v8 }
 0x249   : > { %11158 = vmatmul.mubr.bf16.gmra.mxu0 %v13198_v13  ;;  %v12255_v13 = vld [vmem:[%s17345_s2 + $0x2e0] sm:$0xff]  }
 0x24a   : > { %11161 = vmatprep.mubr.msk.bf16.mxu0 %vm12555_vm0, %v17482_v8  ;;  %10988 = vmatpush3.bf16.msra.mxu1 %v12235_v3  ;;  %v1872_v3 = vrot.slane %v13245_v58, 1 }
 0x24b   : > { %10989 = vmatprep.subr.bf16.mxu1 %v17482_v8  ;;  %11246 = vmatpush3.bf16.msra.mxu0 %v12240_v9 }
 0x24c   : > { %11247 = vmatprep.subr.bf16.mxu0 %v17482_v8  ;;  %v14007_v9 = vsel %vm1860_vm6, %v1870_v41, %v1872_v3 }
 0x24d   : > { %10902 = vmatmul.mubr.bf16.gmra.mxu1 %v13972_v30 }
 0x24e   : > { %10905 = vmatprep.mubr.msk.bf16.mxu1 %vm12555_vm0, %v17482_v8  ;;  %10990 = vmatpush3.bf16.msra.mxu1 %v12238_v60  ;;  %v14017_v60 = vsel %vm1860_vm6, %v1872_v3, %v1874_v42 }
 0x24f   : > { %10991 = vmatprep.subr.bf16.mxu1 %v17482_v8  ;;  %11248 = vmatpush3.bf16.msra.mxu0 %v12242_v7 }
 0x250   : > { %11249 = vmatprep.subr.bf16.mxu0 %v17482_v8 }
 0x251   : > { %11162 = vmatmul.mubr.bf16.gmra.mxu0 %v13196_v35 }
 0x252   : > { %11165 = vmatprep.mubr.msk.bf16.mxu0 %vm12555_vm0, %v17482_v8  ;;  %10992 = vmatpush3.bf16.msra.mxu1 %v12241_v63 }
 0x253   : > { %11250 = vmatpush3.bf16.msra.mxu0 %v12243_v40  ;;  %11081 = vmatprep.subr.bf16.mxu1 %v17482_v8 }
 0x254   : > { %11251 = vmatprep.subr.bf16.mxu0 %v17482_v8 }
 0x255   : > { %10906 = vmatmul.mubr.bf16.gmra.mxu1 %v13995_v20 }
 0x256   : > { %10909 = vmatprep.mubr.msk.bf16.mxu1 %vm12555_vm0, %v17482_v8 }
 0x257   : > { %11252 = vmatpush3.bf16.msra.mxu0 %v12244_v15  ;;  %v14030_v15 = vrot.slane %v13299_v26, 1 }
 0x258   : > { %11341 = vmatprep.subr.bf16.mxu0 %v17482_v8 }
 0x259   : > { %11166 = vmatmul.mubr.bf16.gmra.mxu0 %v13258_v21  ;;  %v14036_v17 = vsel %vm1860_vm6, %v1874_v42, %v14030_v15  ;;  %v1879_v54 = vsel %vm1860_vm6, %v14030_v15, %v1878_v52  ;;  %v2317_v52 = vrot.slane %v13107_v10, 2  ;;  %v12246_v10 = vld [vmem:[%s17345_s2 + $0x1b0] sm:$0xff]  }
 0x25a   : > { %11169 = vmatprep.mubr.msk.bf16.mxu0 %vm12555_vm0, %v17482_v8 }
 0x25b   : > { %v2319_v44 = vsel %vm2316_vm7, %v2317_v52, %v2318_v38  ;;  %v12250_v52 = vld [vmem:[%s17345_s2 + $0x2f8] sm:$0xff]  }
 0x25d   : > { %10910 = vmatmul.mubr.bf16.gmra.mxu1 %v14007_v9 }
 0x25e   : > { %10913 = vmatprep.mubr.msk.bf16.mxu1 %vm12555_vm0, %v17482_v8 }
 0x261   : > { %11170 = vmatmul.mubr.bf16.gmra.mxu0 %v13245_v58 }
 0x262   : > { %11173 = vmatprep.mubr.msk.bf16.mxu0 %vm12555_vm0, %v17482_v8 }
 0x263   : > { %v14019_v7 = vpop.f32.mrf.mxu1 }
 0x265   : > { %10914 = vmatmul.mubr.bf16.gmra.mxu1 %v14017_v60  ;;  %v10787_v63 = vpop.f32.mrf.mxu1 }
 0x266   : > { %10917 = vmatprep.mubr.msk.bf16.mxu1 %vm12555_vm0, %v17482_v8 }
 0x267   : > { %v14024_v40 = vpop.f32.mrf.mxu0  ;;  %v14027_v41 = vpop.f32.mrf.mxu1 }
 0x269   : > { %11174 = vmatmul.mubr.bf16.gmra.mxu0 %v13318_v33  ;;  %v10943_v3 = vpop.f32.mrf.mxu0  ;;  %v10788_v4 = vpop.f32.mrf.mxu1 }
 0x26a   : > { %11177 = vmatprep.mubr.msk.bf16.mxu0 %vm12555_vm0, %v17482_v8 }
 0x26b   : > { %v14038_v57 = vpop.f32.mrf.mxu0  ;;  %v14040_v63 = vpop.f32.mrf.mxu1 }
 0x26c   : > { %17569 = vst [vmem:[#allocation67_spill] sm:$0xff] %v14038_v57 }
 0x26d   : > { %10918 = vmatmul.mubr.bf16.gmra.mxu1 %v14036_v17  ;;  %v10944_v23 = vpop.f32.mrf.mxu0  ;;  %v10791_v6 = vpop.f32.mrf.mxu1 }
 0x26e   : > { %10921 = vmatprep.mubr.msk.bf16.mxu1 %vm12555_vm0, %v17482_v8 }
 0x26f   : > { %v14046_v34 = vpop.f32.mrf.mxu0  ;;  %v14049_v4 = vpop.f32.mrf.mxu1 }
 0x270   : > { %17570 = vst [vmem:[#allocation68_spill] sm:$0xff] %v14046_v34 }
 0x271   : > { %11178 = vmatmul.mubr.bf16.gmra.mxu0 %v13299_v26  ;;  %v10947_v42 = vpop.f32.mrf.mxu0  ;;  %v10792_v3 = vpop.f32.mrf.mxu1 }
 0x272   : > { %11181 = vmatprep.mubr.msk.bf16.mxu0 %vm12555_vm0, %v17482_v8 }
 0x273   : > { %v14055_v48 = vpop.f32.mrf.mxu0 }
 0x274   : > { %17571 = vst [vmem:[#allocation69_spill] sm:$0xff] %v14055_v48  ;;  %v14057_v23 = vpop.f32.mrf.mxu1 }
 0x275   : > { %10922 = vmatmul.mubr.bf16.gmra.mxu1 %v1879_v54  ;;  %v10948_v6 = vpop.f32.mrf.mxu0  ;;  %v12245_v54 = vld [vmem:[%s17345_s2 + $0x1b8] sm:$0xff]  }
 0x276   : > { %10993 = vmatprep.mubr.msk.bf16.mxu1 %vm12555_vm0, %v17482_v8  ;;  %v10795_v18 = vpop.f32.mrf.mxu1 }
 0x278   : > { %v14062_v61 = vpop.f32.mrf.mxu0  ;;  %v14065_v42 = vpop.f32.mrf.mxu1 }
 0x279   : > { %17572 = vst [vmem:[#allocation70_spill] sm:$0xff] %v14062_v61  ;;  %11182 = vmatmul.mubr.bf16.gmra.mxu0 %v13400_v45 }
 0x27a   : > { %11253 = vmatprep.mubr.msk.bf16.mxu0 %vm12555_vm0, %v17482_v8  ;;  %v10951_v3 = vpop.f32.mrf.mxu0  ;;  %v10796_v18 = vpop.f32.mrf.mxu1 }
 0x27b   : > { %v2320_v18 = vrot.slane %v13150_v32, 2 }
 0x27c   : > { %v14074_v6 = vpop.f32.mrf.mxu0  ;;  %v14076_v19 = vpop.f32.mrf.mxu1 }
 0x27d   : > { %17573 = vst [vmem:[#allocation71_spill] sm:$0xff] %v14074_v6  ;;  %10994 = vmatmul.mubr.bf16.vlgmr.msra.gmra.mxu1 %v2319_v44  ;;  %v2321_v24 = vsel %vm2316_vm7, %v2318_v38, %v2320_v18  ;;  %v12253_v38 = vld [vmem:[%s17345_s2 + $0x2e8] sm:$0xff]   ;;  %v2775_v6 = vshll.u32 %v13143_v1, 16 }
 0x27e   : > { %11082 = vmatpush3.bf16.msra.mxu1 %v12245_v54  ;;  %10997 = vmatprep.mubr.msk.bf16.mxu1 %vm12555_vm0, %v17482_v8  ;;  %v10952_v25 = vpop.f32.mrf.mxu0  ;;  %v10799_v50 = vpop.f32.mrf.mxu1 }
 0x27f   : > { %11083 = vmatprep.subr.bf16.mxu1 %v17482_v8  ;;  %v12247_v50 = vld [vmem:[%s17345_s2 + $0x1a8] sm:$0xff]  }
 0x280   : > { %v14090_v54 = vpop.f32.mrf.mxu1 }
 0x281   : > { %v14087_v3 = vpop.f32.mrf.mxu0  ;;  %11254 = vmatmul.mubr.bf16.vlgmr.msra.gmra.mxu0 %v13920_v16  ;;  %v12252_v16 = vld [vmem:[%s17345_s2 + $0x2f0] sm:$0xff]  }
 0x282   : > { %17574 = vst [vmem:[#allocation72_spill] sm:$0xff] %v14087_v3  ;;  %11084 = vmatpush3.bf16.msra.mxu1 %v12246_v10  ;;  %11257 = vmatprep.mubr.msk.bf16.mxu0 %vm12555_vm0, %v17482_v8  ;;  %v10800_v44 = vpop.f32.mrf.mxu1 }
 0x283   : > { %v10955_v25 = vpop.f32.mrf.mxu0  ;;  %11085 = vmatprep.subr.bf16.mxu1 %v17482_v8  ;;  %11342 = vmatpush3.bf16.msra.mxu0 %v12250_v52  ;;  %v12248_v52 = vld [vmem:[%s17345_s2 + $0x1a0] sm:$0xff]  }
 0x284   : > { %11343 = vmatprep.subr.bf16.mxu0 %v17482_v8 }
 0x285   : > { %v14104_v10 = vpop.f32.mrf.mxu0  ;;  %v14106_v32 = vpop.f32.mrf.mxu1  ;;  %10998 = vmatmul.mubr.bf16.gmra.mxu1 %v2321_v24 }
 0x286   : > { %17575 = vst [vmem:[#allocation73_spill] sm:$0xff] %v14104_v10  ;;  %11001 = vmatprep.mubr.msk.bf16.mxu1 %vm12555_vm0, %v17482_v8  ;;  %11086 = vmatpush3.bf16.msra.mxu1 %v12247_v50 }
 0x287   : > { %v10956_v25 = vpop.f32.mrf.mxu0  ;;  %v10803_v44 = vpop.f32.mrf.mxu1  ;;  %11087 = vmatprep.subr.bf16.mxu1 %v17482_v8  ;;  %11344 = vmatpush3.bf16.msra.mxu0 %v12252_v16  ;;  %v12249_v16 = vld [vmem:[%s17345_s2 + $0x198] sm:$0xff]  }
 0x288   : > { %11345 = vmatprep.subr.bf16.mxu0 %v17482_v8 }
 0x289   : > { %v14119_v24 = vpop.f32.mrf.mxu0  ;;  %11258 = vmatmul.mubr.bf16.gmra.mxu0 %v13946_v0  ;;  %v14122_v50 = vpop.f32.mrf.mxu1  ;;  %v2323_v0 = vsel %vm2316_vm7, %v2320_v18, %v2322_v22  ;;  %v12256_v18 = vld [vmem:[%s17345_s2 + $0x2d8] sm:$0xff]  }
 0x28a   : > { %17576 = vst [vmem:[#allocation74_spill] sm:$0xff] %v14119_v24  ;;  %11261 = vmatprep.mubr.msk.bf16.mxu0 %vm12555_vm0, %v17482_v8  ;;  %11088 = vmatpush3.bf16.msra.mxu1 %v12248_v52 }
 0x28b   : > { %v10959_v25 = vpop.f32.mrf.mxu0  ;;  %v10804_v44 = vpop.f32.mrf.mxu1  ;;  %11089 = vmatprep.subr.bf16.mxu1 %v17482_v8  ;;  %11346 = vmatpush3.bf16.msra.mxu0 %v12253_v38  ;;  %v12251_v38 = vld [vmem:[%s17345_s2 + $0x190] sm:$0xff]  }
 0x28c   : > { %11347 = vmatprep.subr.bf16.mxu0 %v17482_v8 }
 0x28d   : > { %v14135_v24 = vpop.f32.mrf.mxu0  ;;  %v14137_v52 = vpop.f32.mrf.mxu1  ;;  %11002 = vmatmul.mubr.bf16.gmra.mxu1 %v2323_v0 }
 0x28e   : > { %17577 = vst [vmem:[#allocation75_spill] sm:$0xff] %v14135_v24  ;;  %11005 = vmatprep.mubr.msk.bf16.mxu1 %vm12555_vm0, %v17482_v8  ;;  %11090 = vmatpush3.bf16.msra.mxu1 %v12249_v16  ;;  %v2324_v24 = vrot.slane %v13196_v35, 2 }
 0x28f   : > { %v10960_v25 = vpop.f32.mrf.mxu0  ;;  %v10807_v44 = vpop.f32.mrf.mxu1  ;;  %11091 = vmatprep.subr.bf16.mxu1 %v17482_v8  ;;  %11348 = vmatpush3.bf16.msra.mxu0 %v12255_v13  ;;  %v12254_v13 = vld [vmem:[%s17345_s2 + $0x188] sm:$0xff]  }
 0x290   : > { %11349 = vmatprep.subr.bf16.mxu0 %v17482_v8 }
 0x291   : > { %v14149_v0 = vpop.f32.mrf.mxu0  ;;  %11262 = vmatmul.mubr.bf16.gmra.mxu0 %v13972_v30  ;;  %v14152_v16 = vpop.f32.mrf.mxu1  ;;  %v12258_v30 = vld [vmem:[%s17345_s2 + $0x2d0] sm:$0xff]  }
 0x292   : > { %17578 = vst [vmem:[#allocation76_spill] sm:$0xff] %v14149_v0  ;;  %11265 = vmatprep.mubr.msk.bf16.mxu0 %vm12555_vm0, %v17482_v8  ;;  %11092 = vmatpush3.bf16.msra.mxu1 %v12251_v38  ;;  %v2325_v0 = vsel %vm2316_vm7, %v2322_v22, %v2324_v24  ;;  %v12259_v22 = vld [vmem:[%s17345_s2 + $0x2c8] sm:$0xff]  }
 0x293   : > { %v10963_v25 = vpop.f32.mrf.mxu0  ;;  %v10808_v44 = vpop.f32.mrf.mxu1  ;;  %11093 = vmatprep.subr.bf16.mxu1 %v17482_v8  ;;  %11350 = vmatpush3.bf16.msra.mxu0 %v12256_v18  ;;  %v12257_v18 = vld [vmem:[%s17345_s2 + $0x180] sm:$0xff]  }
 0x294   : > { %11351 = vmatprep.subr.bf16.mxu0 %v17482_v8 }
 0x295   : > { %v14166_v35 = vpop.f32.mrf.mxu0  ;;  %v14168_v38 = vpop.f32.mrf.mxu1  ;;  %11006 = vmatmul.mubr.bf16.gmra.mxu1 %v2325_v0 }
 0x296   : > { %17579 = vst [vmem:[#allocation77_spill] sm:$0xff] %v14166_v35  ;;  %11009 = vmatprep.mubr.msk.bf16.mxu1 %vm12555_vm0, %v17482_v8  ;;  %11094 = vmatpush3.bf16.msra.mxu1 %v12254_v13  ;;  %v2326_v35 = vrot.slane %v13258_v21, 2 }
 0x297   : > { %v10964_v25 = vpop.f32.mrf.mxu0  ;;  %v10811_v44 = vpop.f32.mrf.mxu1  ;;  %11095 = vmatprep.subr.bf16.mxu1 %v17482_v8  ;;  %11352 = vmatpush3.bf16.msra.mxu0 %v12258_v30 }
 0x298   : > { %11353 = vmatprep.subr.bf16.mxu0 %v17482_v8  ;;  %v12260_v44 = vld [vmem:[%s17345_s2 + $0x2c0] sm:$0xff]   ;;  %v2327_v21 = vsel %vm2316_vm7, %v2324_v24, %v2326_v35 }
 0x299   : > { %v14181_v0 = vpop.f32.mrf.mxu0  ;;  %11266 = vmatmul.mubr.bf16.gmra.mxu0 %v13995_v20  ;;  %v14184_v13 = vpop.f32.mrf.mxu1 }
 0x29a   : > { %17580 = vst [vmem:[#allocation78_spill] sm:$0xff] %v14181_v0  ;;  %11269 = vmatprep.mubr.msk.bf16.mxu0 %vm12555_vm0, %v17482_v8  ;;  %11096 = vmatpush3.bf16.msra.mxu1 %v12257_v18 }
 0x29b   : > { %v10967_v25 = vpop.f32.mrf.mxu0  ;;  %v10812_v30 = vpop.f32.mrf.mxu1  ;;  %11354 = vmatpush3.bf16.msra.mxu0 %v12259_v22  ;;  %11185 = vmatprep.subr.bf16.mxu1 %v17482_v8 }
 0x29c   : > { %11355 = vmatprep.subr.bf16.mxu0 %v17482_v8  ;;  %v2328_v30 = vrot.slane %v13245_v58, 2 }
 0x29d   : > { %v14194_v20 = vpop.f32.mrf.mxu0  ;;  %v14196_v0 = vpop.f32.mrf.mxu1  ;;  %11010 = vmatmul.mubr.bf16.gmra.mxu1 %v2327_v21 }
 0x29e   : > { %17581 = vst [vmem:[#allocation79_spill] sm:$0xff] %v14194_v20  ;;  %11013 = vmatprep.mubr.msk.bf16.mxu1 %vm12555_vm0, %v17482_v8  ;;  %v2329_v10 = vsel %vm2316_vm7, %v2326_v35, %v2328_v30 }
 0x29f   : > { %v10968_v18 = vpop.f32.mrf.mxu0  ;;  %v10815_v22 = vpop.f32.mrf.mxu1  ;;  %11356 = vmatpush3.bf16.msra.mxu0 %v12260_v44 }
 0x2a0   : > { %11445 = vmatprep.subr.bf16.mxu0 %v17482_v8 }
 0x2a1   : > { %v14201_v25 = vpop.f32.mrf.mxu0  ;;  %11270 = vmatmul.mubr.bf16.gmra.mxu0 %v14007_v9  ;;  %v14204_v24 = vpop.f32.mrf.mxu1 }
 0x2a2   : > { %17582 = vst [vmem:[#allocation80_spill] sm:$0xff] %v14201_v25  ;;  %11273 = vmatprep.mubr.msk.bf16.mxu0 %vm12555_vm0, %v17482_v8  ;;  %v2330_v25 = vrot.slane %v13318_v33, 2 }
 0x2a3   : > { %v10971_v21 = vpop.f32.mrf.mxu0  ;;  %v10816_v20 = vpop.f32.mrf.mxu1 }
 0x2a5   : > { %v14210_v18 = vpop.f32.mrf.mxu0  ;;  %v14212_v44 = vpop.f32.mrf.mxu1  ;;  %11014 = vmatmul.mubr.bf16.gmra.mxu1 %v2329_v10  ;;  %v2331_v10 = vsel %vm2316_vm7, %v2328_v30, %v2330_v25 }
 0x2a6   : > { %17583 = vst [vmem:[#allocation81_spill] sm:$0xff] %v14210_v18  ;;  %11017 = vmatprep.mubr.msk.bf16.mxu1 %vm12555_vm0, %v17482_v8 }
 0x2a7   : > { %v10972_v9 = vpop.f32.mrf.mxu0  ;;  %v10819_v22 = vpop.f32.mrf.mxu1 }
 0x2a9   : > { %v14217_v58 = vpop.f32.mrf.mxu0  ;;  %11274 = vmatmul.mubr.bf16.gmra.mxu0 %v14017_v60  ;;  %v14220_v21 = vpop.f32.mrf.mxu1 }
 0x2aa   : > { %17584 = vst [vmem:[#allocation82_spill] sm:$0xff] %v14217_v58  ;;  %11277 = vmatprep.mubr.msk.bf16.mxu0 %vm12555_vm0, %v17482_v8 }
 0x2ab   : > { %v10975_v35 = vpop.f32.mrf.mxu0  ;;  %v10820_v20 = vpop.f32.mrf.mxu1 }
 0x2ac   : > { %v2332_v35 = vrot.slane %v13299_v26, 2  ;;  %v2780_v26 = vshrl.u32 %v13164_v47, 16 }
 0x2ad   : > { %v14225_v18 = vpop.f32.mrf.mxu0  ;;  %v14227_v3 = vpop.f32.mrf.mxu1  ;;  %11018 = vmatmul.mubr.bf16.gmra.mxu1 %v2331_v10 }
 0x2ae   : > { %17585 = vst [vmem:[#allocation83_spill] sm:$0xff] %v14225_v18  ;;  %11021 = vmatprep.mubr.msk.bf16.mxu1 %vm12555_vm0, %v17482_v8  ;;  %v2333_v10 = vsel %vm2316_vm7, %v2330_v25, %v2332_v35  ;;  %v3452_v18 = vrot.slane %v13400_v45, 1  ;;  %v2334_v25 = vrot.slane %v13480_v36, 2 }
 0x2af   : > { %v10976_v9 = vpop.f32.mrf.mxu0  ;;  %v10839_v22 = vpop.f32.mrf.mxu1 }
 0x2b0   : > { %v2335_v36 = vsel %vm2316_vm7, %v2332_v35, %v2334_v25  ;;  %v3870_v35 = vrot.slane %v13625_v56, 2  ;;  %v3871_v25 = vrot.slane %v13628_v28, 3 }
 0x2b1   : > { %v14231_v60 = vpop.f32.mrf.mxu0  ;;  %11278 = vmatmul.mubr.bf16.gmra.mxu0 %v14036_v17  ;;  %v14234_v33 = vpop.f32.mrf.mxu1 }
 0x2b2   : > { %17586 = vst [vmem:[#allocation84_spill] sm:$0xff] %v14231_v60  ;;  %11281 = vmatprep.mubr.msk.bf16.mxu0 %vm12555_vm0, %v17482_v8  ;;  %v2783_v60 = vshll.u32 %v13164_v47, 16  ;;  %v2782_v47 = vrot.slane %v2780_v26, 3 }
 0x2b3   : > { %v11047_v30 = vpop.f32.mrf.mxu0  ;;  %v10840_v20 = vpop.f32.mrf.mxu1 }
 0x2b4   : > { %v3453_v30 = vsel %vm1860_vm6, %v14030_v15, %v3452_v18 }
 0x2b5   : > { %v14241_v58 = vpop.f32.mrf.mxu0  ;;  %v14243_v9 = vpop.f32.mrf.mxu1  ;;  %11022 = vmatmul.mubr.bf16.gmra.mxu1 %v2333_v10  ;;  %v2772_v10 = vshrl.u32 %v13143_v1, 16  ;;  %v2777_v1 = vrot.slane %v2775_v6, 4 }
 0x2b6   : > { %17587 = vst [vmem:[#allocation85_spill] sm:$0xff] %v14241_v58  ;;  %11025 = vmatprep.mubr.msk.bf16.mxu1 %vm12555_vm0, %v17482_v8 }
 0x2b7   : > { %v11048_v17 = vpop.f32.mrf.mxu0  ;;  %v10843_v22 = vpop.f32.mrf.mxu1  ;;  %v2774_v48 = vrot.slane %v2772_v10, 3  ;;  %v12261_v10 = vld [vmem:[%s17345_s2 + $0x238] sm:$0xff]  }
 0x2b8   : > { %v14260_v17 = vpack.c.bf16 %v13323_v2, %v13323_v2 }
 0x2b9   : > { %v14252_v20 = vpop.f32.mrf.mxu0  ;;  %11282 = vmatmul.mubr.bf16.gmra.mxu0 %v3453_v30  ;;  %v14254_v58 = vpop.f32.mrf.mxu1  ;;  %v2778_v6 = vor.u32 %v2777_v1, %v2774_v48 }
 0x2ba   : > { %17588 = vst [vmem:[#allocation86_spill] sm:$0xff] %v14252_v20  ;;  %17589 = vst [vmem:[#allocation87_spill] sm:$0xff] %v14260_v17  ;;  %11285 = vmatprep.mubr.msk.bf16.mxu0 %vm12555_vm0, %v17482_v8  ;;  %v2785_v20 = vrot.slane %v2783_v60, 4  ;;  %v3454_v34 = vrot.slane %v14260_v17, 1 }
 0x2bb   : > { %v11051_v22 = vpop.f32.mrf.mxu0  ;;  %v10844_v15 = vpop.f32.mrf.mxu1 }
 0x2bc   : > { %v3455_v22 = vsel %vm1860_vm6, %v3452_v18, %v3454_v34  ;;  %v2786_v15 = vor.u32 %v2785_v20, %v2782_v47  ;;  %v3872_v20 = vor.u32 %v3871_v25, %v3870_v35 }
 0x2bd   : > { %v14265_v30 = vpop.f32.mrf.mxu0  ;;  %v14267_v61 = vpop.f32.mrf.mxu1  ;;  %11026 = vmatmul.mubr.bf16.gmra.mxu1 %v2335_v36 }
 0x2be   : > { %17590 = vst [vmem:[#allocation88_spill] sm:$0xff] %v14265_v30  ;;  %11097 = vmatprep.mubr.msk.bf16.mxu1 %vm12555_vm0, %v17482_v8  ;;  %v2787_v18 = vsel %vm2770_vm4, %v2778_v6, %v2786_v15  ;;  %v3874_v6 = vrot.slane %v13631_v31, 2 }
 0x2bf   : > { %v11052_v2 = vpop.f32.mrf.mxu0  ;;  %v10847_v57 = vpop.f32.mrf.mxu1 }
 0x2c0   : > { %v3867_v2 = vrot.slane %v2780_v26, 2  ;;  %v3868_v57 = vrot.slane %v2783_v60, 3  ;;  %v12262_v26 = vld [vmem:[%s17345_s2 + $0x230] sm:$0xff]  }
 0x2c1   : > { %v14275_v30 = vpop.f32.mrf.mxu0  ;;  %11286 = vmatmul.mubr.bf16.gmra.mxu0 %v3455_v22  ;;  %v14277_v36 = vpop.f32.mrf.mxu1  ;;  %v2794_v22 = vrot.slane %v13628_v28, 4 }
 0x2c2   : > { %17591 = vst [vmem:[#allocation89_spill] sm:$0xff] %v14275_v30  ;;  %11357 = vmatprep.mubr.msk.bf16.mxu0 %vm12555_vm0, %v17482_v8  ;;  %v2791_v30 = vrot.slane %v13625_v56, 3  ;;  %v3869_v1 = vor.u32 %v3868_v57, %v3867_v2  ;;  %v12266_v56 = vld [vmem:[%s17345_s2 + $0x378] sm:$0xff]  }
 0x2c3   : > { %v11055_v47 = vpop.f32.mrf.mxu0  ;;  %v10848_v34 = vpop.f32.mrf.mxu1 }
 0x2c4   : > { %v3873_v28 = vsel %vm3866_vm5, %v3869_v1, %v3872_v20  ;;  %v2795_v25 = vor.u32 %v2794_v22, %v2791_v30  ;;  %v12263_v47 = vld [vmem:[%s17345_s2 + $0x228] sm:$0xff]   ;;  %v12268_v30 = vld [vmem:[%s17345_s2 + $0x370] sm:$0xff]  }
 0x2c5   : > { %v14287_v17 = vpop.f32.mrf.mxu0  ;;  %v14289_v48 = vpop.f32.mrf.mxu1  ;;  %11098 = vmatmul.mubr.bf16.vlgmr.msra.gmra.mxu1 %v2787_v18 }
 0x2c6   : > { %17592 = vst [vmem:[#allocation90_spill] sm:$0xff] %v14287_v17  ;;  %11186 = vmatpush3.bf16.msra.mxu1 %v12261_v10  ;;  %11101 = vmatprep.mubr.msk.bf16.mxu1 %vm12555_vm0, %v17482_v8  ;;  %v3875_v10 = vrot.slane %v13634_v49, 3  ;;  %v14317_v22 = vsel %vm2770_vm4, %v2786_v15, %v2795_v25  ;;  %v12264_v15 = vld [vmem:[%s17345_s2 + $0x220] sm:$0xff]  }
 0x2c7   : > { %v11056_v60 = vpop.f32.mrf.mxu0  ;;  %v10851_v35 = vpop.f32.mrf.mxu1  ;;  %11187 = vmatprep.subr.bf16.mxu1 %v17482_v8 }
 0x2c8   : > { %v3876_v1 = vor.u32 %v3875_v10, %v3874_v6  ;;  %v2803_v60 = vrot.slane %v13634_v49, 4  ;;  %v12269_v49 = vld [vmem:[%s17345_s2 + $0x368] sm:$0xff]  }
 0x2c9   : > { %v14303_v2 = vpop.f32.mrf.mxu0  ;;  %11358 = vmatmul.mubr.bf16.vlgmr.msra.gmra.mxu0 %v3873_v28  ;;  %v14305_v57 = vpop.f32.mrf.mxu1 }
 0x2ca   : > { %17593 = vst [vmem:[#allocation91_spill] sm:$0xff] %v14303_v2  ;;  %11188 = vmatpush3.bf16.msra.mxu1 %v12262_v26  ;;  %11361 = vmatprep.mubr.msk.bf16.mxu0 %vm12555_vm0, %v17482_v8  ;;  %v2800_v26 = vrot.slane %v13631_v31, 3  ;;  %v14337_v6 = vsel %vm3866_vm5, %v3872_v20, %v3876_v1  ;;  %v12265_v20 = vld [vmem:[%s17345_s2 + $0x218] sm:$0xff]  }
 0x2cb   : > { %v11059_v34 = vpop.f32.mrf.mxu0  ;;  %v10852_v18 = vpop.f32.mrf.mxu1  ;;  %11189 = vmatprep.subr.bf16.mxu1 %v17482_v8  ;;  %11446 = vmatpush3.bf16.msra.mxu0 %v12266_v56  ;;  %17595 = vst [vmem:[#allocation93_spill] sm:$0xff] %v14337_v6 }
 0x2cc   : > { %11447 = vmatprep.subr.bf16.mxu0 %v17482_v8  ;;  %v2804_v10 = vor.u32 %v2803_v60, %v2800_v26  ;;  %v3878_v34 = vrot.slane %v13642_v5, 2  ;;  %v12271_v60 = vld [vmem:[%s17345_s2 + $0x360] sm:$0xff]  }
 0x2cd   : > { %v14322_v35 = vpop.f32.mrf.mxu0  ;;  %v14324_v28 = vpop.f32.mrf.mxu1  ;;  %11102 = vmatmul.mubr.bf16.gmra.mxu1 %v14317_v22 }
 0x2ce   : > { %17594 = vst [vmem:[#allocation92_spill] sm:$0xff] %v14322_v35  ;;  %11105 = vmatprep.mubr.msk.bf16.mxu1 %vm12555_vm0, %v17482_v8  ;;  %11190 = vmatpush3.bf16.msra.mxu1 %v12263_v47  ;;  %v3879_v47 = vrot.slane %v13645_v14, 3 }
 0x2cf   : > { %v11060_v56 = vpop.f32.mrf.mxu0  ;;  %v10855_v31 = vpop.f32.mrf.mxu1  ;;  %11191 = vmatprep.subr.bf16.mxu1 %v17482_v8  ;;  %11448 = vmatpush3.bf16.msra.mxu0 %v12268_v30 }
 0x2d0   : > { %11449 = vmatprep.subr.bf16.mxu0 %v17482_v8  ;;  %v14357_v31 = vsel %vm2770_vm4, %v2795_v25, %v2804_v10  ;;  %v12267_v25 = vld [vmem:[%s17345_s2 + $0x210] sm:$0xff]  }
 0x2d1   : > { %v14342_v18 = vpop.f32.mrf.mxu0  ;;  %11362 = vmatmul.mubr.bf16.gmra.mxu0 %v14337_v6  ;;  %v14345_v56 = vpop.f32.mrf.mxu1  ;;  %v3880_v6 = vor.u32 %v3879_v47, %v3878_v34 }
 0x2d2   : > { %17596 = vst [vmem:[#allocation94_spill] sm:$0xff] %v14342_v18  ;;  %11365 = vmatprep.mubr.msk.bf16.mxu0 %vm12555_vm0, %v17482_v8  ;;  %11192 = vmatpush3.bf16.msra.mxu1 %v12264_v15  ;;  %v2809_v18 = vrot.slane %v13642_v5, 3  ;;  %v2812_v15 = vrot.slane %v13645_v14, 4  ;;  %v12272_v14 = vld [vmem:[%s17345_s2 + $0x358] sm:$0xff]  }
 0x2d3   : > { %v11063_v30 = vpop.f32.mrf.mxu0  ;;  %v10856_v26 = vpop.f32.mrf.mxu1  ;;  %11193 = vmatprep.subr.bf16.mxu1 %v17482_v8  ;;  %11450 = vmatpush3.bf16.msra.mxu0 %v12269_v49  ;;  %v14377_v34 = vsel %vm3866_vm5, %v3876_v1, %v3880_v6  ;;  %v12270_v1 = vld [vmem:[%s17345_s2 + $0x208] sm:$0xff]  }
 0x2d4   : > { %11451 = vmatprep.subr.bf16.mxu0 %v17482_v8  ;;  %17598 = vst [vmem:[#allocation96_spill] sm:$0xff] %v14377_v34  ;;  %v2813_v47 = vor.u32 %v2812_v15, %v2809_v18  ;;  %v3882_v26 = vrot.slane %v13654_v12, 2  ;;  %v12274_v15 = vld [vmem:[%s17345_s2 + $0x350] sm:$0xff]  }
 0x2d5   : > { %v14362_v35 = vpop.f32.mrf.mxu0  ;;  %v14364_v30 = vpop.f32.mrf.mxu1  ;;  %11106 = vmatmul.mubr.bf16.gmra.mxu1 %v14357_v31 }
 0x2d6   : > { %17597 = vst [vmem:[#allocation95_spill] sm:$0xff] %v14362_v35  ;;  %11109 = vmatprep.mubr.msk.bf16.mxu1 %vm12555_vm0, %v17482_v8  ;;  %11194 = vmatpush3.bf16.msra.mxu1 %v12265_v20  ;;  %v3883_v20 = vrot.slane %v13657_v43, 3 }
 0x2d7   : > { %v11064_v49 = vpop.f32.mrf.mxu0  ;;  %v10859_v5 = vpop.f32.mrf.mxu1  ;;  %11195 = vmatprep.subr.bf16.mxu1 %v17482_v8  ;;  %11452 = vmatpush3.bf16.msra.mxu0 %v12271_v60 }
 0x2d8   : > { %11453 = vmatprep.subr.bf16.mxu0 %v17482_v8  ;;  %v14397_v5 = vsel %vm2770_vm4, %v2804_v10, %v2813_v47  ;;  %v12273_v10 = vld [vmem:[%s17345_s2 + $0x200] sm:$0xff]  }
 0x2d9   : > { %v14382_v35 = vpop.f32.mrf.mxu0  ;;  %11366 = vmatmul.mubr.bf16.gmra.mxu0 %v14377_v34  ;;  %v14385_v49 = vpop.f32.mrf.mxu1  ;;  %v3884_v34 = vor.u32 %v3883_v20, %v3882_v26 }
 0x2da   : > { %17599 = vst [vmem:[#allocation97_spill] sm:$0xff] %v14382_v35  ;;  %11369 = vmatprep.mubr.msk.bf16.mxu0 %vm12555_vm0, %v17482_v8  ;;  %11196 = vmatpush3.bf16.msra.mxu1 %v12267_v25  ;;  %v2818_v35 = vrot.slane %v13654_v12, 3  ;;  %v2821_v25 = vrot.slane %v13657_v43, 4  ;;  %v12275_v43 = vld [vmem:[%s17345_s2 + $0x348] sm:$0xff]  }
 0x2db   : > { %v11067_v18 = vpop.f32.mrf.mxu0  ;;  %v10860_v60 = vpop.f32.mrf.mxu1  ;;  %11197 = vmatprep.subr.bf16.mxu1 %v17482_v8  ;;  %11454 = vmatpush3.bf16.msra.mxu0 %v12272_v14  ;;  %v14417_v26 = vsel %vm3866_vm5, %v3880_v6, %v3884_v34 }
 0x2dc   : > { %11455 = vmatprep.subr.bf16.mxu0 %v17482_v8  ;;  %17601 = vst [vmem:[#allocation99_spill] sm:$0xff] %v14417_v26  ;;  %v2822_v20 = vor.u32 %v2821_v25, %v2818_v35  ;;  %v3886_v60 = vrot.slane %v13660_v37, 2  ;;  %v12276_v35 = vld [vmem:[%s17345_s2 + $0x340] sm:$0xff]  }
 0x2dd   : > { %v14402_v2 = vpop.f32.mrf.mxu0  ;;  %v14404_v18 = vpop.f32.mrf.mxu1  ;;  %11110 = vmatmul.mubr.bf16.gmra.mxu1 %v14397_v5 }
 0x2de   : > { %17600 = vst [vmem:[#allocation98_spill] sm:$0xff] %v14402_v2  ;;  %11113 = vmatprep.mubr.msk.bf16.mxu1 %vm12555_vm0, %v17482_v8  ;;  %11198 = vmatpush3.bf16.msra.mxu1 %v12270_v1  ;;  %v3887_v1 = vrot.slane %v13665_v39, 3  ;;  %v14434_v25 = vsel %vm2770_vm4, %v2813_v47, %v2822_v20 }
 0x2df   : > { %v11068_v14 = vpop.f32.mrf.mxu0  ;;  %v10863_v12 = vpop.f32.mrf.mxu1  ;;  %11199 = vmatprep.subr.bf16.mxu1 %v17482_v8  ;;  %11456 = vmatpush3.bf16.msra.mxu0 %v12274_v15 }
 0x2e0   : > { %11457 = vmatprep.subr.bf16.mxu0 %v17482_v8  ;;  %v3888_v12 = vor.u32 %v3887_v1, %v3886_v60  ;;  %v3891_v60 = vrot.slane %v13679_v59, 3 }
 0x2e1   : > { %v14422_v2 = vpop.f32.mrf.mxu0  ;;  %11370 = vmatmul.mubr.bf16.gmra.mxu0 %v14417_v26  ;;  %v14425_v14 = vpop.f32.mrf.mxu1  ;;  %v2827_v26 = vrot.slane %v13660_v37, 3 }
 0x2e2   : > { %17602 = vst [vmem:[#allocation100_spill] sm:$0xff] %v14422_v2  ;;  %11373 = vmatprep.mubr.msk.bf16.mxu0 %vm12555_vm0, %v17482_v8  ;;  %11200 = vmatpush3.bf16.msra.mxu1 %v12273_v10  ;;  %v2830_v2 = vrot.slane %v13665_v39, 4  ;;  %v14447_v47 = vsel %vm3866_vm5, %v3884_v34, %v3888_v12  ;;  %v3890_v39 = vrot.slane %v13668_v51, 2 }
 0x2e3   : > { %v11071_v15 = vpop.f32.mrf.mxu0  ;;  %v10864_v6 = vpop.f32.mrf.mxu1  ;;  %11458 = vmatpush3.bf16.msra.mxu0 %v12275_v43  ;;  %11289 = vmatprep.subr.bf16.mxu1 %v17482_v8  ;;  %17604 = vst [vmem:[#allocation102_spill] sm:$0xff] %v14447_v47 }
 0x2e4   : > { %11459 = vmatprep.subr.bf16.mxu0 %v17482_v8  ;;  %v2831_v37 = vor.u32 %v2830_v2, %v2827_v26  ;;  %v3892_v2 = vor.u32 %v3891_v60, %v3890_v39  ;;  %v2836_v26 = vrot.slane %v13668_v51, 3  ;;  %v3894_v39 = vrot.slane %v13503_v62, 2 }
 0x2e5   : > { %v14439_v10 = vpop.f32.mrf.mxu0  ;;  %v14441_v15 = vpop.f32.mrf.mxu1  ;;  %11114 = vmatmul.mubr.bf16.gmra.mxu1 %v14434_v25  ;;  %v3895_v51 = vrot.slane %v13511_v29, 3 }
 0x2e6   : > { %17603 = vst [vmem:[#allocation101_spill] sm:$0xff] %v14439_v10  ;;  %11117 = vmatprep.mubr.msk.bf16.mxu1 %vm12555_vm0, %v17482_v8  ;;  %v14460_v34 = vsel %vm2770_vm4, %v2822_v20, %v2831_v37 }
 0x2e7   : > { %v11072_v43 = vpop.f32.mrf.mxu0  ;;  %v10867_v6 = vpop.f32.mrf.mxu1  ;;  %11460 = vmatpush3.bf16.msra.mxu0 %v12276_v35  ;;  %v3896_v62 = vor.u32 %v3895_v51, %v3894_v39 }
 0x2e8   : > { %11549 = vmatprep.subr.bf16.mxu0 %v17482_v8  ;;  %v2839_v6 = vrot.slane %v13679_v59, 4 }
 0x2e9   : > { %v14452_v1 = vpop.f32.mrf.mxu0  ;;  %11374 = vmatmul.mubr.bf16.gmra.mxu0 %v14447_v47  ;;  %v14455_v10 = vpop.f32.mrf.mxu1 }
 0x2ea   : > { %17605 = vst [vmem:[#allocation103_spill] sm:$0xff] %v14452_v1  ;;  %11377 = vmatprep.mubr.msk.bf16.mxu0 %vm12555_vm0, %v17482_v8  ;;  %v2840_v20 = vor.u32 %v2839_v6, %v2836_v26 }
 0x2eb   : > { %v11075_v35 = vpop.f32.mrf.mxu0  ;;  %v10868_v43 = vpop.f32.mrf.mxu1 }
 0x2ec   : > { %v14472_v43 = vsel %vm3866_vm5, %v3888_v12, %v3892_v2  ;;  %v1763_v12 = vadd.f32 %v14227_v3, %v14019_v7  ;;  %v14486_v26 = vsel %vm2770_vm4, %v2831_v37, %v2840_v20  ;;  %v14498_v7 = vsel %vm3866_vm5, %v3892_v2, %v3896_v62 }
 0x2ed   : > { %v14464_v17 = vpop.f32.mrf.mxu0  ;;  %v14466_v1 = vpop.f32.mrf.mxu1  ;;  %11118 = vmatmul.mubr.bf16.gmra.mxu1 %v14460_v34  ;;  %17607 = vst [vmem:[#allocation105_spill] sm:$0xff] %v14472_v43  ;;  %17608 = vst [vmem:[#allocation106_spill] sm:$0xff] %v14498_v7 }
 0x2ee   : > { %17606 = vst [vmem:[#allocation104_spill] sm:$0xff] %v14464_v17  ;;  %11121 = vmatprep.mubr.msk.bf16.mxu1 %vm12555_vm0, %v17482_v8 }
 0x2ef   : > { %v11076_v47 = vpop.f32.mrf.mxu0  ;;  %v10871_v35 = vpop.f32.mrf.mxu1 }
 0x2f1   : > { %v14476_v59 = vpop.f32.mrf.mxu0  ;;  %11378 = vmatmul.mubr.bf16.gmra.mxu0 %v14472_v43  ;;  %v14479_v60 = vpop.f32.mrf.mxu1 }
 0x2f2   : > { %11381 = vmatprep.mubr.msk.bf16.mxu0 %vm12555_vm0, %v17482_v8 }
 0x2f3   : > { %v11079_v17 = vpop.f32.mrf.mxu0  ;;  %v10872_v47 = vpop.f32.mrf.mxu1 }
 0x2f4   : > { %v1766_v47 = vadd.f32 %v14234_v33, %v14027_v41  ;;  %v14511_v33 = vsel %vm2770_vm4, %v2840_v20, %v13547_v27 }
 0x2f5   : > { %v14488_v6 = vpop.f32.mrf.mxu0  ;;  %v1971_v29 = vpop.f32.mrf.mxu1  ;;  %11122 = vmatmul.mubr.bf16.gmra.mxu1 %v14486_v26 }
 0x2f6   : > { %v14491_v35 = vadd.f32 %v1971_v29, %v1763_v12  ;;  %11125 = vmatprep.mubr.msk.bf16.mxu1 %vm12555_vm0, %v17482_v8 }
 0x2f7   : > { %v11080_v43 = vpop.f32.mrf.mxu0  ;;  %v10891_v17 = vpop.f32.mrf.mxu1 }
 0x2f8   : > { %v1771_v43 = vadd.f32 %v14243_v9, %v14040_v63  ;;  %v14524_v63 = vsel %vm3866_vm5, %v3896_v62, %v13829_v46  ;;  %v1779_v62 = vadd.f32 %v14267_v61, %v14057_v23 }
 0x2f9   : > { %v14500_v3 = vpop.f32.mrf.mxu0  ;;  %11382 = vmatmul.mubr.bf16.gmra.mxu0 %v14498_v7  ;;  %v1974_v37 = vpop.f32.mrf.mxu1  ;;  %17609 = vst [vmem:[#allocation107_spill] sm:$0xff] %v14524_v63 }
 0x2fa   : > { %v14503_v39 = vadd.f32 %v1974_v37, %v1766_v47  ;;  %11385 = vmatprep.mubr.msk.bf16.mxu0 %vm12555_vm0, %v17482_v8  ;;  %v1774_v37 = vadd.f32 %v14254_v58, %v14049_v4 }
 0x2fb   : > { %v11151_v51 = vpop.f32.mrf.mxu0  ;;  %v10892_v12 = vpop.f32.mrf.mxu1 }
 0x2fc   : > { %v17610_v51 = vshrl.u32 %v13515_v55, 16 }
 0x2fd   : > { %v14513_v41 = vpop.f32.mrf.mxu0  ;;  %v1979_v2 = vpop.f32.mrf.mxu1  ;;  %11126 = vmatmul.mubr.bf16.gmra.mxu1 %v14511_v33 }
 0x2fe   : > { %v14516_v29 = vadd.f32 %v1979_v2, %v1771_v43  ;;  %11129 = vmatprep.mubr.msk.bf16.mxu1 %vm12555_vm0, %v17482_v8  ;;  %v3910_v12 = vrot.slane %v17610_v51, 2  ;;  %v17611_v43 = vshll.u32 %v13515_v55, 16 }
 0x2ff   : > { %v11152_v17 = vpop.f32.mrf.mxu0  ;;  %v10895_v47 = vpop.f32.mrf.mxu1 }
 0x300   : > { %v3913_v58 = vrot.slane %v17611_v43, 3  ;;  %v1782_v43 = vadd.f32 %v14277_v36, %v14065_v42  ;;  %v1787_v42 = vadd.f32 %v14289_v48, %v14076_v19  ;;  %v12282_v19 = vld [vmem:[%s17345_s2 + $0x3f8] sm:$0xff]  }
 0x301   : > { %v14526_v27 = vpop.f32.mrf.mxu0  ;;  %11386 = vmatmul.mubr.bf16.gmra.mxu0 %v14524_v63  ;;  %v1982_v9 = vpop.f32.mrf.mxu1 }
 0x302   : > { %v14529_v20 = vadd.f32 %v1982_v9, %v1774_v37  ;;  %11389 = vmatprep.mubr.msk.bf16.mxu0 %vm12555_vm0, %v17482_v8  ;;  %v3914_v9 = vor.u32 %v3913_v58, %v3910_v12 }
 0x303   : > { %v11155_v4 = vpop.f32.mrf.mxu0  ;;  %v10896_v2 = vpop.f32.mrf.mxu1 }
 0x304   : > { %v3915_v4 = vsel %vm3866_vm5, %v13829_v46, %v3914_v9 }
 0x305   : > { %v14539_v17 = vpop.f32.mrf.mxu0  ;;  %v1987_v47 = vpop.f32.mrf.mxu1  ;;  %11130 = vmatmul.mubr.bf16.gmra.mxu1 %v13558_v53  ;;  %v12277_v53 = vld [vmem:[%s17345_s2 + $0x2b8] sm:$0xff]  }
 0x306   : > { %v14542_v37 = vadd.f32 %v1987_v47, %v1779_v62  ;;  %11201 = vmatprep.mubr.msk.bf16.mxu1 %vm12555_vm0, %v17482_v8  ;;  %v12278_v62 = vld [vmem:[%s17345_s2 + $0x2b0] sm:$0xff]  }
 0x307   : > { %v11156_v51 = vpop.f32.mrf.mxu0  ;;  %v10899_v63 = vpop.f32.mrf.mxu1 }
 0x309   : > { %v14550_v61 = vpop.f32.mrf.mxu0  ;;  %11390 = vmatmul.mubr.bf16.gmra.mxu0 %v3915_v4  ;;  %v1990_v23 = vpop.f32.mrf.mxu1  ;;  %v12279_v4 = vld [vmem:[%s17345_s2 + $0x2a8] sm:$0xff]  }
 0x30a   : > { %v14552_v2 = vadd.f32 %v1990_v23, %v1782_v43  ;;  %11461 = vmatprep.mubr.msk.bf16.mxu0 %vm12555_vm0, %v17482_v8 }
 0x30b   : > { %v11159_v63 = vpop.f32.mrf.mxu0  ;;  %v10900_v12 = vpop.f32.mrf.mxu1 }
 0x30c   : > { %v17612_v12 = vld [vmem:[#allocation20_spill] sm:$0xff] }
 0x30d   : > { %v14561_v36 = vpop.f32.mrf.mxu0  ;;  %v1995_v46 = vpop.f32.mrf.mxu1  ;;  %11202 = vmatmul.mubr.bf16.vlgmr.msra.gmra.mxu1 %v13236_v11  ;;  %v1790_v11 = vadd.f32 %v14305_v57, %v14090_v54  ;;  %v12284_v54 = vld [vmem:[%s17345_s2 + $0x3f0] sm:$0xff]   ;;  %v1795_v57 = vadd.f32 %v14324_v28, %v14106_v32  ;;  %v12285_v32 = vld [vmem:[%s17345_s2 + $0x3e8] sm:$0xff]   ;;  %v1798_v28 = vadd.f32 %v14345_v56, %v14122_v50  ;;  %v12287_v50 = vld [vmem:[%s17345_s2 + $0x3e0] sm:$0xff]   ;;  %v1803_v56 = vadd.f32 %v14364_v30, %v14137_v52 }
 0x30e   : > { %v14564_v58 = vadd.f32 %v1995_v46, %v1787_v42  ;;  %11290 = vmatpush3.bf16.msra.mxu1 %v12277_v53  ;;  %11205 = vmatprep.mubr.msk.bf16.mxu1 %vm12555_vm0, %v17482_v8  ;;  %v12280_v46 = vld [vmem:[%s17345_s2 + $0x2a0] sm:$0xff]   ;;  %v12288_v52 = vld [vmem:[%s17345_s2 + $0x3d8] sm:$0xff]   ;;  %v1806_v30 = vadd.f32 %v14385_v49, %v14152_v16  ;;  %v12290_v16 = vld [vmem:[%s17345_s2 + $0x3d0] sm:$0xff]   ;;  %v1811_v49 = vadd.f32 %v14404_v18, %v14168_v38 }
 0x30f   : > { %v11160_v47 = vpop.f32.mrf.mxu0  ;;  %v10903_v9 = vpop.f32.mrf.mxu1  ;;  %11291 = vmatprep.subr.bf16.mxu1 %v17482_v8  ;;  %v12291_v38 = vld [vmem:[%s17345_s2 + $0x3c8] sm:$0xff]   ;;  %v1814_v18 = vadd.f32 %v14425_v14, %v14184_v13  ;;  %v12292_v13 = vld [vmem:[%s17345_s2 + $0x3c0] sm:$0xff]   ;;  %v1819_v14 = vadd.f32 %v14441_v15, %v14196_v0 }
 0x311   : > { %v14577_v48 = vpop.f32.mrf.mxu0  ;;  %11462 = vmatmul.mubr.bf16.vlgmr.msra.gmra.mxu0 %v14317_v22  ;;  %v1998_v51 = vpop.f32.mrf.mxu1 }
 0x312   : > { %v14580_v43 = vadd.f32 %v1998_v51, %v1790_v11  ;;  %11292 = vmatpush3.bf16.msra.mxu1 %v12278_v62  ;;  %11465 = vmatprep.mubr.msk.bf16.mxu0 %vm12555_vm0, %v17482_v8  ;;  %v12281_v51 = vld [vmem:[%s17345_s2 + $0x298] sm:$0xff]  }
 0x313   : > { %v11163_v23 = vpop.f32.mrf.mxu0  ;;  %v10904_v53 = vpop.f32.mrf.mxu1  ;;  %11293 = vmatprep.subr.bf16.mxu1 %v17482_v8  ;;  %11550 = vmatpush3.bf16.msra.mxu0 %v12282_v19 }
 0x314   : > { %11551 = vmatprep.subr.bf16.mxu0 %v17482_v8 }
 0x315   : > { %v14594_v22 = vpop.f32.mrf.mxu0  ;;  %v2003_v63 = vpop.f32.mrf.mxu1  ;;  %11206 = vmatmul.mubr.bf16.gmra.mxu1 %v17612_v12 }
 0x316   : > { %v14597_v42 = vadd.f32 %v2003_v63, %v1795_v57  ;;  %11209 = vmatprep.mubr.msk.bf16.mxu1 %vm12555_vm0, %v17482_v8  ;;  %11294 = vmatpush3.bf16.msra.mxu1 %v12279_v4  ;;  %v12283_v63 = vld [vmem:[%s17345_s2 + $0x290] sm:$0xff]  }
 0x317   : > { %v11164_v62 = vpop.f32.mrf.mxu0  ;;  %v10907_v47 = vpop.f32.mrf.mxu1  ;;  %11295 = vmatprep.subr.bf16.mxu1 %v17482_v8  ;;  %11552 = vmatpush3.bf16.msra.mxu0 %v12284_v54  ;;  %v17613_v54 = vld [vmem:[#allocation23_spill] sm:$0xff] }
 0x318   : > { %11553 = vmatprep.subr.bf16.mxu0 %v17482_v8 }
 0x319   : > { %v14611_v9 = vpop.f32.mrf.mxu0  ;;  %11466 = vmatmul.mubr.bf16.gmra.mxu0 %v14357_v31  ;;  %v2006_v19 = vpop.f32.mrf.mxu1 }
 0x31a   : > { %v14614_v11 = vadd.f32 %v2006_v19, %v1798_v28  ;;  %11469 = vmatprep.mubr.msk.bf16.mxu0 %vm12555_vm0, %v17482_v8  ;;  %11296 = vmatpush3.bf16.msra.mxu1 %v12280_v46  ;;  %v12286_v28 = vld [vmem:[%s17345_s2 + $0x288] sm:$0xff]  }
 0x31b   : > { %v11167_v4 = vpop.f32.mrf.mxu0  ;;  %v10908_v23 = vpop.f32.mrf.mxu1  ;;  %11297 = vmatprep.subr.bf16.mxu1 %v17482_v8  ;;  %11554 = vmatpush3.bf16.msra.mxu0 %v12285_v32 }
 0x31c   : > { %11555 = vmatprep.subr.bf16.mxu0 %v17482_v8  ;;  %v17614_v23 = vld [vmem:[#allocation15_spill] sm:$0xff] }
 0x31d   : > { %v14628_v31 = vpop.f32.mrf.mxu0  ;;  %v2011_v53 = vpop.f32.mrf.mxu1  ;;  %11210 = vmatmul.mubr.bf16.gmra.mxu1 %v17613_v54 }
 0x31e   : > { %v14631_v57 = vadd.f32 %v2011_v53, %v1803_v56  ;;  %11213 = vmatprep.mubr.msk.bf16.mxu1 %vm12555_vm0, %v17482_v8  ;;  %11298 = vmatpush3.bf16.msra.mxu1 %v12281_v51  ;;  %v12289_v56 = vld [vmem:[%s17345_s2 + $0x280] sm:$0xff]  }
 0x31f   : > { %v11168_v12 = vpop.f32.mrf.mxu0  ;;  %v10911_v46 = vpop.f32.mrf.mxu1  ;;  %11299 = vmatprep.subr.bf16.mxu1 %v17482_v8  ;;  %11556 = vmatpush3.bf16.msra.mxu0 %v12287_v50 }
 0x320   : > { %11557 = vmatprep.subr.bf16.mxu0 %v17482_v8 }
 0x321   : > { %v14645_v62 = vpop.f32.mrf.mxu0  ;;  %11470 = vmatmul.mubr.bf16.gmra.mxu0 %v14397_v5  ;;  %v2014_v47 = vpop.f32.mrf.mxu1 }
 0x322   : > { %v14648_v32 = vadd.f32 %v2014_v47, %v1806_v30  ;;  %11473 = vmatprep.mubr.msk.bf16.mxu0 %vm12555_vm0, %v17482_v8  ;;  %11300 = vmatpush3.bf16.msra.mxu1 %v12283_v63 }
 0x323   : > { %v11171_v19 = vpop.f32.mrf.mxu0  ;;  %v10912_v51 = vpop.f32.mrf.mxu1  ;;  %11301 = vmatprep.subr.bf16.mxu1 %v17482_v8  ;;  %11558 = vmatpush3.bf16.msra.mxu0 %v12288_v52 }
 0x324   : > { %11559 = vmatprep.subr.bf16.mxu0 %v17482_v8 }
 0x325   : > { %v14662_v5 = vpop.f32.mrf.mxu0  ;;  %v2019_v4 = vpop.f32.mrf.mxu1  ;;  %11214 = vmatmul.mubr.bf16.gmra.mxu1 %v17614_v23 }
 0x326   : > { %v14665_v50 = vadd.f32 %v2019_v4, %v1811_v49  ;;  %11217 = vmatprep.mubr.msk.bf16.mxu1 %vm12555_vm0, %v17482_v8  ;;  %11302 = vmatpush3.bf16.msra.mxu1 %v12286_v28  ;;  %v17615_v28 = vld [vmem:[#allocation24_spill] sm:$0xff]  ;;  %v1822_v49 = vadd.f32 %v14455_v10, %v14204_v24  ;;  %v17616_v10 = vld [vmem:[#allocation25_spill] sm:$0xff] }
 0x327   : > { %v11172_v53 = vpop.f32.mrf.mxu0  ;;  %v10915_v54 = vpop.f32.mrf.mxu1  ;;  %11303 = vmatprep.subr.bf16.mxu1 %v17482_v8  ;;  %11560 = vmatpush3.bf16.msra.mxu0 %v12290_v16 }
 0x328   : > { %11561 = vmatprep.subr.bf16.mxu0 %v17482_v8  ;;  %v1827_v53 = vadd.f32 %v14466_v1, %v14212_v44 }
 0x329   : > { %v14679_v63 = vpop.f32.mrf.mxu0  ;;  %11474 = vmatmul.mubr.bf16.gmra.mxu0 %v14434_v25  ;;  %v2022_v12 = vpop.f32.mrf.mxu1 }
 0x32a   : > { %v14682_v46 = vadd.f32 %v2022_v12, %v1814_v18  ;;  %11477 = vmatprep.mubr.msk.bf16.mxu0 %vm12555_vm0, %v17482_v8  ;;  %11304 = vmatpush3.bf16.msra.mxu1 %v12289_v56  ;;  %v1830_v12 = vadd.f32 %v14479_v60, %v14220_v21  ;;  %v17617_v60 = vld [vmem:[#allocation26_spill] sm:$0xff] }
 0x32b   : > { %v11175_v52 = vpop.f32.mrf.mxu0  ;;  %v10916_v30 = vpop.f32.mrf.mxu1  ;;  %11562 = vmatpush3.bf16.msra.mxu0 %v12291_v38  ;;  %11393 = vmatprep.subr.bf16.mxu1 %v17482_v8 }
 0x32c   : > { %11563 = vmatprep.subr.bf16.mxu0 %v17482_v8 }
 0x32d   : > { %v14693_v25 = vpop.f32.mrf.mxu0  ;;  %v2027_v47 = vpop.f32.mrf.mxu1  ;;  %11218 = vmatmul.mubr.bf16.gmra.mxu1 %v17615_v28 }
 0x32e   : > { %v14696_v19 = vadd.f32 %v2027_v47, %v1819_v14  ;;  %11221 = vmatprep.mubr.msk.bf16.mxu1 %vm12555_vm0, %v17482_v8  ;;  %v2281_v14 = vadd.f32 %v14024_v40, %v14491_v35  ;;  %v3248_v47 = vshll.u32 %v13400_v45, 16 }
 0x32f   : > { %v11176_v51 = vpop.f32.mrf.mxu0  ;;  %v10919_v16 = vpop.f32.mrf.mxu1  ;;  %11564 = vmatpush3.bf16.msra.mxu0 %v12292_v13 }
 0x330   : > { %11653 = vmatprep.subr.bf16.mxu0 %v17482_v8 }
 0x331   : > { %v14703_v0 = vpop.f32.mrf.mxu0  ;;  %11478 = vmatmul.mubr.bf16.gmra.mxu0 %v14460_v34  ;;  %v2030_v15 = vpop.f32.mrf.mxu1 }
 0x332   : > { %v14706_v4 = vadd.f32 %v2030_v15, %v1822_v49  ;;  %11481 = vmatprep.mubr.msk.bf16.mxu0 %vm12555_vm0, %v17482_v8  ;;  %v17618_v49 = vld [vmem:[#allocation67_spill] sm:$0xff] }
 0x333   : > { %v11179_v23 = vpop.f32.mrf.mxu0  ;;  %v10920_v56 = vpop.f32.mrf.mxu1  ;;  %v2282_v15 = vadd.f32 %v17618_v49, %v14503_v39  ;;  %v17624_v49 = vld [vmem:[#allocation29_spill] sm:$0xff] }
 0x334   : > { %v3250_v23 = vrot.slane %v3248_v47, 1 }
 0x335   : > { %v14712_v54 = vpop.f32.mrf.mxu0  ;;  %v2035_v24 = vpop.f32.mrf.mxu1  ;;  %11222 = vmatmul.mubr.bf16.gmra.mxu1 %v17616_v10  ;;  %v17619_v10 = vld [vmem:[#allocation68_spill] sm:$0xff] }
 0x336   : > { %v14715_v38 = vadd.f32 %v2035_v24, %v1827_v53  ;;  %11225 = vmatprep.mubr.msk.bf16.mxu1 %vm12555_vm0, %v17482_v8 }
 0x337   : > { %v11180_v34 = vpop.f32.mrf.mxu0  ;;  %v10923_v18 = vpop.f32.mrf.mxu1 }
 0x338   : > { %v2283_v34 = vadd.f32 %v17619_v10, %v14516_v29  ;;  %v17620_v18 = vld [vmem:[#allocation27_spill] sm:$0xff]  ;;  %v17622_v29 = vld [vmem:[#allocation69_spill] sm:$0xff] }
 0x339   : > { %v14721_v52 = vpop.f32.mrf.mxu0  ;;  %11482 = vmatmul.mubr.bf16.gmra.mxu0 %v14486_v26  ;;  %v2038_v44 = vpop.f32.mrf.mxu1 }
 0x33a   : > { %v14724_v1 = vadd.f32 %v2038_v44, %v1830_v12  ;;  %11485 = vmatprep.mubr.msk.bf16.mxu0 %vm12555_vm0, %v17482_v8  ;;  %v3251_v12 = vsel %vm1441_vm1, %v17620_v18, %v3250_v23 }
 0x33b   : > { %v11183_v30 = vpop.f32.mrf.mxu0  ;;  %v10924_v13 = vpop.f32.mrf.mxu1 }
 0x33c   : > { %v17621_v13 = vld [vmem:[#allocation87_spill] sm:$0xff] }
 0x33d   : > { %v14731_v28 = vpop.f32.mrf.mxu0  ;;  %v2427_v21 = vpop.f32.mrf.mxu1  ;;  %11226 = vmatmul.mubr.bf16.gmra.mxu1 %v17617_v60  ;;  %v2284_v60 = vadd.f32 %v17622_v29, %v14529_v20 }
 0x33e   : > { %v14734_v51 = vadd.f32 %v2427_v21, %v2281_v14  ;;  %11229 = vmatprep.mubr.msk.bf16.mxu1 %vm12555_vm0, %v17482_v8  ;;  %v3256_v14 = vshll.u32 %v17621_v13, 16 }
 0x33f   : > { %v11184_v26 = vpop.f32.mrf.mxu0  ;;  %v10995_v16 = vpop.f32.mrf.mxu1 }
 0x341   : > { %v14740_v56 = vpop.f32.mrf.mxu0  ;;  %11486 = vmatmul.mubr.bf16.gmra.mxu0 %v14511_v33  ;;  %v2430_v40 = vpop.f32.mrf.mxu1  ;;  %v3252_v33 = vshrl.u32 %v13400_v45, 16 }
 0x342   : > { %v14743_v35 = vadd.f32 %v2430_v40, %v2282_v15  ;;  %11489 = vmatprep.mubr.msk.bf16.mxu0 %vm12555_vm0, %v17482_v8 }
 0x343   : > { %v11255_v53 = vpop.f32.mrf.mxu0  ;;  %v10996_v24 = vpop.f32.mrf.mxu1  ;;  %v3254_v26 = vor.u32 %v3252_v33, %v3250_v23 }
 0x344   : > { %v3258_v53 = vrot.slane %v3256_v14, 1  ;;  %v17627_v14 = vld [vmem:[#allocation71_spill] sm:$0xff] }
 0x345   : > { %v14751_v39 = vpop.f32.mrf.mxu0  ;;  %v2435_v44 = vpop.f32.mrf.mxu1  ;;  %11230 = vmatmul.mubr.bf16.gmra.mxu1 %v3251_v12 }
 0x346   : > { %v14753_v30 = vadd.f32 %v2435_v44, %v2283_v34  ;;  %11233 = vmatprep.mubr.msk.bf16.mxu1 %vm12555_vm0, %v17482_v8  ;;  %v17625_v34 = vld [vmem:[#allocation70_spill] sm:$0xff]  ;;  %v3259_v12 = vsel %vm1441_vm1, %v3254_v26, %v3258_v53 }
 0x347   : > { %v11256_v47 = vpop.f32.mrf.mxu0  ;;  %v10999_v21 = vpop.f32.mrf.mxu1  ;;  %v2285_v18 = vadd.f32 %v17625_v34, %v14542_v37  ;;  %v17630_v37 = vld [vmem:[#allocation30_spill] sm:$0xff]  ;;  %v17632_v34 = vld [vmem:[#allocation72_spill] sm:$0xff] }
 0x348   : > { %v2286_v47 = vadd.f32 %v17627_v14, %v14552_v2  ;;  %v17628_v21 = vld [vmem:[#allocation3_spill] sm:$0xff] }
 0x349   : > { %v14761_v16 = vpop.f32.mrf.mxu0  ;;  %11490 = vmatmul.mubr.bf16.gmra.mxu0 %v17624_v49  ;;  %v2438_v15 = vpop.f32.mrf.mxu1  ;;  %v3651_v29 = vrot.slane %v17628_v21, 2 }
 0x34a   : > { %17623 = vst [vmem:[#allocation20_spill] sm:$0xff] %v14761_v16  ;;  %v14764_v40 = vadd.f32 %v2438_v15, %v2284_v60  ;;  %11493 = vmatprep.mubr.msk.bf16.mxu0 %vm12555_vm0, %v17482_v8  ;;  %v17631_v15 = vld [vmem:[#allocation16_spill] sm:$0xff] }
 0x34b   : > { %v11259_v24 = vpop.f32.mrf.mxu0  ;;  %v11000_v10 = vpop.f32.mrf.mxu1  ;;  %v3650_v53 = vrot.slane %v17631_v15, 2 }
 0x34c   : > { %v12293_v24 = vld [vmem:[%s17345_s2 + $0x338] sm:$0xff]  }
 0x34d   : > { %v14771_v20 = vpop.f32.mrf.mxu0  ;;  %v2443_v23 = vpop.f32.mrf.mxu1  ;;  %11234 = vmatmul.mubr.bf16.gmra.mxu1 %v3259_v12  ;;  %v3652_v12 = vsel %vm2316_vm7, %v3650_v53, %v3651_v29  ;;  %v12298_v53 = vld [vmem:[%s17345_s2 + $0x478] sm:$0xff]  }
 0x34e   : > { %17626 = vst [vmem:[#allocation23_spill] sm:$0xff] %v14771_v20  ;;  %v14773_v44 = vadd.f32 %v2443_v23, %v2285_v18  ;;  %11305 = vmatprep.mubr.msk.bf16.mxu1 %vm12555_vm0, %v17482_v8  ;;  %v2287_v18 = vadd.f32 %v17632_v34, %v14564_v58  ;;  %v17633_v23 = vld [vmem:[#allocation17_spill] sm:$0xff]  ;;  %v12294_v58 = vld [vmem:[%s17345_s2 + $0x330] sm:$0xff]  }
 0x34f   : > { %v11260_v33 = vpop.f32.mrf.mxu0  ;;  %v11003_v13 = vpop.f32.mrf.mxu1 }
 0x350   : > { %v4699_v33 = vrot.slane %v17633_v23, 1 }
 0x351   : > { %v14780_v60 = vpop.f32.mrf.mxu0  ;;  %11494 = vmatmul.mubr.bf16.gmra.mxu0 %v17630_v37  ;;  %v2446_v26 = vpop.f32.mrf.mxu1  ;;  %v4698_v37 = vrot.slane %v17628_v21, 1 }
 0x352   : > { %17629 = vst [vmem:[#allocation15_spill] sm:$0xff] %v14780_v60  ;;  %v14783_v49 = vadd.f32 %v2446_v26, %v2286_v47  ;;  %11565 = vmatprep.mubr.msk.bf16.mxu0 %vm12555_vm0, %v17482_v8 }
 0x353   : > { %v11263_v10 = vpop.f32.mrf.mxu0  ;;  %v11004_v2 = vpop.f32.mrf.mxu1 }
 0x354   : > { %v4700_v10 = vsel %vm1860_vm6, %v4698_v37, %v4699_v33  ;;  %v3653_v2 = vrot.slane %v17633_v23, 2 }
 0x355   : > { %v14795_v13 = vpop.f32.mrf.mxu0  ;;  %v2451_v14 = vpop.f32.mrf.mxu1  ;;  %11306 = vmatmul.mubr.bf16.vlgmr.msra.gmra.mxu1 %v3652_v12 }
 0x356   : > { %17634 = vst [vmem:[#allocation24_spill] sm:$0xff] %v14795_v13  ;;  %v14797_v47 = vadd.f32 %v2451_v14, %v2287_v18  ;;  %11394 = vmatpush3.bf16.msra.mxu1 %v12293_v24  ;;  %11309 = vmatprep.mubr.msk.bf16.mxu1 %vm12555_vm0, %v17482_v8  ;;  %v17635_v24 = vld [vmem:[#allocation73_spill] sm:$0xff]  ;;  %v12295_v14 = vld [vmem:[%s17345_s2 + $0x328] sm:$0xff]  }
 0x357   : > { %v11264_v26 = vpop.f32.mrf.mxu0  ;;  %v11007_v15 = vpop.f32.mrf.mxu1  ;;  %11395 = vmatprep.subr.bf16.mxu1 %v17482_v8  ;;  %v2288_v21 = vadd.f32 %v17635_v24, %v14580_v43  ;;  %v12300_v43 = vld [vmem:[%s17345_s2 + $0x470] sm:$0xff]   ;;  %v17638_v24 = vld [vmem:[#allocation5_spill] sm:$0xff] }
 0x358   : > { %v17637_v15 = vld [vmem:[#allocation74_spill] sm:$0xff] }
 0x359   : > { %v14813_v34 = vpop.f32.mrf.mxu0  ;;  %11566 = vmatmul.mubr.bf16.vlgmr.msra.gmra.mxu0 %v4700_v10  ;;  %v2454_v18 = vpop.f32.mrf.mxu1  ;;  %v2289_v10 = vadd.f32 %v17637_v15, %v14597_v42  ;;  %v12296_v42 = vld [vmem:[%s17345_s2 + $0x320] sm:$0xff]   ;;  %v12301_v15 = vld [vmem:[%s17345_s2 + $0x468] sm:$0xff]  }
 0x35a   : > { %17636 = vst [vmem:[#allocation25_spill] sm:$0xff] %v14813_v34  ;;  %v14815_v12 = vadd.f32 %v2454_v18, %v2288_v21  ;;  %11396 = vmatpush3.bf16.msra.mxu1 %v12294_v58  ;;  %11569 = vmatprep.mubr.msk.bf16.mxu0 %vm12555_vm0, %v17482_v8  ;;  %v14829_v58 = vsel %vm2316_vm7, %v3651_v29, %v3653_v2  ;;  %v4701_v21 = vrot.slane %v17638_v24, 1 }
 0x35b   : > { %v11267_v37 = vpop.f32.mrf.mxu0  ;;  %v11008_v26 = vpop.f32.mrf.mxu1  ;;  %11397 = vmatprep.subr.bf16.mxu1 %v17482_v8  ;;  %11654 = vmatpush3.bf16.msra.mxu0 %v12298_v53 }
 0x35c   : > { %11655 = vmatprep.subr.bf16.mxu0 %v17482_v8 }
 0x35d   : > { %v14833_v18 = vpop.f32.mrf.mxu0  ;;  %v2459_v37 = vpop.f32.mrf.mxu1  ;;  %11310 = vmatmul.mubr.bf16.gmra.mxu1 %v14829_v58 }
 0x35e   : > { %17639 = vst [vmem:[#allocation26_spill] sm:$0xff] %v14833_v18  ;;  %v14836_v53 = vadd.f32 %v2459_v37, %v2289_v10  ;;  %11313 = vmatprep.mubr.msk.bf16.mxu1 %vm12555_vm0, %v17482_v8  ;;  %11398 = vmatpush3.bf16.msra.mxu1 %v12295_v14  ;;  %v14848_v10 = vsel %vm1860_vm6, %v4699_v33, %v4701_v21  ;;  %v17641_v37 = vld [vmem:[#allocation75_spill] sm:$0xff]  ;;  %v3655_v14 = vrot.slane %v17638_v24, 2  ;;  %v12297_v33 = vld [vmem:[%s17345_s2 + $0x318] sm:$0xff]  }
 0x35f   : > { %v11268_v29 = vpop.f32.mrf.mxu0  ;;  %v11011_v26 = vpop.f32.mrf.mxu1  ;;  %11399 = vmatprep.subr.bf16.mxu1 %v17482_v8  ;;  %11656 = vmatpush3.bf16.msra.mxu0 %v12300_v43  ;;  %17640 = vst [vmem:[#allocation67_spill] sm:$0xff] %v14848_v10  ;;  %v2290_v23 = vadd.f32 %v17641_v37, %v14614_v11  ;;  %v12303_v37 = vld [vmem:[%s17345_s2 + $0x460] sm:$0xff]  }
 0x360   : > { %11657 = vmatprep.subr.bf16.mxu0 %v17482_v8 }
 0x361   : > { %v14854_v7 = vpop.f32.mrf.mxu0  ;;  %11570 = vmatmul.mubr.bf16.gmra.mxu0 %v14848_v10  ;;  %v2462_v29 = vpop.f32.mrf.mxu1  ;;  %v14871_v10 = vsel %vm2316_vm7, %v3653_v2, %v3655_v14 }
 0x362   : > { %17642 = vst [vmem:[#allocation68_spill] sm:$0xff] %v14854_v7  ;;  %v14857_v43 = vadd.f32 %v2462_v29, %v2290_v23  ;;  %11573 = vmatprep.mubr.msk.bf16.mxu0 %vm12555_vm0, %v17482_v8  ;;  %11400 = vmatpush3.bf16.msra.mxu1 %v12296_v42  ;;  %v17643_v23 = vld [vmem:[#allocation76_spill] sm:$0xff]  ;;  %17644 = vst [vmem:[#allocation27_spill] sm:$0xff] %v14871_v10  ;;  %v17645_v42 = vld [vmem:[#allocation18_spill] sm:$0xff] }
 0x363   : > { %v11271_v11 = vpop.f32.mrf.mxu0  ;;  %v11012_v26 = vpop.f32.mrf.mxu1  ;;  %11401 = vmatprep.subr.bf16.mxu1 %v17482_v8  ;;  %11658 = vmatpush3.bf16.msra.mxu0 %v12301_v15  ;;  %v2291_v29 = vadd.f32 %v17643_v23, %v14631_v57  ;;  %v4703_v24 = vrot.slane %v17645_v42, 1  ;;  %v12299_v57 = vld [vmem:[%s17345_s2 + $0x310] sm:$0xff]   ;;  %v12304_v23 = vld [vmem:[%s17345_s2 + $0x458] sm:$0xff]  }
 0x364   : > { %11659 = vmatprep.subr.bf16.mxu0 %v17482_v8 }
 0x365   : > { %v14875_v7 = vpop.f32.mrf.mxu0  ;;  %v2467_v11 = vpop.f32.mrf.mxu1  ;;  %11314 = vmatmul.mubr.bf16.gmra.mxu1 %v14871_v10 }
 0x366   : > { %17646 = vst [vmem:[#allocation87_spill] sm:$0xff] %v14875_v7  ;;  %v14878_v15 = vadd.f32 %v2467_v11, %v2291_v29  ;;  %11317 = vmatprep.mubr.msk.bf16.mxu1 %vm12555_vm0, %v17482_v8  ;;  %11402 = vmatpush3.bf16.msra.mxu1 %v12297_v33  ;;  %v14890_v29 = vsel %vm1860_vm6, %v4701_v21, %v4703_v24  ;;  %v17648_v11 = vld [vmem:[#allocation77_spill] sm:$0xff]  ;;  %v3657_v33 = vrot.slane %v17645_v42, 2  ;;  %v12302_v21 = vld [vmem:[%s17345_s2 + $0x308] sm:$0xff]  }
 0x367   : > { %v11272_v2 = vpop.f32.mrf.mxu0  ;;  %v11015_v26 = vpop.f32.mrf.mxu1  ;;  %11403 = vmatprep.subr.bf16.mxu1 %v17482_v8  ;;  %11660 = vmatpush3.bf16.msra.mxu0 %v12303_v37  ;;  %17647 = vst [vmem:[#allocation69_spill] sm:$0xff] %v14890_v29  ;;  %v2292_v7 = vadd.f32 %v17648_v11, %v14648_v32  ;;  %v12306_v11 = vld [vmem:[%s17345_s2 + $0x450] sm:$0xff]  }
 0x368   : > { %11661 = vmatprep.subr.bf16.mxu0 %v17482_v8 }
 0x369   : > { %v14896_v18 = vpop.f32.mrf.mxu0  ;;  %11574 = vmatmul.mubr.bf16.gmra.mxu0 %v14890_v29  ;;  %v2470_v2 = vpop.f32.mrf.mxu1  ;;  %v14913_v29 = vsel %vm2316_vm7, %v3655_v14, %v3657_v33 }
 0x36a   : > { %17649 = vst [vmem:[#allocation29_spill] sm:$0xff] %v14896_v18  ;;  %v14899_v37 = vadd.f32 %v2470_v2, %v2292_v7  ;;  %11577 = vmatprep.mubr.msk.bf16.mxu0 %vm12555_vm0, %v17482_v8  ;;  %11404 = vmatpush3.bf16.msra.mxu1 %v12299_v57  ;;  %v17650_v7 = vld [vmem:[#allocation78_spill] sm:$0xff]  ;;  %17651 = vst [vmem:[#allocation70_spill] sm:$0xff] %v14913_v29  ;;  %v17652_v57 = vld [vmem:[#allocation8_spill] sm:$0xff] }
 0x36b   : > { %v11275_v32 = vpop.f32.mrf.mxu0  ;;  %v11016_v26 = vpop.f32.mrf.mxu1  ;;  %11405 = vmatprep.subr.bf16.mxu1 %v17482_v8  ;;  %11662 = vmatpush3.bf16.msra.mxu0 %v12304_v23  ;;  %v2293_v2 = vadd.f32 %v17650_v7, %v14665_v50  ;;  %v4705_v42 = vrot.slane %v17652_v57, 1  ;;  %v12305_v50 = vld [vmem:[%s17345_s2 + $0x300] sm:$0xff]   ;;  %v12307_v7 = vld [vmem:[%s17345_s2 + $0x448] sm:$0xff]  }
 0x36c   : > { %11663 = vmatprep.subr.bf16.mxu0 %v17482_v8 }
 0x36d   : > { %v14917_v18 = vpop.f32.mrf.mxu0  ;;  %v2475_v32 = vpop.f32.mrf.mxu1  ;;  %11318 = vmatmul.mubr.bf16.gmra.mxu1 %v14913_v29 }
 0x36e   : > { %17653 = vst [vmem:[#allocation71_spill] sm:$0xff] %v14917_v18  ;;  %v14920_v23 = vadd.f32 %v2475_v32, %v2293_v2  ;;  %11321 = vmatprep.mubr.msk.bf16.mxu1 %vm12555_vm0, %v17482_v8  ;;  %11406 = vmatpush3.bf16.msra.mxu1 %v12302_v21  ;;  %v14932_v2 = vsel %vm1860_vm6, %v4703_v24, %v4705_v42  ;;  %v17655_v32 = vld [vmem:[#allocation79_spill] sm:$0xff]  ;;  %v3659_v21 = vrot.slane %v17652_v57, 2 }
 0x36f   : > { %v11276_v14 = vpop.f32.mrf.mxu0  ;;  %v11019_v26 = vpop.f32.mrf.mxu1  ;;  %11407 = vmatprep.subr.bf16.mxu1 %v17482_v8  ;;  %11664 = vmatpush3.bf16.msra.mxu0 %v12306_v11  ;;  %17654 = vst [vmem:[#allocation3_spill] sm:$0xff] %v14932_v2  ;;  %v2294_v18 = vadd.f32 %v17655_v32, %v14682_v46  ;;  %v12308_v46 = vld [vmem:[%s17345_s2 + $0x440] sm:$0xff]   ;;  %v17657_v32 = vld [vmem:[#allocation80_spill] sm:$0xff] }
 0x370   : > { %11665 = vmatprep.subr.bf16.mxu0 %v17482_v8  ;;  %v2295_v57 = vadd.f32 %v17657_v32, %v14696_v19 }
 0x371   : > { %v14938_v34 = vpop.f32.mrf.mxu0  ;;  %11578 = vmatmul.mubr.bf16.gmra.mxu0 %v14932_v2  ;;  %v2478_v14 = vpop.f32.mrf.mxu1  ;;  %v14952_v2 = vsel %vm2316_vm7, %v3657_v33, %v3659_v21  ;;  %v17662_v33 = vld [vmem:[#allocation81_spill] sm:$0xff] }
 0x372   : > { %17656 = vst [vmem:[#allocation30_spill] sm:$0xff] %v14938_v34  ;;  %v14941_v11 = vadd.f32 %v2478_v14, %v2294_v18  ;;  %11581 = vmatprep.mubr.msk.bf16.mxu0 %vm12555_vm0, %v17482_v8  ;;  %11408 = vmatpush3.bf16.msra.mxu1 %v12305_v50  ;;  %17658 = vst [vmem:[#allocation16_spill] sm:$0xff] %v14952_v2  ;;  %v17659_v18 = vld [vmem:[#allocation22_spill] sm:$0xff]  ;;  %v2296_v32 = vadd.f32 %v17662_v33, %v14706_v4 }
 0x373   : > { %v11279_v24 = vpop.f32.mrf.mxu0  ;;  %v11020_v26 = vpop.f32.mrf.mxu1  ;;  %11666 = vmatpush3.bf16.msra.mxu0 %v12307_v7  ;;  %11497 = vmatprep.subr.bf16.mxu1 %v17482_v8  ;;  %v4707_v14 = vrot.slane %v17659_v18, 1  ;;  %v3661_v13 = vrot.slane %v17659_v18, 2  ;;  %v17666_v33 = vld [vmem:[#allocation10_spill] sm:$0xff] }
 0x374   : > { %11667 = vmatprep.subr.bf16.mxu0 %v17482_v8  ;;  %v4709_v18 = vrot.slane %v17666_v33, 1 }
 0x375   : > { %v14956_v50 = vpop.f32.mrf.mxu0  ;;  %v2483_v24 = vpop.f32.mrf.mxu1  ;;  %11322 = vmatmul.mubr.bf16.gmra.mxu1 %v14952_v2  ;;  %v14964_v19 = vsel %vm1860_vm6, %v4705_v42, %v4707_v14  ;;  %v14980_v4 = vsel %vm2316_vm7, %v3659_v21, %v3661_v13 }
 0x376   : > { %17660 = vst [vmem:[#allocation72_spill] sm:$0xff] %v14956_v50  ;;  %v14959_v7 = vadd.f32 %v2483_v24, %v2295_v57  ;;  %11325 = vmatprep.mubr.msk.bf16.mxu1 %vm12555_vm0, %v17482_v8  ;;  %17661 = vst [vmem:[#allocation73_spill] sm:$0xff] %v14964_v19 }
 0x377   : > { %v11280_v26 = vpop.f32.mrf.mxu0  ;;  %v11023_v34 = vpop.f32.mrf.mxu1  ;;  %11668 = vmatpush3.bf16.msra.mxu0 %v12308_v46  ;;  %v17664_v46 = vld [vmem:[#allocation82_spill] sm:$0xff]  ;;  %17665 = vst [vmem:[#allocation75_spill] sm:$0xff] %v14980_v4 }
 0x378   : > { %11757 = vmatprep.subr.bf16.mxu0 %v17482_v8  ;;  %v2297_v26 = vadd.f32 %v17664_v46, %v14715_v38  ;;  %v17669_v38 = vld [vmem:[#allocation83_spill] sm:$0xff]  ;;  %v3663_v46 = vrot.slane %v17666_v33, 2 }
 0x379   : > { %v14970_v50 = vpop.f32.mrf.mxu0  ;;  %11582 = vmatmul.mubr.bf16.gmra.mxu0 %v14964_v19  ;;  %v2486_v57 = vpop.f32.mrf.mxu1  ;;  %v2298_v21 = vadd.f32 %v17669_v38, %v14724_v1  ;;  %v17673_v1 = vld [vmem:[#allocation28_spill] sm:$0xff] }
 0x37a   : > { %17663 = vst [vmem:[#allocation74_spill] sm:$0xff] %v14970_v50  ;;  %v14973_v24 = vadd.f32 %v2486_v57, %v2296_v32  ;;  %11585 = vmatprep.mubr.msk.bf16.mxu0 %vm12555_vm0, %v17482_v8  ;;  %v15006_v20 = vsel %vm2316_vm7, %v3661_v13, %v3663_v46  ;;  %v4711_v38 = vrot.slane %v17673_v1, 1 }
 0x37b   : > { %v11283_v34 = vpop.f32.mrf.mxu0  ;;  %v11024_v42 = vpop.f32.mrf.mxu1  ;;  %17672 = vst [vmem:[#allocation79_spill] sm:$0xff] %v15006_v20 }
 0x37c   : > { %v14991_v42 = vsel %vm1860_vm6, %v4707_v14, %v4709_v18  ;;  %v17671_v14 = vld [vmem:[#allocation84_spill] sm:$0xff] }
 0x37d   : > { %v14983_v60 = vpop.f32.mrf.mxu0  ;;  %v2491_v50 = vpop.f32.mrf.mxu1  ;;  %11326 = vmatmul.mubr.bf16.gmra.mxu1 %v14980_v4  ;;  %17668 = vst [vmem:[#allocation77_spill] sm:$0xff] %v14991_v42 }
 0x37e   : > { %17667 = vst [vmem:[#allocation76_spill] sm:$0xff] %v14983_v60  ;;  %v14986_v32 = vadd.f32 %v2491_v50, %v2297_v26  ;;  %11329 = vmatprep.mubr.msk.bf16.mxu1 %vm12555_vm0, %v17482_v8 }
 0x37f   : > { %v11284_v57 = vpop.f32.mrf.mxu0  ;;  %v11027_v34 = vpop.f32.mrf.mxu1 }
 0x380   : > { %v2735_v34 = vadd.f32 %v17671_v14, %v14734_v51  ;;  %v17676_v51 = vld [vmem:[#allocation85_spill] sm:$0xff]  ;;  %v15022_v14 = vrot.slane %v17673_v1, 2 }
 0x381   : > { %v14996_v19 = vpop.f32.mrf.mxu0  ;;  %11586 = vmatmul.mubr.bf16.gmra.mxu0 %v14991_v42  ;;  %v2494_v60 = vpop.f32.mrf.mxu1  ;;  %v2736_v13 = vadd.f32 %v17676_v51, %v14743_v35  ;;  %v17680_v51 = vld [vmem:[#allocation32_spill] sm:$0xff] }
 0x382   : > { %17670 = vst [vmem:[#allocation78_spill] sm:$0xff] %v14996_v19  ;;  %v14999_v50 = vadd.f32 %v2494_v60, %v2298_v21  ;;  %11589 = vmatprep.mubr.msk.bf16.mxu0 %vm12555_vm0, %v17482_v8  ;;  %v15035_v35 = vsel %vm2316_vm7, %v3663_v46, %v15022_v14  ;;  %v15038_v1 = vrot.slane %v17680_v51, 1  ;;  %v17684_v46 = vld [vmem:[#allocation88_spill] sm:$0xff] }
 0x383   : > { %v11287_v26 = vpop.f32.mrf.mxu0  ;;  %v11028_v57 = vpop.f32.mrf.mxu1  ;;  %17679 = vst [vmem:[#allocation83_spill] sm:$0xff] %v15035_v35 }
 0x384   : > { %v15017_v57 = vsel %vm1860_vm6, %v4709_v18, %v4711_v38  ;;  %v17678_v18 = vld [vmem:[#allocation86_spill] sm:$0xff]  ;;  %17681 = vst [vmem:[#allocation84_spill] sm:$0xff] %v15038_v1 }
 0x385   : > { %v15009_v33 = vpop.f32.mrf.mxu0  ;;  %v2951_v19 = vpop.f32.mrf.mxu1  ;;  %11330 = vmatmul.mubr.bf16.gmra.mxu1 %v15006_v20  ;;  %17675 = vst [vmem:[#allocation81_spill] sm:$0xff] %v15017_v57 }
 0x386   : > { %17674 = vst [vmem:[#allocation80_spill] sm:$0xff] %v15009_v33  ;;  %v15012_v60 = vadd.f32 %v2951_v19, %v2735_v34  ;;  %11333 = vmatprep.mubr.msk.bf16.mxu1 %vm12555_vm0, %v17482_v8  ;;  %v2737_v33 = vadd.f32 %v17678_v18, %v14753_v30  ;;  %v15049_v30 = vsel %vm1860_vm6, %v4711_v38, %v15038_v1  ;;  %v17686_v38 = vld [vmem:[#allocation89_spill] sm:$0xff] }
 0x387   : > { %v11288_v21 = vpop.f32.mrf.mxu0  ;;  %v11099_v26 = vpop.f32.mrf.mxu1  ;;  %17683 = vst [vmem:[#allocation86_spill] sm:$0xff] %v15049_v30 }
 0x389   : > { %v15024_v42 = vpop.f32.mrf.mxu0  ;;  %11590 = vmatmul.mubr.bf16.gmra.mxu0 %v15017_v57  ;;  %v2954_v19 = vpop.f32.mrf.mxu1 }
 0x38a   : > { %17677 = vst [vmem:[#allocation82_spill] sm:$0xff] %v15024_v42  ;;  %v15027_v34 = vadd.f32 %v2954_v19, %v2736_v13  ;;  %11593 = vmatprep.mubr.msk.bf16.mxu0 %vm12555_vm0, %v17482_v8 }
 0x38b   : > { %v11359_v21 = vpop.f32.mrf.mxu0  ;;  %v11100_v26 = vpop.f32.mrf.mxu1 }
 0x38c   : > { %v2738_v26 = vadd.f32 %v17684_v46, %v14764_v40  ;;  %v17687_v46 = vld [vmem:[#allocation33_spill] sm:$0xff] }
 0x38d   : > { %v15040_v42 = vpop.f32.mrf.mxu0  ;;  %v2959_v57 = vpop.f32.mrf.mxu1  ;;  %11334 = vmatmul.mubr.bf16.gmra.mxu1 %v15035_v35 }
 0x38e   : > { %17682 = vst [vmem:[#allocation85_spill] sm:$0xff] %v15040_v42  ;;  %v15043_v13 = vadd.f32 %v2959_v57, %v2737_v33  ;;  %11337 = vmatprep.mubr.msk.bf16.mxu1 %vm12555_vm0, %v17482_v8  ;;  %v3667_v33 = vrot.slane %v13515_v55, 2 }
 0x38f   : > { %v11360_v19 = vpop.f32.mrf.mxu0  ;;  %v11103_v21 = vpop.f32.mrf.mxu1 }
 0x390   : > { %v2739_v21 = vadd.f32 %v17686_v38, %v14773_v44  ;;  %v3668_v40 = vsel %vm2316_vm7, %v15022_v14, %v3667_v33  ;;  %v17689_v44 = vld [vmem:[#allocation90_spill] sm:$0xff] }
 0x391   : > { %v15053_v18 = vpop.f32.mrf.mxu0  ;;  %11594 = vmatmul.mubr.bf16.gmra.mxu0 %v15049_v30  ;;  %v2962_v42 = vpop.f32.mrf.mxu1 }
 0x392   : > { %17685 = vst [vmem:[#allocation88_spill] sm:$0xff] %v15053_v18  ;;  %v15056_v45 = vadd.f32 %v2962_v42, %v2738_v26  ;;  %11597 = vmatprep.mubr.msk.bf16.mxu0 %vm12555_vm0, %v17482_v8  ;;  %v4715_v18 = vrot.slane %v17687_v46, 1 }
 0x393   : > { %v11363_v57 = vpop.f32.mrf.mxu0  ;;  %v11104_v19 = vpop.f32.mrf.mxu1 }
 0x394   : > { %v4716_v57 = vsel %vm1860_vm6, %v15038_v1, %v4715_v18  ;;  %v2740_v19 = vadd.f32 %v17689_v44, %v14783_v49  ;;  %v17690_v18 = vld [vmem:[#allocation91_spill] sm:$0xff] }
 0x395   : > { %v15066_v16 = vpop.f32.mrf.mxu0  ;;  %v2967_v30 = vpop.f32.mrf.mxu1  ;;  %11338 = vmatmul.mubr.bf16.gmra.mxu1 %v3668_v40  ;;  %v17691_v44 = vld [vmem:[#allocation31_spill] sm:$0xff] }
 0x396   : > { %17688 = vst [vmem:[#allocation89_spill] sm:$0xff] %v15066_v16  ;;  %v15068_v42 = vadd.f32 %v2967_v30, %v2739_v21  ;;  %11409 = vmatprep.mubr.msk.bf16.mxu1 %vm12555_vm0, %v17482_v8  ;;  %v12309_v30 = vld [vmem:[%s17345_s2 + $0x3b8] sm:$0xff]  }
 0x397   : > { %v11364_v55 = vpop.f32.mrf.mxu0  ;;  %v11107_v26 = vpop.f32.mrf.mxu1 }
 0x398   : > { %v2741_v55 = vadd.f32 %v17690_v18, %v14797_v47  ;;  %v12314_v47 = vld [vmem:[%s17345_s2 + $0x4f8] sm:$0xff]  }
 0x399   : > { %v15076_v33 = vpop.f32.mrf.mxu0  ;;  %11598 = vmatmul.mubr.bf16.gmra.mxu0 %v4716_v57  ;;  %v2970_v38 = vpop.f32.mrf.mxu1 }
 0x39a   : > { %v15078_v16 = vadd.f32 %v2970_v38, %v2740_v19  ;;  %11669 = vmatprep.mubr.msk.bf16.mxu0 %vm12555_vm0, %v17482_v8  ;;  %v12310_v19 = vld [vmem:[%s17345_s2 + $0x3b0] sm:$0xff]  }
 0x39b   : > { %v11367_v21 = vpop.f32.mrf.mxu0  ;;  %v11108_v40 = vpop.f32.mrf.mxu1 }
 0x39c   : > { %v17692_v40 = vld [vmem:[#allocation92_spill] sm:$0xff] }
 0x39d   : > { %v15087_v26 = vpop.f32.mrf.mxu0  ;;  %v2975_v49 = vpop.f32.mrf.mxu1  ;;  %11410 = vmatmul.mubr.bf16.vlgmr.msra.gmra.mxu1 %v17691_v44  ;;  %v2742_v18 = vadd.f32 %v17692_v40, %v14815_v12  ;;  %v12311_v44 = vld [vmem:[%s17345_s2 + $0x3a8] sm:$0xff]   ;;  %v12316_v12 = vld [vmem:[%s17345_s2 + $0x4f0] sm:$0xff]  }
 0x39e   : > { %v15090_v57 = vadd.f32 %v2975_v49, %v2741_v55  ;;  %11498 = vmatpush3.bf16.msra.mxu1 %v12309_v30  ;;  %11413 = vmatprep.mubr.msk.bf16.mxu1 %vm12555_vm0, %v17482_v8 }
 0x39f   : > { %v11368_v38 = vpop.f32.mrf.mxu0  ;;  %v11111_v21 = vpop.f32.mrf.mxu1  ;;  %11499 = vmatprep.subr.bf16.mxu1 %v17482_v8 }
 0x3a1   : > { %v15103_v55 = vpop.f32.mrf.mxu0  ;;  %11670 = vmatmul.mubr.bf16.vlgmr.msra.gmra.mxu0 %v14829_v58  ;;  %v2978_v30 = vpop.f32.mrf.mxu1  ;;  %v17693_v58 = vld [vmem:[#allocation94_spill] sm:$0xff] }
 0x3a2   : > { %v15106_v49 = vadd.f32 %v2978_v30, %v2742_v18  ;;  %11500 = vmatpush3.bf16.msra.mxu1 %v12310_v19  ;;  %11673 = vmatprep.mubr.msk.bf16.mxu0 %vm12555_vm0, %v17482_v8  ;;  %v2743_v40 = vadd.f32 %v17693_v58, %v14836_v53  ;;  %v17695_v30 = vld [vmem:[#allocation34_spill] sm:$0xff]  ;;  %v12317_v53 = vld [vmem:[%s17345_s2 + $0x4e8] sm:$0xff]  }
 0x3a3   : > { %v11371_v38 = vpop.f32.mrf.mxu0  ;;  %v11112_v21 = vpop.f32.mrf.mxu1  ;;  %11501 = vmatprep.subr.bf16.mxu1 %v17482_v8  ;;  %11758 = vmatpush3.bf16.msra.mxu0 %v12314_v47  ;;  %v12312_v47 = vld [vmem:[%s17345_s2 + $0x3a0] sm:$0xff]   ;;  %v17696_v58 = vld [vmem:[#allocation95_spill] sm:$0xff] }
 0x3a4   : > { %11759 = vmatprep.subr.bf16.mxu0 %v17482_v8 }
 0x3a5   : > { %v15120_v19 = vpop.f32.mrf.mxu0  ;;  %v2983_v18 = vpop.f32.mrf.mxu1  ;;  %11414 = vmatmul.mubr.bf16.gmra.mxu1 %v17695_v30 }
 0x3a6   : > { %17694 = vst [vmem:[#allocation33_spill] sm:$0xff] %v15120_v19  ;;  %v15123_v1 = vadd.f32 %v2983_v18, %v2743_v40  ;;  %11417 = vmatprep.mubr.msk.bf16.mxu1 %vm12555_vm0, %v17482_v8  ;;  %11502 = vmatpush3.bf16.msra.mxu1 %v12311_v44  ;;  %v2744_v40 = vadd.f32 %v17696_v58, %v14857_v43  ;;  %v12319_v43 = vld [vmem:[%s17345_s2 + $0x4e0] sm:$0xff]   ;;  %v17698_v58 = vld [vmem:[#allocation97_spill] sm:$0xff] }
 0x3a7   : > { %v11372_v38 = vpop.f32.mrf.mxu0  ;;  %v11115_v21 = vpop.f32.mrf.mxu1  ;;  %11503 = vmatprep.subr.bf16.mxu1 %v17482_v8  ;;  %11760 = vmatpush3.bf16.msra.mxu0 %v12316_v12  ;;  %v12313_v12 = vld [vmem:[%s17345_s2 + $0x398] sm:$0xff]  }
 0x3a8   : > { %11761 = vmatprep.subr.bf16.mxu0 %v17482_v8 }
 0x3a9   : > { %v15137_v18 = vpop.f32.mrf.mxu0  ;;  %11674 = vmatmul.mubr.bf16.gmra.mxu0 %v14871_v10  ;;  %v2986_v44 = vpop.f32.mrf.mxu1  ;;  %v17700_v10 = vld [vmem:[#allocation35_spill] sm:$0xff] }
 0x3aa   : > { %17697 = vst [vmem:[#allocation90_spill] sm:$0xff] %v15137_v18  ;;  %v15140_v19 = vadd.f32 %v2986_v44, %v2744_v40  ;;  %11677 = vmatprep.mubr.msk.bf16.mxu0 %vm12555_vm0, %v17482_v8  ;;  %11504 = vmatpush3.bf16.msra.mxu1 %v12312_v47  ;;  %v2745_v40 = vadd.f32 %v17698_v58, %v14878_v15  ;;  %v12320_v15 = vld [vmem:[%s17345_s2 + $0x4d8] sm:$0xff]   ;;  %v17701_v58 = vld [vmem:[#allocation98_spill] sm:$0xff] }
 0x3ab   : > { %v11375_v38 = vpop.f32.mrf.mxu0  ;;  %v11116_v21 = vpop.f32.mrf.mxu1  ;;  %11505 = vmatprep.subr.bf16.mxu1 %v17482_v8  ;;  %11762 = vmatpush3.bf16.msra.mxu0 %v12317_v53  ;;  %v12315_v53 = vld [vmem:[%s17345_s2 + $0x390] sm:$0xff]  }
 0x3ac   : > { %11763 = vmatprep.subr.bf16.mxu0 %v17482_v8 }
 0x3ad   : > { %v15154_v44 = vpop.f32.mrf.mxu0  ;;  %v2991_v47 = vpop.f32.mrf.mxu1  ;;  %11418 = vmatmul.mubr.bf16.gmra.mxu1 %v17700_v10 }
 0x3ae   : > { %17699 = vst [vmem:[#allocation91_spill] sm:$0xff] %v15154_v44  ;;  %v15157_v18 = vadd.f32 %v2991_v47, %v2745_v40  ;;  %11421 = vmatprep.mubr.msk.bf16.mxu1 %vm12555_vm0, %v17482_v8  ;;  %11506 = vmatpush3.bf16.msra.mxu1 %v12313_v12  ;;  %v2746_v40 = vadd.f32 %v17701_v58, %v14899_v37  ;;  %v12322_v37 = vld [vmem:[%s17345_s2 + $0x4d0] sm:$0xff]  }
 0x3af   : > { %v11376_v38 = vpop.f32.mrf.mxu0  ;;  %v11119_v21 = vpop.f32.mrf.mxu1  ;;  %11507 = vmatprep.subr.bf16.mxu1 %v17482_v8  ;;  %11764 = vmatpush3.bf16.msra.mxu0 %v12319_v43  ;;  %v12318_v43 = vld [vmem:[%s17345_s2 + $0x388] sm:$0xff]   ;;  %v17703_v58 = vld [vmem:[#allocation100_spill] sm:$0xff] }
 0x3b0   : > { %11765 = vmatprep.subr.bf16.mxu0 %v17482_v8 }
 0x3b1   : > { %v15171_v47 = vpop.f32.mrf.mxu0  ;;  %11678 = vmatmul.mubr.bf16.gmra.mxu0 %v14913_v29  ;;  %v2994_v12 = vpop.f32.mrf.mxu1  ;;  %v17705_v29 = vld [vmem:[#allocation56_spill] sm:$0xff] }
 0x3b2   : > { %17702 = vst [vmem:[#allocation31_spill] sm:$0xff] %v15171_v47  ;;  %v15174_v44 = vadd.f32 %v2994_v12, %v2746_v40  ;;  %11681 = vmatprep.mubr.msk.bf16.mxu0 %vm12555_vm0, %v17482_v8  ;;  %11508 = vmatpush3.bf16.msra.mxu1 %v12315_v53  ;;  %v2747_v40 = vadd.f32 %v17703_v58, %v14920_v23  ;;  %v12323_v23 = vld [vmem:[%s17345_s2 + $0x4c8] sm:$0xff]   ;;  %v17706_v58 = vld [vmem:[#allocation101_spill] sm:$0xff] }
 0x3b3   : > { %v11379_v38 = vpop.f32.mrf.mxu0  ;;  %v11120_v21 = vpop.f32.mrf.mxu1  ;;  %11509 = vmatprep.subr.bf16.mxu1 %v17482_v8  ;;  %11766 = vmatpush3.bf16.msra.mxu0 %v12320_v15  ;;  %v12321_v15 = vld [vmem:[%s17345_s2 + $0x380] sm:$0xff]  }
 0x3b4   : > { %11767 = vmatprep.subr.bf16.mxu0 %v17482_v8 }
 0x3b5   : > { %v15188_v12 = vpop.f32.mrf.mxu0  ;;  %v2999_v53 = vpop.f32.mrf.mxu1  ;;  %11422 = vmatmul.mubr.bf16.gmra.mxu1 %v17705_v29 }
 0x3b6   : > { %17704 = vst [vmem:[#allocation92_spill] sm:$0xff] %v15188_v12  ;;  %v15191_v47 = vadd.f32 %v2999_v53, %v2747_v40  ;;  %11425 = vmatprep.mubr.msk.bf16.mxu1 %vm12555_vm0, %v17482_v8  ;;  %11510 = vmatpush3.bf16.msra.mxu1 %v12318_v43  ;;  %v2748_v40 = vadd.f32 %v17706_v58, %v14941_v11  ;;  %v12324_v11 = vld [vmem:[%s17345_s2 + $0x4c0] sm:$0xff]  }
 0x3b7   : > { %v11380_v38 = vpop.f32.mrf.mxu0  ;;  %v11123_v21 = vpop.f32.mrf.mxu1  ;;  %11511 = vmatprep.subr.bf16.mxu1 %v17482_v8  ;;  %11768 = vmatpush3.bf16.msra.mxu0 %v12322_v37 }
 0x3b8   : > { %11769 = vmatprep.subr.bf16.mxu0 %v17482_v8  ;;  %v17708_v21 = vld [vmem:[#allocation103_spill] sm:$0xff] }
 0x3b9   : > { %v15205_v53 = vpop.f32.mrf.mxu0  ;;  %11682 = vmatmul.mubr.bf16.gmra.mxu0 %v14952_v2  ;;  %v3002_v43 = vpop.f32.mrf.mxu1  ;;  %v2749_v58 = vadd.f32 %v17708_v21, %v14959_v7  ;;  %v17710_v2 = vld [vmem:[#allocation61_spill] sm:$0xff] }
 0x3ba   : > { %17707 = vst [vmem:[#allocation94_spill] sm:$0xff] %v15205_v53  ;;  %v15208_v12 = vadd.f32 %v3002_v43, %v2748_v40  ;;  %11685 = vmatprep.mubr.msk.bf16.mxu0 %vm12555_vm0, %v17482_v8  ;;  %11512 = vmatpush3.bf16.msra.mxu1 %v12321_v15 }
 0x3bb   : > { %v11383_v37 = vpop.f32.mrf.mxu0  ;;  %v11124_v38 = vpop.f32.mrf.mxu1  ;;  %11770 = vmatpush3.bf16.msra.mxu0 %v12323_v23  ;;  %11601 = vmatprep.subr.bf16.mxu1 %v17482_v8 }
 0x3bc   : > { %11771 = vmatprep.subr.bf16.mxu0 %v17482_v8  ;;  %v17711_v38 = vld [vmem:[#allocation104_spill] sm:$0xff] }
 0x3bd   : > { %v15219_v40 = vpop.f32.mrf.mxu0  ;;  %v3007_v43 = vpop.f32.mrf.mxu1  ;;  %11426 = vmatmul.mubr.bf16.gmra.mxu1 %v17710_v2  ;;  %v2750_v53 = vadd.f32 %v17711_v38, %v14973_v24 }
 0x3be   : > { %17709 = vst [vmem:[#allocation34_spill] sm:$0xff] %v15219_v40  ;;  %v15222_v15 = vadd.f32 %v3007_v43, %v2749_v58  ;;  %11429 = vmatprep.mubr.msk.bf16.mxu1 %vm12555_vm0, %v17482_v8 }
 0x3bf   : > { %v11384_v23 = vpop.f32.mrf.mxu0  ;;  %v11127_v37 = vpop.f32.mrf.mxu1  ;;  %11772 = vmatpush3.bf16.msra.mxu0 %v12324_v11  ;;  %v2751_v11 = vadd.f32 %v14476_v59, %v14986_v32 }
 0x3c0   : > { %11861 = vmatprep.subr.bf16.mxu0 %v17482_v8  ;;  %v17713_v37 = vld [vmem:[#allocation65_spill] sm:$0xff] }
 0x3c1   : > { %v15229_v7 = vpop.f32.mrf.mxu0  ;;  %11686 = vmatmul.mubr.bf16.gmra.mxu0 %v14980_v4  ;;  %v3010_v21 = vpop.f32.mrf.mxu1  ;;  %v2752_v4 = vadd.f32 %v14488_v6, %v14999_v50 }
 0x3c2   : > { %v15232_v40 = vadd.f32 %v3010_v21, %v2750_v53  ;;  %11689 = vmatprep.mubr.msk.bf16.mxu0 %vm12555_vm0, %v17482_v8 }
 0x3c3   : > { %v11387_v58 = vpop.f32.mrf.mxu0  ;;  %v11128_v43 = vpop.f32.mrf.mxu1 }
 0x3c5   : > { %v15238_v23 = vpop.f32.mrf.mxu0  ;;  %v3015_v24 = vpop.f32.mrf.mxu1  ;;  %11430 = vmatmul.mubr.bf16.gmra.mxu1 %v17713_v37 }
 0x3c6   : > { %17712 = vst [vmem:[#allocation95_spill] sm:$0xff] %v15238_v23  ;;  %v15241_v38 = vadd.f32 %v3015_v24, %v2751_v11  ;;  %11433 = vmatprep.mubr.msk.bf16.mxu1 %vm12555_vm0, %v17482_v8  ;;  %v3211_v24 = vadd.f32 %v14500_v3, %v15012_v60  ;;  %v17714_v23 = vld [vmem:[#allocation66_spill] sm:$0xff] }
 0x3c7   : > { %v11388_v53 = vpop.f32.mrf.mxu0  ;;  %v11131_v21 = vpop.f32.mrf.mxu1 }
 0x3c9   : > { %v15247_v58 = vpop.f32.mrf.mxu0  ;;  %11690 = vmatmul.mubr.bf16.gmra.mxu0 %v15006_v20  ;;  %v3018_v59 = vpop.f32.mrf.mxu1 }
 0x3ca   : > { %v15250_v32 = vadd.f32 %v3018_v59, %v2752_v4  ;;  %11693 = vmatprep.mubr.msk.bf16.mxu0 %vm12555_vm0, %v17482_v8  ;;  %v3212_v59 = vadd.f32 %v14513_v41, %v15027_v34  ;;  %v17716_v34 = vld [vmem:[#allocation36_spill] sm:$0xff] }
 0x3cb   : > { %v11391_v43 = vpop.f32.mrf.mxu0  ;;  %v11132_v11 = vpop.f32.mrf.mxu1 }
 0x3cd   : > { %v15256_v53 = vpop.f32.mrf.mxu0  ;;  %v3344_v21 = vpop.f32.mrf.mxu1  ;;  %11434 = vmatmul.mubr.bf16.gmra.mxu1 %v17714_v23 }
 0x3ce   : > { %v15259_v6 = vadd.f32 %v3344_v21, %v3211_v24  ;;  %11437 = vmatprep.mubr.msk.bf16.mxu1 %vm12555_vm0, %v17482_v8  ;;  %v3213_v21 = vadd.f32 %v14526_v27, %v15043_v13  ;;  %v3214_v27 = vadd.f32 %v14539_v17, %v15056_v45  ;;  %v17718_v17 = vld [vmem:[#allocation37_spill] sm:$0xff] }
 0x3cf   : > { %v11392_v4 = vpop.f32.mrf.mxu0  ;;  %v11203_v50 = vpop.f32.mrf.mxu1 }
 0x3d0   : > { %v15275_v4 = vrot.slane %v17680_v51, 2 }
 0x3d1   : > { %v15265_v43 = vpop.f32.mrf.mxu0  ;;  %11694 = vmatmul.mubr.bf16.gmra.mxu0 %v15035_v35  ;;  %v3347_v3 = vpop.f32.mrf.mxu1 }
 0x3d2   : > { %v15268_v60 = vadd.f32 %v3347_v3, %v3212_v59  ;;  %11697 = vmatprep.mubr.msk.bf16.mxu0 %vm12555_vm0, %v17482_v8  ;;  %17715 = vst [vmem:[#allocation97_spill] sm:$0xff] %v15275_v4 }
 0x3d3   : > { %v11463_v11 = vpop.f32.mrf.mxu0  ;;  %v11204_v24 = vpop.f32.mrf.mxu1 }
 0x3d4   : > { %v15287_v11 = vsel %vm2316_vm7, %v15022_v14, %v15275_v4  ;;  %v5162_v14 = vrot.slane %v17687_v46, 2 }
 0x3d5   : > { %v15277_v50 = vpop.f32.mrf.mxu0  ;;  %v3352_v41 = vpop.f32.mrf.mxu1  ;;  %11438 = vmatmul.mubr.bf16.gmra.mxu1 %v17716_v34  ;;  %17717 = vst [vmem:[#allocation35_spill] sm:$0xff] %v15287_v11 }
 0x3d6   : > { %v15280_v35 = vadd.f32 %v3352_v41, %v3213_v21  ;;  %11441 = vmatprep.mubr.msk.bf16.mxu1 %vm12555_vm0, %v17482_v8 }
 0x3d7   : > { %v11464_v59 = vpop.f32.mrf.mxu0  ;;  %v11207_v3 = vpop.f32.mrf.mxu1 }
 0x3d8   : > { %v3215_v3 = vadd.f32 %v14550_v61, %v15068_v42  ;;  %v3216_v61 = vadd.f32 %v14561_v36, %v15078_v16  ;;  %v17719_v16 = vld [vmem:[#allocation2_spill] sm:$0xff] }
 0x3d9   : > { %v15291_v13 = vpop.f32.mrf.mxu0  ;;  %11698 = vmatmul.mubr.bf16.gmra.mxu0 %v15287_v11  ;;  %v3355_v24 = vpop.f32.mrf.mxu1 }
 0x3da   : > { %v15294_v21 = vadd.f32 %v3355_v24, %v3214_v27  ;;  %11701 = vmatprep.mubr.msk.bf16.mxu0 %vm12555_vm0, %v17482_v8 }
 0x3db   : > { %v11467_v41 = vpop.f32.mrf.mxu0  ;;  %v11208_v59 = vpop.f32.mrf.mxu1 }
 0x3dc   : > { %v5163_v41 = vsel %vm2316_vm7, %v15275_v4, %v5162_v14  ;;  %v3217_v14 = vadd.f32 %v14577_v48, %v15090_v57  ;;  %v12330_v48 = vld [vmem:[%s17345_s2 + $0x578] sm:$0xff]   ;;  %v3218_v57 = vadd.f32 %v14594_v22, %v15106_v49  ;;  %v12332_v22 = vld [vmem:[%s17345_s2 + $0x570] sm:$0xff]   ;;  %v3219_v49 = vadd.f32 %v14611_v9, %v15123_v1  ;;  %v12333_v9 = vld [vmem:[%s17345_s2 + $0x568] sm:$0xff]  }
 0x3dd   : > { %v15301_v20 = vpop.f32.mrf.mxu0  ;;  %v3360_v45 = vpop.f32.mrf.mxu1  ;;  %11442 = vmatmul.mubr.bf16.gmra.mxu1 %v17718_v17  ;;  %v3220_v1 = vadd.f32 %v14628_v31, %v15140_v19  ;;  %v12335_v31 = vld [vmem:[%s17345_s2 + $0x560] sm:$0xff]  }
 0x3de   : > { %v15304_v51 = vadd.f32 %v3360_v45, %v3215_v3  ;;  %11513 = vmatprep.mubr.msk.bf16.mxu1 %vm12555_vm0, %v17482_v8  ;;  %v12325_v3 = vld [vmem:[%s17345_s2 + $0x438] sm:$0xff]  }
 0x3df   : > { %v11468_v27 = vpop.f32.mrf.mxu0  ;;  %v11211_v24 = vpop.f32.mrf.mxu1 }
 0x3e1   : > { %v15312_v42 = vpop.f32.mrf.mxu0  ;;  %11702 = vmatmul.mubr.bf16.gmra.mxu0 %v5163_v41  ;;  %v3363_v59 = vpop.f32.mrf.mxu1  ;;  %v12326_v41 = vld [vmem:[%s17345_s2 + $0x430] sm:$0xff]  }
 0x3e2   : > { %v15314_v11 = vadd.f32 %v3363_v59, %v3216_v61  ;;  %11773 = vmatprep.mubr.msk.bf16.mxu0 %vm12555_vm0, %v17482_v8 }
 0x3e3   : > { %v11471_v45 = vpop.f32.mrf.mxu0  ;;  %v11212_v17 = vpop.f32.mrf.mxu1 }
 0x3e5   : > { %v15323_v27 = vpop.f32.mrf.mxu0  ;;  %v3368_v36 = vpop.f32.mrf.mxu1  ;;  %11514 = vmatmul.mubr.bf16.vlgmr.msra.gmra.mxu1 %v17719_v16 }
 0x3e6   : > { %v15326_v24 = vadd.f32 %v3368_v36, %v3217_v14  ;;  %11602 = vmatpush3.bf16.msra.mxu1 %v12325_v3  ;;  %11517 = vmatprep.mubr.msk.bf16.mxu1 %vm12555_vm0, %v17482_v8  ;;  %v12327_v14 = vld [vmem:[%s17345_s2 + $0x428] sm:$0xff]  }
 0x3e7   : > { %v11472_v61 = vpop.f32.mrf.mxu0  ;;  %v11215_v59 = vpop.f32.mrf.mxu1  ;;  %11603 = vmatprep.subr.bf16.mxu1 %v17482_v8 }
 0x3e8   : > { %v17720_v61 = vld [vmem:[#allocation4_spill] sm:$0xff] }
 0x3e9   : > { %v15339_v45 = vpop.f32.mrf.mxu0  ;;  %11774 = vmatmul.mubr.bf16.vlgmr.msra.gmra.mxu0 %v17695_v30  ;;  %v3371_v3 = vpop.f32.mrf.mxu1 }
 0x3ea   : > { %v15342_v17 = vadd.f32 %v3371_v3, %v3218_v57  ;;  %11604 = vmatpush3.bf16.msra.mxu1 %v12326_v41  ;;  %11777 = vmatprep.mubr.msk.bf16.mxu0 %vm12555_vm0, %v17482_v8 }
 0x3eb   : > { %v11475_v36 = vpop.f32.mrf.mxu0  ;;  %v11216_v16 = vpop.f32.mrf.mxu1  ;;  %11605 = vmatprep.subr.bf16.mxu1 %v17482_v8  ;;  %11862 = vmatpush3.bf16.msra.mxu0 %v12330_v48  ;;  %v12328_v48 = vld [vmem:[%s17345_s2 + $0x420] sm:$0xff]  }
 0x3ec   : > { %11863 = vmatprep.subr.bf16.mxu0 %v17482_v8 }
 0x3ed   : > { %v15356_v30 = vpop.f32.mrf.mxu0  ;;  %v3376_v41 = vpop.f32.mrf.mxu1  ;;  %11518 = vmatmul.mubr.bf16.gmra.mxu1 %v17720_v61 }
 0x3ee   : > { %v15359_v59 = vadd.f32 %v3376_v41, %v3219_v49  ;;  %11521 = vmatprep.mubr.msk.bf16.mxu1 %vm12555_vm0, %v17482_v8  ;;  %11606 = vmatpush3.bf16.msra.mxu1 %v12327_v14 }
 0x3ef   : > { %v11476_v57 = vpop.f32.mrf.mxu0  ;;  %v11219_v3 = vpop.f32.mrf.mxu1  ;;  %11607 = vmatprep.subr.bf16.mxu1 %v17482_v8  ;;  %11864 = vmatpush3.bf16.msra.mxu0 %v12332_v22  ;;  %v12329_v22 = vld [vmem:[%s17345_s2 + $0x418] sm:$0xff]  }
 0x3f0   : > { %11865 = vmatprep.subr.bf16.mxu0 %v17482_v8  ;;  %v12331_v3 = vld [vmem:[%s17345_s2 + $0x410] sm:$0xff]  }
 0x3f1   : > { %v15373_v36 = vpop.f32.mrf.mxu0  ;;  %11778 = vmatmul.mubr.bf16.gmra.mxu0 %v17700_v10  ;;  %v3379_v14 = vpop.f32.mrf.mxu1  ;;  %v3221_v10 = vadd.f32 %v14645_v62, %v15157_v18  ;;  %v12336_v62 = vld [vmem:[%s17345_s2 + $0x558] sm:$0xff]   ;;  %v3222_v18 = vadd.f32 %v14662_v5, %v15174_v44  ;;  %v12338_v5 = vld [vmem:[%s17345_s2 + $0x550] sm:$0xff]  }
 0x3f2   : > { %v15376_v16 = vadd.f32 %v3379_v14, %v3220_v1  ;;  %11781 = vmatprep.mubr.msk.bf16.mxu0 %vm12555_vm0, %v17482_v8  ;;  %11608 = vmatpush3.bf16.msra.mxu1 %v12328_v48  ;;  %v17721_v48 = vld [vmem:[#allocation13_spill] sm:$0xff] }
 0x3f3   : > { %v11479_v49 = vpop.f32.mrf.mxu0  ;;  %v11220_v41 = vpop.f32.mrf.mxu1  ;;  %11609 = vmatprep.subr.bf16.mxu1 %v17482_v8  ;;  %11866 = vmatpush3.bf16.msra.mxu0 %v12333_v9 }
 0x3f4   : > { %11867 = vmatprep.subr.bf16.mxu0 %v17482_v8  ;;  %v12334_v41 = vld [vmem:[%s17345_s2 + $0x408] sm:$0xff]  }
 0x3f5   : > { %v15390_v19 = vpop.f32.mrf.mxu0  ;;  %v3384_v61 = vpop.f32.mrf.mxu1  ;;  %11522 = vmatmul.mubr.bf16.gmra.mxu1 %v17721_v48  ;;  %v17722_v48 = vld [vmem:[#allocation7_spill] sm:$0xff] }
 0x3f6   : > { %v15393_v57 = vadd.f32 %v3384_v61, %v3221_v10  ;;  %11525 = vmatprep.mubr.msk.bf16.mxu1 %vm12555_vm0, %v17482_v8  ;;  %11610 = vmatpush3.bf16.msra.mxu1 %v12329_v22 }
 0x3f7   : > { %v11480_v9 = vpop.f32.mrf.mxu0  ;;  %v11223_v1 = vpop.f32.mrf.mxu1  ;;  %11611 = vmatprep.subr.bf16.mxu1 %v17482_v8  ;;  %11868 = vmatpush3.bf16.msra.mxu0 %v12335_v31 }
 0x3f8   : > { %11869 = vmatprep.subr.bf16.mxu0 %v17482_v8  ;;  %v12337_v9 = vld [vmem:[%s17345_s2 + $0x400] sm:$0xff]  }
 0x3f9   : > { %v15407_v14 = vpop.f32.mrf.mxu0  ;;  %11782 = vmatmul.mubr.bf16.gmra.mxu0 %v17705_v29  ;;  %v3387_v22 = vpop.f32.mrf.mxu1  ;;  %v3223_v29 = vadd.f32 %v14679_v63, %v15191_v47  ;;  %v12339_v63 = vld [vmem:[%s17345_s2 + $0x548] sm:$0xff]   ;;  %v3224_v47 = vadd.f32 %v14693_v25, %v15208_v12  ;;  %v12340_v25 = vld [vmem:[%s17345_s2 + $0x540] sm:$0xff]   ;;  %v3225_v12 = vadd.f32 %v14703_v0, %v15222_v15 }
 0x3fa   : > { %v15410_v49 = vadd.f32 %v3387_v22, %v3222_v18  ;;  %11785 = vmatprep.mubr.msk.bf16.mxu0 %vm12555_vm0, %v17482_v8  ;;  %11612 = vmatpush3.bf16.msra.mxu1 %v12331_v3 }
 0x3fb   : > { %v11483_v31 = vpop.f32.mrf.mxu0  ;;  %v11224_v10 = vpop.f32.mrf.mxu1  ;;  %11613 = vmatprep.subr.bf16.mxu1 %v17482_v8  ;;  %11870 = vmatpush3.bf16.msra.mxu0 %v12336_v62 }
 0x3fc   : > { %11871 = vmatprep.subr.bf16.mxu0 %v17482_v8 }
 0x3fd   : > { %v15424_v44 = vpop.f32.mrf.mxu0  ;;  %v3392_v61 = vpop.f32.mrf.mxu1  ;;  %11526 = vmatmul.mubr.bf16.gmra.mxu1 %v17722_v48 }
 0x3fe   : > { %v15427_v3 = vadd.f32 %v3392_v61, %v3223_v29  ;;  %11529 = vmatprep.mubr.msk.bf16.mxu1 %vm12555_vm0, %v17482_v8  ;;  %11614 = vmatpush3.bf16.msra.mxu1 %v12334_v41  ;;  %v17724_v29 = vld [vmem:[#allocation6_spill] sm:$0xff] }
 0x3ff   : > { %v11484_v1 = vpop.f32.mrf.mxu0  ;;  %v11227_v62 = vpop.f32.mrf.mxu1  ;;  %11615 = vmatprep.subr.bf16.mxu1 %v17482_v8  ;;  %11872 = vmatpush3.bf16.msra.mxu0 %v12338_v5 }
 0x400   : > { %11873 = vmatprep.subr.bf16.mxu0 %v17482_v8  ;;  %v3226_v1 = vadd.f32 %v14712_v54, %v15232_v40  ;;  %v17727_v40 = vld [vmem:[#allocation21_spill] sm:$0xff] }
 0x401   : > { %v15441_v18 = vpop.f32.mrf.mxu0  ;;  %11786 = vmatmul.mubr.bf16.gmra.mxu0 %v17710_v2  ;;  %v3395_v22 = vpop.f32.mrf.mxu1 }
 0x402   : > { %v15444_v41 = vadd.f32 %v3395_v22, %v3224_v47  ;;  %11789 = vmatprep.mubr.msk.bf16.mxu0 %vm12555_vm0, %v17482_v8  ;;  %11616 = vmatpush3.bf16.msra.mxu1 %v12337_v9  ;;  %v3227_v22 = vadd.f32 %v14721_v52, %v15241_v38 }
 0x403   : > { %v11487_v31 = vpop.f32.mrf.mxu0  ;;  %v11228_v10 = vpop.f32.mrf.mxu1  ;;  %11874 = vmatpush3.bf16.msra.mxu0 %v12339_v63  ;;  %11705 = vmatprep.subr.bf16.mxu1 %v17482_v8 }
 0x404   : > { %11875 = vmatprep.subr.bf16.mxu0 %v17482_v8 }
 0x405   : > { %v15455_v2 = vpop.f32.mrf.mxu0  ;;  %v3400_v5 = vpop.f32.mrf.mxu1  ;;  %11530 = vmatmul.mubr.bf16.gmra.mxu1 %v17724_v29 }
 0x406   : > { %17723 = vst [vmem:[#allocation98_spill] sm:$0xff] %v15455_v2  ;;  %v15458_v61 = vadd.f32 %v3400_v5, %v3225_v12  ;;  %11533 = vmatprep.mubr.msk.bf16.mxu1 %vm12555_vm0, %v17482_v8  ;;  %v3228_v12 = vadd.f32 %v14731_v28, %v15250_v32 }
 0x407   : > { %v11488_v48 = vpop.f32.mrf.mxu0  ;;  %v11231_v9 = vpop.f32.mrf.mxu1  ;;  %11876 = vmatpush3.bf16.msra.mxu0 %v12340_v25 }
 0x408   : > { %11965 = vmatprep.subr.bf16.mxu0 %v17482_v8  ;;  %v3611_v9 = vadd.f32 %v14740_v56, %v15259_v6 }
 0x409   : > { %v15465_v0 = vpop.f32.mrf.mxu0  ;;  %11790 = vmatmul.mubr.bf16.gmra.mxu0 %v17713_v37  ;;  %v3403_v15 = vpop.f32.mrf.mxu1 }
 0x40a   : > { %17725 = vst [vmem:[#allocation100_spill] sm:$0xff] %v15465_v0  ;;  %v15468_v62 = vadd.f32 %v3403_v15, %v3226_v1  ;;  %11793 = vmatprep.mubr.msk.bf16.mxu0 %vm12555_vm0, %v17482_v8 }
 0x40b   : > { %v11491_v63 = vpop.f32.mrf.mxu0  ;;  %v11232_v47 = vpop.f32.mrf.mxu1 }
 0x40c   : > { %v17730_v63 = vld [vmem:[#allocation19_spill] sm:$0xff]  ;;  %v3612_v47 = vadd.f32 %v14751_v39, %v15268_v60 }
 0x40d   : > { %v15474_v31 = vpop.f32.mrf.mxu0  ;;  %v3408_v54 = vpop.f32.mrf.mxu1  ;;  %11534 = vmatmul.mubr.bf16.gmra.mxu1 %v17727_v40 }
 0x40e   : > { %17726 = vst [vmem:[#allocation56_spill] sm:$0xff] %v15474_v31  ;;  %v15477_v10 = vadd.f32 %v3408_v54, %v3227_v22  ;;  %11537 = vmatprep.mubr.msk.bf16.mxu1 %vm12555_vm0, %v17482_v8 }
 0x40f   : > { %v11492_v37 = vpop.f32.mrf.mxu0  ;;  %v11235_v25 = vpop.f32.mrf.mxu1 }
 0x410   : > { %v17732_v37 = vld [vmem:[#allocation20_spill] sm:$0xff] }
 0x411   : > { %v15483_v5 = vpop.f32.mrf.mxu0  ;;  %11794 = vmatmul.mubr.bf16.gmra.mxu0 %v17714_v23  ;;  %v3411_v52 = vpop.f32.mrf.mxu1  ;;  %v3613_v25 = vadd.f32 %v17732_v37, %v15280_v35  ;;  %v17740_v37 = vld [vmem:[#allocation15_spill] sm:$0xff] }
 0x412   : > { %17728 = vst [vmem:[#allocation101_spill] sm:$0xff] %v15483_v5  ;;  %v15486_v38 = vadd.f32 %v3411_v52, %v3228_v12  ;;  %11797 = vmatprep.mubr.msk.bf16.mxu0 %vm12555_vm0, %v17482_v8  ;;  %v17792_v5 = vld [vmem:[#allocation52_spill] sm:$0xff] }
 0x413   : > { %v11495_v29 = vpop.f32.mrf.mxu0  ;;  %v11236_v48 = vpop.f32.mrf.mxu1 }
 0x414   : > { %v17734_v29 = vld [vmem:[#allocation11_spill] sm:$0xff] }
 0x415   : > { %v15492_v1 = vpop.f32.mrf.mxu0  ;;  %v3760_v15 = vpop.f32.mrf.mxu1  ;;  %11538 = vmatmul.mubr.bf16.gmra.mxu1 %v17730_v63  ;;  %v17735_v48 = vld [vmem:[#allocation23_spill] sm:$0xff]  ;;  %v17737_v63 = vld [vmem:[#allocation38_spill] sm:$0xff] }
 0x416   : > { %17729 = vst [vmem:[#allocation103_spill] sm:$0xff] %v15492_v1  ;;  %v15495_v28 = vadd.f32 %v3760_v15, %v3611_v9  ;;  %11541 = vmatprep.mubr.msk.bf16.mxu1 %vm12555_vm0, %v17482_v8  ;;  %v3614_v9 = vadd.f32 %v17735_v48, %v15294_v21  ;;  %v17742_v48 = vld [vmem:[#allocation24_spill] sm:$0xff]  ;;  %v17791_v1 = vld [vmem:[#allocation59_spill] sm:$0xff] }
 0x417   : > { %v11496_v23 = vpop.f32.mrf.mxu0  ;;  %v11307_v32 = vpop.f32.mrf.mxu1 }
 0x419   : > { %v15501_v22 = vpop.f32.mrf.mxu0  ;;  %11798 = vmatmul.mubr.bf16.gmra.mxu0 %v17716_v34  ;;  %v3763_v56 = vpop.f32.mrf.mxu1 }
 0x41a   : > { %17731 = vst [vmem:[#allocation61_spill] sm:$0xff] %v15501_v22  ;;  %v15504_v6 = vadd.f32 %v3763_v56, %v3612_v47  ;;  %11801 = vmatprep.mubr.msk.bf16.mxu0 %vm12555_vm0, %v17482_v8  ;;  %v17738_v56 = vld [vmem:[#allocation9_spill] sm:$0xff]  ;;  %v17790_v22 = vld [vmem:[#allocation88_spill] sm:$0xff] }
 0x41b   : > { %v11567_v54 = vpop.f32.mrf.mxu0  ;;  %v11308_v40 = vpop.f32.mrf.mxu1 }
 0x41c   : > { %v17739_v54 = vld [vmem:[#allocation14_spill] sm:$0xff] }
 0x41d   : > { %v15510_v12 = vpop.f32.mrf.mxu0  ;;  %v3768_v52 = vpop.f32.mrf.mxu1  ;;  %11542 = vmatmul.mubr.bf16.gmra.mxu1 %v17734_v29  ;;  %v4488_v40 = vpack.c.bf16 %v17739_v54, %v17738_v56 }
 0x41e   : > { %17733 = vst [vmem:[#allocation104_spill] sm:$0xff] %v15510_v12  ;;  %v15513_v39 = vadd.f32 %v3768_v52, %v3613_v25  ;;  %11545 = vmatprep.mubr.msk.bf16.mxu1 %vm12555_vm0, %v17482_v8  ;;  %v3615_v25 = vadd.f32 %v17740_v37, %v15304_v51  ;;  %v17788_v12 = vld [vmem:[#allocation12_spill] sm:$0xff] }
 0x41f   : > { %v11568_v60 = vpop.f32.mrf.mxu0  ;;  %v11311_v34 = vpop.f32.mrf.mxu1 }
 0x421   : > { %v15519_v15 = vpop.f32.mrf.mxu0  ;;  %11802 = vmatmul.mubr.bf16.gmra.mxu0 %v17737_v63  ;;  %v3771_v35 = vpop.f32.mrf.mxu1 }
 0x422   : > { %17736 = vst [vmem:[#allocation65_spill] sm:$0xff] %v15519_v15  ;;  %v15522_v23 = vadd.f32 %v3771_v35, %v3614_v9  ;;  %11805 = vmatprep.mubr.msk.bf16.mxu0 %vm12555_vm0, %v17482_v8  ;;  %v3616_v9 = vadd.f32 %v17742_v48, %v15314_v11  ;;  %v17744_v35 = vld [vmem:[#allocation39_spill] sm:$0xff] }
 0x423   : > { %v11571_v32 = vpop.f32.mrf.mxu0  ;;  %v11312_v47 = vpop.f32.mrf.mxu1 }
 0x424   : > { %v12341_v47 = vld [vmem:[%s17345_s2 + $0x4b8] sm:$0xff]  }
 0x425   : > { %v15530_v52 = vpop.f32.mrf.mxu0  ;;  %v3776_v21 = vpop.f32.mrf.mxu1  ;;  %11546 = vmatmul.mubr.bf16.gmra.mxu1 %v4488_v40  ;;  %v17745_v40 = vld [vmem:[#allocation25_spill] sm:$0xff] }
 0x426   : > { %17741 = vst [vmem:[#allocation66_spill] sm:$0xff] %v15530_v52  ;;  %v15532_v29 = vadd.f32 %v3776_v21, %v3615_v25  ;;  %11617 = vmatprep.mubr.msk.bf16.mxu1 %vm12555_vm0, %v17482_v8  ;;  %v3617_v37 = vadd.f32 %v17745_v40, %v15326_v24  ;;  %v17747_v21 = vld [vmem:[#allocation40_spill] sm:$0xff]  ;;  %v12346_v24 = vld [vmem:[%s17345_s2 + $0x5f8] sm:$0xff]  }
 0x427   : > { %v11572_v60 = vpop.f32.mrf.mxu0  ;;  %v11315_v34 = vpop.f32.mrf.mxu1  ;;  %v17777_v52 = vld [vmem:[#allocation57_spill] sm:$0xff] }
 0x428   : > { %v12342_v34 = vld [vmem:[%s17345_s2 + $0x4b0] sm:$0xff]  }
 0x429   : > { %v15538_v63 = vpop.f32.mrf.mxu0  ;;  %11806 = vmatmul.mubr.bf16.gmra.mxu0 %v17744_v35  ;;  %v3779_v32 = vpop.f32.mrf.mxu1  ;;  %v17748_v35 = vld [vmem:[#allocation26_spill] sm:$0xff] }
 0x42a   : > { %17743 = vst [vmem:[#allocation36_spill] sm:$0xff] %v15538_v63  ;;  %v15541_v51 = vadd.f32 %v3779_v32, %v3616_v9  ;;  %11877 = vmatprep.mubr.msk.bf16.mxu0 %vm12555_vm0, %v17482_v8  ;;  %v3618_v32 = vadd.f32 %v17748_v35, %v15342_v17  ;;  %v12348_v17 = vld [vmem:[%s17345_s2 + $0x5f0] sm:$0xff]   ;;  %v17775_v63 = vld [vmem:[#allocation78_spill] sm:$0xff] }
 0x42b   : > { %v11575_v56 = vpop.f32.mrf.mxu0  ;;  %v11316_v54 = vpop.f32.mrf.mxu1 }
 0x42d   : > { %v15550_v11 = vpop.f32.mrf.mxu0  ;;  %v3784_v25 = vpop.f32.mrf.mxu1  ;;  %11618 = vmatmul.mubr.bf16.vlgmr.msra.gmra.mxu1 %v17747_v21 }
 0x42e   : > { %17746 = vst [vmem:[#allocation37_spill] sm:$0xff] %v15550_v11  ;;  %v15553_v60 = vadd.f32 %v3784_v25, %v3617_v37  ;;  %11706 = vmatpush3.bf16.msra.mxu1 %v12341_v47  ;;  %11621 = vmatprep.mubr.msk.bf16.mxu1 %vm12555_vm0, %v17482_v8  ;;  %v17750_v47 = vld [vmem:[#allocation41_spill] sm:$0xff]  ;;  %v12343_v37 = vld [vmem:[%s17345_s2 + $0x4a8] sm:$0xff]  }
 0x42f   : > { %v11576_v48 = vpop.f32.mrf.mxu0  ;;  %v11319_v9 = vpop.f32.mrf.mxu1  ;;  %11707 = vmatprep.subr.bf16.mxu1 %v17482_v8 }
 0x430   : > { %v17751_v48 = vld [vmem:[#allocation68_spill] sm:$0xff] }
 0x431   : > { %v15566_v56 = vpop.f32.mrf.mxu0  ;;  %11878 = vmatmul.mubr.bf16.vlgmr.msra.gmra.mxu0 %v17750_v47  ;;  %v3787_v54 = vpop.f32.mrf.mxu1  ;;  %v3619_v9 = vadd.f32 %v17751_v48, %v15359_v59  ;;  %v12349_v59 = vld [vmem:[%s17345_s2 + $0x5e8] sm:$0xff]  }
 0x432   : > { %17749 = vst [vmem:[#allocation2_spill] sm:$0xff] %v15566_v56  ;;  %v15569_v40 = vadd.f32 %v3787_v54, %v3618_v32  ;;  %11708 = vmatpush3.bf16.msra.mxu1 %v12342_v34  ;;  %11881 = vmatprep.mubr.msk.bf16.mxu0 %vm12555_vm0, %v17482_v8  ;;  %v17753_v32 = vld [vmem:[#allocation42_spill] sm:$0xff] }
 0x433   : > { %v11579_v25 = vpop.f32.mrf.mxu0  ;;  %v11320_v21 = vpop.f32.mrf.mxu1  ;;  %11709 = vmatprep.subr.bf16.mxu1 %v17482_v8  ;;  %11966 = vmatpush3.bf16.msra.mxu0 %v12346_v24  ;;  %v12344_v24 = vld [vmem:[%s17345_s2 + $0x4a0] sm:$0xff]  }
 0x434   : > { %11967 = vmatprep.subr.bf16.mxu0 %v17482_v8  ;;  %v17754_v21 = vld [vmem:[#allocation87_spill] sm:$0xff] }
 0x435   : > { %v15583_v34 = vpop.f32.mrf.mxu0  ;;  %v3792_v35 = vpop.f32.mrf.mxu1  ;;  %11622 = vmatmul.mubr.bf16.gmra.mxu1 %v17753_v32  ;;  %v3620_v48 = vadd.f32 %v17754_v21, %v15376_v16  ;;  %v12351_v16 = vld [vmem:[%s17345_s2 + $0x5e0] sm:$0xff]   ;;  %v17757_v21 = vld [vmem:[#allocation29_spill] sm:$0xff] }
 0x436   : > { %17752 = vst [vmem:[#allocation4_spill] sm:$0xff] %v15583_v34  ;;  %v15586_v47 = vadd.f32 %v3792_v35, %v3619_v9  ;;  %11625 = vmatprep.mubr.msk.bf16.mxu1 %vm12555_vm0, %v17482_v8  ;;  %11710 = vmatpush3.bf16.msra.mxu1 %v12343_v37  ;;  %v17756_v37 = vld [vmem:[#allocation43_spill] sm:$0xff] }
 0x437   : > { %v11580_v54 = vpop.f32.mrf.mxu0  ;;  %v11323_v25 = vpop.f32.mrf.mxu1  ;;  %11711 = vmatprep.subr.bf16.mxu1 %v17482_v8  ;;  %11968 = vmatpush3.bf16.msra.mxu0 %v12348_v17  ;;  %v12345_v17 = vld [vmem:[%s17345_s2 + $0x498] sm:$0xff]  }
 0x438   : > { %11969 = vmatprep.subr.bf16.mxu0 %v17482_v8 }
 0x439   : > { %v15600_v9 = vpop.f32.mrf.mxu0  ;;  %11882 = vmatmul.mubr.bf16.gmra.mxu0 %v17756_v37  ;;  %v3795_v35 = vpop.f32.mrf.mxu1 }
 0x43a   : > { %17755 = vst [vmem:[#allocation13_spill] sm:$0xff] %v15600_v9  ;;  %v15603_v4 = vadd.f32 %v3795_v35, %v3620_v48  ;;  %11885 = vmatprep.mubr.msk.bf16.mxu0 %vm12555_vm0, %v17482_v8  ;;  %11712 = vmatpush3.bf16.msra.mxu1 %v12344_v24  ;;  %v3621_v48 = vadd.f32 %v17757_v21, %v15393_v57  ;;  %v17759_v35 = vld [vmem:[#allocation45_spill] sm:$0xff]  ;;  %v17760_v21 = vld [vmem:[#allocation71_spill] sm:$0xff] }
 0x43b   : > { %v11583_v54 = vpop.f32.mrf.mxu0  ;;  %v11324_v25 = vpop.f32.mrf.mxu1  ;;  %11713 = vmatprep.subr.bf16.mxu1 %v17482_v8  ;;  %11970 = vmatpush3.bf16.msra.mxu0 %v12349_v59  ;;  %v12347_v59 = vld [vmem:[%s17345_s2 + $0x490] sm:$0xff]   ;;  %v12352_v57 = vld [vmem:[%s17345_s2 + $0x5d8] sm:$0xff]  }
 0x43c   : > { %11971 = vmatprep.subr.bf16.mxu0 %v17482_v8 }
 0x43d   : > { %v15617_v37 = vpop.f32.mrf.mxu0  ;;  %v3800_v24 = vpop.f32.mrf.mxu1  ;;  %11626 = vmatmul.mubr.bf16.gmra.mxu1 %v17759_v35 }
 0x43e   : > { %17758 = vst [vmem:[#allocation7_spill] sm:$0xff] %v15617_v37  ;;  %v15620_v9 = vadd.f32 %v3800_v24, %v3621_v48  ;;  %11629 = vmatprep.mubr.msk.bf16.mxu1 %vm12555_vm0, %v17482_v8  ;;  %11714 = vmatpush3.bf16.msra.mxu1 %v12345_v17  ;;  %v3622_v48 = vadd.f32 %v17760_v21, %v15410_v49  ;;  %v17762_v17 = vld [vmem:[#allocation44_spill] sm:$0xff] }
 0x43f   : > { %v11584_v54 = vpop.f32.mrf.mxu0  ;;  %v11327_v25 = vpop.f32.mrf.mxu1  ;;  %11715 = vmatprep.subr.bf16.mxu1 %v17482_v8  ;;  %11972 = vmatpush3.bf16.msra.mxu0 %v12351_v16  ;;  %v12350_v16 = vld [vmem:[%s17345_s2 + $0x488] sm:$0xff]   ;;  %v12354_v49 = vld [vmem:[%s17345_s2 + $0x5d0] sm:$0xff]  }
 0x440   : > { %11973 = vmatprep.subr.bf16.mxu0 %v17482_v8 }
 0x441   : > { %v15634_v24 = vpop.f32.mrf.mxu0  ;;  %11886 = vmatmul.mubr.bf16.gmra.mxu0 %v17762_v17  ;;  %v3803_v37 = vpop.f32.mrf.mxu1  ;;  %v17765_v17 = vld [vmem:[#allocation47_spill] sm:$0xff] }
 0x442   : > { %17761 = vst [vmem:[#allocation6_spill] sm:$0xff] %v15634_v24  ;;  %v15637_v34 = vadd.f32 %v3803_v37, %v3622_v48  ;;  %11889 = vmatprep.mubr.msk.bf16.mxu0 %vm12555_vm0, %v17482_v8  ;;  %11716 = vmatpush3.bf16.msra.mxu1 %v12347_v59  ;;  %v17763_v37 = vld [vmem:[#allocation30_spill] sm:$0xff] }
 0x443   : > { %v11587_v54 = vpop.f32.mrf.mxu0  ;;  %v11328_v25 = vpop.f32.mrf.mxu1  ;;  %11717 = vmatprep.subr.bf16.mxu1 %v17482_v8  ;;  %11974 = vmatpush3.bf16.msra.mxu0 %v12352_v57  ;;  %v3623_v21 = vadd.f32 %v17763_v37, %v15427_v3  ;;  %v12353_v57 = vld [vmem:[%s17345_s2 + $0x480] sm:$0xff]   ;;  %v12355_v3 = vld [vmem:[%s17345_s2 + $0x5c8] sm:$0xff]   ;;  %v17766_v37 = vld [vmem:[#allocation72_spill] sm:$0xff] }
 0x444   : > { %11975 = vmatprep.subr.bf16.mxu0 %v17482_v8 }
 0x445   : > { %v15651_v48 = vpop.f32.mrf.mxu0  ;;  %v3808_v59 = vpop.f32.mrf.mxu1  ;;  %11630 = vmatmul.mubr.bf16.gmra.mxu1 %v17765_v17 }
 0x446   : > { %17764 = vst [vmem:[#allocation21_spill] sm:$0xff] %v15651_v48  ;;  %v15654_v24 = vadd.f32 %v3808_v59, %v3623_v21  ;;  %11633 = vmatprep.mubr.msk.bf16.mxu1 %vm12555_vm0, %v17482_v8  ;;  %11718 = vmatpush3.bf16.msra.mxu1 %v12350_v16  ;;  %v3624_v21 = vadd.f32 %v17766_v37, %v15444_v41  ;;  %v17768_v16 = vld [vmem:[#allocation46_spill] sm:$0xff] }
 0x447   : > { %v11588_v54 = vpop.f32.mrf.mxu0  ;;  %v11331_v25 = vpop.f32.mrf.mxu1  ;;  %11719 = vmatprep.subr.bf16.mxu1 %v17482_v8  ;;  %11976 = vmatpush3.bf16.msra.mxu0 %v12354_v49  ;;  %v12356_v41 = vld [vmem:[%s17345_s2 + $0x5c0] sm:$0xff]  }
 0x448   : > { %11977 = vmatprep.subr.bf16.mxu0 %v17482_v8  ;;  %v17769_v25 = vld [vmem:[#allocation74_spill] sm:$0xff] }
 0x449   : > { %v15668_v59 = vpop.f32.mrf.mxu0  ;;  %11890 = vmatmul.mubr.bf16.gmra.mxu0 %v17768_v16  ;;  %v3811_v48 = vpop.f32.mrf.mxu1  ;;  %v3625_v37 = vadd.f32 %v17769_v25, %v15458_v61  ;;  %v17771_v16 = vld [vmem:[#allocation50_spill] sm:$0xff]  ;;  %v17774_v61 = vld [vmem:[#allocation48_spill] sm:$0xff] }
 0x44a   : > { %17767 = vst [vmem:[#allocation19_spill] sm:$0xff] %v15668_v59  ;;  %v15671_v56 = vadd.f32 %v3811_v48, %v3624_v21  ;;  %11893 = vmatprep.mubr.msk.bf16.mxu0 %vm12555_vm0, %v17482_v8  ;;  %11720 = vmatpush3.bf16.msra.mxu1 %v12353_v57 }
 0x44b   : > { %v11591_v49 = vpop.f32.mrf.mxu0  ;;  %v11332_v54 = vpop.f32.mrf.mxu1  ;;  %11978 = vmatpush3.bf16.msra.mxu0 %v12355_v3  ;;  %11809 = vmatprep.subr.bf16.mxu1 %v17482_v8 }
 0x44c   : > { %11979 = vmatprep.subr.bf16.mxu0 %v17482_v8  ;;  %v17772_v54 = vld [vmem:[#allocation76_spill] sm:$0xff] }
 0x44d   : > { %v15682_v48 = vpop.f32.mrf.mxu0  ;;  %v3816_v21 = vpop.f32.mrf.mxu1  ;;  %11634 = vmatmul.mubr.bf16.gmra.mxu1 %v17771_v16  ;;  %v3626_v59 = vadd.f32 %v17772_v54, %v15468_v62 }
 0x44e   : > { %17770 = vst [vmem:[#allocation20_spill] sm:$0xff] %v15682_v48  ;;  %v15685_v57 = vadd.f32 %v3816_v21, %v3625_v37  ;;  %11637 = vmatprep.mubr.msk.bf16.mxu1 %vm12555_vm0, %v17482_v8 }
 0x44f   : > { %v11592_v3 = vpop.f32.mrf.mxu0  ;;  %v11335_v49 = vpop.f32.mrf.mxu1  ;;  %11980 = vmatpush3.bf16.msra.mxu0 %v12356_v41 }
 0x450   : > { %v3627_v3 = vadd.f32 %v17775_v63, %v15477_v10 }
 0x451   : > { %v15691_v11 = vpop.f32.mrf.mxu0  ;;  %11894 = vmatmul.mubr.bf16.gmra.mxu0 %v17774_v61  ;;  %v3819_v25 = vpop.f32.mrf.mxu1  ;;  %v17778_v61 = vld [vmem:[#allocation80_spill] sm:$0xff] }
 0x452   : > { %17773 = vst [vmem:[#allocation11_spill] sm:$0xff] %v15691_v11  ;;  %v15694_v48 = vadd.f32 %v3819_v25, %v3626_v59  ;;  %11897 = vmatprep.mubr.msk.bf16.mxu0 %vm12555_vm0, %v17482_v8  ;;  %v3628_v25 = vadd.f32 %v17778_v61, %v15486_v38  ;;  %v17784_v61 = vld [vmem:[#allocation58_spill] sm:$0xff] }
 0x453   : > { %v11595_v37 = vpop.f32.mrf.mxu0  ;;  %v11336_v21 = vpop.f32.mrf.mxu1 }
 0x454   : > { %v17780_v21 = vld [vmem:[#allocation51_spill] sm:$0xff] }
 0x455   : > { %v15700_v49 = vpop.f32.mrf.mxu0  ;;  %v3824_v41 = vpop.f32.mrf.mxu1  ;;  %11638 = vmatmul.mubr.bf16.gmra.mxu1 %v17777_v52 }
 0x456   : > { %17776 = vst [vmem:[#allocation23_spill] sm:$0xff] %v15700_v49  ;;  %v15703_v62 = vadd.f32 %v3824_v41, %v3627_v3  ;;  %11641 = vmatprep.mubr.msk.bf16.mxu1 %vm12555_vm0, %v17482_v8  ;;  %v17781_v49 = vld [vmem:[#allocation82_spill] sm:$0xff] }
 0x457   : > { %v11596_v59 = vpop.f32.mrf.mxu0  ;;  %v11339_v54 = vpop.f32.mrf.mxu1  ;;  %v4078_v11 = vadd.f32 %v17781_v49, %v15495_v28 }
 0x458   : > { %v17782_v59 = vld [vmem:[#allocation53_spill] sm:$0xff] }
 0x459   : > { %v15709_v37 = vpop.f32.mrf.mxu0  ;;  %11898 = vmatmul.mubr.bf16.gmra.mxu0 %v17780_v21  ;;  %v3827_v10 = vpop.f32.mrf.mxu1  ;;  %v5956_v54 = vrot.slane %v17782_v59, 1 }
 0x45a   : > { %17779 = vst [vmem:[#allocation38_spill] sm:$0xff] %v15709_v37  ;;  %v15712_v63 = vadd.f32 %v3827_v10, %v3628_v25  ;;  %11901 = vmatprep.mubr.msk.bf16.mxu0 %vm12555_vm0, %v17482_v8  ;;  %v17785_v10 = vld [vmem:[#allocation54_spill] sm:$0xff] }
 0x45b   : > { %v11599_v3 = vpop.f32.mrf.mxu0  ;;  %v11340_v41 = vpop.f32.mrf.mxu1 }
 0x45c   : > { %v5957_v3 = vsel %vm1441_vm1, %v17785_v10, %v5956_v54  ;;  %v17786_v41 = vld [vmem:[#allocation85_spill] sm:$0xff]  ;;  %v4080_v10 = vadd.f32 %v17790_v22, %v15513_v39 }
 0x45d   : > { %v15719_v15 = vpop.f32.mrf.mxu0  ;;  %v4201_v38 = vpop.f32.mrf.mxu1  ;;  %11642 = vmatmul.mubr.bf16.gmra.mxu1 %v17784_v61  ;;  %v4079_v28 = vadd.f32 %v17786_v41, %v15504_v6  ;;  %v15743_v6 = vsel %vm2077_vm2, %v17792_v5, %v17791_v1 }
 0x45e   : > { %17783 = vst [vmem:[#allocation9_spill] sm:$0xff] %v15719_v15  ;;  %v15722_v37 = vadd.f32 %v4201_v38, %v4078_v11  ;;  %11645 = vmatprep.mubr.msk.bf16.mxu1 %vm12555_vm0, %v17482_v8 }
 0x45f   : > { %v11600_v25 = vpop.f32.mrf.mxu0  ;;  %v11411_v21 = vpop.f32.mrf.mxu1 }
 0x460   : > { %v17789_v25 = vshll.u32 %v17788_v12, 16 }
 0x461   : > { %v15730_v49 = vpop.f32.mrf.mxu0  ;;  %11902 = vmatmul.mubr.bf16.gmra.mxu0 %v5957_v3  ;;  %v4204_v59 = vpop.f32.mrf.mxu1  ;;  %v17793_v3 = vshrl.u32 %v17687_v46, 16 }
 0x462   : > { %17787 = vst [vmem:[#allocation14_spill] sm:$0xff] %v15730_v49  ;;  %v15732_v15 = vadd.f32 %v4204_v59, %v4079_v28  ;;  %11905 = vmatprep.mubr.msk.bf16.mxu0 %vm12555_vm0, %v17482_v8  ;;  %v5962_v21 = vrot.slane %v17789_v25, 1  ;;  %v17794_v28 = vshll.u32 %v17687_v46, 16  ;;  %v17796_v25 = vld [vmem:[#allocation55_spill] sm:$0xff] }
 0x463   : > { %v11671_v11 = vpop.f32.mrf.mxu0  ;;  %v11412_v38 = vpop.f32.mrf.mxu1  ;;  %v4957_v41 = vrot.slane %v17793_v3, 1  ;;  %v5958_v22 = vor.u32 %v5956_v54, %v17796_v25  ;;  %v17797_v3 = vld [vmem:[#allocation89_spill] sm:$0xff] }
 0x464   : > { %v4960_v59 = vrot.slane %v17794_v28, 2  ;;  %v4081_v46 = vadd.f32 %v17797_v3, %v15522_v23  ;;  %v17798_v23 = vshrl.u32 %v17788_v12, 16 }
 0x465   : > { %v15749_v49 = vpop.f32.mrf.mxu0  ;;  %v4209_v11 = vpop.f32.mrf.mxu1  ;;  %11646 = vmatmul.mubr.bf16.gmra.mxu1 %v15743_v6  ;;  %v5963_v31 = vsel %vm1441_vm1, %v5958_v22, %v5962_v21  ;;  %v17799_v22 = vld [vmem:[#allocation49_spill] sm:$0xff] }
 0x466   : > { %17795 = vst [vmem:[#allocation15_spill] sm:$0xff] %v15749_v49  ;;  %v15752_v38 = vadd.f32 %v4209_v11, %v4080_v10  ;;  %11649 = vmatprep.mubr.msk.bf16.mxu1 %vm12555_vm0, %v17482_v8  ;;  %v4961_v28 = vor.u32 %v4960_v59, %v4957_v41  ;;  %v4082_v11 = vadd.f32 %v15076_v33, %v15532_v29 }
 0x467   : > { %v11672_v5 = vpop.f32.mrf.mxu0  ;;  %v11415_v39 = vpop.f32.mrf.mxu1  ;;  %v5966_v41 = vor.u32 %v17798_v23, %v5962_v21 }
 0x468   : > { %v4962_v25 = vsel %vm2077_vm2, %v17791_v1, %v4961_v28  ;;  %v17800_v5 = vshll.u32 %v17799_v22, 16  ;;  %v4083_v1 = vadd.f32 %v15087_v26, %v15541_v51  ;;  %v17801_v51 = vld [vmem:[#allocation93_spill] sm:$0xff] }
 0x469   : > { %v15760_v0 = vpop.f32.mrf.mxu0  ;;  %11906 = vmatmul.mubr.bf16.gmra.mxu0 %v5963_v31  ;;  %v4212_v49 = vpop.f32.mrf.mxu1 }
 0x46a   : > { %v15762_v2 = vadd.f32 %v4212_v49, %v4081_v46  ;;  %11909 = vmatprep.mubr.msk.bf16.mxu0 %vm12555_vm0, %v17482_v8  ;;  %v5970_v39 = vrot.slane %v17800_v5, 1 }
 0x46b   : > { %v11675_v54 = vpop.f32.mrf.mxu0  ;;  %v11416_v10 = vpop.f32.mrf.mxu1 }
 0x46c   : > { %v5971_v29 = vsel %vm1441_vm1, %v5966_v41, %v5970_v39  ;;  %v12357_v54 = vld [vmem:[%s17345_s2 + $0x538] sm:$0xff]  }
 0x46d   : > { %v15772_v59 = vpop.f32.mrf.mxu0  ;;  %v4217_v31 = vpop.f32.mrf.mxu1  ;;  %11650 = vmatmul.mubr.bf16.gmra.mxu1 %v4962_v25  ;;  %v4084_v25 = vadd.f32 %v15103_v55, %v15553_v60  ;;  %v17802_v55 = vld [vmem:[#allocation33_spill] sm:$0xff] }
 0x46e   : > { %v15774_v49 = vadd.f32 %v4217_v31, %v4082_v11  ;;  %11721 = vmatprep.mubr.msk.bf16.mxu1 %vm12555_vm0, %v17482_v8  ;;  %v12358_v31 = vld [vmem:[%s17345_s2 + $0x530] sm:$0xff]   ;;  %v4085_v60 = vadd.f32 %v17802_v55, %v15569_v40  ;;  %v17803_v40 = vld [vmem:[#allocation90_spill] sm:$0xff] }
 0x46f   : > { %v11676_v3 = vpop.f32.mrf.mxu0  ;;  %v11419_v33 = vpop.f32.mrf.mxu1 }
 0x471   : > { %v15783_v21 = vpop.f32.mrf.mxu0  ;;  %11910 = vmatmul.mubr.bf16.gmra.mxu0 %v5971_v29  ;;  %v4220_v46 = vpop.f32.mrf.mxu1 }
 0x472   : > { %v15785_v28 = vadd.f32 %v4220_v46, %v4083_v1  ;;  %11981 = vmatprep.mubr.msk.bf16.mxu0 %vm12555_vm0, %v17482_v8  ;;  %v12359_v1 = vld [vmem:[%s17345_s2 + $0x528] sm:$0xff]  }
 0x473   : > { %v11679_v10 = vpop.f32.mrf.mxu0  ;;  %v11420_v11 = vpop.f32.mrf.mxu1 }
 0x474   : > { %v4086_v10 = vadd.f32 %v17803_v40, %v15586_v47  ;;  %v17805_v47 = vld [vmem:[#allocation91_spill] sm:$0xff] }
 0x475   : > { %v15794_v23 = vpop.f32.mrf.mxu0  ;;  %v4225_v26 = vpop.f32.mrf.mxu1  ;;  %11722 = vmatmul.mubr.bf16.vlgmr.msra.gmra.mxu1 %v17801_v51  ;;  %v12360_v51 = vld [vmem:[%s17345_s2 + $0x520] sm:$0xff]  }
 0x476   : > { %v15797_v41 = vadd.f32 %v4225_v26, %v4084_v25  ;;  %11810 = vmatpush3.bf16.msra.mxu1 %v12357_v54  ;;  %11725 = vmatprep.mubr.msk.bf16.mxu1 %vm12555_vm0, %v17482_v8  ;;  %v17804_v25 = vld [vmem:[#allocation96_spill] sm:$0xff] }
 0x477   : > { %v11680_v5 = vpop.f32.mrf.mxu0  ;;  %v11423_v39 = vpop.f32.mrf.mxu1  ;;  %11811 = vmatprep.subr.bf16.mxu1 %v17482_v8 }
 0x478   : > { %v4087_v39 = vadd.f32 %v17805_v47, %v15603_v4  ;;  %v17806_v4 = vld [vmem:[#allocation31_spill] sm:$0xff] }
 0x479   : > { %v15807_v3 = vpop.f32.mrf.mxu0  ;;  %11982 = vmatmul.mubr.bf16.vlgmr.msra.gmra.mxu0 %v17753_v32  ;;  %v4228_v33 = vpop.f32.mrf.mxu1  ;;  %v4088_v40 = vadd.f32 %v17806_v4, %v15620_v9  ;;  %v17808_v9 = vld [vmem:[#allocation92_spill] sm:$0xff] }
 0x47a   : > { %v15810_v29 = vadd.f32 %v4228_v33, %v4085_v60  ;;  %11812 = vmatpush3.bf16.msra.mxu1 %v12358_v31  ;;  %11985 = vmatprep.mubr.msk.bf16.mxu0 %vm12555_vm0, %v17482_v8  ;;  %v4089_v47 = vadd.f32 %v17808_v9, %v15637_v34  ;;  %v17809_v34 = vld [vmem:[#allocation94_spill] sm:$0xff] }
 0x47b   : > { %v11683_v46 = vpop.f32.mrf.mxu0  ;;  %v11424_v54 = vpop.f32.mrf.mxu1  ;;  %11813 = vmatprep.subr.bf16.mxu1 %v17482_v8 }
 0x47d   : > { %v15820_v11 = vpop.f32.mrf.mxu0  ;;  %v4233_v32 = vpop.f32.mrf.mxu1  ;;  %11726 = vmatmul.mubr.bf16.gmra.mxu1 %v17804_v25 }
 0x47e   : > { %v15823_v26 = vadd.f32 %v4233_v32, %v4086_v10  ;;  %11729 = vmatprep.mubr.msk.bf16.mxu1 %vm12555_vm0, %v17482_v8  ;;  %11814 = vmatpush3.bf16.msra.mxu1 %v12359_v1  ;;  %v12361_v1 = vld [vmem:[%s17345_s2 + $0x518] sm:$0xff]   ;;  %v17807_v32 = vld [vmem:[#allocation99_spill] sm:$0xff] }
 0x47f   : > { %v11684_v31 = vpop.f32.mrf.mxu0  ;;  %v11427_v5 = vpop.f32.mrf.mxu1  ;;  %11815 = vmatprep.subr.bf16.mxu1 %v17482_v8 }
 0x481   : > { %v15833_v55 = vpop.f32.mrf.mxu0  ;;  %11986 = vmatmul.mubr.bf16.gmra.mxu0 %v17759_v35  ;;  %v4236_v60 = vpop.f32.mrf.mxu1 }
 0x482   : > { %v15836_v33 = vadd.f32 %v4236_v60, %v4087_v39  ;;  %11989 = vmatprep.mubr.msk.bf16.mxu0 %vm12555_vm0, %v17482_v8  ;;  %11816 = vmatpush3.bf16.msra.mxu1 %v12360_v51  ;;  %v12362_v51 = vld [vmem:[%s17345_s2 + $0x510] sm:$0xff]  }
 0x483   : > { %v11687_v46 = vpop.f32.mrf.mxu0  ;;  %v11428_v54 = vpop.f32.mrf.mxu1  ;;  %11817 = vmatprep.subr.bf16.mxu1 %v17482_v8 }
 0x485   : > { %v15846_v10 = vpop.f32.mrf.mxu0  ;;  %v4241_v35 = vpop.f32.mrf.mxu1  ;;  %11730 = vmatmul.mubr.bf16.gmra.mxu1 %v17807_v32  ;;  %v17810_v32 = vld [vmem:[#allocation102_spill] sm:$0xff] }
 0x486   : > { %v15849_v25 = vadd.f32 %v4241_v35, %v4088_v40  ;;  %11733 = vmatprep.mubr.msk.bf16.mxu1 %vm12555_vm0, %v17482_v8  ;;  %11818 = vmatpush3.bf16.msra.mxu1 %v12361_v1  ;;  %v12363_v1 = vld [vmem:[%s17345_s2 + $0x508] sm:$0xff]   ;;  %v4090_v40 = vadd.f32 %v17809_v34, %v15654_v24  ;;  %v17811_v24 = vld [vmem:[#allocation34_spill] sm:$0xff] }
 0x487   : > { %v11688_v31 = vpop.f32.mrf.mxu0  ;;  %v11431_v5 = vpop.f32.mrf.mxu1  ;;  %11819 = vmatprep.subr.bf16.mxu1 %v17482_v8 }
 0x489   : > { %v15859_v39 = vpop.f32.mrf.mxu0  ;;  %11990 = vmatmul.mubr.bf16.gmra.mxu0 %v17765_v17  ;;  %v4244_v60 = vpop.f32.mrf.mxu1 }
 0x48a   : > { %v15862_v46 = vadd.f32 %v4244_v60, %v4089_v47  ;;  %11993 = vmatprep.mubr.msk.bf16.mxu0 %vm12555_vm0, %v17482_v8  ;;  %11820 = vmatpush3.bf16.msra.mxu1 %v12362_v51  ;;  %v12364_v51 = vld [vmem:[%s17345_s2 + $0x500] sm:$0xff]   ;;  %v4091_v47 = vadd.f32 %v17811_v24, %v15671_v56 }
 0x48b   : > { %v11691_v54 = vpop.f32.mrf.mxu0  ;;  %v11432_v4 = vpop.f32.mrf.mxu1  ;;  %11821 = vmatprep.subr.bf16.mxu1 %v17482_v8 }
 0x48d   : > { %v15872_v35 = vpop.f32.mrf.mxu0  ;;  %v4249_v17 = vpop.f32.mrf.mxu1  ;;  %11734 = vmatmul.mubr.bf16.gmra.mxu1 %v17810_v32  ;;  %v17812_v32 = vld [vmem:[#allocation105_spill] sm:$0xff] }
 0x48e   : > { %v15875_v31 = vadd.f32 %v4249_v17, %v4090_v40  ;;  %11737 = vmatprep.mubr.msk.bf16.mxu1 %vm12555_vm0, %v17482_v8  ;;  %11822 = vmatpush3.bf16.msra.mxu1 %v12363_v1  ;;  %v4092_v40 = vadd.f32 %v15229_v7, %v15685_v57 }
 0x48f   : > { %v11692_v5 = vpop.f32.mrf.mxu0  ;;  %v11435_v9 = vpop.f32.mrf.mxu1  ;;  %11823 = vmatprep.subr.bf16.mxu1 %v17482_v8 }
 0x491   : > { %v15885_v60 = vpop.f32.mrf.mxu0  ;;  %11994 = vmatmul.mubr.bf16.gmra.mxu0 %v17771_v16  ;;  %v4252_v54 = vpop.f32.mrf.mxu1 }
 0x492   : > { %v15888_v4 = vadd.f32 %v4252_v54, %v4091_v47  ;;  %11997 = vmatprep.mubr.msk.bf16.mxu0 %vm12555_vm0, %v17482_v8  ;;  %11824 = vmatpush3.bf16.msra.mxu1 %v12364_v51  ;;  %v17813_v51 = vld [vmem:[#allocation95_spill] sm:$0xff] }
 0x493   : > { %v11695_v1 = vpop.f32.mrf.mxu0  ;;  %v11436_v34 = vpop.f32.mrf.mxu1  ;;  %11913 = vmatprep.subr.bf16.mxu1 %v17482_v8  ;;  %v4093_v24 = vadd.f32 %v17813_v51, %v15694_v48 }
 0x494   : > { %v4094_v34 = vadd.f32 %v15247_v58, %v15703_v62 }
 0x495   : > { %v15895_v17 = vpop.f32.mrf.mxu0  ;;  %v4257_v56 = vpop.f32.mrf.mxu1  ;;  %11738 = vmatmul.mubr.bf16.gmra.mxu1 %v17812_v32  ;;  %v17814_v32 = vld [vmem:[#allocation106_spill] sm:$0xff] }
 0x496   : > { %v15898_v16 = vadd.f32 %v4257_v56, %v4092_v40  ;;  %11741 = vmatprep.mubr.msk.bf16.mxu1 %vm12555_vm0, %v17482_v8 }
 0x497   : > { %v11696_v5 = vpop.f32.mrf.mxu0  ;;  %v11439_v9 = vpop.f32.mrf.mxu1 }
 0x498   : > { %v4095_v9 = vadd.f32 %v15256_v53, %v15712_v63 }
 0x499   : > { %v15904_v47 = vpop.f32.mrf.mxu0  ;;  %11998 = vmatmul.mubr.bf16.gmra.mxu0 %v17777_v52  ;;  %v4260_v7 = vpop.f32.mrf.mxu1 }
 0x49a   : > { %v15907_v57 = vadd.f32 %v4260_v7, %v4093_v24  ;;  %12001 = vmatprep.mubr.msk.bf16.mxu0 %vm12555_vm0, %v17482_v8 }
 0x49b   : > { %v11699_v54 = vpop.f32.mrf.mxu0  ;;  %v11440_v1 = vpop.f32.mrf.mxu1 }
 0x49c   : > { %v4470_v54 = vadd.f32 %v15265_v43, %v15722_v37 }
 0x49d   : > { %v15913_v40 = vpop.f32.mrf.mxu0  ;;  %v4265_v56 = vpop.f32.mrf.mxu1  ;;  %11742 = vmatmul.mubr.bf16.gmra.mxu1 %v17814_v32  ;;  %v4471_v32 = vadd.f32 %v15277_v50, %v15732_v15 }
 0x49e   : > { %v15916_v48 = vadd.f32 %v4265_v56, %v4094_v34  ;;  %11745 = vmatprep.mubr.msk.bf16.mxu1 %vm12555_vm0, %v17482_v8  ;;  %v17815_v56 = vld [vmem:[#allocation107_spill] sm:$0xff] }
 0x49f   : > { %v11700_v52 = vpop.f32.mrf.mxu0  ;;  %v11443_v5 = vpop.f32.mrf.mxu1 }
 0x4a1   : > { %v15922_v51 = vpop.f32.mrf.mxu0  ;;  %12002 = vmatmul.mubr.bf16.gmra.mxu0 %v17784_v61  ;;  %v4268_v58 = vpop.f32.mrf.mxu1 }
 0x4a2   : > { %v15925_v62 = vadd.f32 %v4268_v58, %v4095_v9  ;;  %12005 = vmatprep.mubr.msk.bf16.mxu0 %vm12555_vm0, %v17482_v8  ;;  %v4472_v58 = vadd.f32 %v15291_v13, %v15752_v38 }
 0x4a3   : > { %v11703_v24 = vpop.f32.mrf.mxu0  ;;  %v11444_v7 = vpop.f32.mrf.mxu1 }
 0x4a5   : > { %v15931_v1 = vpop.f32.mrf.mxu0  ;;  %v4588_v34 = vpop.f32.mrf.mxu1  ;;  %11746 = vmatmul.mubr.bf16.gmra.mxu1 %v17815_v56 }
 0x4a6   : > { %v15934_v53 = vadd.f32 %v4588_v34, %v4470_v54  ;;  %11749 = vmatprep.mubr.msk.bf16.mxu1 %vm12555_vm0, %v17482_v8  ;;  %v17816_v54 = vld [vmem:[#allocation60_spill] sm:$0xff]  ;;  %v4473_v34 = vadd.f32 %v15301_v20, %v15762_v2 }
 0x4a7   : > { %v11704_v63 = vpop.f32.mrf.mxu0  ;;  %v11515_v61 = vpop.f32.mrf.mxu1 }
 0x4a8   : > { %v17817_v63 = vld [vmem:[#allocation62_spill] sm:$0xff] }
 0x4a9   : > { %v15940_v52 = vpop.f32.mrf.mxu0  ;;  %12006 = vmatmul.mubr.bf16.gmra.mxu0 %v15743_v6  ;;  %v4591_v43 = vpop.f32.mrf.mxu1 }
 0x4aa   : > { %v15943_v37 = vadd.f32 %v4591_v43, %v4471_v32  ;;  %12009 = vmatprep.mubr.msk.bf16.mxu0 %vm12555_vm0, %v17482_v8  ;;  %v4474_v43 = vadd.f32 %v15312_v42, %v15774_v49 }
 0x4ab   : > { %v11775_v5 = vpop.f32.mrf.mxu0  ;;  %v11516_v9 = vpop.f32.mrf.mxu1 }
 0x4ad   : > { %v15949_v24 = vpop.f32.mrf.mxu0  ;;  %v4596_v7 = vpop.f32.mrf.mxu1  ;;  %11750 = vmatmul.mubr.bf16.gmra.mxu1 %v17816_v54  ;;  %v4475_v54 = vadd.f32 %v15323_v27, %v15785_v28  ;;  %v17820_v27 = vld [vmem:[#allocation17_spill] sm:$0xff] }
 0x4ae   : > { %v15952_v50 = vadd.f32 %v4596_v7, %v4472_v58  ;;  %11753 = vmatprep.mubr.msk.bf16.mxu1 %vm12555_vm0, %v17482_v8  ;;  %v17818_v58 = vld [vmem:[#allocation63_spill] sm:$0xff] }
 0x4af   : > { %v11776_v15 = vpop.f32.mrf.mxu0  ;;  %v11519_v6 = vpop.f32.mrf.mxu1 }
 0x4b0   : > { %v17819_v6 = vld [vmem:[#allocation64_spill] sm:$0xff] }
 0x4b1   : > { %v15958_v56 = vpop.f32.mrf.mxu0  ;;  %12010 = vmatmul.mubr.bf16.gmra.mxu0 %v17817_v63  ;;  %v4599_v13 = vpop.f32.mrf.mxu1 }
 0x4b2   : > { %v15961_v38 = vadd.f32 %v4599_v13, %v4473_v34  ;;  %12013 = vmatprep.mubr.msk.bf16.mxu0 %vm12555_vm0, %v17482_v8  ;;  %v12365_v34 = vld [vmem:[%s17345_s2 + $0x5b8] sm:$0xff]  }
 0x4b3   : > { %v11779_v61 = vpop.f32.mrf.mxu0  ;;  %v11520_v32 = vpop.f32.mrf.mxu1 }
 0x4b4   : > { %v4476_v61 = vadd.f32 %v15339_v45, %v15797_v41  ;;  %v4477_v45 = vadd.f32 %v15356_v30, %v15810_v29  ;;  %v17821_v29 = vld [vmem:[#allocation5_spill] sm:$0xff] }
 0x4b5   : > { %v15967_v5 = vpop.f32.mrf.mxu0  ;;  %v4604_v9 = vpop.f32.mrf.mxu1  ;;  %11754 = vmatmul.mubr.bf16.gmra.mxu1 %v17818_v58 }
 0x4b6   : > { %v15970_v20 = vadd.f32 %v4604_v9, %v4474_v43  ;;  %11825 = vmatprep.mubr.msk.bf16.mxu1 %vm12555_vm0, %v17482_v8  ;;  %v12366_v9 = vld [vmem:[%s17345_s2 + $0x5b0] sm:$0xff]  }
 0x4b7   : > { %v11780_v2 = vpop.f32.mrf.mxu0  ;;  %v11523_v7 = vpop.f32.mrf.mxu1 }
 0x4b9   : > { %v15976_v15 = vpop.f32.mrf.mxu0  ;;  %12014 = vmatmul.mubr.bf16.gmra.mxu0 %v17819_v6  ;;  %v4607_v42 = vpop.f32.mrf.mxu1  ;;  %v12367_v6 = vld [vmem:[%s17345_s2 + $0x5a8] sm:$0xff]  }
 0x4ba   : > { %v15979_v49 = vadd.f32 %v4607_v42, %v4475_v54 }
 0x4bb   : > { %v11783_v63 = vpop.f32.mrf.mxu0  ;;  %v11524_v13 = vpop.f32.mrf.mxu1 }
 0x4bc   : > { %v4478_v63 = vadd.f32 %v15373_v36, %v15823_v26  ;;  %v4479_v36 = vadd.f32 %v15390_v19, %v15836_v33  ;;  %v17822_v33 = vld [vmem:[#allocation18_spill] sm:$0xff] }
 0x4bd   : > { %v15986_v32 = vpop.f32.mrf.mxu0  ;;  %v4612_v43 = vpop.f32.mrf.mxu1  ;;  %11826 = vmatmul.mubr.bf16.vlgmr.msra.gmra.mxu1 %v17820_v27 }
 0x4be   : > { %v15989_v28 = vadd.f32 %v4612_v43, %v4476_v61  ;;  %11914 = vmatpush3.bf16.msra.mxu1 %v12365_v34  ;;  %11829 = vmatprep.mubr.msk.bf16.mxu1 %vm12555_vm0, %v17482_v8  ;;  %v12368_v43 = vld [vmem:[%s17345_s2 + $0x5a0] sm:$0xff]  }
 0x4bf   : > { %v11784_v58 = vpop.f32.mrf.mxu0  ;;  %v11527_v2 = vpop.f32.mrf.mxu1  ;;  %11915 = vmatprep.subr.bf16.mxu1 %v17482_v8 }
 0x4c1   : > { %v15999_v41 = vpop.f32.mrf.mxu0  ;;  %v4615_v7 = vpop.f32.mrf.mxu1 }
 0x4c2   : > { %v16001_v54 = vadd.f32 %v4615_v7, %v4477_v45  ;;  %11916 = vmatpush3.bf16.msra.mxu1 %v12366_v9  ;;  %v12369_v45 = vld [vmem:[%s17345_s2 + $0x598] sm:$0xff]  }
 0x4c3   : > { %v11787_v42 = vpop.f32.mrf.mxu0  ;;  %v11528_v34 = vpop.f32.mrf.mxu1  ;;  %11917 = vmatprep.subr.bf16.mxu1 %v17482_v8 }
 0x4c4   : > { %v4480_v42 = vadd.f32 %v15407_v14, %v15849_v25  ;;  %v4481_v14 = vadd.f32 %v15424_v44, %v15862_v46  ;;  %v17823_v46 = vld [vmem:[#allocation8_spill] sm:$0xff] }
 0x4c5   : > { %v16009_v13 = vpop.f32.mrf.mxu0  ;;  %v4620_v30 = vpop.f32.mrf.mxu1  ;;  %11830 = vmatmul.mubr.bf16.gmra.mxu1 %v17821_v29 }
 0x4c6   : > { %v16012_v61 = vadd.f32 %v4620_v30, %v4478_v63  ;;  %11833 = vmatprep.mubr.msk.bf16.mxu1 %vm12555_vm0, %v17482_v8  ;;  %11918 = vmatpush3.bf16.msra.mxu1 %v12367_v6  ;;  %v12370_v30 = vld [vmem:[%s17345_s2 + $0x590] sm:$0xff]  }
 0x4c7   : > { %v11788_v27 = vpop.f32.mrf.mxu0  ;;  %v11531_v9 = vpop.f32.mrf.mxu1  ;;  %11919 = vmatprep.subr.bf16.mxu1 %v17482_v8 }
 0x4c9   : > { %v16022_v26 = vpop.f32.mrf.mxu0  ;;  %v4623_v58 = vpop.f32.mrf.mxu1 }
 0x4ca   : > { %v16024_v2 = vadd.f32 %v4623_v58, %v4479_v36  ;;  %11920 = vmatpush3.bf16.msra.mxu1 %v12368_v43  ;;  %v12371_v36 = vld [vmem:[%s17345_s2 + $0x588] sm:$0xff]  }
 0x4cb   : > { %v11791_v7 = vpop.f32.mrf.mxu0  ;;  %v11532_v6 = vpop.f32.mrf.mxu1  ;;  %11921 = vmatprep.subr.bf16.mxu1 %v17482_v8 }
 0x4cc   : > { %v4482_v7 = vadd.f32 %v15441_v18, %v15875_v31  ;;  %v17824_v18 = vld [vmem:[#allocation98_spill] sm:$0xff] }
 0x4cd   : > { %v16032_v34 = vpop.f32.mrf.mxu0  ;;  %v4628_v19 = vpop.f32.mrf.mxu1  ;;  %11834 = vmatmul.mubr.bf16.gmra.mxu1 %v17822_v33  ;;  %v4483_v31 = vadd.f32 %v17824_v18, %v15888_v4 }
 0x4ce   : > { %v16035_v63 = vadd.f32 %v4628_v19, %v4480_v42  ;;  %11837 = vmatprep.mubr.msk.bf16.mxu1 %vm12555_vm0, %v17482_v8  ;;  %11922 = vmatpush3.bf16.msra.mxu1 %v12369_v45  ;;  %v12372_v19 = vld [vmem:[%s17345_s2 + $0x580] sm:$0xff]  }
 0x4cf   : > { %v11792_v29 = vpop.f32.mrf.mxu0  ;;  %v11535_v43 = vpop.f32.mrf.mxu1  ;;  %11923 = vmatprep.subr.bf16.mxu1 %v17482_v8 }
 0x4d1   : > { %v16045_v25 = vpop.f32.mrf.mxu0  ;;  %v4631_v27 = vpop.f32.mrf.mxu1 }
 0x4d2   : > { %v16047_v9 = vadd.f32 %v4631_v27, %v4481_v14  ;;  %11924 = vmatpush3.bf16.msra.mxu1 %v12370_v30 }
 0x4d3   : > { %v11795_v58 = vpop.f32.mrf.mxu0  ;;  %v11536_v45 = vpop.f32.mrf.mxu1  ;;  %11925 = vmatprep.subr.bf16.mxu1 %v17482_v8 }
 0x4d5   : > { %v16055_v6 = vpop.f32.mrf.mxu0  ;;  %v4636_v44 = vpop.f32.mrf.mxu1  ;;  %11838 = vmatmul.mubr.bf16.gmra.mxu1 %v17823_v46  ;;  %v17827_v46 = vld [vmem:[#allocation22_spill] sm:$0xff] }
 0x4d6   : > { %v16058_v42 = vadd.f32 %v4636_v44, %v4482_v7  ;;  %11841 = vmatprep.mubr.msk.bf16.mxu1 %vm12555_vm0, %v17482_v8  ;;  %11926 = vmatpush3.bf16.msra.mxu1 %v12371_v36  ;;  %v17825_v36 = vld [vmem:[#allocation100_spill] sm:$0xff] }
 0x4d7   : > { %v11796_v33 = vpop.f32.mrf.mxu0  ;;  %v11539_v30 = vpop.f32.mrf.mxu1  ;;  %11927 = vmatprep.subr.bf16.mxu1 %v17482_v8  ;;  %v4484_v45 = vadd.f32 %v17825_v36, %v15898_v16  ;;  %v17830_v36 = vld [vmem:[#allocation101_spill] sm:$0xff] }
 0x4d9   : > { %v16068_v29 = vpop.f32.mrf.mxu0  ;;  %v4639_v43 = vpop.f32.mrf.mxu1 }
 0x4da   : > { %v16070_v14 = vadd.f32 %v4639_v43, %v4483_v31  ;;  %11928 = vmatpush3.bf16.msra.mxu1 %v12372_v19  ;;  %v17828_v19 = vld [vmem:[#allocation56_spill] sm:$0xff] }
 0x4db   : > { %v11799_v27 = vpop.f32.mrf.mxu0  ;;  %v11540_v58 = vpop.f32.mrf.mxu1  ;;  %12017 = vmatprep.subr.bf16.mxu1 %v17482_v8  ;;  %v4485_v18 = vadd.f32 %v17828_v19, %v15907_v57  ;;  %v17833_v19 = vld [vmem:[#allocation103_spill] sm:$0xff] }
 0x4dd   : > { %v16075_v7 = vpop.f32.mrf.mxu0  ;;  %v4644_v44 = vpop.f32.mrf.mxu1  ;;  %11842 = vmatmul.mubr.bf16.gmra.mxu1 %v17827_v46  ;;  %v4486_v46 = vadd.f32 %v17830_v36, %v15916_v48 }
 0x4de   : > { %17826 = vst [vmem:[#allocation24_spill] sm:$0xff] %v16075_v7  ;;  %v16078_v33 = vadd.f32 %v4644_v44, %v4484_v45  ;;  %11845 = vmatprep.mubr.msk.bf16.mxu1 %vm12555_vm0, %v17482_v8  ;;  %v17832_v7 = vld [vmem:[#allocation10_spill] sm:$0xff] }
 0x4df   : > { %v11800_v4 = vpop.f32.mrf.mxu0  ;;  %v11543_v30 = vpop.f32.mrf.mxu1 }
 0x4e1   : > { %v16084_v31 = vpop.f32.mrf.mxu0  ;;  %v4647_v43 = vpop.f32.mrf.mxu1 }
 0x4e2   : > { %17829 = vst [vmem:[#allocation39_spill] sm:$0xff] %v16084_v31  ;;  %v16086_v27 = vadd.f32 %v4647_v43, %v4485_v18  ;;  %v4487_v18 = vadd.f32 %v17833_v19, %v15925_v62  ;;  %v17837_v31 = vld [vmem:[#allocation28_spill] sm:$0xff] }
 0x4e3   : > { %v11803_v16 = vpop.f32.mrf.mxu0  ;;  %v11544_v58 = vpop.f32.mrf.mxu1  ;;  %v17838_v19 = vld [vmem:[#allocation104_spill] sm:$0xff] }
 0x4e5   : > { %v16090_v45 = vpop.f32.mrf.mxu0  ;;  %v4652_v44 = vpop.f32.mrf.mxu1  ;;  %11846 = vmatmul.mubr.bf16.gmra.mxu1 %v17832_v7 }
 0x4e6   : > { %17831 = vst [vmem:[#allocation25_spill] sm:$0xff] %v16090_v45  ;;  %v16093_v4 = vadd.f32 %v4652_v44, %v4486_v46  ;;  %11849 = vmatprep.mubr.msk.bf16.mxu1 %vm12555_vm0, %v17482_v8  ;;  %v17835_v45 = vld [vmem:[#allocation61_spill] sm:$0xff] }
 0x4e7   : > { %v11804_v57 = vpop.f32.mrf.mxu0  ;;  %v11547_v30 = vpop.f32.mrf.mxu1  ;;  %v4879_v7 = vadd.f32 %v17835_v45, %v15934_v53 }
 0x4e9   : > { %v16099_v43 = vpop.f32.mrf.mxu0  ;;  %v4655_v16 = vpop.f32.mrf.mxu1 }
 0x4ea   : > { %17834 = vst [vmem:[#allocation40_spill] sm:$0xff] %v16099_v43  ;;  %v16101_v58 = vadd.f32 %v4655_v16, %v4487_v18  ;;  %v4880_v18 = vadd.f32 %v17838_v19, %v15943_v37  ;;  %v17842_v43 = vld [vmem:[#allocation32_spill] sm:$0xff]  ;;  %v17843_v19 = vld [vmem:[#allocation66_spill] sm:$0xff] }
 0x4eb   : > { %v11807_v48 = vpop.f32.mrf.mxu0  ;;  %v11548_v36 = vpop.f32.mrf.mxu1 }
 0x4ed   : > { %v16105_v46 = vpop.f32.mrf.mxu0  ;;  %v5054_v44 = vpop.f32.mrf.mxu1  ;;  %11850 = vmatmul.mubr.bf16.gmra.mxu1 %v17837_v31 }
 0x4ee   : > { %17836 = vst [vmem:[#allocation26_spill] sm:$0xff] %v16105_v46  ;;  %v16108_v57 = vadd.f32 %v5054_v44, %v4879_v7  ;;  %11853 = vmatprep.mubr.msk.bf16.mxu1 %vm12555_vm0, %v17482_v8  ;;  %v17840_v46 = vld [vmem:[#allocation65_spill] sm:$0xff] }
 0x4ef   : > { %v11808_v62 = vpop.f32.mrf.mxu0  ;;  %v11619_v30 = vpop.f32.mrf.mxu1  ;;  %v4881_v31 = vadd.f32 %v17840_v46, %v15952_v50 }
 0x4f1   : > { %v16114_v16 = vpop.f32.mrf.mxu0  ;;  %v5057_v48 = vpop.f32.mrf.mxu1 }
 0x4f2   : > { %17839 = vst [vmem:[#allocation41_spill] sm:$0xff] %v16114_v16  ;;  %v16116_v36 = vadd.f32 %v5057_v48, %v4880_v18  ;;  %v4882_v18 = vadd.f32 %v17843_v19, %v15961_v38  ;;  %v17847_v19 = vld [vmem:[#allocation37_spill] sm:$0xff] }
 0x4f3   : > { %v11879_v53 = vpop.f32.mrf.mxu0  ;;  %v11620_v45 = vpop.f32.mrf.mxu1 }
 0x4f5   : > { %v16120_v7 = vpop.f32.mrf.mxu0  ;;  %v5062_v44 = vpop.f32.mrf.mxu1  ;;  %11854 = vmatmul.mubr.bf16.gmra.mxu1 %v17842_v43 }
 0x4f6   : > { %17841 = vst [vmem:[#allocation68_spill] sm:$0xff] %v16120_v7  ;;  %v16123_v62 = vadd.f32 %v5062_v44, %v4881_v31  ;;  %11857 = vmatprep.mubr.msk.bf16.mxu1 %vm12555_vm0, %v17482_v8  ;;  %v17845_v7 = vld [vmem:[#allocation36_spill] sm:$0xff] }
 0x4f7   : > { %v11880_v37 = vpop.f32.mrf.mxu0  ;;  %v11623_v30 = vpop.f32.mrf.mxu1  ;;  %v4883_v43 = vadd.f32 %v17845_v7, %v15970_v20  ;;  %v12373_v20 = vld [vmem:[%s17345_s2 + $0x638] sm:$0xff]  }
 0x4f9   : > { %v16129_v48 = vpop.f32.mrf.mxu0  ;;  %v5065_v53 = vpop.f32.mrf.mxu1 }
 0x4fa   : > { %17844 = vst [vmem:[#allocation42_spill] sm:$0xff] %v16129_v48  ;;  %v16131_v45 = vadd.f32 %v5065_v53, %v4882_v18  ;;  %v4884_v18 = vadd.f32 %v17847_v19, %v15979_v49  ;;  %v12374_v19 = vld [vmem:[%s17345_s2 + $0x630] sm:$0xff]  }
 0x4fb   : > { %v11883_v50 = vpop.f32.mrf.mxu0  ;;  %v11624_v46 = vpop.f32.mrf.mxu1 }
 0x4fd   : > { %v16135_v31 = vpop.f32.mrf.mxu0  ;;  %v5070_v44 = vpop.f32.mrf.mxu1  ;;  %11858 = vmatmul.mubr.bf16.gmra.mxu1 %v17788_v12 }
 0x4fe   : > { %17846 = vst [vmem:[#allocation87_spill] sm:$0xff] %v16135_v31  ;;  %v16138_v37 = vadd.f32 %v5070_v44, %v4883_v43  ;;  %11929 = vmatprep.mubr.msk.bf16.mxu1 %vm12555_vm0, %v17482_v8  ;;  %v17849_v44 = vld [vmem:[#allocation2_spill] sm:$0xff] }
 0x4ff   : > { %v11884_v38 = vpop.f32.mrf.mxu0  ;;  %v11627_v30 = vpop.f32.mrf.mxu1  ;;  %v4885_v31 = vadd.f32 %v17849_v44, %v15989_v28  ;;  %v17852_v28 = vld [vmem:[#allocation4_spill] sm:$0xff] }
 0x500   : > { %v17851_v30 = vld [vmem:[#allocation67_spill] sm:$0xff] }
 0x501   : > { %v16144_v53 = vpop.f32.mrf.mxu0  ;;  %v5073_v50 = vpop.f32.mrf.mxu1 }
 0x502   : > { %17848 = vst [vmem:[#allocation43_spill] sm:$0xff] %v16144_v53  ;;  %v16146_v46 = vadd.f32 %v5073_v50, %v4884_v18 }
 0x503   : > { %v11887_v7 = vpop.f32.mrf.mxu0  ;;  %v11628_v43 = vpop.f32.mrf.mxu1 }
 0x504   : > { %v4886_v7 = vadd.f32 %v17852_v28, %v16001_v54  ;;  %v17856_v28 = vld [vmem:[#allocation69_spill] sm:$0xff] }
 0x505   : > { %v16153_v48 = vpop.f32.mrf.mxu0  ;;  %v5078_v38 = vpop.f32.mrf.mxu1  ;;  %11930 = vmatmul.mubr.bf16.vlgmr.msra.gmra.mxu1 %v17851_v30 }
 0x506   : > { %17850 = vst [vmem:[#allocation29_spill] sm:$0xff] %v16153_v48  ;;  %v16156_v49 = vadd.f32 %v5078_v38, %v4885_v31  ;;  %12018 = vmatpush3.bf16.msra.mxu1 %v12373_v20  ;;  %11933 = vmatprep.mubr.msk.bf16.mxu1 %vm12555_vm0, %v17482_v8  ;;  %v12375_v20 = vld [vmem:[%s17345_s2 + $0x628] sm:$0xff]  }
 0x507   : > { %v11888_v18 = vpop.f32.mrf.mxu0  ;;  %v11631_v50 = vpop.f32.mrf.mxu1  ;;  %12019 = vmatprep.subr.bf16.mxu1 %v17482_v8 }
 0x508   : > { %v17854_v18 = vld [vmem:[#allocation13_spill] sm:$0xff] }
 0x509   : > { %v16166_v43 = vpop.f32.mrf.mxu0  ;;  %v5081_v44 = vpop.f32.mrf.mxu1  ;;  %v4887_v50 = vadd.f32 %v17854_v18, %v16012_v61  ;;  %v17857_v61 = vld [vmem:[#allocation7_spill] sm:$0xff] }
 0x50a   : > { %17853 = vst [vmem:[#allocation45_spill] sm:$0xff] %v16166_v43  ;;  %v16168_v31 = vadd.f32 %v5081_v44, %v4886_v7  ;;  %12020 = vmatpush3.bf16.msra.mxu1 %v12374_v19  ;;  %v12376_v19 = vld [vmem:[%s17345_s2 + $0x620] sm:$0xff]  }
 0x50b   : > { %v11891_v38 = vpop.f32.mrf.mxu0  ;;  %v11632_v30 = vpop.f32.mrf.mxu1  ;;  %12021 = vmatprep.subr.bf16.mxu1 %v17482_v8 }
 0x50c   : > { %v4888_v38 = vadd.f32 %v17857_v61, %v16024_v2  ;;  %v17861_v61 = vld [vmem:[#allocation3_spill] sm:$0xff] }
 0x50d   : > { %v16176_v48 = vpop.f32.mrf.mxu0  ;;  %v5086_v54 = vpop.f32.mrf.mxu1  ;;  %11934 = vmatmul.mubr.bf16.gmra.mxu1 %v17856_v28 }
 0x50e   : > { %17855 = vst [vmem:[#allocation71_spill] sm:$0xff] %v16176_v48  ;;  %v16179_v43 = vadd.f32 %v5086_v54, %v4887_v50  ;;  %11937 = vmatprep.mubr.msk.bf16.mxu1 %vm12555_vm0, %v17482_v8  ;;  %12022 = vmatpush3.bf16.msra.mxu1 %v12375_v20  ;;  %v12377_v20 = vld [vmem:[%s17345_s2 + $0x618] sm:$0xff]  }
 0x50f   : > { %v11892_v7 = vpop.f32.mrf.mxu0  ;;  %v11635_v44 = vpop.f32.mrf.mxu1  ;;  %12023 = vmatprep.subr.bf16.mxu1 %v17482_v8 }
 0x510   : > { %v17859_v7 = vld [vmem:[#allocation6_spill] sm:$0xff] }
 0x511   : > { %v16189_v30 = vpop.f32.mrf.mxu0  ;;  %v5089_v18 = vpop.f32.mrf.mxu1  ;;  %v4889_v44 = vadd.f32 %v17859_v7, %v16035_v63  ;;  %v17862_v63 = vld [vmem:[#allocation21_spill] sm:$0xff] }
 0x512   : > { %17858 = vst [vmem:[#allocation44_spill] sm:$0xff] %v16189_v30  ;;  %v16191_v50 = vadd.f32 %v5089_v18, %v4888_v38  ;;  %12024 = vmatpush3.bf16.msra.mxu1 %v12376_v19  ;;  %v12378_v19 = vld [vmem:[%s17345_s2 + $0x610] sm:$0xff]  }
 0x513   : > { %v11895_v54 = vpop.f32.mrf.mxu0  ;;  %v11636_v28 = vpop.f32.mrf.mxu1  ;;  %12025 = vmatprep.subr.bf16.mxu1 %v17482_v8 }
 0x514   : > { %v4890_v54 = vadd.f32 %v17862_v63, %v16047_v9  ;;  %v17866_v63 = vld [vmem:[#allocation73_spill] sm:$0xff] }
 0x515   : > { %v16199_v48 = vpop.f32.mrf.mxu0  ;;  %v5094_v2 = vpop.f32.mrf.mxu1  ;;  %11938 = vmatmul.mubr.bf16.gmra.mxu1 %v17861_v61 }
 0x516   : > { %17860 = vst [vmem:[#allocation30_spill] sm:$0xff] %v16199_v48  ;;  %v16202_v30 = vadd.f32 %v5094_v2, %v4889_v44  ;;  %11941 = vmatprep.mubr.msk.bf16.mxu1 %vm12555_vm0, %v17482_v8  ;;  %12026 = vmatpush3.bf16.msra.mxu1 %v12377_v20  ;;  %v12379_v20 = vld [vmem:[%s17345_s2 + $0x608] sm:$0xff]  }
 0x517   : > { %v11896_v38 = vpop.f32.mrf.mxu0  ;;  %v11639_v18 = vpop.f32.mrf.mxu1  ;;  %12027 = vmatprep.subr.bf16.mxu1 %v17482_v8 }
 0x518   : > { %v17864_v38 = vld [vmem:[#allocation19_spill] sm:$0xff] }
 0x519   : > { %v16212_v28 = vpop.f32.mrf.mxu0  ;;  %v5097_v7 = vpop.f32.mrf.mxu1  ;;  %v4891_v18 = vadd.f32 %v17864_v38, %v16058_v42  ;;  %v17867_v42 = vld [vmem:[#allocation20_spill] sm:$0xff] }
 0x51a   : > { %17863 = vst [vmem:[#allocation47_spill] sm:$0xff] %v16212_v28  ;;  %v16214_v44 = vadd.f32 %v5097_v7, %v4890_v54  ;;  %12028 = vmatpush3.bf16.msra.mxu1 %v12378_v19  ;;  %v12380_v19 = vld [vmem:[%s17345_s2 + $0x600] sm:$0xff]  }
 0x51b   : > { %v11899_v2 = vpop.f32.mrf.mxu0  ;;  %v11640_v61 = vpop.f32.mrf.mxu1  ;;  %12029 = vmatprep.subr.bf16.mxu1 %v17482_v8 }
 0x51c   : > { %v4892_v2 = vadd.f32 %v17867_v42, %v16070_v14 }
 0x51d   : > { %v16222_v48 = vpop.f32.mrf.mxu0  ;;  %v5102_v9 = vpop.f32.mrf.mxu1  ;;  %11942 = vmatmul.mubr.bf16.gmra.mxu1 %v17866_v63 }
 0x51e   : > { %17865 = vst [vmem:[#allocation72_spill] sm:$0xff] %v16222_v48  ;;  %v16225_v28 = vadd.f32 %v5102_v9, %v4891_v18  ;;  %11945 = vmatprep.mubr.msk.bf16.mxu1 %vm12555_vm0, %v17482_v8  ;;  %12030 = vmatpush3.bf16.msra.mxu1 %v12379_v20  ;;  %v17869_v20 = vld [vmem:[#allocation11_spill] sm:$0xff] }
 0x51f   : > { %v11900_v54 = vpop.f32.mrf.mxu0  ;;  %v11643_v7 = vpop.f32.mrf.mxu1  ;;  %12031 = vmatprep.subr.bf16.mxu1 %v17482_v8  ;;  %v4893_v48 = vadd.f32 %v17869_v20, %v16078_v33 }
 0x520   : > { %v17871_v7 = vld [vmem:[#allocation77_spill] sm:$0xff] }
 0x521   : > { %v16235_v61 = vpop.f32.mrf.mxu0  ;;  %v5105_v38 = vpop.f32.mrf.mxu1 }
 0x522   : > { %17868 = vst [vmem:[#allocation46_spill] sm:$0xff] %v16235_v61  ;;  %v16237_v18 = vadd.f32 %v5105_v38, %v4892_v2  ;;  %12032 = vmatpush3.bf16.msra.mxu1 %v12380_v19  ;;  %v17872_v2 = vld [vmem:[#allocation23_spill] sm:$0xff]  ;;  %v17876_v61 = vld [vmem:[#allocation81_spill] sm:$0xff] }
 0x523   : > { %v11903_v9 = vpop.f32.mrf.mxu0  ;;  %v11644_v63 = vpop.f32.mrf.mxu1  ;;  %v4894_v19 = vadd.f32 %v17872_v2, %v16086_v27  ;;  %v17877_v2 = vld [vmem:[#allocation9_spill] sm:$0xff] }
 0x525   : > { %v16241_v53 = vpop.f32.mrf.mxu0  ;;  %v5110_v54 = vpop.f32.mrf.mxu1  ;;  %11946 = vmatmul.mubr.bf16.gmra.mxu1 %v17871_v7 }
 0x526   : > { %17870 = vst [vmem:[#allocation74_spill] sm:$0xff] %v16241_v53  ;;  %v16244_v16 = vadd.f32 %v5110_v54, %v4893_v48  ;;  %11949 = vmatprep.mubr.msk.bf16.mxu1 %vm12555_vm0, %v17482_v8  ;;  %v17874_v53 = vld [vmem:[#allocation38_spill] sm:$0xff] }
 0x527   : > { %v11904_v14 = vpop.f32.mrf.mxu0  ;;  %v11647_v42 = vpop.f32.mrf.mxu1  ;;  %v4895_v7 = vadd.f32 %v17874_v53, %v16093_v4 }
 0x529   : > { %v16250_v38 = vpop.f32.mrf.mxu0  ;;  %v5113_v9 = vpop.f32.mrf.mxu1 }
 0x52a   : > { %17873 = vst [vmem:[#allocation50_spill] sm:$0xff] %v16250_v38  ;;  %v16252_v63 = vadd.f32 %v5113_v9, %v4894_v19  ;;  %v4896_v19 = vadd.f32 %v17877_v2, %v16101_v58  ;;  %v17880_v38 = vld [vmem:[#allocation86_spill] sm:$0xff]  ;;  %v17881_v2 = vld [vmem:[#allocation15_spill] sm:$0xff] }
 0x52b   : > { %v11907_v33 = vpop.f32.mrf.mxu0  ;;  %v11648_v20 = vpop.f32.mrf.mxu1 }
 0x52d   : > { %v16256_v48 = vpop.f32.mrf.mxu0  ;;  %v5118_v54 = vpop.f32.mrf.mxu1  ;;  %11950 = vmatmul.mubr.bf16.gmra.mxu1 %v17876_v61 }
 0x52e   : > { %17875 = vst [vmem:[#allocation76_spill] sm:$0xff] %v16256_v48  ;;  %v16259_v14 = vadd.f32 %v5118_v54, %v4895_v7  ;;  %11953 = vmatprep.mubr.msk.bf16.mxu1 %vm12555_vm0, %v17482_v8  ;;  %v17878_v48 = vld [vmem:[#allocation14_spill] sm:$0xff] }
 0x52f   : > { %v11908_v27 = vpop.f32.mrf.mxu0  ;;  %v11651_v42 = vpop.f32.mrf.mxu1  ;;  %v5319_v61 = vadd.f32 %v17878_v48, %v16108_v57 }
 0x531   : > { %v16265_v9 = vpop.f32.mrf.mxu0  ;;  %v5121_v33 = vpop.f32.mrf.mxu1 }
 0x532   : > { %v16267_v20 = vadd.f32 %v5121_v33, %v4896_v19  ;;  %v5320_v19 = vadd.f32 %v17881_v2, %v16116_v36  ;;  %v6171_v33 = vrot.slane %v17788_v12, 1 }
 0x533   : > { %v11911_v4 = vpop.f32.mrf.mxu0  ;;  %v11652_v53 = vpop.f32.mrf.mxu1 }
 0x535   : > { %v16271_v7 = vpop.f32.mrf.mxu0  ;;  %v5446_v54 = vpop.f32.mrf.mxu1  ;;  %11954 = vmatmul.mubr.bf16.gmra.mxu1 %v17880_v38  ;;  %v5321_v38 = vadd.f32 %v15760_v0, %v16123_v62 }
 0x536   : > { %17879 = vst [vmem:[#allocation48_spill] sm:$0xff] %v16271_v7  ;;  %v16274_v27 = vadd.f32 %v5446_v54, %v5319_v61  ;;  %11957 = vmatprep.mubr.msk.bf16.mxu1 %vm12555_vm0, %v17482_v8  ;;  %v17882_v61 = vld [vmem:[#allocation84_spill] sm:$0xff] }
 0x537   : > { %v11912_v58 = vpop.f32.mrf.mxu0  ;;  %v11723_v42 = vpop.f32.mrf.mxu1  ;;  %v6172_v54 = vsel %vm1860_vm6, %v17882_v61, %v6171_v33 }
 0x539   : > { %v16281_v4 = vpop.f32.mrf.mxu0  ;;  %v5449_v57 = vpop.f32.mrf.mxu1 }
 0x53a   : > { %v16283_v48 = vadd.f32 %v5449_v57, %v5320_v19 }
 0x53b   : > { %v11983_v53 = vpop.f32.mrf.mxu0  ;;  %v11724_v7 = vpop.f32.mrf.mxu1 }
 0x53c   : > { %v5322_v7 = vadd.f32 %v15772_v59, %v16131_v45  ;;  %v6173_v53 = vrot.slane %v17799_v22, 1 }
 0x53d   : > { %v16289_v58 = vpop.f32.mrf.mxu0  ;;  %v5454_v42 = vpop.f32.mrf.mxu1  ;;  %11958 = vmatmul.mubr.bf16.gmra.mxu1 %v6172_v54 }
 0x53e   : > { %17883 = vst [vmem:[#allocation78_spill] sm:$0xff] %v16289_v58  ;;  %v16291_v36 = vadd.f32 %v5454_v42, %v5321_v38  ;;  %11961 = vmatprep.mubr.msk.bf16.mxu1 %vm12555_vm0, %v17482_v8  ;;  %v5323_v38 = vadd.f32 %v15783_v21, %v16138_v37  ;;  %v6174_v54 = vsel %vm1860_vm6, %v6171_v33, %v6173_v53 }
 0x53f   : > { %v11984_v2 = vpop.f32.mrf.mxu0  ;;  %v11727_v19 = vpop.f32.mrf.mxu1  ;;  %v5325_v53 = vadd.f32 %v15807_v3, %v16156_v49 }
 0x541   : > { %v16297_v57 = vpop.f32.mrf.mxu0  ;;  %v5457_v0 = vpop.f32.mrf.mxu1 }
 0x542   : > { %v16299_v62 = vadd.f32 %v5457_v0, %v5322_v7  ;;  %v5324_v7 = vadd.f32 %v15794_v23, %v16146_v46 }
 0x543   : > { %v11987_v61 = vpop.f32.mrf.mxu0  ;;  %v11728_v58 = vpop.f32.mrf.mxu1 }
 0x545   : > { %v16305_v42 = vpop.f32.mrf.mxu0  ;;  %v5462_v2 = vpop.f32.mrf.mxu1  ;;  %11962 = vmatmul.mubr.bf16.gmra.mxu1 %v6174_v54  ;;  %v17884_v54 = vld [vmem:[#allocation27_spill] sm:$0xff] }
 0x546   : > { %v16307_v19 = vadd.f32 %v5462_v2, %v5323_v38  ;;  %12033 = vmatprep.mubr.msk.bf16.mxu1 %vm12555_vm0, %v17482_v8 }
 0x547   : > { %v11988_v59 = vpop.f32.mrf.mxu0  ;;  %v11731_v45 = vpop.f32.mrf.mxu1 }
 0x548   : > { %v5326_v59 = vadd.f32 %v15820_v11, %v16168_v31 }
 0x549   : > { %v16313_v58 = vpop.f32.mrf.mxu0  ;;  %v5465_v0 = vpop.f32.mrf.mxu1 }
 0x54a   : > { %v16315_v21 = vadd.f32 %v5465_v0, %v5324_v7 }
 0x54b   : > { %v11991_v37 = vpop.f32.mrf.mxu0  ;;  %v11732_v33 = vpop.f32.mrf.mxu1 }
 0x54c   : > { %v5327_v37 = vadd.f32 %v15833_v55, %v16179_v43 }
 0x54d   : > { %v16319_v61 = vpop.f32.mrf.mxu0  ;;  %v5470_v38 = vpop.f32.mrf.mxu1  ;;  %12034 = vmatmul.mubr.bf16.vlgmr.msra.gmra.mxu1 %v17884_v54 }
 0x54e   : > { %v16322_v2 = vadd.f32 %v5470_v38, %v5325_v53  ;;  %12037 = vmatprep.mubr.msk.bf16.mxu1 %vm12555_vm0, %v17482_v8  ;;  %v17885_v38 = vld [vmem:[#allocation70_spill] sm:$0xff] }
 0x54f   : > { %v11992_v23 = vpop.f32.mrf.mxu0  ;;  %v11735_v46 = vpop.f32.mrf.mxu1 }
 0x550   : > { %v5328_v23 = vadd.f32 %v15846_v10, %v16191_v50 }
 0x551   : > { %v16328_v45 = vpop.f32.mrf.mxu0  ;;  %v5473_v7 = vpop.f32.mrf.mxu1 }
 0x552   : > { %v16330_v0 = vadd.f32 %v5473_v7, %v5326_v59 }
 0x553   : > { %v11995_v3 = vpop.f32.mrf.mxu0  ;;  %v11736_v49 = vpop.f32.mrf.mxu1 }
 0x554   : > { %v5329_v3 = vadd.f32 %v15859_v39, %v16202_v30 }
 0x555   : > { %v16334_v33 = vpop.f32.mrf.mxu0  ;;  %v5478_v53 = vpop.f32.mrf.mxu1  ;;  %12038 = vmatmul.mubr.bf16.gmra.mxu1 %v17885_v38 }
 0x556   : > { %v16337_v54 = vadd.f32 %v5478_v53, %v5327_v37  ;;  %12041 = vmatprep.mubr.msk.bf16.mxu1 %vm12555_vm0, %v17482_v8  ;;  %v17886_v53 = vld [vmem:[#allocation16_spill] sm:$0xff] }
 0x557   : > { %v11996_v11 = vpop.f32.mrf.mxu0  ;;  %v11739_v31 = vpop.f32.mrf.mxu1 }
 0x558   : > { %v5330_v11 = vadd.f32 %v15872_v35, %v16214_v44 }
 0x559   : > { %v16343_v46 = vpop.f32.mrf.mxu0  ;;  %v5481_v59 = vpop.f32.mrf.mxu1 }
 0x55a   : > { %v16345_v7 = vadd.f32 %v5481_v59, %v5328_v23 }
 0x55b   : > { %v11999_v55 = vpop.f32.mrf.mxu0  ;;  %v11740_v43 = vpop.f32.mrf.mxu1 }
 0x55c   : > { %v5331_v55 = vadd.f32 %v15885_v60, %v16225_v28 }
 0x55d   : > { %v16349_v49 = vpop.f32.mrf.mxu0  ;;  %v5486_v37 = vpop.f32.mrf.mxu1  ;;  %12042 = vmatmul.mubr.bf16.gmra.mxu1 %v17886_v53 }
 0x55e   : > { %v16352_v38 = vadd.f32 %v5486_v37, %v5329_v3  ;;  %12045 = vmatprep.mubr.msk.bf16.mxu1 %vm12555_vm0, %v17482_v8  ;;  %v17887_v37 = vld [vmem:[#allocation75_spill] sm:$0xff] }
 0x55f   : > { %v12000_v10 = vpop.f32.mrf.mxu0  ;;  %v11743_v50 = vpop.f32.mrf.mxu1 }
 0x560   : > { %v5332_v10 = vadd.f32 %v15895_v17, %v16237_v18 }
 0x561   : > { %v16358_v31 = vpop.f32.mrf.mxu0  ;;  %v5489_v23 = vpop.f32.mrf.mxu1 }
 0x562   : > { %v16360_v59 = vadd.f32 %v5489_v23, %v5330_v11 }
 0x563   : > { %v12003_v39 = vpop.f32.mrf.mxu0  ;;  %v11744_v30 = vpop.f32.mrf.mxu1 }
 0x564   : > { %v5333_v39 = vadd.f32 %v15904_v47, %v16244_v16 }
 0x565   : > { %v16364_v43 = vpop.f32.mrf.mxu0  ;;  %v5494_v3 = vpop.f32.mrf.mxu1  ;;  %12046 = vmatmul.mubr.bf16.gmra.mxu1 %v17887_v37 }
 0x566   : > { %v16367_v53 = vadd.f32 %v5494_v3, %v5331_v55  ;;  %12049 = vmatprep.mubr.msk.bf16.mxu1 %vm12555_vm0, %v17482_v8  ;;  %v17888_v3 = vld [vmem:[#allocation79_spill] sm:$0xff] }
 0x567   : > { %v12004_v35 = vpop.f32.mrf.mxu0  ;;  %v11747_v44 = vpop.f32.mrf.mxu1 }
 0x568   : > { %v5334_v35 = vadd.f32 %v15913_v40, %v16252_v63 }
 0x569   : > { %v16373_v50 = vpop.f32.mrf.mxu0  ;;  %v5497_v11 = vpop.f32.mrf.mxu1 }
 0x56a   : > { %v16375_v23 = vadd.f32 %v5497_v11, %v5332_v10 }
 0x56b   : > { %v12007_v60 = vpop.f32.mrf.mxu0  ;;  %v11748_v28 = vpop.f32.mrf.mxu1 }
 0x56c   : > { %v5335_v60 = vadd.f32 %v15922_v51, %v16259_v14 }
 0x56d   : > { %v16379_v30 = vpop.f32.mrf.mxu0  ;;  %v5502_v55 = vpop.f32.mrf.mxu1  ;;  %12050 = vmatmul.mubr.bf16.gmra.mxu1 %v17888_v3 }
 0x56e   : > { %v16382_v37 = vadd.f32 %v5502_v55, %v5333_v39  ;;  %12053 = vmatprep.mubr.msk.bf16.mxu1 %vm12555_vm0, %v17482_v8  ;;  %v17889_v55 = vld [vmem:[#allocation83_spill] sm:$0xff] }
 0x56f   : > { %v12008_v17 = vpop.f32.mrf.mxu0  ;;  %v11751_v18 = vpop.f32.mrf.mxu1 }
 0x570   : > { %v5336_v17 = vadd.f32 %v15931_v1, %v16267_v20 }
 0x571   : > { %v16388_v44 = vpop.f32.mrf.mxu0  ;;  %v5505_v10 = vpop.f32.mrf.mxu1 }
 0x572   : > { %v16390_v11 = vadd.f32 %v5505_v10, %v5334_v35 }
 0x573   : > { %v12011_v47 = vpop.f32.mrf.mxu0  ;;  %v11752_v16 = vpop.f32.mrf.mxu1 }
 0x574   : > { %v5711_v47 = vadd.f32 %v15940_v52, %v16274_v27  ;;  %v5713_v27 = vadd.f32 %v15958_v56, %v16291_v36  ;;  %v5715_v36 = vadd.f32 %v15976_v15, %v16307_v19  ;;  %v5718_v19 = vadd.f32 %v16009_v13, %v16330_v0 }
 0x575   : > { %v16394_v28 = vpop.f32.mrf.mxu0  ;;  %v5510_v39 = vpop.f32.mrf.mxu1  ;;  %12054 = vmatmul.mubr.bf16.gmra.mxu1 %v17889_v55  ;;  %v5721_v13 = vadd.f32 %v16045_v25, %v16352_v38  ;;  %v17892_v25 = vld [vmem:[#allocation24_spill] sm:$0xff] }
 0x576   : > { %v16397_v3 = vadd.f32 %v5510_v39, %v5335_v60  ;;  %12057 = vmatprep.mubr.msk.bf16.mxu1 %vm12555_vm0, %v17482_v8  ;;  %v17890_v39 = vld [vmem:[#allocation35_spill] sm:$0xff]  ;;  %v5724_v38 = vadd.f32 %v17892_v25, %v16375_v23  ;;  %v17895_v23 = vld [vmem:[#allocation40_spill] sm:$0xff] }
 0x577   : > { %v12012_v40 = vpop.f32.mrf.mxu0  ;;  %v11755_v63 = vpop.f32.mrf.mxu1 }
 0x578   : > { %v5712_v40 = vadd.f32 %v15949_v24, %v16283_v48  ;;  %v6565_v63 = vrot.slane %v17788_v12, 2  ;;  %v5714_v12 = vadd.f32 %v15967_v5, %v16299_v62 }
 0x579   : > { %v16403_v18 = vpop.f32.mrf.mxu0  ;;  %v5513_v35 = vpop.f32.mrf.mxu1 }
 0x57a   : > { %v16405_v10 = vadd.f32 %v5513_v35, %v5336_v17 }
 0x57b   : > { %v12015_v51 = vpop.f32.mrf.mxu0  ;;  %v11756_v14 = vpop.f32.mrf.mxu1 }
 0x57c   : > { %v17891_v51 = vld [vmem:[#allocation97_spill] sm:$0xff] }
 0x57d   : > { %v16409_v16 = vpop.f32.mrf.mxu0  ;;  %v5829_v60 = vpop.f32.mrf.mxu1  ;;  %12058 = vmatmul.mubr.bf16.gmra.mxu1 %v17890_v39  ;;  %v6566_v14 = vsel %vm2316_vm7, %v17891_v51, %v6565_v63 }
 0x57e   : > { %v16412_v55 = vadd.f32 %v5829_v60, %v5711_v47  ;;  %12061 = vmatprep.mubr.msk.bf16.mxu1 %vm12555_vm0, %v17482_v8 }
 0x57f   : > { %v12016_v1 = vpop.f32.mrf.mxu0  ;;  %v11827_v20 = vpop.f32.mrf.mxu1 }
 0x580   : > { %v6567_v1 = vrot.slane %v17799_v22, 2  ;;  %v5717_v22 = vadd.f32 %v15999_v41, %v16322_v2  ;;  %v5720_v41 = vadd.f32 %v16032_v34, %v16345_v7  ;;  %v5723_v34 = vadd.f32 %v16068_v29, %v16367_v53  ;;  %v17894_v29 = vld [vmem:[#allocation25_spill] sm:$0xff] }
 0x581   : > { %v5832_v17 = vpop.f32.mrf.mxu1  ;;  %v5726_v53 = vadd.f32 %v17894_v29, %v16390_v11  ;;  %v17897_v11 = vld [vmem:[#allocation41_spill] sm:$0xff] }
 0x582   : > { %v16419_v35 = vadd.f32 %v5832_v17, %v5712_v40  ;;  %v6568_v20 = vsel %vm2316_vm7, %v6565_v63, %v6567_v1 }
 0x583   : > { %v11828_v52 = vpop.f32.mrf.mxu1 }
 0x585   : > { %v5837_v47 = vpop.f32.mrf.mxu1  ;;  %12062 = vmatmul.mubr.bf16.gmra.mxu1 %v6566_v14 }
 0x586   : > { %v16425_v60 = vadd.f32 %v5837_v47, %v5713_v27  ;;  %12065 = vmatprep.mubr.msk.bf16.mxu1 %vm12555_vm0, %v17482_v8  ;;  %v5716_v27 = vadd.f32 %v15986_v32, %v16315_v21  ;;  %v5719_v32 = vadd.f32 %v16022_v26, %v16337_v54  ;;  %v5722_v26 = vadd.f32 %v16055_v6, %v16360_v59  ;;  %v17893_v6 = vld [vmem:[#allocation39_spill] sm:$0xff] }
 0x587   : > { %v11831_v24 = vpop.f32.mrf.mxu1  ;;  %v5725_v59 = vadd.f32 %v17893_v6, %v16382_v37  ;;  %v17896_v37 = vld [vmem:[#allocation26_spill] sm:$0xff] }
 0x589   : > { %v5840_v48 = vpop.f32.mrf.mxu1 }
 0x58a   : > { %v16431_v39 = vadd.f32 %v5840_v48, %v5714_v12 }
 0x58b   : > { %v11832_v56 = vpop.f32.mrf.mxu1 }
 0x58d   : > { %v5845_v40 = vpop.f32.mrf.mxu1  ;;  %12066 = vmatmul.mubr.bf16.gmra.mxu1 %v6568_v20 }
 0x58e   : > { %v16437_v17 = vadd.f32 %v5845_v40, %v5715_v36 }
 0x58f   : > { %v11835_v52 = vpop.f32.mrf.mxu1 }
 0x591   : > { %v5848_v5 = vpop.f32.mrf.mxu1 }
 0x592   : > { %v16441_v62 = vadd.f32 %v5848_v5, %v5716_v27 }
 0x593   : > { %v11836_v51 = vpop.f32.mrf.mxu1 }
 0x595   : > { %v5853_v14 = vpop.f32.mrf.mxu1 }
 0x596   : > { %v16445_v47 = vadd.f32 %v5853_v14, %v5717_v22 }
 0x597   : > { %v11839_v15 = vpop.f32.mrf.mxu1 }
 0x599   : > { %v5856_v63 = vpop.f32.mrf.mxu1 }
 0x59a   : > { %v16449_v24 = vadd.f32 %v5856_v63, %v5718_v19 }
 0x59b   : > { %v11840_v12 = vpop.f32.mrf.mxu1 }
 0x59d   : > { %v5861_v21 = vpop.f32.mrf.mxu1 }
 0x59e   : > { %v16453_v48 = vadd.f32 %v5861_v21, %v5719_v32 }
 0x59f   : > { %v11843_v1 = vpop.f32.mrf.mxu1 }
 0x5a1   : > { %v5864_v2 = vpop.f32.mrf.mxu1 }
 0x5a2   : > { %v16457_v56 = vadd.f32 %v5864_v2, %v5720_v41  ;;  %v5727_v41 = vadd.f32 %v17895_v23, %v16397_v3  ;;  %v17898_v3 = vld [vmem:[#allocation68_spill] sm:$0xff] }
 0x5a3   : > { %v11844_v36 = vpop.f32.mrf.mxu1  ;;  %v6135_v25 = vadd.f32 %v17898_v3, %v16419_v35  ;;  %v17901_v35 = vld [vmem:[#allocation43_spill] sm:$0xff] }
 0x5a4   : > { %v6138_v23 = vadd.f32 %v17901_v35, %v16437_v17 }
 0x5a5   : > { %v5869_v0 = vpop.f32.mrf.mxu1 }
 0x5a6   : > { %v16461_v20 = vadd.f32 %v5869_v0, %v5721_v13  ;;  %v5728_v0 = vadd.f32 %v17896_v37, %v16405_v10  ;;  %v17899_v10 = vld [vmem:[#allocation42_spill] sm:$0xff] }
 0x5a7   : > { %v11847_v40 = vpop.f32.mrf.mxu1  ;;  %v6136_v6 = vadd.f32 %v17899_v10, %v16425_v60  ;;  %v17902_v60 = vld [vmem:[#allocation29_spill] sm:$0xff] }
 0x5a8   : > { %v6139_v37 = vadd.f32 %v17902_v60, %v16441_v62  ;;  %v12383_v62 = vld [vmem:[%s17346_s3 + $0x78] sm:$0xff]  }
 0x5a9   : > { %v5872_v54 = vpop.f32.mrf.mxu1 }
 0x5aa   : > { %v16465_v52 = vadd.f32 %v5872_v54, %v5722_v26 }
 0x5ab   : > { %v11848_v27 = vpop.f32.mrf.mxu1 }
 0x5ac   : > { %v6134_v27 = vadd.f32 %v17897_v11, %v16412_v55  ;;  %v17900_v55 = vld [vmem:[#allocation87_spill] sm:$0xff]  ;;  %v12384_v11 = vld [vmem:[%s17346_s3 + $0x30] sm:$0xff]  }
 0x5ad   : > { %v5877_v7 = vpop.f32.mrf.mxu1  ;;  %v6137_v29 = vadd.f32 %v17900_v55, %v16431_v39  ;;  %v12382_v39 = vld [vmem:[%s17346_s3 + $0x38] sm:$0xff]   ;;  %v12387_v55 = vld [vmem:[%s17346_s3 + $0x68] sm:$0xff]  }
 0x5ae   : > { %v16469_v5 = vadd.f32 %v5877_v7, %v5723_v34 }
 0x5af   : > { %v11851_v51 = vpop.f32.mrf.mxu1 }
 0x5b1   : > { %v5880_v22 = vpop.f32.mrf.mxu1 }
 0x5b2   : > { %v16473_v14 = vadd.f32 %v5880_v22, %v5724_v38 }
 0x5b3   : > { %v11852_v15 = vpop.f32.mrf.mxu1 }
 0x5b5   : > { %v5885_v19 = vpop.f32.mrf.mxu1 }
 0x5b6   : > { %v16477_v63 = vadd.f32 %v5885_v19, %v5725_v59 }
 0x5b7   : > { %v11855_v12 = vpop.f32.mrf.mxu1 }
 0x5b9   : > { %v5888_v32 = vpop.f32.mrf.mxu1 }
 0x5ba   : > { %v16481_v21 = vadd.f32 %v5888_v32, %v5726_v53 }
 0x5bb   : > { %v11856_v1 = vpop.f32.mrf.mxu1 }
 0x5bd   : > { %v5893_v2 = vpop.f32.mrf.mxu1 }
 0x5be   : > { %v16485_v36 = vadd.f32 %v5893_v2, %v5727_v41 }
 0x5bf   : > { %v11859_v13 = vpop.f32.mrf.mxu1 }
 0x5c1   : > { %v5896_v40 = vpop.f32.mrf.mxu1 }
 0x5c2   : > { %v16489_v26 = vadd.f32 %v5896_v40, %v5728_v0  ;;  %v12381_v0 = vld [vmem:[%s17346_s3 + $0x80] sm:$0xff]  }
 0x5c3   : > { %v11860_v54 = vpop.f32.mrf.mxu1 }
 0x5c4   : > { %v12556_v54 = vmov 0  }
 0x5c5   : > { %v6259_v34 = vpop.f32.mrf.mxu1  ;;  %6950 = vmatprep.subr.bf16.mxu0 %v12556_v54  ;;  %7046 = vmatprep.subr.bf16.mxu1 %v12556_v54 }
 0x5c6   : > { %v16493_v7 = vadd.f32 %v6259_v34, %v6134_v27  ;;  %6951 = vmatpush1.bf16.msra.mxu0 %v12381_v0  ;;  %7047 = vmatpush1.bf16.msra.mxu1 %v12382_v39  ;;  %v17903_v34 = vld [vmem:[#allocation45_spill] sm:$0xff] }
 0x5c7   : > { %v11931_v51 = vpop.f32.mrf.mxu1  ;;  %6952 = vmatprep.subr.bf16.mxu0 %v12556_v54  ;;  %7048 = vmatprep.subr.bf16.mxu1 %v12556_v54 }
 0x5c8   : > { %v6140_v51 = vadd.f32 %v17903_v34, %v16445_v47  ;;  %v17904_v47 = vld [vmem:[#allocation71_spill] sm:$0xff] }
 0x5c9   : > { %v6262_v38 = vpop.f32.mrf.mxu1 }
 0x5ca   : > { %v16497_v22 = vadd.f32 %v6262_v38, %v6135_v25  ;;  %6953 = vmatpush1.bf16.msra.mxu0 %v12383_v62  ;;  %7049 = vmatpush1.bf16.msra.mxu1 %v12384_v11  ;;  %v12385_v38 = vld [vmem:[%s17346_s3 + $0x70] sm:$0xff]  }
 0x5cb   : > { %v11932_v15 = vpop.f32.mrf.mxu1  ;;  %6954 = vmatprep.subr.bf16.mxu0 %v12556_v54  ;;  %7050 = vmatprep.subr.bf16.mxu1 %v12556_v54  ;;  %v12392_v62 = vld [vmem:[%s17346_s3 + $0x10] sm:$0xff]  }
 0x5cc   : > { %v12386_v15 = vld [vmem:[%s17346_s3 + $0x28] sm:$0xff]  }
 0x5cd   : > { %v6267_v59 = vpop.f32.mrf.mxu1 }
 0x5ce   : > { %v16501_v19 = vadd.f32 %v6267_v59, %v6136_v6  ;;  %v6141_v6 = vadd.f32 %v17904_v47, %v16449_v24  ;;  %6955 = vmatpush1.bf16.msra.mxu0 %v12385_v38  ;;  %7051 = vmatpush1.bf16.msra.mxu1 %v12386_v15  ;;  %v17905_v24 = vld [vmem:[#allocation44_spill] sm:$0xff]  ;;  %v12394_v38 = vld [vmem:[%s17346_s3 + $0x8] sm:$0xff]  }
 0x5cf   : > { %v11935_v12 = vpop.f32.mrf.mxu1  ;;  %6956 = vmatprep.subr.bf16.mxu0 %v12556_v54  ;;  %7052 = vmatprep.subr.bf16.mxu1 %v12556_v54 }
 0x5d1   : > { %v6270_v53 = vpop.f32.mrf.mxu1 }
 0x5d2   : > { %v16505_v32 = vadd.f32 %v6270_v53, %v6137_v29  ;;  %v12388_v29 = vld [vmem:[%s17346_s3 + $0x20] sm:$0xff]   ;;  %6957 = vmatpush1.bf16.msra.mxu0 %v12387_v55 }
 0x5d3   : > { %v11936_v1 = vpop.f32.mrf.mxu1  ;;  %7053 = vmatpush1.bf16.msra.mxu1 %v12388_v29  ;;  %6958 = vmatprep.subr.bf16.mxu0 %v12556_v54  ;;  %v12396_v55 = vld [vmem:[%s17346_s3] sm:$0xff]  }
 0x5d4   : > { %v6142_v1 = vadd.f32 %v17905_v24, %v16453_v48  ;;  %7054 = vmatprep.subr.bf16.mxu1 %v12556_v54  ;;  %v17906_v48 = vld [vmem:[#allocation30_spill] sm:$0xff] }
 0x5d5   : > { %v6275_v41 = vpop.f32.mrf.mxu1 }
 0x5d6   : > { %v16509_v2 = vadd.f32 %v6275_v41, %v6138_v23  ;;  %v12389_v41 = vld [vmem:[%s17346_s3 + $0x60] sm:$0xff]  }
 0x5d7   : > { %v11939_v13 = vpop.f32.mrf.mxu1  ;;  %6959 = vmatpush1.bf16.msra.mxu0 %v12389_v41  ;;  %v17910_v41 = vld [vmem:[#allocation74_spill] sm:$0xff] }
 0x5d8   : > { %v12390_v13 = vld [vmem:[%s17346_s3 + $0x18] sm:$0xff]   ;;  %6960 = vmatprep.subr.bf16.mxu0 %v12556_v54 }
 0x5d9   : > { %v6278_v40 = vpop.f32.mrf.mxu1  ;;  %7055 = vmatpush1.bf16.msra.mxu1 %v12390_v13  ;;  %v6147_v13 = vadd.f32 %v17910_v41, %v16473_v14  ;;  %v6150_v14 = vadd.f32 %v16265_v9, %v16485_v36 }
 0x5da   : > { %v16521_v17 = vadd.f32 %v6278_v40, %v6139_v37  ;;  %v6143_v37 = vadd.f32 %v17906_v48, %v16457_v56  ;;  %v12391_v40 = vld [vmem:[%s17346_s3 + $0x58] sm:$0xff]   ;;  %7056 = vmatprep.subr.bf16.mxu1 %v12556_v54  ;;  %v17907_v56 = vld [vmem:[#allocation47_spill] sm:$0xff] }
 0x5db   : > { %v11940_v27 = vpop.f32.mrf.mxu1  ;;  %6961 = vmatpush1.bf16.msra.mxu0 %v12391_v40 }
 0x5dc   : > { %v6144_v27 = vadd.f32 %v17907_v56, %v16461_v20  ;;  %6962 = vmatprep.subr.bf16.mxu0 %v12556_v54  ;;  %v17908_v20 = vld [vmem:[#allocation72_spill] sm:$0xff] }
 0x5dd   : > { %v6283_v3 = vpop.f32.mrf.mxu1  ;;  %7057 = vmatpush1.bf16.msra.mxu1 %v12392_v62  ;;  %v17912_v56 = vld [vmem:[#allocation76_spill] sm:$0xff] }
 0x5de   : > { %v16533_v25 = vadd.f32 %v6283_v3, %v6140_v51  ;;  %v12393_v3 = vld [vmem:[%s17346_s3 + $0x50] sm:$0xff]   ;;  %7058 = vmatprep.subr.bf16.mxu1 %v12556_v54 }
 0x5df   : > { %v11943_v10 = vpop.f32.mrf.mxu1  ;;  %6963 = vmatpush1.bf16.msra.mxu0 %v12393_v3 }
 0x5e0   : > { %v6145_v10 = vadd.f32 %v17908_v20, %v16465_v52  ;;  %6964 = vmatprep.subr.bf16.mxu0 %v12556_v54  ;;  %v17909_v52 = vld [vmem:[#allocation46_spill] sm:$0xff] }
 0x5e1   : > { %v6286_v59 = vpop.f32.mrf.mxu1  ;;  %7059 = vmatpush1.bf16.msra.mxu1 %v12394_v38 }
 0x5e2   : > { %v16545_v12 = vadd.f32 %v6286_v59, %v6141_v6  ;;  %v12395_v59 = vld [vmem:[%s17346_s3 + $0x48] sm:$0xff]   ;;  %7060 = vmatprep.subr.bf16.mxu1 %v12556_v54 }
 0x5e3   : > { %v11944_v53 = vpop.f32.mrf.mxu1  ;;  %6965 = vmatpush1.bf16.msra.mxu0 %v12395_v59 }
 0x5e4   : > { %v6146_v53 = vadd.f32 %v17909_v52, %v16469_v5  ;;  %6980 = vmatprep.subr.bf16.mxu0 %v12556_v54 }
 0x5e5   : > { %v6291_v35 = vpop.f32.mrf.mxu1  ;;  %7061 = vmatpush1.bf16.msra.mxu1 %v12396_v55 }
 0x5e6   : > { %v16557_v23 = vadd.f32 %v6291_v35, %v6142_v1  ;;  %7076 = vmatprep.subr.bf16.mxu1 %v12556_v54 }
 0x5e7   : > { %v11947_v60 = vpop.f32.mrf.mxu1 }
 0x5e9   : > { %v6294_v0 = vpop.f32.mrf.mxu1 }
 0x5ea   : > { %v16569_v39 = vadd.f32 %v6294_v0, %v6143_v37  ;;  %v17911_v0 = vld [vmem:[#allocation50_spill] sm:$0xff] }
 0x5eb   : > { %v11948_v11 = vpop.f32.mrf.mxu1  ;;  %v6148_v5 = vadd.f32 %v17911_v0, %v16477_v63  ;;  %v17913_v63 = vld [vmem:[#allocation48_spill] sm:$0xff] }
 0x5ed   : > { %v6299_v34 = vpop.f32.mrf.mxu1 }
 0x5ee   : > { %v16581_v51 = vadd.f32 %v6299_v34, %v6144_v27  ;;  %v6149_v27 = vadd.f32 %v17912_v56, %v16481_v21  ;;  %v6530_v21 = vadd.f32 %v16281_v4, %v16493_v7  ;;  %v6532_v4 = vadd.f32 %v16297_v57, %v16501_v19 }
 0x5ef   : > { %v11951_v15 = vpop.f32.mrf.mxu1  ;;  %v6534_v57 = vadd.f32 %v16313_v58, %v16509_v2  ;;  %v6536_v58 = vadd.f32 %v16328_v45, %v16533_v25  ;;  %v6538_v45 = vadd.f32 %v16343_v46, %v16557_v23 }
 0x5f0   : > { %v6540_v46 = vadd.f32 %v16358_v31, %v16581_v51 }
 0x5f1   : > { %v6302_v47 = vpop.f32.mrf.mxu1 }
 0x5f2   : > { %v16593_v6 = vadd.f32 %v6302_v47, %v6145_v10  ;;  %v6151_v47 = vadd.f32 %v17913_v63, %v16489_v26 }
 0x5f3   : > { %v11952_v29 = vpop.f32.mrf.mxu1 }
 0x5f5   : > { %v6307_v24 = vpop.f32.mrf.mxu1 }
 0x5f6   : > { %v16605_v1 = vadd.f32 %v6307_v24, %v6146_v53  ;;  %v16634_v53 = vld [vmem:[%s17349_s6 + $0x1] ss:$0 sm:$0xff] }
 0x5f7   : > { %v11955_v35 = vpop.f32.mrf.mxu1  ;;  %v17914_v24 = vld [vmem:[#allocation78_spill] sm:$0xff] }
 0x5f8   : > { %v6531_v35 = vadd.f32 %v17914_v24, %v16497_v22  ;;  %v6533_v22 = vadd.f32 %v16305_v42, %v16505_v32  ;;  %v6535_v42 = vadd.f32 %v16319_v61, %v16521_v17  ;;  %v6537_v61 = vadd.f32 %v16334_v33, %v16545_v12 }
 0x5f9   : > { %v6310_v60 = vpop.f32.mrf.mxu1  ;;  %v6539_v33 = vadd.f32 %v16349_v49, %v16569_v39  ;;  %v6541_v49 = vadd.f32 %v16364_v43, %v16593_v6  ;;  %v6542_v31 = vadd.f32 %v16373_v50, %v16605_v1 }
 0x5fa   : > { %v16611_v48 = vadd.f32 %v6310_v60, %v6147_v13 }
 0x5fb   : > { %v11956_v37 = vpop.f32.mrf.mxu1 }
 0x5fc   : > { %v6543_v43 = vadd.f32 %v16379_v30, %v16611_v48 }
 0x5fd   : > { %v6315_v40 = vpop.f32.mrf.mxu1 }
 0x5fe   : > { %v16615_v62 = vadd.f32 %v6315_v40, %v6148_v5 }
 0x5ff   : > { %v11959_v11 = vpop.f32.mrf.mxu1 }
 0x600   : > { %v6544_v50 = vadd.f32 %v16388_v44, %v16615_v62 }
 0x601   : > { %v6318_v34 = vpop.f32.mrf.mxu1 }
 0x602   : > { %v16619_v3 = vadd.f32 %v6318_v34, %v6149_v27 }
 0x603   : > { %v11960_v38 = vpop.f32.mrf.mxu1 }
 0x604   : > { %v6545_v30 = vadd.f32 %v16394_v28, %v16619_v3 }
 0x605   : > { %v6323_v15 = vpop.f32.mrf.mxu1 }
 0x606   : > { %v16623_v20 = vadd.f32 %v6323_v15, %v6150_v14 }
 0x607   : > { %v11963_v10 = vpop.f32.mrf.mxu1 }
 0x608   : > { %v6546_v44 = vadd.f32 %v16403_v18, %v16623_v20  ;;  %v12398_v18 = vld [vmem:[%s17346_s3 + $0x40] sm:$0xff]  }
 0x609   : > { %v6326_v59 = vpop.f32.mrf.mxu1  ;;  %7077 = vmatpush2.bf16.msra.mxu1 %v12398_v18 }
 0x60a   : > { %v16627_v55 = vadd.f32 %v6326_v59, %v6151_v47  ;;  %7287 = vmatprep.subr.bf16.mxu1 %v12556_v54 }
 0x60b   : > { %v11964_v29 = vpop.f32.mrf.mxu1 }
 0x60c   : > { %v6547_v28 = vadd.f32 %v16409_v16, %v16627_v55 }
 0x60d   : > { %v6653_v52 = vpop.f32.mrf.mxu1 }
 0x60e   : > { %v6724_v9 = vadd.f32 %v6653_v52, %v6530_v21 }
 0x60f   : > { %v12035_v36 = vpop.f32.mrf.mxu1 }
 0x610   : > { %v6746_v26 = vadd.f32 %v16634_v53, %v6724_v9 }
 0x611   : > { %v6656_v41 = vpop.f32.mrf.mxu1 }
 0x612   : > { %v6725_v13 = vadd.f32 %v6656_v41, %v6531_v35  ;;  %v6764_v60 = vmax.f32 %v6746_v26, 0.0 }
 0x613   : > { %v12036_v37 = vpop.f32.mrf.mxu1 }
 0x614   : > { %6782 = vxpose.xlu1.b32.start [1/16] (narrow) %v6764_v60, 16  ;;  %v6747_v7 = vadd.f32 %v16634_v53, %v6725_v13 }
 0x615   : > { %v6661_v0 = vpop.f32.mrf.mxu1 }
 0x616   : > { %v6726_v5 = vadd.f32 %v6661_v0, %v6532_v4  ;;  %v6765_v40 = vmax.f32 %v6747_v7, 0.0 }
 0x617   : > { %v12039_v11 = vpop.f32.mrf.mxu1 }
 0x618   : > { %6783 = vxpose.xlu1.b32.cont [2/16] (narrow) %v6765_v40, 16  ;;  %v6748_v56 = vadd.f32 %v16634_v53, %v6726_v5 }
 0x619   : > { %v6664_v27 = vpop.f32.mrf.mxu1 }
 0x61a   : > { %v6727_v34 = vadd.f32 %v6664_v27, %v6533_v22  ;;  %v6766_v38 = vmax.f32 %v6748_v56, 0.0 }
 0x61b   : > { %v12040_v14 = vpop.f32.mrf.mxu1 }
 0x61c   : > { %6784 = vxpose.xlu1.b32.cont [3/16] (narrow) %v6766_v38, 16  ;;  %v6749_v19 = vadd.f32 %v16634_v53, %v6727_v34 }
 0x61d   : > { %v6669_v15 = vpop.f32.mrf.mxu1 }
 0x61e   : > { %v6728_v10 = vadd.f32 %v6669_v15, %v6534_v57  ;;  %v6767_v63 = vmax.f32 %v6749_v19, 0.0 }
 0x61f   : > { %v12043_v47 = vpop.f32.mrf.mxu1 }
 0x620   : > { %6785 = vxpose.xlu1.b32.cont [4/16] (narrow) %v6767_v63, 16  ;;  %v6750_v32 = vadd.f32 %v16634_v53, %v6728_v10 }
 0x621   : > { %v6672_v59 = vpop.f32.mrf.mxu1 }
 0x622   : > { %v6729_v29 = vadd.f32 %v6672_v59, %v6535_v42  ;;  %v6768_v21 = vmax.f32 %v6750_v32, 0.0 }
 0x623   : > { %v12044_v52 = vpop.f32.mrf.mxu1 }
 0x624   : > { %6786 = vxpose.xlu1.b32.cont [5/16] (narrow) %v6768_v21, 16  ;;  %v6751_v2 = vadd.f32 %v16634_v53, %v6729_v29 }
 0x625   : > { %v6677_v9 = vpop.f32.mrf.mxu1 }
 0x626   : > { %v6730_v36 = vadd.f32 %v6677_v9, %v6536_v58  ;;  %v6769_v24 = vmax.f32 %v6751_v2, 0.0 }
 0x627   : > { %v12047_v35 = vpop.f32.mrf.mxu1 }
 0x628   : > { %6787 = vxpose.xlu1.b32.cont [6/16] (narrow) %v6769_v24, 16  ;;  %v6752_v17 = vadd.f32 %v16634_v53, %v6730_v36 }
 0x629   : > { %v6680_v26 = vpop.f32.mrf.mxu1 }
 0x62a   : > { %v6731_v41 = vadd.f32 %v6680_v26, %v6537_v61  ;;  %v6770_v13 = vmax.f32 %v6752_v17, 0.0 }
 0x62b   : > { %v12048_v60 = vpop.f32.mrf.mxu1 }
 0x62c   : > { %6788 = vxpose.xlu1.b32.cont [7/16] (narrow) %v6770_v13, 16  ;;  %v6753_v25 = vadd.f32 %v16634_v53, %v6731_v41  ;;  %v12397_v60 = vld [vmem:[%s17346_s3 + $0x88] sm:$0xff]  }
 0x62d   : > { %v6685_v37 = vpop.f32.mrf.mxu1  ;;  %6981 = vmatpush2.bf16.msra.mxu0 %v12397_v60 }
 0x62e   : > { %v6732_v4 = vadd.f32 %v6685_v37, %v6538_v45  ;;  %v6771_v7 = vmax.f32 %v6753_v25, 0.0  ;;  %7167 = vmatprep.subr.bf16.mxu0 %v12556_v54 }
 0x62f   : > { %v12051_v0 = vpop.f32.mrf.mxu1 }
 0x630   : > { %6789 = vxpose.xlu1.b32.cont [8/16] (narrow) %v6771_v7, 16  ;;  %v6754_v12 = vadd.f32 %v16634_v53, %v6732_v4 }
 0x631   : > { %v6688_v5 = vpop.f32.mrf.mxu1 }
 0x632   : > { %v6733_v40 = vadd.f32 %v6688_v5, %v6539_v33  ;;  %v6772_v11 = vmax.f32 %v6754_v12, 0.0 }
 0x633   : > { %v12052_v22 = vpop.f32.mrf.mxu1 }
 0x634   : > { %6790 = vxpose.xlu1.b32.cont [9/16] (narrow) %v6772_v11, 16  ;;  %v6755_v23 = vadd.f32 %v16634_v53, %v6733_v40  ;;  %v12399_v40 = vld [vmem:[%s17346_s3 + $0x110] sm:$0xff]   ;;  %v12400_v11 = vld [vmem:[%s17346_s3 + $0xc8] sm:$0xff]  }
 0x635   : > { %v6693_v56 = vpop.f32.mrf.mxu1 }
 0x636   : > { %v6734_v27 = vadd.f32 %v6693_v56, %v6540_v46  ;;  %v6773_v34 = vmax.f32 %v6755_v23, 0.0  ;;  %v12401_v56 = vld [vmem:[%s17346_s3 + $0x108] sm:$0xff]  }
 0x637   : > { %v12055_v38 = vpop.f32.mrf.mxu1 }
 0x638   : > { %6791 = vxpose.xlu1.b32.cont [10/16] (narrow) %v6773_v34, 16  ;;  %v6756_v39 = vadd.f32 %v16634_v53, %v6734_v27  ;;  %v12402_v27 = vld [vmem:[%s17346_s3 + $0xc0] sm:$0xff]   ;;  %v12404_v38 = vld [vmem:[%s17346_s3 + $0xb8] sm:$0xff]  }
 0x639   : > { %v6696_v14 = vpop.f32.mrf.mxu1  ;;  %v12403_v34 = vld [vmem:[%s17346_s3 + $0x100] sm:$0xff]  }
 0x63a   : > { %v6735_v57 = vadd.f32 %v6696_v14, %v6541_v49  ;;  %v6774_v19 = vmax.f32 %v6756_v39, 0.0  ;;  %v12405_v49 = vld [vmem:[%s17346_s3 + $0xf8] sm:$0xff]   ;;  %v12406_v39 = vld [vmem:[%s17346_s3 + $0xb0] sm:$0xff]  }
 0x63b   : > { %v12056_v15 = vpop.f32.mrf.mxu1  ;;  %v12407_v14 = vld [vmem:[%s17346_s3 + $0xf0] sm:$0xff]  }
 0x63c   : > { %6792 = vxpose.xlu1.b32.cont [11/16] (narrow) %v6774_v19, 16  ;;  %v6757_v51 = vadd.f32 %v16634_v53, %v6735_v57  ;;  %v12408_v57 = vld [vmem:[%s17346_s3 + $0xa8] sm:$0xff]   ;;  %v12410_v15 = vld [vmem:[%s17346_s3 + $0xa0] sm:$0xff]  }
 0x63d   : > { %v6701_v10 = vpop.f32.mrf.mxu1  ;;  %v12409_v19 = vld [vmem:[%s17346_s3 + $0xe8] sm:$0xff]  }
 0x63e   : > { %v6736_v63 = vadd.f32 %v6701_v10, %v6542_v31  ;;  %v6775_v47 = vmax.f32 %v6757_v51, 0.0  ;;  %v12411_v31 = vld [vmem:[%s17346_s3 + $0xe0] sm:$0xff]   ;;  %v12412_v51 = vld [vmem:[%s17346_s3 + $0x98] sm:$0xff]  }
 0x63f   : > { %v12059_v42 = vpop.f32.mrf.mxu1  ;;  %v12413_v10 = vld [vmem:[%s17346_s3 + $0xd8] sm:$0xff]  }
 0x640   : > { %6793 = vxpose.xlu1.b32.cont [12/16] (narrow) %v6775_v47, 16  ;;  %v6758_v6 = vadd.f32 %v16634_v53, %v6736_v63  ;;  %v12414_v63 = vld [vmem:[%s17346_s3 + $0x90] sm:$0xff]   ;;  %v12415_v47 = vld [vmem:[%s17346_s3 + $0x118] sm:$0xff]  }
 0x641   : > { %v6704_v32 = vpop.f32.mrf.mxu1  ;;  %v12416_v42 = vld [vmem:[%s17346_s3 + $0xd0] sm:$0xff]  }
 0x642   : > { %v6737_v59 = vadd.f32 %v6704_v32, %v6543_v43  ;;  %v6776_v29 = vmax.f32 %v6758_v6, 0.0  ;;  %v12417_v43 = vld [vmem:[%s17346_s3 + $0x1a0] sm:$0xff]  }
 0x643   : > { %v12060_v21 = vpop.f32.mrf.mxu1 }
 0x644   : > { %6794 = vxpose.xlu1.b32.cont [13/16] (narrow) %v6776_v29, 16  ;;  %v6759_v1 = vadd.f32 %v16634_v53, %v6737_v59  ;;  %v12418_v59 = vld [vmem:[%s17346_s3 + $0x158] sm:$0xff]  }
 0x645   : > { %v6709_v52 = vpop.f32.mrf.mxu1 }
 0x646   : > { %v6738_v58 = vadd.f32 %v6709_v52, %v6544_v50  ;;  %v6777_v2 = vmax.f32 %v6759_v1, 0.0  ;;  %v12419_v50 = vld [vmem:[%s17346_s3 + $0x198] sm:$0xff]   ;;  %v12420_v1 = vld [vmem:[%s17346_s3 + $0x150] sm:$0xff]  }
 0x647   : > { %v12063_v9 = vpop.f32.mrf.mxu1  ;;  %v12421_v52 = vld [vmem:[%s17346_s3 + $0x190] sm:$0xff]  }
 0x648   : > { %6795 = vxpose.xlu1.b32.cont [14/16] (narrow) %v6777_v2, 16  ;;  %v6760_v48 = vadd.f32 %v16634_v53, %v6738_v58  ;;  %v12422_v58 = vld [vmem:[%s17346_s3 + $0x148] sm:$0xff]   ;;  %v12424_v9 = vld [vmem:[%s17346_s3 + $0x140] sm:$0xff]  }
 0x649   : > { %v6712_v36 = vpop.f32.mrf.mxu1  ;;  %v12423_v2 = vld [vmem:[%s17346_s3 + $0x188] sm:$0xff]  }
 0x64a   : > { %v6739_v24 = vadd.f32 %v6712_v36, %v6545_v30  ;;  %v6778_v35 = vmax.f32 %v6760_v48, 0.0  ;;  %v12425_v30 = vld [vmem:[%s17346_s3 + $0x180] sm:$0xff]   ;;  %v12426_v48 = vld [vmem:[%s17346_s3 + $0x138] sm:$0xff]  }
 0x64b   : > { %v12064_v61 = vpop.f32.mrf.mxu1  ;;  %v12427_v36 = vld [vmem:[%s17346_s3 + $0x178] sm:$0xff]  }
 0x64c   : > { %6796 = vxpose.xlu1.b32.cont [15/16] (narrow) %v6778_v35, 16  ;;  %v6761_v62 = vadd.f32 %v16634_v53, %v6739_v24  ;;  %v12428_v24 = vld [vmem:[%s17346_s3 + $0x130] sm:$0xff]   ;;  %v12430_v61 = vld [vmem:[%s17346_s3 + $0x128] sm:$0xff]  }
 0x64d   : > { %v6717_v17 = vpop.f32.mrf.mxu1  ;;  %v12429_v35 = vld [vmem:[%s17346_s3 + $0x170] sm:$0xff]  }
 0x64e   : > { %v6740_v26 = vadd.f32 %v6717_v17, %v6546_v44  ;;  %v6779_v41 = vmax.f32 %v6761_v62, 0.0  ;;  %v12431_v44 = vld [vmem:[%s17346_s3 + $0x168] sm:$0xff]   ;;  %v12432_v62 = vld [vmem:[%s17346_s3 + $0x120] sm:$0xff]  }
 0x64f   : > { %v12067_v13 = vpop.f32.mrf.mxu1  ;;  %v12433_v17 = vld [vmem:[%s17346_s3 + $0x1a8] sm:$0xff]  }
 0x650   : > { %6797 = vxpose.xlu1.b32.end [16/16] (narrow) %v6779_v41, 16  ;;  %v6762_v3 = vadd.f32 %v16634_v53, %v6740_v26  ;;  %v12434_v26 = vld [vmem:[%s17346_s3 + $0x160] sm:$0xff]   ;;  %v12435_v41 = vld [vmem:[%s17346_s3 + $0x230] sm:$0xff]  }
 0x651   : > { %v6720_v20 = vpop.f32.mrf.mxu1 }
 0x652   : > { %v6741_v45 = vadd.f32 %v6720_v20, %v6547_v28  ;;  %v6780_v25 = vmax.f32 %v6762_v3, 0.0  ;;  %v12436_v3 = vld [vmem:[%s17346_s3 + $0x1e8] sm:$0xff]  }
 0x653   : > { %v12068_v37 = vpop.f32.mrf.mxu1  ;;  %v12437_v20 = vld [vmem:[%s17346_s3 + $0x228] sm:$0xff]  }
 0x654   : > { %6814 = vxpose.xlu0.b32.start [1/2] (short) (narrow) %v6780_v25, 16  ;;  %v6763_v16 = vadd.f32 %v16634_v53, %v6741_v45  ;;  %v12438_v45 = vld [vmem:[%s17346_s3 + $0x1e0] sm:$0xff]   ;;  %v12440_v37 = vld [vmem:[%s17346_s3 + $0x1d8] sm:$0xff]  }
 0x655   : > { %v12439_v25 = vld [vmem:[%s17346_s3 + $0x220] sm:$0xff]  }
 0x656   : > { %v6781_v55 = vmax.f32 %v6763_v16, 0.0  ;;  %v12441_v16 = vld [vmem:[%s17346_s3 + $0x218] sm:$0xff]  }
 0x658   : > { %6815 = vxpose.xlu0.b32.end [2/2] (short) (narrow) %v6781_v55, 16  ;;  %v12442_v55 = vld [vmem:[%s17346_s3 + $0x1d0] sm:$0xff]  }
 0x690   : > { %v6798_v4 = vpop.trf.xlu1 }
 0x694   : > { %v6799_v0 = vpop.trf.xlu1 }
 0x695   : > { %v16696_v33 = vpack.c.bf16 %v6799_v0, %v6798_v4  ;;  %v12443_v4 = vld [vmem:[%s17346_s3 + $0x210] sm:$0xff]   ;;  %v12445_v0 = vld [vmem:[%s17346_s3 + $0x208] sm:$0xff]  }
 0x697   : > { %v16713_v22 = vshrl.u32 %v16696_v33, 16  ;;  %v7107_v29 = vrot.slane %v16696_v33, 1  ;;  %v7347_v60 = vrot.slane %v16696_v33, 2 }
 0x699   : > { %v7227_v6 = vrot.slane %v16713_v22, 1  ;;  %v7467_v13 = vrot.slane %v16713_v22, 2 }
 0x6d0   : > { %v6830_v7 = vpop.trf.xlu0 }
 0x6d4   : > { %v6831_v12 = vpop.trf.xlu0 }
 0x6d5   : > { %v16698_v5 = vpack.c.bf16 %v6831_v12, %v6830_v7  ;;  %v12444_v7 = vld [vmem:[%s17346_s3 + $0x1c8] sm:$0xff]   ;;  %v12446_v12 = vld [vmem:[%s17346_s3 + $0x1c0] sm:$0xff]  }
 0x6d7   : > { %9735 = vmatprep.mubr.msk.bf16.mxu1 %vm6946_vm8, %v16698_v5  ;;  %v16706_v53 = vshrl.u32 %v16698_v5, 16  ;;  %v7108_v46 = vrot.slane %v16698_v5, 1  ;;  %v7348_v21 = vrot.slane %v16698_v5, 2  ;;  %v7588_v18 = vrot.slane %v16698_v5, 3 }
 0x6d8   : > { %7079 = vmatmul.mubr.bf16.vlgmr.msra.gmra.mxu1 %v16696_v33 }
 0x6d9   : > { %7288 = vmatpush1.bf16.msra.mxu1 %v12399_v40  ;;  %9725 = vmatprep.mubr.msk.bf16.mxu0 %vm6946_vm8, %v16706_v53  ;;  %v7228_v23 = vrot.slane %v16706_v53, 1  ;;  %v7468_v32 = vrot.slane %v16706_v53, 2  ;;  %v7708_v28 = vrot.slane %v16706_v53, 3  ;;  %v12447_v40 = vld [vmem:[%s17346_s3 + $0x200] sm:$0xff]  }
 0x6da   : > { %6983 = vmatmul.mubr.bf16.vlgmr.msra.gmra.mxu0 %v16713_v22  ;;  %7289 = vmatprep.subr.bf16.mxu1 %v12556_v54 }
 0x6db   : > { %7168 = vmatpush1.bf16.msra.mxu0 %v12400_v11  ;;  %9763 = vmatprep.mubr.msk.bf16.mxu0 %vm6946_vm8, %v7108_v46  ;;  %v12448_v11 = vld [vmem:[%s17346_s3 + $0x1b8] sm:$0xff]  }
 0x6dc   : > { %9791 = vmatprep.mubr.msk.bf16.mxu1 %vm6946_vm8, %v7228_v23  ;;  %7169 = vmatprep.subr.bf16.mxu0 %v12556_v54  ;;  %v12449_v46 = vld [vmem:[%s17346_s3 + $0x1f8] sm:$0xff]   ;;  %v12450_v23 = vld [vmem:[%s17346_s3 + $0x1b0] sm:$0xff]  }
 0x6dd   : > { %7290 = vmatpush1.bf16.msra.mxu1 %v12401_v56  ;;  %v12451_v56 = vld [vmem:[%s17346_s3 + $0x238] sm:$0xff]  }
 0x6de   : > { %7291 = vmatprep.subr.bf16.mxu1 %v12556_v54 }
 0x6df   : > { %7170 = vmatpush1.bf16.msra.mxu0 %v12402_v27  ;;  %v12452_v27 = vld [vmem:[%s17346_s3 + $0x1f0] sm:$0xff]  }
 0x6e0   : > { %7171 = vmatprep.subr.bf16.mxu0 %v12556_v54 }
 0x6e1   : > { %7292 = vmatpush1.bf16.msra.mxu1 %v12403_v34  ;;  %v12453_v34 = vld [vmem:[%s17346_s3 + $0x2c0] sm:$0xff]  }
 0x6e2   : > { %7293 = vmatprep.subr.bf16.mxu1 %v12556_v54 }
 0x6e3   : > { %7172 = vmatpush1.bf16.msra.mxu0 %v12404_v38  ;;  %v7707_v38 = vrot.slane %v16713_v22, 3 }
 0x6e4   : > { %7173 = vmatprep.subr.bf16.mxu0 %v12556_v54 }
 0x6e5   : > { %7294 = vmatpush1.bf16.msra.mxu1 %v12405_v49  ;;  %v7948_v49 = vrot.slane %v16706_v53, 4 }
 0x6e6   : > { %7295 = vmatprep.subr.bf16.mxu1 %v12556_v54 }
 0x6e7   : > { %7174 = vmatpush1.bf16.msra.mxu0 %v12406_v39  ;;  %v12454_v39 = vld [vmem:[%s17346_s3 + $0x278] sm:$0xff]  }
 0x6e8   : > { %7175 = vmatprep.subr.bf16.mxu0 %v12556_v54 }
 0x6e9   : > { %7296 = vmatpush1.bf16.msra.mxu1 %v12407_v14  ;;  %v7587_v14 = vrot.slane %v16696_v33, 3 }
 0x6ea   : > { %7297 = vmatprep.subr.bf16.mxu1 %v12556_v54 }
 0x6eb   : > { %7176 = vmatpush1.bf16.msra.mxu0 %v12408_v57  ;;  %v7828_v57 = vrot.slane %v16698_v5, 4 }
 0x6ec   : > { %7177 = vmatprep.subr.bf16.mxu0 %v12556_v54 }
 0x6ed   : > { %7298 = vmatpush1.bf16.msra.mxu1 %v12409_v19  ;;  %v12455_v19 = vld [vmem:[%s17346_s3 + $0x2b8] sm:$0xff]  }
 0x6ee   : > { %7299 = vmatprep.subr.bf16.mxu1 %v12556_v54 }
 0x6ef   : > { %7178 = vmatpush1.bf16.msra.mxu0 %v12410_v15  ;;  %v12456_v15 = vld [vmem:[%s17346_s3 + $0x270] sm:$0xff]  }
 0x6f0   : > { %7179 = vmatprep.subr.bf16.mxu0 %v12556_v54 }
 0x6f1   : > { %7300 = vmatpush1.bf16.msra.mxu1 %v12411_v31  ;;  %v12457_v31 = vld [vmem:[%s17346_s3 + $0x2b0] sm:$0xff]  }
 0x6f2   : > { %7301 = vmatprep.subr.bf16.mxu1 %v12556_v54 }
 0x6f3   : > { %7180 = vmatpush1.bf16.msra.mxu0 %v12412_v51  ;;  %v12458_v51 = vld [vmem:[%s17346_s3 + $0x268] sm:$0xff]  }
 0x6f4   : > { %7181 = vmatprep.subr.bf16.mxu0 %v12556_v54 }
 0x6f5   : > { %7302 = vmatpush1.bf16.msra.mxu1 %v12413_v10  ;;  %v12459_v10 = vld [vmem:[%s17346_s3 + $0x2a8] sm:$0xff]  }
 0x6f6   : > { %7317 = vmatprep.subr.bf16.mxu1 %v12556_v54 }
 0x6f7   : > { %7182 = vmatpush1.bf16.msra.mxu0 %v12414_v63  ;;  %v12460_v63 = vld [vmem:[%s17346_s3 + $0x260] sm:$0xff]  }
 0x6f8   : > { %7197 = vmatprep.subr.bf16.mxu0 %v12556_v54 }
 0x6f9   : > { %7318 = vmatpush2.bf16.msra.mxu1 %v12415_v47  ;;  %v12461_v47 = vld [vmem:[%s17346_s3 + $0x2a0] sm:$0xff]  }
 0x6fa   : > { %7527 = vmatprep.subr.bf16.mxu1 %v12556_v54 }
 0x6fb   : > { %7198 = vmatpush2.bf16.msra.mxu0 %v12416_v42  ;;  %v12462_v42 = vld [vmem:[%s17346_s3 + $0x258] sm:$0xff]  }
 0x6fc   : > { %7320 = vmatmul.mubr.bf16.vlgmr.msra.gmra.mxu1 %v7227_v6  ;;  %7407 = vmatprep.subr.bf16.mxu0 %v12556_v54  ;;  %v12464_v6 = vld [vmem:[%s17346_s3 + $0x250] sm:$0xff]  }
 0x6fd   : > { %7528 = vmatpush1.bf16.msra.mxu1 %v12417_v43  ;;  %9847 = vmatprep.mubr.msk.bf16.mxu1 %vm6946_vm8, %v7468_v32  ;;  %v12463_v43 = vld [vmem:[%s17346_s3 + $0x298] sm:$0xff]   ;;  %v12465_v32 = vld [vmem:[%s17346_s3 + $0x290] sm:$0xff]  }
 0x6fe   : > { %7200 = vmatmul.mubr.bf16.vlgmr.msra.gmra.mxu0 %v7107_v29  ;;  %7529 = vmatprep.subr.bf16.mxu1 %v12556_v54  ;;  %v12467_v29 = vld [vmem:[%s17346_s3 + $0x288] sm:$0xff]  }
 0x6ff   : > { %7408 = vmatpush1.bf16.msra.mxu0 %v12418_v59  ;;  %9819 = vmatprep.mubr.msk.bf16.mxu0 %vm6946_vm8, %v7348_v21  ;;  %v12466_v59 = vld [vmem:[%s17346_s3 + $0x248] sm:$0xff]   ;;  %v12468_v21 = vld [vmem:[%s17346_s3 + $0x240] sm:$0xff]  }
 0x700   : > { %7409 = vmatprep.subr.bf16.mxu0 %v12556_v54 }
 0x701   : > { %7530 = vmatpush1.bf16.msra.mxu1 %v12419_v50  ;;  %v12469_v50 = vld [vmem:[%s17346_s3 + $0x2c8] sm:$0xff]  }
 0x702   : > { %7531 = vmatprep.subr.bf16.mxu1 %v12556_v54 }
 0x703   : > { %7410 = vmatpush1.bf16.msra.mxu0 %v12420_v1  ;;  %v12470_v1 = vld [vmem:[%s17346_s3 + $0x280] sm:$0xff]  }
 0x704   : > { %7411 = vmatprep.subr.bf16.mxu0 %v12556_v54 }
 0x705   : > { %7532 = vmatpush1.bf16.msra.mxu1 %v12421_v52  ;;  %v12471_v52 = vld [vmem:[%s17346_s3 + $0x350] sm:$0xff]  }
 0x706   : > { %7533 = vmatprep.subr.bf16.mxu1 %v12556_v54 }
 0x707   : > { %7412 = vmatpush1.bf16.msra.mxu0 %v12422_v58  ;;  %v7947_v58 = vrot.slane %v16713_v22, 4 }
 0x708   : > { %7413 = vmatprep.subr.bf16.mxu0 %v12556_v54 }
 0x709   : > { %7534 = vmatpush1.bf16.msra.mxu1 %v12423_v2  ;;  %v8188_v2 = vrot.slane %v16706_v53, 5 }
 0x70a   : > { %7535 = vmatprep.subr.bf16.mxu1 %v12556_v54 }
 0x70b   : > { %7414 = vmatpush1.bf16.msra.mxu0 %v12424_v9  ;;  %v12472_v9 = vld [vmem:[%s17346_s3 + $0x308] sm:$0xff]  }
 0x70c   : > { %7415 = vmatprep.subr.bf16.mxu0 %v12556_v54 }
 0x70d   : > { %7536 = vmatpush1.bf16.msra.mxu1 %v12425_v30  ;;  %v7827_v30 = vrot.slane %v16696_v33, 4 }
 0x70e   : > { %7537 = vmatprep.subr.bf16.mxu1 %v12556_v54 }
 0x70f   : > { %7416 = vmatpush1.bf16.msra.mxu0 %v12426_v48  ;;  %v8068_v48 = vrot.slane %v16698_v5, 5 }
 0x710   : > { %7417 = vmatprep.subr.bf16.mxu0 %v12556_v54 }
 0x711   : > { %7538 = vmatpush1.bf16.msra.mxu1 %v12427_v36  ;;  %v12473_v36 = vld [vmem:[%s17346_s3 + $0x348] sm:$0xff]  }
 0x712   : > { %7539 = vmatprep.subr.bf16.mxu1 %v12556_v54 }
 0x713   : > { %7418 = vmatpush1.bf16.msra.mxu0 %v12428_v24  ;;  %v12474_v24 = vld [vmem:[%s17346_s3 + $0x300] sm:$0xff]  }
 0x714   : > { %7419 = vmatprep.subr.bf16.mxu0 %v12556_v54 }
 0x715   : > { %7540 = vmatpush1.bf16.msra.mxu1 %v12429_v35  ;;  %v12475_v35 = vld [vmem:[%s17346_s3 + $0x340] sm:$0xff]  }
 0x716   : > { %7541 = vmatprep.subr.bf16.mxu1 %v12556_v54 }
 0x717   : > { %7420 = vmatpush1.bf16.msra.mxu0 %v12430_v61  ;;  %v12476_v61 = vld [vmem:[%s17346_s3 + $0x2f8] sm:$0xff]  }
 0x718   : > { %7421 = vmatprep.subr.bf16.mxu0 %v12556_v54 }
 0x719   : > { %7542 = vmatpush1.bf16.msra.mxu1 %v12431_v44  ;;  %v12477_v44 = vld [vmem:[%s17346_s3 + $0x338] sm:$0xff]  }
 0x71a   : > { %7557 = vmatprep.subr.bf16.mxu1 %v12556_v54 }
 0x71b   : > { %7422 = vmatpush1.bf16.msra.mxu0 %v12432_v62  ;;  %v12478_v62 = vld [vmem:[%s17346_s3 + $0x2f0] sm:$0xff]  }
 0x71c   : > { %7437 = vmatprep.subr.bf16.mxu0 %v12556_v54 }
 0x71d   : > { %7558 = vmatpush2.bf16.msra.mxu1 %v12433_v17  ;;  %v12479_v17 = vld [vmem:[%s17346_s3 + $0x330] sm:$0xff]  }
 0x71e   : > { %7767 = vmatprep.subr.bf16.mxu1 %v12556_v54 }
 0x71f   : > { %7438 = vmatpush2.bf16.msra.mxu0 %v12434_v26  ;;  %v12480_v26 = vld [vmem:[%s17346_s3 + $0x2e8] sm:$0xff]  }
 0x720   : > { %7560 = vmatmul.mubr.bf16.vlgmr.msra.gmra.mxu1 %v7467_v13  ;;  %7647 = vmatprep.subr.bf16.mxu0 %v12556_v54  ;;  %v12482_v13 = vld [vmem:[%s17346_s3 + $0x2e0] sm:$0xff]  }
 0x721   : > { %7768 = vmatpush1.bf16.msra.mxu1 %v12435_v41  ;;  %9903 = vmatprep.mubr.msk.bf16.mxu1 %vm6946_vm8, %v7708_v28  ;;  %v12481_v41 = vld [vmem:[%s17346_s3 + $0x328] sm:$0xff]   ;;  %v12483_v28 = vld [vmem:[%s17346_s3 + $0x320] sm:$0xff]  }
 0x722   : > { %7440 = vmatmul.mubr.bf16.vlgmr.msra.gmra.mxu0 %v7347_v60  ;;  %7769 = vmatprep.subr.bf16.mxu1 %v12556_v54  ;;  %v12485_v60 = vld [vmem:[%s17346_s3 + $0x318] sm:$0xff]  }
 0x723   : > { %7648 = vmatpush1.bf16.msra.mxu0 %v12436_v3  ;;  %9875 = vmatprep.mubr.msk.bf16.mxu0 %vm6946_vm8, %v7588_v18  ;;  %v12484_v3 = vld [vmem:[%s17346_s3 + $0x2d8] sm:$0xff]   ;;  %v12486_v18 = vld [vmem:[%s17346_s3 + $0x2d0] sm:$0xff]  }
 0x724   : > { %7649 = vmatprep.subr.bf16.mxu0 %v12556_v54 }
 0x725   : > { %7770 = vmatpush1.bf16.msra.mxu1 %v12437_v20  ;;  %v12487_v20 = vld [vmem:[%s17346_s3 + $0x358] sm:$0xff]  }
 0x726   : > { %7771 = vmatprep.subr.bf16.mxu1 %v12556_v54 }
 0x727   : > { %7650 = vmatpush1.bf16.msra.mxu0 %v12438_v45  ;;  %v12488_v45 = vld [vmem:[%s17346_s3 + $0x310] sm:$0xff]  }
 0x728   : > { %7651 = vmatprep.subr.bf16.mxu0 %v12556_v54 }
 0x729   : > { %7772 = vmatpush1.bf16.msra.mxu1 %v12439_v25  ;;  %v12489_v25 = vld [vmem:[%s17346_s3 + $0x3e0] sm:$0xff]  }
 0x72a   : > { %7773 = vmatprep.subr.bf16.mxu1 %v12556_v54 }
 0x72b   : > { %7652 = vmatpush1.bf16.msra.mxu0 %v12440_v37  ;;  %v8187_v37 = vrot.slane %v16713_v22, 5 }
 0x72c   : > { %7653 = vmatprep.subr.bf16.mxu0 %v12556_v54 }
 0x72d   : > { %7774 = vmatpush1.bf16.msra.mxu1 %v12441_v16  ;;  %v8428_v16 = vrot.slane %v16706_v53, 6 }
 0x72e   : > { %7775 = vmatprep.subr.bf16.mxu1 %v12556_v54 }
 0x72f   : > { %7654 = vmatpush1.bf16.msra.mxu0 %v12442_v55  ;;  %v12490_v55 = vld [vmem:[%s17346_s3 + $0x398] sm:$0xff]  }
 0x730   : > { %7655 = vmatprep.subr.bf16.mxu0 %v12556_v54 }
 0x731   : > { %7776 = vmatpush1.bf16.msra.mxu1 %v12443_v4  ;;  %v8067_v4 = vrot.slane %v16696_v33, 5 }
 0x732   : > { %7777 = vmatprep.subr.bf16.mxu1 %v12556_v54 }
 0x733   : > { %7656 = vmatpush1.bf16.msra.mxu0 %v12444_v7  ;;  %v8308_v7 = vrot.slane %v16698_v5, 6 }
 0x734   : > { %7657 = vmatprep.subr.bf16.mxu0 %v12556_v54 }
 0x735   : > { %7778 = vmatpush1.bf16.msra.mxu1 %v12445_v0  ;;  %v12491_v0 = vld [vmem:[%s17346_s3 + $0x3d8] sm:$0xff]  }
 0x736   : > { %7779 = vmatprep.subr.bf16.mxu1 %v12556_v54 }
 0x737   : > { %7658 = vmatpush1.bf16.msra.mxu0 %v12446_v12  ;;  %v12492_v12 = vld [vmem:[%s17346_s3 + $0x390] sm:$0xff]  }
 0x738   : > { %7659 = vmatprep.subr.bf16.mxu0 %v12556_v54 }
 0x739   : > { %7780 = vmatpush1.bf16.msra.mxu1 %v12447_v40  ;;  %v12493_v40 = vld [vmem:[%s17346_s3 + $0x3d0] sm:$0xff]  }
 0x73a   : > { %7781 = vmatprep.subr.bf16.mxu1 %v12556_v54 }
 0x73b   : > { %7660 = vmatpush1.bf16.msra.mxu0 %v12448_v11  ;;  %v12494_v11 = vld [vmem:[%s17346_s3 + $0x388] sm:$0xff]  }
 0x73c   : > { %7661 = vmatprep.subr.bf16.mxu0 %v12556_v54 }
 0x73d   : > { %7782 = vmatpush1.bf16.msra.mxu1 %v12449_v46  ;;  %v12495_v46 = vld [vmem:[%s17346_s3 + $0x3c8] sm:$0xff]  }
 0x73e   : > { %7797 = vmatprep.subr.bf16.mxu1 %v12556_v54 }
 0x73f   : > { %7662 = vmatpush1.bf16.msra.mxu0 %v12450_v23  ;;  %v12496_v23 = vld [vmem:[%s17346_s3 + $0x380] sm:$0xff]  }
 0x740   : > { %7677 = vmatprep.subr.bf16.mxu0 %v12556_v54 }
 0x741   : > { %7798 = vmatpush2.bf16.msra.mxu1 %v12451_v56 }
 0x742   : > { %8007 = vmatprep.subr.bf16.mxu1 %v12556_v54 }
 0x743   : > { %7678 = vmatpush2.bf16.msra.mxu0 %v12452_v27  ;;  %v12497_v27 = vld [vmem:[%s17346_s3 + $0x3c0] sm:$0xff]  }
 0x744   : > { %7800 = vmatmul.mubr.bf16.vlgmr.msra.gmra.mxu1 %v7707_v38  ;;  %7887 = vmatprep.subr.bf16.mxu0 %v12556_v54 }
 0x745   : > { %8008 = vmatpush1.bf16.msra.mxu1 %v12453_v34  ;;  %9959 = vmatprep.mubr.msk.bf16.mxu1 %vm6946_vm8, %v7948_v49 }
 0x746   : > { %7680 = vmatmul.mubr.bf16.vlgmr.msra.gmra.mxu0 %v7587_v14  ;;  %8009 = vmatprep.subr.bf16.mxu1 %v12556_v54 }
 0x747   : > { %7888 = vmatpush1.bf16.msra.mxu0 %v12454_v39  ;;  %9931 = vmatprep.mubr.msk.bf16.mxu0 %vm6946_vm8, %v7828_v57  ;;  %v12498_v39 = vld [vmem:[%s17346_s3 + $0x378] sm:$0xff]  }
 0x748   : > { %7889 = vmatprep.subr.bf16.mxu0 %v12556_v54 }
 0x749   : > { %8010 = vmatpush1.bf16.msra.mxu1 %v12455_v19  ;;  %v12499_v19 = vld [vmem:[%s17346_s3 + $0x3b8] sm:$0xff]  }
 0x74a   : > { %8011 = vmatprep.subr.bf16.mxu1 %v12556_v54 }
 0x74b   : > { %7890 = vmatpush1.bf16.msra.mxu0 %v12456_v15 }
 0x74c   : > { %7891 = vmatprep.subr.bf16.mxu0 %v12556_v54 }
 0x74d   : > { %8012 = vmatpush1.bf16.msra.mxu1 %v12457_v31 }
 0x74e   : > { %8013 = vmatprep.subr.bf16.mxu1 %v12556_v54 }
 0x74f   : > { %7892 = vmatpush1.bf16.msra.mxu0 %v12458_v51  ;;  %v12500_v51 = vld [vmem:[%s17346_s3 + $0x370] sm:$0xff]  }
 0x750   : > { %7893 = vmatprep.subr.bf16.mxu0 %v12556_v54 }
 0x751   : > { %8014 = vmatpush1.bf16.msra.mxu1 %v12459_v10 }
 0x752   : > { %8015 = vmatprep.subr.bf16.mxu1 %v12556_v54 }
 0x753   : > { %7894 = vmatpush1.bf16.msra.mxu0 %v12460_v63  ;;  %v12501_v63 = vld [vmem:[%s17346_s3 + $0x3b0] sm:$0xff]  }
 0x754   : > { %7895 = vmatprep.subr.bf16.mxu0 %v12556_v54 }
 0x755   : > { %8016 = vmatpush1.bf16.msra.mxu1 %v12461_v47  ;;  %v12502_v47 = vld [vmem:[%s17346_s3 + $0x368] sm:$0xff]  }
 0x756   : > { %8017 = vmatprep.subr.bf16.mxu1 %v12556_v54 }
 0x757   : > { %7896 = vmatpush1.bf16.msra.mxu0 %v12462_v42  ;;  %v12503_v42 = vld [vmem:[%s17346_s3 + $0x3a8] sm:$0xff]  }
 0x758   : > { %7897 = vmatprep.subr.bf16.mxu0 %v12556_v54 }
 0x759   : > { %8018 = vmatpush1.bf16.msra.mxu1 %v12463_v43  ;;  %v12504_v43 = vld [vmem:[%s17346_s3 + $0x360] sm:$0xff]  }
 0x75a   : > { %8019 = vmatprep.subr.bf16.mxu1 %v12556_v54 }
 0x75b   : > { %7898 = vmatpush1.bf16.msra.mxu0 %v12464_v6  ;;  %v12505_v6 = vld [vmem:[%s17346_s3 + $0x3e8] sm:$0xff]  }
 0x75c   : > { %7899 = vmatprep.subr.bf16.mxu0 %v12556_v54 }
 0x75d   : > { %8020 = vmatpush1.bf16.msra.mxu1 %v12465_v32  ;;  %v12506_v32 = vld [vmem:[%s17346_s3 + $0x3a0] sm:$0xff]  }
 0x75e   : > { %8021 = vmatprep.subr.bf16.mxu1 %v12556_v54 }
 0x75f   : > { %7900 = vmatpush1.bf16.msra.mxu0 %v12466_v59  ;;  %v12507_v59 = vld [vmem:[%s17346_s3 + $0x470] sm:$0xff]  }
 0x760   : > { %7901 = vmatprep.subr.bf16.mxu0 %v12556_v54 }
 0x761   : > { %8022 = vmatpush1.bf16.msra.mxu1 %v12467_v29  ;;  %v8427_v29 = vrot.slane %v16713_v22, 6 }
 0x762   : > { %8037 = vmatprep.subr.bf16.mxu1 %v12556_v54 }
 0x763   : > { %7902 = vmatpush1.bf16.msra.mxu0 %v12468_v21  ;;  %v8668_v21 = vrot.slane %v16706_v53, 7  ;;  %v12510_v53 = vld [vmem:[%s17346_s3 + $0x420] sm:$0xff]  }
 0x764   : > { %7917 = vmatprep.subr.bf16.mxu0 %v12556_v54 }
 0x765   : > { %8038 = vmatpush2.bf16.msra.mxu1 %v12469_v50  ;;  %v12508_v50 = vld [vmem:[%s17346_s3 + $0x428] sm:$0xff]  }
 0x766   : > { %8247 = vmatprep.subr.bf16.mxu1 %v12556_v54 }
 0x767   : > { %7918 = vmatpush2.bf16.msra.mxu0 %v12470_v1  ;;  %v8307_v1 = vrot.slane %v16696_v33, 6 }
 0x768   : > { %8040 = vmatmul.mubr.bf16.vlgmr.msra.gmra.mxu1 %v7947_v58  ;;  %8127 = vmatprep.subr.bf16.mxu0 %v12556_v54  ;;  %v12509_v58 = vld [vmem:[%s17346_s3 + $0x468] sm:$0xff]  }
 0x769   : > { %8248 = vmatpush1.bf16.msra.mxu1 %v12471_v52  ;;  %10015 = vmatprep.mubr.msk.bf16.mxu1 %vm6946_vm8, %v8188_v2  ;;  %v8548_v52 = vrot.slane %v16698_v5, 7  ;;  %v12511_v5 = vld [vmem:[%s17346_s3 + $0x460] sm:$0xff]   ;;  %v12512_v2 = vld [vmem:[%s17346_s3 + $0x418] sm:$0xff]  }
 0x76a   : > { %7920 = vmatmul.mubr.bf16.vlgmr.msra.gmra.mxu0 %v7827_v30  ;;  %8249 = vmatprep.subr.bf16.mxu1 %v12556_v54  ;;  %v12514_v30 = vld [vmem:[%s17346_s3 + $0x410] sm:$0xff]  }
 0x76b   : > { %8128 = vmatpush1.bf16.msra.mxu0 %v12472_v9  ;;  %9987 = vmatprep.mubr.msk.bf16.mxu0 %vm6946_vm8, %v8068_v48  ;;  %v12513_v9 = vld [vmem:[%s17346_s3 + $0x458] sm:$0xff]  }
 0x76c   : > { %8129 = vmatprep.subr.bf16.mxu0 %v12556_v54 }
 0x76d   : > { %8250 = vmatpush1.bf16.msra.mxu1 %v12473_v36  ;;  %v12515_v36 = vld [vmem:[%s17346_s3 + $0x450] sm:$0xff]  }
 0x76e   : > { %8251 = vmatprep.subr.bf16.mxu1 %v12556_v54 }
 0x76f   : > { %8130 = vmatpush1.bf16.msra.mxu0 %v12474_v24 }
 0x770   : > { %8131 = vmatprep.subr.bf16.mxu0 %v12556_v54 }
 0x771   : > { %8252 = vmatpush1.bf16.msra.mxu1 %v12475_v35 }
 0x772   : > { %8253 = vmatprep.subr.bf16.mxu1 %v12556_v54 }
 0x773   : > { %8132 = vmatpush1.bf16.msra.mxu0 %v12476_v61 }
 0x774   : > { %8133 = vmatprep.subr.bf16.mxu0 %v12556_v54 }
 0x775   : > { %8254 = vmatpush1.bf16.msra.mxu1 %v12477_v44  ;;  %v12516_v44 = vld [vmem:[%s17346_s3 + $0x408] sm:$0xff]  }
 0x776   : > { %8255 = vmatprep.subr.bf16.mxu1 %v12556_v54 }
 0x777   : > { %8134 = vmatpush1.bf16.msra.mxu0 %v12478_v62 }
 0x778   : > { %8135 = vmatprep.subr.bf16.mxu0 %v12556_v54 }
 0x779   : > { %8256 = vmatpush1.bf16.msra.mxu1 %v12479_v17 }
 0x77a   : > { %8257 = vmatprep.subr.bf16.mxu1 %v12556_v54 }
 0x77b   : > { %8136 = vmatpush1.bf16.msra.mxu0 %v12480_v26  ;;  %v12517_v26 = vld [vmem:[%s17346_s3 + $0x448] sm:$0xff]  }
 0x77c   : > { %8137 = vmatprep.subr.bf16.mxu0 %v12556_v54 }
 0x77d   : > { %8258 = vmatpush1.bf16.msra.mxu1 %v12481_v41 }
 0x77e   : > { %8259 = vmatprep.subr.bf16.mxu1 %v12556_v54 }
 0x77f   : > { %8138 = vmatpush1.bf16.msra.mxu0 %v12482_v13 }
 0x780   : > { %8139 = vmatprep.subr.bf16.mxu0 %v12556_v54 }
 0x781   : > { %8260 = vmatpush1.bf16.msra.mxu1 %v12483_v28 }
 0x782   : > { %8261 = vmatprep.subr.bf16.mxu1 %v12556_v54 }
 0x783   : > { %8140 = vmatpush1.bf16.msra.mxu0 %v12484_v3  ;;  %v12518_v3 = vld [vmem:[%s17346_s3 + $0x400] sm:$0xff]  }
 0x784   : > { %8141 = vmatprep.subr.bf16.mxu0 %v12556_v54 }
 0x785   : > { %8262 = vmatpush1.bf16.msra.mxu1 %v12485_v60 }
 0x786   : > { %8277 = vmatprep.subr.bf16.mxu1 %v12556_v54 }
 0x787   : > { %8142 = vmatpush1.bf16.msra.mxu0 %v12486_v18  ;;  %v12519_v18 = vld [vmem:[%s17346_s3 + $0x440] sm:$0xff]  }
 0x788   : > { %8157 = vmatprep.subr.bf16.mxu0 %v12556_v54 }
 0x789   : > { %8278 = vmatpush2.bf16.msra.mxu1 %v12487_v20  ;;  %v12520_v20 = vld [vmem:[%s17346_s3 + $0x3f8] sm:$0xff]  }
 0x78a   : > { %8487 = vmatprep.subr.bf16.mxu1 %v12556_v54 }
 0x78b   : > { %8158 = vmatpush2.bf16.msra.mxu0 %v12488_v45  ;;  %v12521_v45 = vld [vmem:[%s17346_s3 + $0x438] sm:$0xff]  }
 0x78c   : > { %8280 = vmatmul.mubr.bf16.vlgmr.msra.gmra.mxu1 %v8187_v37  ;;  %8367 = vmatprep.subr.bf16.mxu0 %v12556_v54  ;;  %v12523_v37 = vld [vmem:[%s17346_s3 + $0x478] sm:$0xff]  }
 0x78d   : > { %8488 = vmatpush1.bf16.msra.mxu1 %v12489_v25  ;;  %10071 = vmatprep.mubr.msk.bf16.mxu1 %vm6946_vm8, %v8428_v16  ;;  %v12522_v25 = vld [vmem:[%s17346_s3 + $0x3f0] sm:$0xff]  }
 0x78e   : > { %8160 = vmatmul.mubr.bf16.vlgmr.msra.gmra.mxu0 %v8067_v4  ;;  %8489 = vmatprep.subr.bf16.mxu1 %v12556_v54  ;;  %v12524_v16 = vld [vmem:[%s17346_s3 + $0x430] sm:$0xff]   ;;  %v8547_v4 = vrot.slane %v16696_v33, 7  ;;  %v12525_v33 = vld [vmem:[%s17347_s4 + $0x38] sm:$0xff]  }
 0x78f   : > { %8368 = vmatpush1.bf16.msra.mxu0 %v12490_v55  ;;  %10043 = vmatprep.mubr.msk.bf16.mxu0 %vm6946_vm8, %v8308_v7  ;;  %v8667_v55 = vrot.slane %v16713_v22, 7 }
 0x790   : > { %8369 = vmatprep.subr.bf16.mxu0 %v12556_v54 }
 0x791   : > { %8490 = vmatpush1.bf16.msra.mxu1 %v12491_v0 }
 0x792   : > { %8491 = vmatprep.subr.bf16.mxu1 %v12556_v54 }
 0x793   : > { %8370 = vmatpush1.bf16.msra.mxu0 %v12492_v12 }
 0x794   : > { %8371 = vmatprep.subr.bf16.mxu0 %v12556_v54 }
 0x795   : > { %8492 = vmatpush1.bf16.msra.mxu1 %v12493_v40 }
 0x796   : > { %8493 = vmatprep.subr.bf16.mxu1 %v12556_v54 }
 0x797   : > { %8372 = vmatpush1.bf16.msra.mxu0 %v12494_v11 }
 0x798   : > { %v7080_v56 = vpop.f32.mrf.mxu1  ;;  %8373 = vmatprep.subr.bf16.mxu0 %v12556_v54 }
 0x799   : > { %8494 = vmatpush1.bf16.msra.mxu1 %v12495_v46 }
 0x79a   : > { %v6984_v34 = vpop.f32.mrf.mxu0  ;;  %v7082_v38 = vpop.f32.mrf.mxu1  ;;  %8495 = vmatprep.subr.bf16.mxu1 %v12556_v54 }
 0x79b   : > { %v17140_v49 = vadd.f32 %v7080_v56, %v6984_v34  ;;  %8374 = vmatpush1.bf16.msra.mxu0 %v12496_v23  ;;  %v12527_v34 = vld [vmem:[%s17347_s4 + $0x28] sm:$0xff]   ;;  %v12528_v38 = vld [vmem:[%s17347_s4 + $0x20] sm:$0xff]  }
 0x79c   : > { %v6986_v14 = vpop.f32.mrf.mxu0  ;;  %v7083_v57 = vpop.f32.mrf.mxu1  ;;  %8375 = vmatprep.subr.bf16.mxu0 %v12556_v54 }
 0x79d   : > { %8496 = vmatpush1.bf16.msra.mxu1 %v12497_v27  ;;  %v12526_v27 = vld [vmem:[%s17347_s4 + $0x30] sm:$0xff]   ;;  %v12529_v57 = vld [vmem:[%s17347_s4 + $0x18] sm:$0xff]  }
 0x79e   : > { %v6987_v15 = vpop.f32.mrf.mxu0  ;;  %v7084_v31 = vpop.f32.mrf.mxu1  ;;  %8497 = vmatprep.subr.bf16.mxu1 %v12556_v54 }
 0x79f   : > { %8376 = vmatpush1.bf16.msra.mxu0 %v12498_v39 }
 0x7a0   : > { %v6988_v10 = vpop.f32.mrf.mxu0  ;;  %8377 = vmatprep.subr.bf16.mxu0 %v12556_v54 }
 0x7a1   : > { %8498 = vmatpush1.bf16.msra.mxu1 %v12499_v19 }
 0x7a2   : > { %8499 = vmatprep.subr.bf16.mxu1 %v12556_v54 }
 0x7a3   : > { %8378 = vmatpush1.bf16.msra.mxu0 %v12500_v51 }
 0x7a4   : > { %8379 = vmatprep.subr.bf16.mxu0 %v12556_v54 }
 0x7a5   : > { %8500 = vmatpush1.bf16.msra.mxu1 %v12501_v63 }
 0x7a6   : > { %8501 = vmatprep.subr.bf16.mxu1 %v12556_v54 }
 0x7a7   : > { %8380 = vmatpush1.bf16.msra.mxu0 %v12502_v47 }
 0x7a8   : > { %8381 = vmatprep.subr.bf16.mxu0 %v12556_v54 }
 0x7a9   : > { %8502 = vmatpush1.bf16.msra.mxu1 %v12503_v42  ;;  %v12530_v42 = vld [vmem:[%s17347_s4 + $0x10] sm:$0xff]  }
 0x7aa   : > { %8517 = vmatprep.subr.bf16.mxu1 %v12556_v54 }
 0x7ab   : > { %8382 = vmatpush1.bf16.msra.mxu0 %v12504_v43  ;;  %v12531_v43 = vld [vmem:[%s17347_s4 + $0x8] sm:$0xff]  }
 0x7ac   : > { %8397 = vmatprep.subr.bf16.mxu0 %v12556_v54 }
 0x7ad   : > { %8518 = vmatpush2.bf16.msra.mxu1 %v12505_v6  ;;  %v12533_v6 = vld [vmem:[%s17348_s5 + $0x38] sm:$0xff]  }
 0x7ae   : > { %8727 = vmatprep.subr.bf16.mxu1 %v12556_v54 }
 0x7af   : > { %8398 = vmatpush2.bf16.msra.mxu0 %v12506_v32  ;;  %v12534_v32 = vld [vmem:[%s17348_s5 + $0x30] sm:$0xff]  }
 0x7b0   : > { %8520 = vmatmul.mubr.bf16.vlgmr.msra.gmra.mxu1 %v8427_v29  ;;  %8607 = vmatprep.subr.bf16.mxu0 %v12556_v54  ;;  %v12535_v29 = vld [vmem:[%s17348_s5 + $0x28] sm:$0xff]  }
 0x7b1   : > { %8728 = vmatpush1.bf16.msra.mxu1 %v12507_v59  ;;  %10127 = vmatprep.mubr.msk.bf16.mxu1 %vm6946_vm8, %v8668_v21  ;;  %v12532_v59 = vld [vmem:[%s17347_s4] sm:$0xff]  }
 0x7b2   : > { %8400 = vmatmul.mubr.bf16.vlgmr.msra.gmra.mxu0 %v8307_v1  ;;  %8729 = vmatprep.subr.bf16.mxu1 %v12556_v54 }
 0x7b3   : > { %8608 = vmatpush1.bf16.msra.mxu0 %v12508_v50  ;;  %10099 = vmatprep.mubr.msk.bf16.mxu0 %vm6946_vm8, %v8548_v52 }
 0x7b4   : > { %8609 = vmatprep.subr.bf16.mxu0 %v12556_v54 }
 0x7b5   : > { %8730 = vmatpush1.bf16.msra.mxu1 %v12509_v58  ;;  %v12536_v58 = vld [vmem:[%s17348_s5 + $0x20] sm:$0xff]  }
 0x7b6   : > { %8731 = vmatprep.subr.bf16.mxu1 %v12556_v54 }
 0x7b7   : > { %8610 = vmatpush1.bf16.msra.mxu0 %v12510_v53 }
 0x7b8   : > { %8611 = vmatprep.subr.bf16.mxu0 %v12556_v54 }
 0x7b9   : > { %8732 = vmatpush1.bf16.msra.mxu1 %v12511_v5 }
 0x7ba   : > { %8733 = vmatprep.subr.bf16.mxu1 %v12556_v54 }
 0x7bb   : > { %8612 = vmatpush1.bf16.msra.mxu0 %v12512_v2 }
 0x7bc   : > { %v7321_v48 = vpop.f32.mrf.mxu1  ;;  %8613 = vmatprep.subr.bf16.mxu0 %v12556_v54 }
 0x7bd   : > { %8734 = vmatpush1.bf16.msra.mxu1 %v12513_v9 }
 0x7be   : > { %v7201_v24 = vpop.f32.mrf.mxu0  ;;  %v7323_v35 = vpop.f32.mrf.mxu1  ;;  %8735 = vmatprep.subr.bf16.mxu1 %v12556_v54 }
 0x7bf   : > { %v7207_v61 = vadd.f32 %v7201_v24, %v17140_v49  ;;  %8614 = vmatpush1.bf16.msra.mxu0 %v12514_v30  ;;  %v12538_v24 = vld [vmem:[%s17348_s5 + $0x10] sm:$0xff]  }
 0x7c0   : > { %v7203_v62 = vpop.f32.mrf.mxu0  ;;  %v7324_v17 = vpop.f32.mrf.mxu1  ;;  %8615 = vmatprep.subr.bf16.mxu0 %v12556_v54 }
 0x7c1   : > { %8736 = vmatpush1.bf16.msra.mxu1 %v12515_v36  ;;  %v7327_v41 = vadd.f32 %v7321_v48, %v7207_v61  ;;  %v12537_v48 = vld [vmem:[%s17348_s5 + $0x18] sm:$0xff]  }
 0x7c2   : > { %v7204_v13 = vpop.f32.mrf.mxu0  ;;  %v7325_v28 = vpop.f32.mrf.mxu1  ;;  %8737 = vmatprep.subr.bf16.mxu1 %v12556_v54 }
 0x7c3   : > { %8616 = vmatpush1.bf16.msra.mxu0 %v12516_v44 }
 0x7c4   : > { %v7205_v60 = vpop.f32.mrf.mxu0  ;;  %8617 = vmatprep.subr.bf16.mxu0 %v12556_v54 }
 0x7c5   : > { %8738 = vmatpush1.bf16.msra.mxu1 %v12517_v26 }
 0x7c6   : > { %8739 = vmatprep.subr.bf16.mxu1 %v12556_v54 }
 0x7c7   : > { %8618 = vmatpush1.bf16.msra.mxu0 %v12518_v3 }
 0x7c8   : > { %8619 = vmatprep.subr.bf16.mxu0 %v12556_v54 }
 0x7c9   : > { %8740 = vmatpush1.bf16.msra.mxu1 %v12519_v18 }
 0x7ca   : > { %8741 = vmatprep.subr.bf16.mxu1 %v12556_v54 }
 0x7cb   : > { %8620 = vmatpush1.bf16.msra.mxu0 %v12520_v20 }
 0x7cc   : > { %8621 = vmatprep.subr.bf16.mxu0 %v12556_v54 }
 0x7cd   : > { %8742 = vmatpush1.bf16.msra.mxu1 %v12521_v45 }
 0x7ce   : > { %8757 = vmatprep.subr.bf16.mxu1 %v12556_v54 }
 0x7cf   : > { %8622 = vmatpush1.bf16.msra.mxu0 %v12522_v25 }
 0x7d0   : > { %8637 = vmatprep.subr.bf16.mxu0 %v12556_v54 }
 0x7d1   : > { %8758 = vmatpush2.bf16.msra.mxu1 %v12523_v37 }
 0x7d2   : > { %12089 = vmatprep.subr.bf16.mxu1 %v17482_v8 }
 0x7d3   : > { %8638 = vmatpush2.bf16.msra.mxu0 %v12524_v16 }
 0x7d4   : > { %8760 = vmatmul.mubr.bf16.vlgmr.msra.gmra.mxu1 %v8667_v55  ;;  %12069 = vmatprep.subr.bf16.mxu0 %v17482_v8 }
 0x7d5   : > { %12105 = vmatprep.mubr.msk.bf16.mxu1 %vm12555_vm0, %v17482_v8  ;;  %12090 = vmatpush3.bf16.msra.mxu1 %v12533_v6 }
 0x7d6   : > { %8640 = vmatmul.mubr.bf16.vlgmr.msra.gmra.mxu0 %v8547_v4  ;;  %12091 = vmatprep.subr.bf16.mxu1 %v17482_v8 }
 0x7d7   : > { %12085 = vmatprep.mubr.msk.bf16.mxu0 %vm12555_vm0, %v17482_v8  ;;  %12070 = vmatpush3.bf16.msra.mxu0 %v12525_v33 }
 0x7d8   : > { %12071 = vmatprep.subr.bf16.mxu0 %v17482_v8 }
 0x7d9   : > { %12092 = vmatpush3.bf16.msra.mxu1 %v12534_v32 }
 0x7da   : > { %12093 = vmatprep.subr.bf16.mxu1 %v17482_v8 }
 0x7db   : > { %12072 = vmatpush3.bf16.msra.mxu0 %v12526_v27 }
 0x7dc   : > { %12073 = vmatprep.subr.bf16.mxu0 %v17482_v8 }
 0x7dd   : > { %12094 = vmatpush3.bf16.msra.mxu1 %v12535_v29 }
 0x7de   : > { %12095 = vmatprep.subr.bf16.mxu1 %v17482_v8 }
 0x7df   : > { %12074 = vmatpush3.bf16.msra.mxu0 %v12527_v34 }
 0x7e0   : > { %v7561_v7 = vpop.f32.mrf.mxu1  ;;  %12075 = vmatprep.subr.bf16.mxu0 %v17482_v8 }
 0x7e1   : > { %12096 = vmatpush3.bf16.msra.mxu1 %v12536_v58 }
 0x7e2   : > { %v7441_v54 = vpop.f32.mrf.mxu0  ;;  %v7563_v0 = vpop.f32.mrf.mxu1  ;;  %12097 = vmatprep.subr.bf16.mxu1 %v17482_v8 }
 0x7e3   : > { %v7447_v12 = vadd.f32 %v7441_v54, %v7327_v41  ;;  %12076 = vmatpush3.bf16.msra.mxu0 %v12528_v38 }
 0x7e4   : > { %v7443_v22 = vpop.f32.mrf.mxu0  ;;  %v7564_v40 = vpop.f32.mrf.mxu1  ;;  %12077 = vmatprep.subr.bf16.mxu0 %v17482_v8 }
 0x7e5   : > { %v7567_v11 = vadd.f32 %v7561_v7, %v7447_v12  ;;  %12098 = vmatpush3.bf16.msra.mxu1 %v12537_v48  ;;  %v384_v40 = vld [vmem:[%s17349_s6 + $0x2] sm:$0x1] }
 0x7e6   : > { %v7444_v46 = vpop.f32.mrf.mxu0  ;;  %v7565_v23 = vpop.f32.mrf.mxu1  ;;  %12099 = vmatprep.subr.bf16.mxu1 %v17482_v8 }
 0x7e7   : > { %12078 = vmatpush3.bf16.msra.mxu0 %v12529_v57  ;;  %v385_v57 = vld [vmem:[%s17349_s6 + $0x3] sm:$0x1] }
 0x7e8   : > { %v7445_v56 = vpop.f32.mrf.mxu0  ;;  %12079 = vmatprep.subr.bf16.mxu0 %v17482_v8 }
 0x7e9   : > { %12100 = vmatpush3.bf16.msra.mxu1 %v12538_v24 }
 0x7ea   : > { %12101 = vmatprep.subr.bf16.mxu1 %v17482_v8 }
 0x7eb   : > { %12080 = vmatpush3.bf16.msra.mxu0 %v12530_v42  ;;  %v386_v42 = vld [vmem:[%s17349_s6 + $0x4] sm:$0x1] }
 0x7ec   : > { %12081 = vmatprep.subr.bf16.mxu0 %v17482_v8 }
 0x7ef   : > { %12082 = vmatpush3.bf16.msra.mxu0 %v12531_v43 }
 0x7f0   : > { %12083 = vmatprep.subr.bf16.mxu0 %v17482_v8 }
 0x7f3   : > { %12084 = vmatpush3.bf16.msra.mxu0 %v12532_v59 }
 0x804   : > { %v7801_v49 = vpop.f32.mrf.mxu1 }
 0x806   : > { %v7681_v39 = vpop.f32.mrf.mxu0  ;;  %v7803_v14 = vpop.f32.mrf.mxu1 }
 0x807   : > { %v7687_v19 = vadd.f32 %v7681_v39, %v7567_v11  ;;  %v12539_v39 = vld [vmem:[%s17348_s5 + $0x8] sm:$0xff]   ;;  %v12540_v14 = vld [vmem:[%s17348_s5] sm:$0xff]  }
 0x808   : > { %v7683_v15 = vpop.f32.mrf.mxu0  ;;  %v7804_v31 = vpop.f32.mrf.mxu1  ;;  %12102 = vmatpush3.bf16.msra.mxu1 %v12539_v39 }
 0x809   : > { %v7807_v51 = vadd.f32 %v7801_v49, %v7687_v19  ;;  %12103 = vmatprep.subr.bf16.mxu1 %v17482_v8 }
 0x80a   : > { %v7684_v10 = vpop.f32.mrf.mxu0  ;;  %v7805_v63 = vpop.f32.mrf.mxu1 }
 0x80c   : > { %v7685_v47 = vpop.f32.mrf.mxu0  ;;  %12104 = vmatpush3.bf16.msra.mxu1 %v12540_v14 }
 0x828   : > { %v8041_v21 = vpop.f32.mrf.mxu1 }
 0x82a   : > { %v7921_v50 = vpop.f32.mrf.mxu0  ;;  %v8043_v1 = vpop.f32.mrf.mxu1 }
 0x82b   : > { %v7927_v52 = vadd.f32 %v7921_v50, %v7807_v51 }
 0x82c   : > { %v7923_v53 = vpop.f32.mrf.mxu0  ;;  %v8044_v5 = vpop.f32.mrf.mxu1 }
 0x82d   : > { %v8047_v2 = vadd.f32 %v8041_v21, %v7927_v52  ;;  %v8987_v52 = vlaneseq }
 0x82e   : > { %v7924_v9 = vpop.f32.mrf.mxu0  ;;  %v8045_v30 = vpop.f32.mrf.mxu1 }
 0x82f   : > { %v8988_v58 = vshrl.u32 %v8987_v52, 7 }
 0x830   : > { %v7925_v36 = vpop.f32.mrf.mxu0 }
 0x831   : > { %v8989_v53 = vsub.s32 0, %v8988_v58 }
 0x84c   : > { %v8281_v35 = vpop.f32.mrf.mxu1 }
 0x84e   : > { %v8161_v61 = vpop.f32.mrf.mxu0  ;;  %v8283_v44 = vpop.f32.mrf.mxu1 }
 0x84f   : > { %v8167_v62 = vadd.f32 %v8161_v61, %v8047_v2 }
 0x850   : > { %v8163_v17 = vpop.f32.mrf.mxu0  ;;  %v8284_v26 = vpop.f32.mrf.mxu1 }
 0x851   : > { %v8287_v41 = vadd.f32 %v8281_v35, %v8167_v62 }
 0x852   : > { %v8164_v13 = vpop.f32.mrf.mxu0  ;;  %v8285_v28 = vpop.f32.mrf.mxu1 }
 0x854   : > { %v8165_v3 = vpop.f32.mrf.mxu0 }
 0x870   : > { %v8521_v60 = vpop.f32.mrf.mxu1 }
 0x872   : > { %v8401_v18 = vpop.f32.mrf.mxu0  ;;  %v8523_v20 = vpop.f32.mrf.mxu1 }
 0x873   : > { %v8407_v4 = vadd.f32 %v8401_v18, %v8287_v41 }
 0x874   : > { %v8403_v45 = vpop.f32.mrf.mxu0  ;;  %v8524_v25 = vpop.f32.mrf.mxu1 }
 0x875   : > { %v8527_v54 = vadd.f32 %v8521_v60, %v8407_v4 }
 0x876   : > { %v8404_v37 = vpop.f32.mrf.mxu0  ;;  %v8525_v16 = vpop.f32.mrf.mxu1 }
 0x878   : > { %v8405_v55 = vpop.f32.mrf.mxu0 }
 0x894   : > { %v8761_v7 = vpop.f32.mrf.mxu1 }
 0x896   : > { %v8641_v0 = vpop.f32.mrf.mxu0  ;;  %v8763_v12 = vpop.f32.mrf.mxu1 }
 0x897   : > { %v8647_v22 = vadd.f32 %v8641_v0, %v8527_v54 }
 0x898   : > { %v8643_v11 = vpop.f32.mrf.mxu0  ;;  %v8764_v46 = vpop.f32.mrf.mxu1 }
 0x899   : > { %v8767_v23 = vadd.f32 %v8761_v7, %v8647_v22 }
 0x89a   : > { %v8644_v56 = vpop.f32.mrf.mxu0  ;;  %v8765_v33 = vpop.f32.mrf.mxu1 }
 0x89b   : > { %v8768_v27 = vadd.f32 %v8767_v23, %v384_v40 }
 0x89c   : > { %v8645_v34 = vpop.f32.mrf.mxu0 }
 0x89d   : > { %v8769_v38 = vmax.f32 %v8768_v27, 0.0 }
 0x89f   : > { %v8770_v49 = vpack.c.bf16 %v8769_v38, %v8769_v38 }
 0x8a1   : > { %12086 = vmatmul.mubr.bf16.vlgmr.msra.gmra.mxu0 %v8770_v49 }
 0x961   : > { %v8869_v19 = vpop.f32.mrf.mxu0 }
 0x962   : > { %v8870_v15 = vadd.f32 %v8869_v19, %v385_v57 }
 0x963   : > { %v12087_v31 = vpop.f32.mrf.mxu0 }
 0x964   : > { %v8875_v51 = vmax.f32 %v8870_v15, 0.0 }
 0x965   : > { %v8872_v10 = vpop.f32.mrf.mxu0 }
 0x966   : > { %v8876_v63 = vpack.c.bf16 %v8875_v51, %v8875_v51 }
 0x967   : > { %v12088_v47 = vpop.f32.mrf.mxu0 }
 0x968   : > { %12106 = vmatmul.mubr.bf16.vlgmr.msra.gmra.mxu1 %v8876_v63 }
 0xa28   : > { %v8975_v43 = vpop.f32.mrf.mxu1 }
 0xa29   : > { %v8976_v8 = vadd.f32 %v8975_v43, %v386_v42 }
 0xa2a   : > { %v12107_v6 = vpop.f32.mrf.mxu1 }
 0xa2b   : > { %v8981_v32 = vsub.f32 0.0, %v8976_v8 }
 0xa2c   : > { %v8978_v59 = vpop.f32.mrf.mxu1 }
 0xa2d   : > { %v8982_v29 = vmul.f32 1.442695, %v8981_v32 }
 0xa2e   : > { %v12108_v21 = vpop.f32.mrf.mxu1 }
 0xa2f   : > { %12541 = vpow2.f32 %v8982_v29 }
 0xa3c   : > { %v12542_v50 = vpop.eup %12541 }
 0xa3d   : > { %v8984_v1 = vadd.f32 1.0, %v12542_v50 }
 0xa3f   : > { %12543 = vrcp.f32 %v8984_v1 }
 0xa4c   : > { %v12544_v5 = vpop.eup %12543 }
 0xa4d   : > { %v8990_v2 = vrot.slane %v12544_v5, %v8989_v53 }
 0xa4f   : > { %8991 = vst [vmem:[%s276_s23] sm:$0xff] %v8990_v2 }
 0xa50 PF: > { %s17_s24 = sadd.s32 1, %s12552_s24  }
 0xa51   : > { %p14_p4 = scmp.ge.s32.totalorder %s17_s24, 4  }
 0xa53   :  { %16 = sbr.rel (!%p14_p4) target bundleno = 1 (0x1), region = 117 }

</bundles_post_ra>
